<compile_context>
chip_gen: v7x
topology: tpu7x:2x2x1
jax: 0.10.0
libtpu: 0.0.40
codegen_flags: <defaults>
</compile_context>

<pallas_src>
import functools

import jax
import jax.numpy as jnp
from jax.experimental import pallas as pl
from jax.experimental.pallas import tpu as pltpu


def _largest_divisor(n, cap):
    b = min(n, cap)
    while n % b:
        b -= 1
    return b


def _round_up(x, m):
    return (x + m - 1) // m * m


# ----------------------------------------------------------------------------
# Kernel 1: conv1 (C=3) as one K=75(->128) matmul with fused 2x2 max pool + bias
# ----------------------------------------------------------------------------
def _conv1_kernel(p_ref, w_ref, b_ref, o_ref, *, B, Q):
    # p_ref: (B, 4*Q, 128) bf16 im2col patches; rows = parity*(Q) + pooled_pos
    # w_ref: (128, 32) bf16 ; b_ref: (1, 32) f32 ; o_ref: (B, Q, 32) bf16
    lhs = p_ref[...].reshape(B * 4 * Q, 128)
    res = jnp.dot(lhs, w_ref[...], preferred_element_type=jnp.float32)
    r4 = res.reshape(B, 4, Q, 32)
    pooled = jnp.maximum(jnp.maximum(r4[:, 0], r4[:, 1]),
                         jnp.maximum(r4[:, 2], r4[:, 3]))
    o_ref[...] = (pooled + b_ref[...]).astype(o_ref.dtype)   # bias commutes with max


def conv1_pool(patches, w, b):
    N, R, K = patches.shape                  # R = 4*Q, K = 128
    Q = R // 4
    OC = w.shape[1]
    B = _largest_divisor(N, 8)
    kern = functools.partial(_conv1_kernel, B=B, Q=Q)
    return pl.pallas_call(
        kern,
        out_shape=jax.ShapeDtypeStruct((N, Q, OC), jnp.bfloat16),
        grid=(N // B,),
        in_specs=[
            pl.BlockSpec((B, R, K), lambda i: (i, 0, 0)),
            pl.BlockSpec((K, OC), lambda i: (0, 0)),
            pl.BlockSpec((1, OC), lambda i: (0, 0)),
        ],
        out_specs=pl.BlockSpec((B, Q, OC), lambda i: (i, 0, 0)),
        compiler_params=pltpu.CompilerParams(dimension_semantics=("parallel",)),
    )(patches, w, b)


# ----------------------------------------------------------------------------
# Kernel 2: conv2/conv3 (C=32) with row-quad (4 rows x 32 ch = 128 lanes) packing.
# Per column-tap kw: two K=128 dots (Z[hh] part and Z[hh+1] part); both output-row
# parities live in the output lane blocks; vertical pool + bias fused in the epilogue.
# ----------------------------------------------------------------------------
def _conv_rowquad_kernel(z_ref, wa_ref, wb_ref, b_ref, o_ref, *, B, Hh, Wp, OC):
    # z_ref : (B, ZR, 128) bf16   flattened row-quad input; ZR >= (Hh+1)*Wp + 4
    # wa_ref: (5, 128, 2*OC) bf16 per-kw weights hitting Z[hh]   rows (lanes a*OC:(a+1)*OC)
    # wb_ref: (5, 128, 2*OC) bf16 per-kw weights hitting Z[hh+1] rows
    # b_ref : (1, OC) f32 ; o_ref: (B, Hh, Wp, OC) bf16 (columns >= real W are don't-care)
    R = Hh * Wp
    zf = z_ref[...]                                   # (B, ZR, 128)
    acc = jnp.zeros((B * R, 2 * OC), jnp.float32)
    for kw in range(5):                               # kw shift == row-offset slice
        lhs_a = zf[:, kw:kw + R, :].reshape(B * R, 128)
        lhs_b = zf[:, Wp + kw:Wp + kw + R, :].reshape(B * R, 128)
        acc = acc + jnp.dot(lhs_a, wa_ref[kw], preferred_element_type=jnp.float32)
        acc = acc + jnp.dot(lhs_b, wb_ref[kw], preferred_element_type=jnp.float32)
    # vertical (row) 2:1 max pool = max over the two output-row-parity lane blocks
    m = jnp.maximum(acc[:, :OC], acc[:, OC:]) + b_ref[...]
    o_ref[...] = m.reshape(B, Hh, Wp, OC).astype(o_ref.dtype)


def conv_rowquad(z, wa, wb, b, *, Hh, Wp, OC):
    N, ZR, K = z.shape
    assert ZR == (Hh + 1) * Wp + 8 and K == 128
    B = _largest_divisor(N, 16)
    kern = functools.partial(_conv_rowquad_kernel, B=B, Hh=Hh, Wp=Wp, OC=OC)
    return pl.pallas_call(
        kern,
        out_shape=jax.ShapeDtypeStruct((N, Hh, Wp, OC), jnp.bfloat16),
        grid=(N // B,),
        in_specs=[
            pl.BlockSpec((B, ZR, K), lambda i: (i, 0, 0)),
            pl.BlockSpec((5, K, 2 * OC), lambda i: (0, 0, 0)),
            pl.BlockSpec((5, K, 2 * OC), lambda i: (0, 0, 0)),
            pl.BlockSpec((1, OC), lambda i: (0, 0)),
        ],
        out_specs=pl.BlockSpec((B, Hh, Wp, OC), lambda i: (i, 0, 0, 0)),
        compiler_params=pltpu.CompilerParams(dimension_semantics=("parallel",)),
    )(z, wa, wb, b)


# ----------------------------------------------------------------------------
# Kernel 3: fused Linear(1024,64) -> Linear(64,10); batch-tiled, parallel grid
# ----------------------------------------------------------------------------
def _fc_fused_kernel(x_ref, w4_ref, b4_ref, w5_ref, b5_ref, o_ref):
    h = jnp.dot(x_ref[...], w4_ref[...], preferred_element_type=jnp.float32)
    h = (h + b4_ref[...]).astype(jnp.bfloat16)
    o_ref[...] = jnp.dot(h, w5_ref[...],
                         preferred_element_type=jnp.float32) + b5_ref[...]


def fc_fused(x, w4, b4, w5, b5):
    N, K = x.shape
    P = w4.shape[1]
    B = _largest_divisor(N, 256)
    return pl.pallas_call(
        _fc_fused_kernel,
        out_shape=jax.ShapeDtypeStruct((N, P), jnp.float32),
        grid=(N // B,),
        in_specs=[
            pl.BlockSpec((B, K), lambda i: (i, 0)),
            pl.BlockSpec((K, P), lambda i: (0, 0)),
            pl.BlockSpec((1, P), lambda i: (0, 0)),
            pl.BlockSpec((P, P), lambda i: (0, 0)),
            pl.BlockSpec((1, P), lambda i: (0, 0)),
        ],
        out_specs=pl.BlockSpec((B, P), lambda i: (i, 0)),
        compiler_params=pltpu.CompilerParams(dimension_semantics=("parallel",)),
    )(x, w4, b4, w5, b5)


# ----------------------------------------------------------------------------
# XLA glue (small tensors): im2col for layer 1, row-quad packing, horizontal pool
# ----------------------------------------------------------------------------
def _im2col_parity(x):
    # x: (N, 32, 32, 3) bf16 -> (N, 4*256, 128); row = (2a+b)*256 + hh*16 + ww,
    # K index = (kh*5+kw)*3 + c, zero-padded 75 -> 128.
    N, H, W, C = x.shape
    xp = jnp.pad(x, ((0, 0), (2, 2), (2, 2), (0, 0)))
    taps = [xp[:, kh:kh + H, kw:kw + W, :] for kh in range(5) for kw in range(5)]
    p = jnp.stack(taps, axis=3).reshape(N, H, W, 25 * C)
    p = p.reshape(N, H // 2, 2, W // 2, 2, 25 * C).transpose(0, 2, 4, 1, 3, 5)
    p = p.reshape(N, 4 * (H // 2) * (W // 2), 25 * C)
    return jnp.pad(p, ((0, 0), (0, 0), (0, 128 - 25 * C)))


def _rowquad_pack(x):
    # x: (N, H, W, 32) bf16 -> (N, ZR, 128) with Zf[n, i*Wp + j, 32r+c] = xpad[n, 2i+r, j, c]
    N, H, W, C = x.shape
    Hh = H // 2
    Wp = _round_up(W + 4, 8)
    xp = jnp.pad(x, ((0, 0), (2, 2), (2, Wp - W - 2), (0, 0)))          # (N, H+4, Wp, C)
    z = jnp.concatenate([xp[:, r:r + 2 * Hh + 1:2] for r in range(4)], axis=-1)
    z = z.reshape(N, (Hh + 1) * Wp, 4 * C)
    return jnp.pad(z, ((0, 0), (0, 8), (0, 0)))                         # slack for shifted slice


def _hpool(y, W):
    # y: (N, Hh, Wp, OC) -> keep the W real columns and 2:1 max-pool them (tiny tensor).
    N, Hh, _, OC = y.shape
    return jnp.max(y[:, :, :W, :].reshape(N, Hh, W // 2, 2, OC), axis=3)


def _conv_pool_layer(x, wa, wb, b, oc):
    N, H, W, C = x.shape
    Hh = H // 2
    Wp = _round_up(W + 4, 8)
    y = conv_rowquad(_rowquad_pack(x), wa, wb, b, Hh=Hh, Wp=Wp, OC=oc)
    return _hpool(y, W)                                                 # (N, H//2, W//2, oc)


# ----------------------------------------------------------------------------
# Parameters: PyTorch-layout init + one-time packing for the kernels
# ----------------------------------------------------------------------------
def init_params(key):
    ks = jax.random.split(key, 10)

    def u(k, shape, fan_in):
        bound = 1.0 / jnp.sqrt(jnp.float32(fan_in))
        return jax.random.uniform(k, shape, jnp.float32, -bound, bound)

    return {
        "w1": u(ks[0], (32, 3, 5, 5), 3 * 25),   "b1": u(ks[1], (32,), 3 * 25),
        "w2": u(ks[2], (32, 32, 5, 5), 32 * 25), "b2": u(ks[3], (32,), 32 * 25),
        "w3": u(ks[4], (64, 32, 5, 5), 32 * 25), "b3": u(ks[5], (64,), 32 * 25),
        # Linear weights stored transposed vs. PyTorch: (in_features, out_features)
        "w4": u(ks[6], (1024, 64), 1024),        "b4": u(ks[7], (64,), 1024),
        "w5": u(ks[8], (64, 10), 64),            "b5": u(ks[9], (10,), 64),
    }


def prepare_kernel_params(p):
    def conv1_pack(w, b):
        wk = jnp.transpose(w, (2, 3, 1, 0)).reshape(75, 32)             # (kh,kw,c) x oc
        wk = jnp.pad(wk, ((0, 128 - 75), (0, 0)))
        return wk.astype(jnp.bfloat16), b.reshape(1, 32).astype(jnp.float32)

    def rowquad_pack_w(w, b):
        oc, c = w.shape[0], w.shape[1]
        wt = jnp.transpose(w, (2, 3, 1, 0))                             # (kh, kw, C, OC)
        zero = jnp.zeros((c, oc), w.dtype)

        def block(kind, a, kw, r):
            if kind == "A":                      # hits Z[hh] (padded rows 2hh..2hh+3)
                kh = r - a
                ok = (0 <= kh <= 4) and (a + kh <= 3)
            else:                                # hits Z[hh+1] (padded rows 2hh+2..2hh+5)
                kh = r + 2 - a
                ok = (0 <= kh <= 4) and (a + kh >= 4)
            return wt[kh, kw] if ok else zero

        def assemble(kind):
            per_kw = []
            for kw in range(5):
                rows = [jnp.concatenate([block(kind, 0, kw, r),
                                         block(kind, 1, kw, r)], axis=1)
                        for r in range(4)]
                per_kw.append(jnp.concatenate(rows, axis=0))            # (4C, 2*OC)
            return jnp.stack(per_kw, axis=0).astype(jnp.bfloat16)       # (5, 128, 2*OC)

        return assemble("A"), assemble("B"), b.reshape(1, oc).astype(jnp.float32)

    w1, b1 = conv1_pack(p["w1"], p["b1"])
    w2a, w2b, b2 = rowquad_pack_w(p["w2"], p["b2"])
    w3a, w3b, b3 = rowquad_pack_w(p["w3"], p["b3"])

    # FC1: fold the PyTorch (C,H,W) flatten order into the weight; K = 1024 real features.
    w4 = p["w4"].reshape(64, 4, 4, 64).transpose(1, 2, 0, 3).reshape(1024, 64)
    w4 = jnp.pad(w4, ((0, 0), (0, 64))).astype(jnp.bfloat16)            # (1024, 128)
    b4 = jnp.pad(p["b4"], (0, 64)).astype(jnp.float32).reshape(1, 128)
    w5 = jnp.pad(p["w5"], ((0, 64), (0, 118))).astype(jnp.bfloat16)     # (128, 128)
    b5 = jnp.pad(p["b5"], (0, 118)).astype(jnp.float32).reshape(1, 128)
    return {"w1": w1, "b1": b1, "w2a": w2a, "w2b": w2b, "b2": b2,
            "w3a": w3a, "w3b": w3b, "b3": b3,
            "w4": w4, "b4": b4, "w5": w5, "b5": b5}


# ----------------------------------------------------------------------------
# Forward pass (Pallas)
# ----------------------------------------------------------------------------
@jax.jit
def mynn_forward(kp, x_nchw):
    N = x_nchw.shape[0]
    x = jnp.transpose(x_nchw, (0, 2, 3, 1)).astype(jnp.bfloat16)        # NCHW -> NHWC
    y = conv1_pool(_im2col_parity(x), kp["w1"], kp["b1"]).reshape(N, 16, 16, 32)
    y = _conv_pool_layer(y, kp["w2a"], kp["w2b"], kp["b2"], 32)         # (N, 8, 8, 32)
    y = _conv_pool_layer(y, kp["w3a"], kp["w3b"], kp["b3"], 64)         # (N, 4, 4, 64)
    feat = y.reshape(N, 1024)                                           # 64 real ch only
    out = fc_fused(feat, kp["w4"], kp["b4"], kp["w5"], kp["b5"])        # (N, 128) f32
    return out[:, :10]                                                  # drop lane padding


# ----------------------------------------------------------------------------
# Pure-JAX f32 reference (same math, no Pallas) for a sanity check
# ----------------------------------------------------------------------------
def _ref_forward(params, x_nchw):
    def conv(x, w, b):
        n, h, wid, c = x.shape
        oc = w.shape[0]
        xp = jnp.pad(x, ((0, 0), (2, 2), (2, 2), (0, 0)))
        taps = [xp[:, kh:kh + h, kw:kw + wid, :] for kh in range(5) for kw in range(5)]
        p = jnp.stack(taps, axis=-1).reshape(n * h * wid, c * 25)
        return (p @ w.reshape(oc, c * 25).T + b).reshape(n, h, wid, oc)

    def pool(x):
        n, h, wid, c = x.shape
        return jnp.max(x.reshape(n, h // 2, 2, wid // 2, 2, c), axis=(2, 4))

    x = jnp.transpose(x_nchw, (0, 2, 3, 1)).astype(jnp.float32)
    x = pool(conv(x, params["w1"], params["b1"]))
    x = pool(conv(x, params["w2"], params["b2"]))
    x = pool(conv(x, params["w3"], params["b3"]))
    x = jnp.transpose(x, (0, 3, 1, 2)).reshape(x.shape[0], -1)
    x = x @ params["w4"] + params["b4"]
    x = x @ params["w5"] + params["b5"]
    return x


if __name__ == "__main__":
    key = jax.random.PRNGKey(0)
    k_param, k_input = jax.random.split(key)
    params = init_params(k_param)
    kparams = prepare_kernel_params(params)          # one-time weight packing
    # Spatial/channels fixed by the module (3x32x32 -> 1024 flat features); small batch.
    x = jax.random.normal(k_input, (2, 3, 32, 32), dtype=jnp.float32)

    out = jax.block_until_ready(mynn_forward(kparams, x))
    assert out.shape == (2, 10) and out.dtype == jnp.float32

    ref = jax.block_until_ready(_ref_forward(params, x))
    # bf16 matmul operands (f32 accumulation) -> tolerance relaxed vs. pure-f32 reference.
    assert jnp.allclose(out, ref, rtol=5e-2, atol=5e-2), "Pallas output mismatch vs reference"

    print("KERNEL_OK")
</pallas_src>

<mosaic_0001>
module attributes {stable_mosaic.version = 11 : i64} {
  func.func @_conv1_kernel(%arg0: i32, %arg1: memref<2x1024x128xbf16, #tpu.memory_space<vmem>>, %arg2: memref<128x32xbf16, #tpu.memory_space<vmem>>, %arg3: memref<1x32xf32, #tpu.memory_space<vmem>>, %arg4: memref<2x256x32xbf16, #tpu.memory_space<vmem>>) attributes {dimension_semantics = [#tpu.dimension_semantics<parallel>], iteration_bounds = array<i64: 1>, scalar_prefetch = 0 : i64, scratch_operands = 0 : i64, tpu.core_type = #tpu.core_type<tc>, window_params = [{transform_indices = @transform_0, window_bounds = array<i64: 2, 1024, 128>}, {pipeline_mode = #tpu.pipeline_mode<synchronous>, transform_indices = @transform_1, window_bounds = array<i64: 128, 32>}, {pipeline_mode = #tpu.pipeline_mode<synchronous>, transform_indices = @transform_2, window_bounds = array<i64: 1, 32>}, {transform_indices = @transform_3, window_bounds = array<i64: 2, 256, 32>}]} {
    %c0 = arith.constant 0 : index
    %c0_0 = arith.constant 0 : index
    %c0_1 = arith.constant 0 : index
    %0 = vector.load %arg1[%c0, %c0_0, %c0_1] : memref<2x1024x128xbf16, #tpu.memory_space<vmem>>, vector<2x1024x128xbf16>
    %1 = vector.shape_cast %0 : vector<2x1024x128xbf16> to vector<2048x128xbf16>
    %c0_2 = arith.constant 0 : index
    %c0_3 = arith.constant 0 : index
    %2 = vector.load %arg2[%c0_2, %c0_3] : memref<128x32xbf16, #tpu.memory_space<vmem>>, vector<128x32xbf16>
    %cst = arith.constant dense<0.000000e+00> : vector<2048x32xf32>
    %3 = tpu.matmul %1, %2, %cst {dimension_numbers = #tpu.dot_dimension_numbers<[1], [0], [0], [1], [0, 0, 1, 1], [], []>} : vector<2048x128xbf16>, vector<128x32xbf16>, vector<2048x32xf32> -> vector<2048x32xf32>
    %4 = vector.shape_cast %3 : vector<2048x32xf32> to vector<2x4x256x32xf32>
    %5 = vector.extract_strided_slice %4 {offsets = [0, 0, 0, 0], sizes = [2, 1, 256, 32], strides = [1, 1, 1, 1]} : vector<2x4x256x32xf32> to vector<2x1x256x32xf32>
    %6 = vector.shape_cast %5 : vector<2x1x256x32xf32> to vector<2x256x32xf32>
    %7 = vector.extract_strided_slice %4 {offsets = [0, 1, 0, 0], sizes = [2, 1, 256, 32], strides = [1, 1, 1, 1]} : vector<2x4x256x32xf32> to vector<2x1x256x32xf32>
    %8 = vector.shape_cast %7 : vector<2x1x256x32xf32> to vector<2x256x32xf32>
    %9 = arith.maximumf %6, %8 : vector<2x256x32xf32>
    %10 = vector.extract_strided_slice %4 {offsets = [0, 2, 0, 0], sizes = [2, 1, 256, 32], strides = [1, 1, 1, 1]} : vector<2x4x256x32xf32> to vector<2x1x256x32xf32>
    %11 = vector.shape_cast %10 : vector<2x1x256x32xf32> to vector<2x256x32xf32>
    %12 = vector.extract_strided_slice %4 {offsets = [0, 3, 0, 0], sizes = [2, 1, 256, 32], strides = [1, 1, 1, 1]} : vector<2x4x256x32xf32> to vector<2x1x256x32xf32>
    %13 = vector.shape_cast %12 : vector<2x1x256x32xf32> to vector<2x256x32xf32>
    %14 = arith.maximumf %11, %13 : vector<2x256x32xf32>
    %15 = arith.maximumf %9, %14 : vector<2x256x32xf32>
    %c0_4 = arith.constant 0 : index
    %c0_5 = arith.constant 0 : index
    %16 = vector.load %arg3[%c0_4, %c0_5] : memref<1x32xf32, #tpu.memory_space<vmem>>, vector<1x32xf32>
    %17 = vector.shape_cast %16 : vector<1x32xf32> to vector<1x1x32xf32>
    %18 = vector.broadcast %17 : vector<1x1x32xf32> to vector<2x256x32xf32>
    %19 = arith.addf %15, %18 : vector<2x256x32xf32>
    %20 = arith.truncf %19 : vector<2x256x32xf32> to vector<2x256x32xbf16>
    %c0_6 = arith.constant 0 : index
    %c0_7 = arith.constant 0 : index
    %c0_8 = arith.constant 0 : index
    %21 = vector.load %arg4[%c0_6, %c0_7, %c0_8] : memref<2x256x32xbf16, #tpu.memory_space<vmem>>, vector<2x256x32xbf16>
    tpu.vector_store %arg4[%c0_6, %c0_7, %c0_8], %20 {strides = array<i32>} : memref<2x256x32xbf16, #tpu.memory_space<vmem>>, vector<2x256x32xbf16>,
    return
  }
  func.func @transform_0(%arg0: i32) -> (i32, i32, i32) {
    %c0_i32 = arith.constant 0 : i32
    %c0_i32_0 = arith.constant 0 : i32
    %c0_i32_1 = arith.constant 0 : i32
    return %arg0, %c0_i32, %c0_i32_0 : i32, i32, i32
  }
  func.func @transform_1(%arg0: i32) -> (i32, i32) {
    %c0_i32 = arith.constant 0 : i32
    %c0_i32_0 = arith.constant 0 : i32
    %c0_i32_1 = arith.constant 0 : i32
    return %c0_i32, %c0_i32_0 : i32, i32
  }
  func.func @transform_2(%arg0: i32) -> (i32, i32) {
    %c0_i32 = arith.constant 0 : i32
    %c0_i32_0 = arith.constant 0 : i32
    %c0_i32_1 = arith.constant 0 : i32
    return %c0_i32, %c0_i32_0 : i32, i32
  }
  func.func @transform_3(%arg0: i32) -> (i32, i32, i32) {
    %c0_i32 = arith.constant 0 : i32
    %c0_i32_0 = arith.constant 0 : i32
    %c0_i32_1 = arith.constant 0 : i32
    return %arg0, %c0_i32, %c0_i32_0 : i32, i32, i32
  }
}

module attributes {stable_mosaic.version = 11 : i64} {
  func.func @_conv_rowquad_kernel(%arg0: i32, %arg1: memref<2x224x128xbf16, #tpu.memory_space<vmem>>, %arg2: memref<5x128x64xbf16, #tpu.memory_space<vmem>>, %arg3: memref<5x128x64xbf16, #tpu.memory_space<vmem>>, %arg4: memref<1x32xf32, #tpu.memory_space<vmem>>, %arg5: memref<2x8x24x32xbf16, #tpu.memory_space<vmem>>) attributes {dimension_semantics = [#tpu.dimension_semantics<parallel>], iteration_bounds = array<i64: 1>, scalar_prefetch = 0 : i64, scratch_operands = 0 : i64, tpu.core_type = #tpu.core_type<tc>, window_params = [{transform_indices = @transform_0, window_bounds = array<i64: 2, 224, 128>}, {pipeline_mode = #tpu.pipeline_mode<synchronous>, transform_indices = @transform_1, window_bounds = array<i64: 5, 128, 64>}, {pipeline_mode = #tpu.pipeline_mode<synchronous>, transform_indices = @transform_2, window_bounds = array<i64: 5, 128, 64>}, {pipeline_mode = #tpu.pipeline_mode<synchronous>, transform_indices = @transform_3, window_bounds = array<i64: 1, 32>}, {transform_indices = @transform_4, window_bounds = array<i64: 2, 8, 24, 32>}]} {
    %c0 = arith.constant 0 : index
    %c0_0 = arith.constant 0 : index
    %c0_1 = arith.constant 0 : index
    %0 = vector.load %arg1[%c0, %c0_0, %c0_1] : memref<2x224x128xbf16, #tpu.memory_space<vmem>>, vector<2x224x128xbf16>
    %cst = arith.constant 0.000000e+00 : f32
    %1 = vector.broadcast %cst : f32 to vector<384x64xf32>
    %2 = vector.extract_strided_slice %0 {offsets = [0, 0, 0], sizes = [2, 192, 128], strides = [1, 1, 1]} : vector<2x224x128xbf16> to vector<2x192x128xbf16>
    %3 = vector.shape_cast %2 : vector<2x192x128xbf16> to vector<384x128xbf16>
    %4 = vector.extract_strided_slice %0 {offsets = [0, 24, 0], sizes = [2, 192, 128], strides = [1, 1, 1]} : vector<2x224x128xbf16> to vector<2x192x128xbf16>
    %5 = vector.shape_cast %4 : vector<2x192x128xbf16> to vector<384x128xbf16>
    %c0_2 = arith.constant 0 : index
    %c0_3 = arith.constant 0 : index
    %c0_4 = arith.constant 0 : index
    %6 = vector.load %arg2[%c0_2, %c0_3, %c0_4] : memref<5x128x64xbf16, #tpu.memory_space<vmem>>, vector<1x128x64xbf16>
    %7 = vector.shape_cast %6 : vector<1x128x64xbf16> to vector<128x64xbf16>
    %cst_5 = arith.constant dense<0.000000e+00> : vector<384x64xf32>
    %8 = tpu.matmul %3, %7, %cst_5 {dimension_numbers = #tpu.dot_dimension_numbers<[1], [0], [0], [1], [0, 0, 1, 1], [], []>} : vector<384x128xbf16>, vector<128x64xbf16>, vector<384x64xf32> -> vector<384x64xf32>
    %9 = arith.addf %1, %8 : vector<384x64xf32>
    %c0_6 = arith.constant 0 : index
    %c0_7 = arith.constant 0 : index
    %c0_8 = arith.constant 0 : index
    %10 = vector.load %arg3[%c0_6, %c0_7, %c0_8] : memref<5x128x64xbf16, #tpu.memory_space<vmem>>, vector<1x128x64xbf16>
    %11 = vector.shape_cast %10 : vector<1x128x64xbf16> to vector<128x64xbf16>
    %cst_9 = arith.constant dense<0.000000e+00> : vector<384x64xf32>
    %12 = tpu.matmul %5, %11, %cst_9 {dimension_numbers = #tpu.dot_dimension_numbers<[1], [0], [0], [1], [0, 0, 1, 1], [], []>} : vector<384x128xbf16>, vector<128x64xbf16>, vector<384x64xf32> -> vector<384x64xf32>
    %13 = arith.addf %9, %12 : vector<384x64xf32>
    %14 = vector.extract_strided_slice %0 {offsets = [0, 1, 0], sizes = [2, 192, 128], strides = [1, 1, 1]} : vector<2x224x128xbf16> to vector<2x192x128xbf16>
    %15 = vector.shape_cast %14 : vector<2x192x128xbf16> to vector<384x128xbf16>
    %16 = vector.extract_strided_slice %0 {offsets = [0, 25, 0], sizes = [2, 192, 128], strides = [1, 1, 1]} : vector<2x224x128xbf16> to vector<2x192x128xbf16>
    %17 = vector.shape_cast %16 : vector<2x192x128xbf16> to vector<384x128xbf16>
    %c1 = arith.constant 1 : index
    %c0_10 = arith.constant 0 : index
    %c0_11 = arith.constant 0 : index
    %18 = vector.load %arg2[%c1, %c0_10, %c0_11] : memref<5x128x64xbf16, #tpu.memory_space<vmem>>, vector<1x128x64xbf16>
    %19 = vector.shape_cast %18 : vector<1x128x64xbf16> to vector<128x64xbf16>
    %cst_12 = arith.constant dense<0.000000e+00> : vector<384x64xf32>
    %20 = tpu.matmul %15, %19, %cst_12 {dimension_numbers = #tpu.dot_dimension_numbers<[1], [0], [0], [1], [0, 0, 1, 1], [], []>} : vector<384x128xbf16>, vector<128x64xbf16>, vector<384x64xf32> -> vector<384x64xf32>
    %21 = arith.addf %13, %20 : vector<384x64xf32>
    %c1_13 = arith.constant 1 : index
    %c0_14 = arith.constant 0 : index
    %c0_15 = arith.constant 0 : index
    %22 = vector.load %arg3[%c1_13, %c0_14, %c0_15] : memref<5x128x64xbf16, #tpu.memory_space<vmem>>, vector<1x128x64xbf16>
    %23 = vector.shape_cast %22 : vector<1x128x64xbf16> to vector<128x64xbf16>
    %cst_16 = arith.constant dense<0.000000e+00> : vector<384x64xf32>
    %24 = tpu.matmul %17, %23, %cst_16 {dimension_numbers = #tpu.dot_dimension_numbers<[1], [0], [0], [1], [0, 0, 1, 1], [], []>} : vector<384x128xbf16>, vector<128x64xbf16>, vector<384x64xf32> -> vector<384x64xf32>
    %25 = arith.addf %21, %24 : vector<384x64xf32>
    %26 = vector.extract_strided_slice %0 {offsets = [0, 2, 0], sizes = [2, 192, 128], strides = [1, 1, 1]} : vector<2x224x128xbf16> to vector<2x192x128xbf16>
    %27 = vector.shape_cast %26 : vector<2x192x128xbf16> to vector<384x128xbf16>
    %28 = vector.extract_strided_slice %0 {offsets = [0, 26, 0], sizes = [2, 192, 128], strides = [1, 1, 1]} : vector<2x224x128xbf16> to vector<2x192x128xbf16>
    %29 = vector.shape_cast %28 : vector<2x192x128xbf16> to vector<384x128xbf16>
    %c2 = arith.constant 2 : index
    %c0_17 = arith.constant 0 : index
    %c0_18 = arith.constant 0 : index
    %30 = vector.load %arg2[%c2, %c0_17, %c0_18] : memref<5x128x64xbf16, #tpu.memory_space<vmem>>, vector<1x128x64xbf16>
    %31 = vector.shape_cast %30 : vector<1x128x64xbf16> to vector<128x64xbf16>
    %cst_19 = arith.constant dense<0.000000e+00> : vector<384x64xf32>
    %32 = tpu.matmul %27, %31, %cst_19 {dimension_numbers = #tpu.dot_dimension_numbers<[1], [0], [0], [1], [0, 0, 1, 1], [], []>} : vector<384x128xbf16>, vector<128x64xbf16>, vector<384x64xf32> -> vector<384x64xf32>
    %33 = arith.addf %25, %32 : vector<384x64xf32>
    %c2_20 = arith.constant 2 : index
    %c0_21 = arith.constant 0 : index
    %c0_22 = arith.constant 0 : index
    %34 = vector.load %arg3[%c2_20, %c0_21, %c0_22] : memref<5x128x64xbf16, #tpu.memory_space<vmem>>, vector<1x128x64xbf16>
    %35 = vector.shape_cast %34 : vector<1x128x64xbf16> to vector<128x64xbf16>
    %cst_23 = arith.constant dense<0.000000e+00> : vector<384x64xf32>
    %36 = tpu.matmul %29, %35, %cst_23 {dimension_numbers = #tpu.dot_dimension_numbers<[1], [0], [0], [1], [0, 0, 1, 1], [], []>} : vector<384x128xbf16>, vector<128x64xbf16>, vector<384x64xf32> -> vector<384x64xf32>
    %37 = arith.addf %33, %36 : vector<384x64xf32>
    %38 = vector.extract_strided_slice %0 {offsets = [0, 3, 0], sizes = [2, 192, 128], strides = [1, 1, 1]} : vector<2x224x128xbf16> to vector<2x192x128xbf16>
    %39 = vector.shape_cast %38 : vector<2x192x128xbf16> to vector<384x128xbf16>
    %40 = vector.extract_strided_slice %0 {offsets = [0, 27, 0], sizes = [2, 192, 128], strides = [1, 1, 1]} : vector<2x224x128xbf16> to vector<2x192x128xbf16>
    %41 = vector.shape_cast %40 : vector<2x192x128xbf16> to vector<384x128xbf16>
    %c3 = arith.constant 3 : index
    %c0_24 = arith.constant 0 : index
    %c0_25 = arith.constant 0 : index
    %42 = vector.load %arg2[%c3, %c0_24, %c0_25] : memref<5x128x64xbf16, #tpu.memory_space<vmem>>, vector<1x128x64xbf16>
    %43 = vector.shape_cast %42 : vector<1x128x64xbf16> to vector<128x64xbf16>
    %cst_26 = arith.constant dense<0.000000e+00> : vector<384x64xf32>
    %44 = tpu.matmul %39, %43, %cst_26 {dimension_numbers = #tpu.dot_dimension_numbers<[1], [0], [0], [1], [0, 0, 1, 1], [], []>} : vector<384x128xbf16>, vector<128x64xbf16>, vector<384x64xf32> -> vector<384x64xf32>
    %45 = arith.addf %37, %44 : vector<384x64xf32>
    %c3_27 = arith.constant 3 : index
    %c0_28 = arith.constant 0 : index
    %c0_29 = arith.constant 0 : index
    %46 = vector.load %arg3[%c3_27, %c0_28, %c0_29] : memref<5x128x64xbf16, #tpu.memory_space<vmem>>, vector<1x128x64xbf16>
    %47 = vector.shape_cast %46 : vector<1x128x64xbf16> to vector<128x64xbf16>
    %cst_30 = arith.constant dense<0.000000e+00> : vector<384x64xf32>
    %48 = tpu.matmul %41, %47, %cst_30 {dimension_numbers = #tpu.dot_dimension_numbers<[1], [0], [0], [1], [0, 0, 1, 1], [], []>} : vector<384x128xbf16>, vector<128x64xbf16>, vector<384x64xf32> -> vector<384x64xf32>
    %49 = arith.addf %45, %48 : vector<384x64xf32>
    %50 = vector.extract_strided_slice %0 {offsets = [0, 4, 0], sizes = [2, 192, 128], strides = [1, 1, 1]} : vector<2x224x128xbf16> to vector<2x192x128xbf16>
    %51 = vector.shape_cast %50 : vector<2x192x128xbf16> to vector<384x128xbf16>
    %52 = vector.extract_strided_slice %0 {offsets = [0, 28, 0], sizes = [2, 192, 128], strides = [1, 1, 1]} : vector<2x224x128xbf16> to vector<2x192x128xbf16>
    %53 = vector.shape_cast %52 : vector<2x192x128xbf16> to vector<384x128xbf16>
    %c4 = arith.constant 4 : index
    %c0_31 = arith.constant 0 : index
    %c0_32 = arith.constant 0 : index
    %54 = vector.load %arg2[%c4, %c0_31, %c0_32] : memref<5x128x64xbf16, #tpu.memory_space<vmem>>, vector<1x128x64xbf16>
    %55 = vector.shape_cast %54 : vector<1x128x64xbf16> to vector<128x64xbf16>
    %cst_33 = arith.constant dense<0.000000e+00> : vector<384x64xf32>
    %56 = tpu.matmul %51, %55, %cst_33 {dimension_numbers = #tpu.dot_dimension_numbers<[1], [0], [0], [1], [0, 0, 1, 1], [], []>} : vector<384x128xbf16>, vector<128x64xbf16>, vector<384x64xf32> -> vector<384x64xf32>
    %57 = arith.addf %49, %56 : vector<384x64xf32>
    %c4_34 = arith.constant 4 : index
    %c0_35 = arith.constant 0 : index
    %c0_36 = arith.constant 0 : index
    %58 = vector.load %arg3[%c4_34, %c0_35, %c0_36] : memref<5x128x64xbf16, #tpu.memory_space<vmem>>, vector<1x128x64xbf16>
    %59 = vector.shape_cast %58 : vector<1x128x64xbf16> to vector<128x64xbf16>
    %cst_37 = arith.constant dense<0.000000e+00> : vector<384x64xf32>
    %60 = tpu.matmul %53, %59, %cst_37 {dimension_numbers = #tpu.dot_dimension_numbers<[1], [0], [0], [1], [0, 0, 1, 1], [], []>} : vector<384x128xbf16>, vector<128x64xbf16>, vector<384x64xf32> -> vector<384x64xf32>
    %61 = arith.addf %57, %60 : vector<384x64xf32>
    %62 = vector.extract_strided_slice %61 {offsets = [0, 0], sizes = [384, 32], strides = [1, 1]} : vector<384x64xf32> to vector<384x32xf32>
    %63 = vector.extract_strided_slice %61 {offsets = [0, 32], sizes = [384, 32], strides = [1, 1]} : vector<384x64xf32> to vector<384x32xf32>
    %64 = arith.maximumf %62, %63 : vector<384x32xf32>
    %c0_38 = arith.constant 0 : index
    %c0_39 = arith.constant 0 : index
    %65 = vector.load %arg4[%c0_38, %c0_39] : memref<1x32xf32, #tpu.memory_space<vmem>>, vector<1x32xf32>
    %66 = vector.broadcast %65 : vector<1x32xf32> to vector<384x32xf32>
    %67 = arith.addf %64, %66 : vector<384x32xf32>
    %68 = vector.shape_cast %67 : vector<384x32xf32> to vector<2x8x24x32xf32>
    %69 = arith.truncf %68 : vector<2x8x24x32xf32> to vector<2x8x24x32xbf16>
    %c0_40 = arith.constant 0 : index
    %c0_41 = arith.constant 0 : index
    %c0_42 = arith.constant 0 : index
    %c0_43 = arith.constant 0 : index
    %70 = vector.load %arg5[%c0_40, %c0_41, %c0_42, %c0_43] : memref<2x8x24x32xbf16, #tpu.memory_space<vmem>>, vector<2x8x24x32xbf16>
    tpu.vector_store %arg5[%c0_40, %c0_41, %c0_42, %c0_43], %69 {strides = array<i32>} : memref<2x8x24x32xbf16, #tpu.memory_space<vmem>>, vector<2x8x24x32xbf16>,
    return
  }
  func.func @transform_0(%arg0: i32) -> (i32, i32, i32) {
    %c0_i32 = arith.constant 0 : i32
    %c0_i32_0 = arith.constant 0 : i32
    %c0_i32_1 = arith.constant 0 : i32
    return %arg0, %c0_i32, %c0_i32_0 : i32, i32, i32
  }
  func.func @transform_1(%arg0: i32) -> (i32, i32, i32) {
    %c0_i32 = arith.constant 0 : i32
    %c0_i32_0 = arith.constant 0 : i32
    %c0_i32_1 = arith.constant 0 : i32
    %c0_i32_2 = arith.constant 0 : i32
    return %c0_i32, %c0_i32_0, %c0_i32_1 : i32, i32, i32
  }
  func.func @transform_2(%arg0: i32) -> (i32, i32, i32) {
    %c0_i32 = arith.constant 0 : i32
    %c0_i32_0 = arith.constant 0 : i32
    %c0_i32_1 = arith.constant 0 : i32
    %c0_i32_2 = arith.constant 0 : i32
    return %c0_i32, %c0_i32_0, %c0_i32_1 : i32, i32, i32
  }
  func.func @transform_3(%arg0: i32) -> (i32, i32) {
    %c0_i32 = arith.constant 0 : i32
    %c0_i32_0 = arith.constant 0 : i32
    %c0_i32_1 = arith.constant 0 : i32
    return %c0_i32, %c0_i32_0 : i32, i32
  }
  func.func @transform_4(%arg0: i32) -> (i32, i32, i32, i32) {
    %c0_i32 = arith.constant 0 : i32
    %c0_i32_0 = arith.constant 0 : i32
    %c0_i32_1 = arith.constant 0 : i32
    %c0_i32_2 = arith.constant 0 : i32
    return %arg0, %c0_i32, %c0_i32_0, %c0_i32_1 : i32, i32, i32, i32
  }
}

module attributes {stable_mosaic.version = 11 : i64} {
  func.func @_conv_rowquad_kernel(%arg0: i32, %arg1: memref<2x88x128xbf16, #tpu.memory_space<vmem>>, %arg2: memref<5x128x128xbf16, #tpu.memory_space<vmem>>, %arg3: memref<5x128x128xbf16, #tpu.memory_space<vmem>>, %arg4: memref<1x64xf32, #tpu.memory_space<vmem>>, %arg5: memref<2x4x16x64xbf16, #tpu.memory_space<vmem>>) attributes {dimension_semantics = [#tpu.dimension_semantics<parallel>], iteration_bounds = array<i64: 1>, scalar_prefetch = 0 : i64, scratch_operands = 0 : i64, tpu.core_type = #tpu.core_type<tc>, window_params = [{transform_indices = @transform_0, window_bounds = array<i64: 2, 88, 128>}, {pipeline_mode = #tpu.pipeline_mode<synchronous>, transform_indices = @transform_1, window_bounds = array<i64: 5, 128, 128>}, {pipeline_mode = #tpu.pipeline_mode<synchronous>, transform_indices = @transform_2, window_bounds = array<i64: 5, 128, 128>}, {pipeline_mode = #tpu.pipeline_mode<synchronous>, transform_indices = @transform_3, window_bounds = array<i64: 1, 64>}, {transform_indices = @transform_4, window_bounds = array<i64: 2, 4, 16, 64>}]} {
    %c0 = arith.constant 0 : index
    %c0_0 = arith.constant 0 : index
    %c0_1 = arith.constant 0 : index
    %0 = vector.load %arg1[%c0, %c0_0, %c0_1] : memref<2x88x128xbf16, #tpu.memory_space<vmem>>, vector<2x88x128xbf16>
    %cst = arith.constant 0.000000e+00 : f32
    %1 = vector.broadcast %cst : f32 to vector<128x128xf32>
    %2 = vector.extract_strided_slice %0 {offsets = [0, 0, 0], sizes = [2, 64, 128], strides = [1, 1, 1]} : vector<2x88x128xbf16> to vector<2x64x128xbf16>
    %3 = vector.shape_cast %2 : vector<2x64x128xbf16> to vector<128x128xbf16>
    %4 = vector.extract_strided_slice %0 {offsets = [0, 16, 0], sizes = [2, 64, 128], strides = [1, 1, 1]} : vector<2x88x128xbf16> to vector<2x64x128xbf16>
    %5 = vector.shape_cast %4 : vector<2x64x128xbf16> to vector<128x128xbf16>
    %c0_2 = arith.constant 0 : index
    %c0_3 = arith.constant 0 : index
    %c0_4 = arith.constant 0 : index
    %6 = vector.load %arg2[%c0_2, %c0_3, %c0_4] : memref<5x128x128xbf16, #tpu.memory_space<vmem>>, vector<1x128x128xbf16>
    %7 = vector.shape_cast %6 : vector<1x128x128xbf16> to vector<128x128xbf16>
    %cst_5 = arith.constant dense<0.000000e+00> : vector<128x128xf32>
    %8 = tpu.matmul %3, %7, %cst_5 {dimension_numbers = #tpu.dot_dimension_numbers<[1], [0], [0], [1], [0, 0, 1, 1], [], []>} : vector<128x128xbf16>, vector<128x128xbf16>, vector<128x128xf32> -> vector<128x128xf32>
    %9 = arith.addf %1, %8 : vector<128x128xf32>
    %c0_6 = arith.constant 0 : index
    %c0_7 = arith.constant 0 : index
    %c0_8 = arith.constant 0 : index
    %10 = vector.load %arg3[%c0_6, %c0_7, %c0_8] : memref<5x128x128xbf16, #tpu.memory_space<vmem>>, vector<1x128x128xbf16>
    %11 = vector.shape_cast %10 : vector<1x128x128xbf16> to vector<128x128xbf16>
    %cst_9 = arith.constant dense<0.000000e+00> : vector<128x128xf32>
    %12 = tpu.matmul %5, %11, %cst_9 {dimension_numbers = #tpu.dot_dimension_numbers<[1], [0], [0], [1], [0, 0, 1, 1], [], []>} : vector<128x128xbf16>, vector<128x128xbf16>, vector<128x128xf32> -> vector<128x128xf32>
    %13 = arith.addf %9, %12 : vector<128x128xf32>
    %14 = vector.extract_strided_slice %0 {offsets = [0, 1, 0], sizes = [2, 64, 128], strides = [1, 1, 1]} : vector<2x88x128xbf16> to vector<2x64x128xbf16>
    %15 = vector.shape_cast %14 : vector<2x64x128xbf16> to vector<128x128xbf16>
    %16 = vector.extract_strided_slice %0 {offsets = [0, 17, 0], sizes = [2, 64, 128], strides = [1, 1, 1]} : vector<2x88x128xbf16> to vector<2x64x128xbf16>
    %17 = vector.shape_cast %16 : vector<2x64x128xbf16> to vector<128x128xbf16>
    %c1 = arith.constant 1 : index
    %c0_10 = arith.constant 0 : index
    %c0_11 = arith.constant 0 : index
    %18 = vector.load %arg2[%c1, %c0_10, %c0_11] : memref<5x128x128xbf16, #tpu.memory_space<vmem>>, vector<1x128x128xbf16>
    %19 = vector.shape_cast %18 : vector<1x128x128xbf16> to vector<128x128xbf16>
    %cst_12 = arith.constant dense<0.000000e+00> : vector<128x128xf32>
    %20 = tpu.matmul %15, %19, %cst_12 {dimension_numbers = #tpu.dot_dimension_numbers<[1], [0], [0], [1], [0, 0, 1, 1], [], []>} : vector<128x128xbf16>, vector<128x128xbf16>, vector<128x128xf32> -> vector<128x128xf32>
    %21 = arith.addf %13, %20 : vector<128x128xf32>
    %c1_13 = arith.constant 1 : index
    %c0_14 = arith.constant 0 : index
    %c0_15 = arith.constant 0 : index
    %22 = vector.load %arg3[%c1_13, %c0_14, %c0_15] : memref<5x128x128xbf16, #tpu.memory_space<vmem>>, vector<1x128x128xbf16>
    %23 = vector.shape_cast %22 : vector<1x128x128xbf16> to vector<128x128xbf16>
    %cst_16 = arith.constant dense<0.000000e+00> : vector<128x128xf32>
    %24 = tpu.matmul %17, %23, %cst_16 {dimension_numbers = #tpu.dot_dimension_numbers<[1], [0], [0], [1], [0, 0, 1, 1], [], []>} : vector<128x128xbf16>, vector<128x128xbf16>, vector<128x128xf32> -> vector<128x128xf32>
    %25 = arith.addf %21, %24 : vector<128x128xf32>
    %26 = vector.extract_strided_slice %0 {offsets = [0, 2, 0], sizes = [2, 64, 128], strides = [1, 1, 1]} : vector<2x88x128xbf16> to vector<2x64x128xbf16>
    %27 = vector.shape_cast %26 : vector<2x64x128xbf16> to vector<128x128xbf16>
    %28 = vector.extract_strided_slice %0 {offsets = [0, 18, 0], sizes = [2, 64, 128], strides = [1, 1, 1]} : vector<2x88x128xbf16> to vector<2x64x128xbf16>
    %29 = vector.shape_cast %28 : vector<2x64x128xbf16> to vector<128x128xbf16>
    %c2 = arith.constant 2 : index
    %c0_17 = arith.constant 0 : index
    %c0_18 = arith.constant 0 : index
    %30 = vector.load %arg2[%c2, %c0_17, %c0_18] : memref<5x128x128xbf16, #tpu.memory_space<vmem>>, vector<1x128x128xbf16>
    %31 = vector.shape_cast %30 : vector<1x128x128xbf16> to vector<128x128xbf16>
    %cst_19 = arith.constant dense<0.000000e+00> : vector<128x128xf32>
    %32 = tpu.matmul %27, %31, %cst_19 {dimension_numbers = #tpu.dot_dimension_numbers<[1], [0], [0], [1], [0, 0, 1, 1], [], []>} : vector<128x128xbf16>, vector<128x128xbf16>, vector<128x128xf32> -> vector<128x128xf32>
    %33 = arith.addf %25, %32 : vector<128x128xf32>
    %c2_20 = arith.constant 2 : index
    %c0_21 = arith.constant 0 : index
    %c0_22 = arith.constant 0 : index
    %34 = vector.load %arg3[%c2_20, %c0_21, %c0_22] : memref<5x128x128xbf16, #tpu.memory_space<vmem>>, vector<1x128x128xbf16>
    %35 = vector.shape_cast %34 : vector<1x128x128xbf16> to vector<128x128xbf16>
    %cst_23 = arith.constant dense<0.000000e+00> : vector<128x128xf32>
    %36 = tpu.matmul %29, %35, %cst_23 {dimension_numbers = #tpu.dot_dimension_numbers<[1], [0], [0], [1], [0, 0, 1, 1], [], []>} : vector<128x128xbf16>, vector<128x128xbf16>, vector<128x128xf32> -> vector<128x128xf32>
    %37 = arith.addf %33, %36 : vector<128x128xf32>
    %38 = vector.extract_strided_slice %0 {offsets = [0, 3, 0], sizes = [2, 64, 128], strides = [1, 1, 1]} : vector<2x88x128xbf16> to vector<2x64x128xbf16>
    %39 = vector.shape_cast %38 : vector<2x64x128xbf16> to vector<128x128xbf16>
    %40 = vector.extract_strided_slice %0 {offsets = [0, 19, 0], sizes = [2, 64, 128], strides = [1, 1, 1]} : vector<2x88x128xbf16> to vector<2x64x128xbf16>
    %41 = vector.shape_cast %40 : vector<2x64x128xbf16> to vector<128x128xbf16>
    %c3 = arith.constant 3 : index
    %c0_24 = arith.constant 0 : index
    %c0_25 = arith.constant 0 : index
    %42 = vector.load %arg2[%c3, %c0_24, %c0_25] : memref<5x128x128xbf16, #tpu.memory_space<vmem>>, vector<1x128x128xbf16>
    %43 = vector.shape_cast %42 : vector<1x128x128xbf16> to vector<128x128xbf16>
    %cst_26 = arith.constant dense<0.000000e+00> : vector<128x128xf32>
    %44 = tpu.matmul %39, %43, %cst_26 {dimension_numbers = #tpu.dot_dimension_numbers<[1], [0], [0], [1], [0, 0, 1, 1], [], []>} : vector<128x128xbf16>, vector<128x128xbf16>, vector<128x128xf32> -> vector<128x128xf32>
    %45 = arith.addf %37, %44 : vector<128x128xf32>
    %c3_27 = arith.constant 3 : index
    %c0_28 = arith.constant 0 : index
    %c0_29 = arith.constant 0 : index
    %46 = vector.load %arg3[%c3_27, %c0_28, %c0_29] : memref<5x128x128xbf16, #tpu.memory_space<vmem>>, vector<1x128x128xbf16>
    %47 = vector.shape_cast %46 : vector<1x128x128xbf16> to vector<128x128xbf16>
    %cst_30 = arith.constant dense<0.000000e+00> : vector<128x128xf32>
    %48 = tpu.matmul %41, %47, %cst_30 {dimension_numbers = #tpu.dot_dimension_numbers<[1], [0], [0], [1], [0, 0, 1, 1], [], []>} : vector<128x128xbf16>, vector<128x128xbf16>, vector<128x128xf32> -> vector<128x128xf32>
    %49 = arith.addf %45, %48 : vector<128x128xf32>
    %50 = vector.extract_strided_slice %0 {offsets = [0, 4, 0], sizes = [2, 64, 128], strides = [1, 1, 1]} : vector<2x88x128xbf16> to vector<2x64x128xbf16>
    %51 = vector.shape_cast %50 : vector<2x64x128xbf16> to vector<128x128xbf16>
    %52 = vector.extract_strided_slice %0 {offsets = [0, 20, 0], sizes = [2, 64, 128], strides = [1, 1, 1]} : vector<2x88x128xbf16> to vector<2x64x128xbf16>
    %53 = vector.shape_cast %52 : vector<2x64x128xbf16> to vector<128x128xbf16>
    %c4 = arith.constant 4 : index
    %c0_31 = arith.constant 0 : index
    %c0_32 = arith.constant 0 : index
    %54 = vector.load %arg2[%c4, %c0_31, %c0_32] : memref<5x128x128xbf16, #tpu.memory_space<vmem>>, vector<1x128x128xbf16>
    %55 = vector.shape_cast %54 : vector<1x128x128xbf16> to vector<128x128xbf16>
    %cst_33 = arith.constant dense<0.000000e+00> : vector<128x128xf32>
    %56 = tpu.matmul %51, %55, %cst_33 {dimension_numbers = #tpu.dot_dimension_numbers<[1], [0], [0], [1], [0, 0, 1, 1], [], []>} : vector<128x128xbf16>, vector<128x128xbf16>, vector<128x128xf32> -> vector<128x128xf32>
    %57 = arith.addf %49, %56 : vector<128x128xf32>
    %c4_34 = arith.constant 4 : index
    %c0_35 = arith.constant 0 : index
    %c0_36 = arith.constant 0 : index
    %58 = vector.load %arg3[%c4_34, %c0_35, %c0_36] : memref<5x128x128xbf16, #tpu.memory_space<vmem>>, vector<1x128x128xbf16>
    %59 = vector.shape_cast %58 : vector<1x128x128xbf16> to vector<128x128xbf16>
    %cst_37 = arith.constant dense<0.000000e+00> : vector<128x128xf32>
    %60 = tpu.matmul %53, %59, %cst_37 {dimension_numbers = #tpu.dot_dimension_numbers<[1], [0], [0], [1], [0, 0, 1, 1], [], []>} : vector<128x128xbf16>, vector<128x128xbf16>, vector<128x128xf32> -> vector<128x128xf32>
    %61 = arith.addf %57, %60 : vector<128x128xf32>
    %62 = vector.extract_strided_slice %61 {offsets = [0, 0], sizes = [128, 64], strides = [1, 1]} : vector<128x128xf32> to vector<128x64xf32>
    %63 = vector.extract_strided_slice %61 {offsets = [0, 64], sizes = [128, 64], strides = [1, 1]} : vector<128x128xf32> to vector<128x64xf32>
    %64 = arith.maximumf %62, %63 : vector<128x64xf32>
    %c0_38 = arith.constant 0 : index
    %c0_39 = arith.constant 0 : index
    %65 = vector.load %arg4[%c0_38, %c0_39] : memref<1x64xf32, #tpu.memory_space<vmem>>, vector<1x64xf32>
    %66 = vector.broadcast %65 : vector<1x64xf32> to vector<128x64xf32>
    %67 = arith.addf %64, %66 : vector<128x64xf32>
    %68 = vector.shape_cast %67 : vector<128x64xf32> to vector<2x4x16x64xf32>
    %69 = arith.truncf %68 : vector<2x4x16x64xf32> to vector<2x4x16x64xbf16>
    %c0_40 = arith.constant 0 : index
    %c0_41 = arith.constant 0 : index
    %c0_42 = arith.constant 0 : index
    %c0_43 = arith.constant 0 : index
    %70 = vector.load %arg5[%c0_40, %c0_41, %c0_42, %c0_43] : memref<2x4x16x64xbf16, #tpu.memory_space<vmem>>, vector<2x4x16x64xbf16>
    tpu.vector_store %arg5[%c0_40, %c0_41, %c0_42, %c0_43], %69 {strides = array<i32>} : memref<2x4x16x64xbf16, #tpu.memory_space<vmem>>, vector<2x4x16x64xbf16>,
    return
  }
  func.func @transform_0(%arg0: i32) -> (i32, i32, i32) {
    %c0_i32 = arith.constant 0 : i32
    %c0_i32_0 = arith.constant 0 : i32
    %c0_i32_1 = arith.constant 0 : i32
    return %arg0, %c0_i32, %c0_i32_0 : i32, i32, i32
  }
  func.func @transform_1(%arg0: i32) -> (i32, i32, i32) {
    %c0_i32 = arith.constant 0 : i32
    %c0_i32_0 = arith.constant 0 : i32
    %c0_i32_1 = arith.constant 0 : i32
    %c0_i32_2 = arith.constant 0 : i32
    return %c0_i32, %c0_i32_0, %c0_i32_1 : i32, i32, i32
  }
  func.func @transform_2(%arg0: i32) -> (i32, i32, i32) {
    %c0_i32 = arith.constant 0 : i32
    %c0_i32_0 = arith.constant 0 : i32
    %c0_i32_1 = arith.constant 0 : i32
    %c0_i32_2 = arith.constant 0 : i32
    return %c0_i32, %c0_i32_0, %c0_i32_1 : i32, i32, i32
  }
  func.func @transform_3(%arg0: i32) -> (i32, i32) {
    %c0_i32 = arith.constant 0 : i32
    %c0_i32_0 = arith.constant 0 : i32
    %c0_i32_1 = arith.constant 0 : i32
    return %c0_i32, %c0_i32_0 : i32, i32
  }
  func.func @transform_4(%arg0: i32) -> (i32, i32, i32, i32) {
    %c0_i32 = arith.constant 0 : i32
    %c0_i32_0 = arith.constant 0 : i32
    %c0_i32_1 = arith.constant 0 : i32
    %c0_i32_2 = arith.constant 0 : i32
    return %arg0, %c0_i32, %c0_i32_0, %c0_i32_1 : i32, i32, i32, i32
  }
}

module attributes {stable_mosaic.version = 11 : i64} {
  func.func @_fc_fused_kernel(%arg0: i32, %arg1: memref<2x1024xbf16, #tpu.memory_space<vmem>>, %arg2: memref<1024x128xbf16, #tpu.memory_space<vmem>>, %arg3: memref<1x128xf32, #tpu.memory_space<vmem>>, %arg4: memref<128x128xbf16, #tpu.memory_space<vmem>>, %arg5: memref<1x128xf32, #tpu.memory_space<vmem>>, %arg6: memref<2x128xf32, #tpu.memory_space<vmem>>) attributes {dimension_semantics = [#tpu.dimension_semantics<parallel>], iteration_bounds = array<i64: 1>, scalar_prefetch = 0 : i64, scratch_operands = 0 : i64, tpu.core_type = #tpu.core_type<tc>, window_params = [{transform_indices = @transform_0, window_bounds = array<i64: 2, 1024>}, {pipeline_mode = #tpu.pipeline_mode<synchronous>, transform_indices = @transform_1, window_bounds = array<i64: 1024, 128>}, {pipeline_mode = #tpu.pipeline_mode<synchronous>, transform_indices = @transform_2, window_bounds = array<i64: 1, 128>}, {pipeline_mode = #tpu.pipeline_mode<synchronous>, transform_indices = @transform_3, window_bounds = array<i64: 128, 128>}, {pipeline_mode = #tpu.pipeline_mode<synchronous>, transform_indices = @transform_4, window_bounds = array<i64: 1, 128>}, {transform_indices = @transform_5, window_bounds = array<i64: 2, 128>}]} {
    %c0 = arith.constant 0 : index
    %c0_0 = arith.constant 0 : index
    %0 = vector.load %arg1[%c0, %c0_0] : memref<2x1024xbf16, #tpu.memory_space<vmem>>, vector<2x1024xbf16>
    %c0_1 = arith.constant 0 : index
    %c0_2 = arith.constant 0 : index
    %1 = vector.load %arg2[%c0_1, %c0_2] : memref<1024x128xbf16, #tpu.memory_space<vmem>>, vector<1024x128xbf16>
    %cst = arith.constant dense<0.000000e+00> : vector<2x128xf32>
    %2 = tpu.matmul %0, %1, %cst {dimension_numbers = #tpu.dot_dimension_numbers<[1], [0], [0], [1], [0, 0, 1, 1], [], []>} : vector<2x1024xbf16>, vector<1024x128xbf16>, vector<2x128xf32> -> vector<2x128xf32>
    %c0_3 = arith.constant 0 : index
    %c0_4 = arith.constant 0 : index
    %3 = vector.load %arg3[%c0_3, %c0_4] : memref<1x128xf32, #tpu.memory_space<vmem>>, vector<1x128xf32>
    %4 = vector.broadcast %3 : vector<1x128xf32> to vector<2x128xf32>
    %5 = arith.addf %2, %4 : vector<2x128xf32>
    %6 = arith.truncf %5 : vector<2x128xf32> to vector<2x128xbf16>
    %c0_5 = arith.constant 0 : index
    %c0_6 = arith.constant 0 : index
    %7 = vector.load %arg4[%c0_5, %c0_6] : memref<128x128xbf16, #tpu.memory_space<vmem>>, vector<128x128xbf16>
    %cst_7 = arith.constant dense<0.000000e+00> : vector<2x128xf32>
    %8 = tpu.matmul %6, %7, %cst_7 {dimension_numbers = #tpu.dot_dimension_numbers<[1], [0], [0], [1], [0, 0, 1, 1], [], []>} : vector<2x128xbf16>, vector<128x128xbf16>, vector<2x128xf32> -> vector<2x128xf32>
    %c0_8 = arith.constant 0 : index
    %c0_9 = arith.constant 0 : index
    %9 = vector.load %arg5[%c0_8, %c0_9] : memref<1x128xf32, #tpu.memory_space<vmem>>, vector<1x128xf32>
    %10 = vector.broadcast %9 : vector<1x128xf32> to vector<2x128xf32>
    %11 = arith.addf %8, %10 : vector<2x128xf32>
    %c0_10 = arith.constant 0 : index
    %c0_11 = arith.constant 0 : index
    %12 = vector.load %arg6[%c0_10, %c0_11] : memref<2x128xf32, #tpu.memory_space<vmem>>, vector<2x128xf32>
    tpu.vector_store %arg6[%c0_10, %c0_11], %11 {strides = array<i32>} : memref<2x128xf32, #tpu.memory_space<vmem>>, vector<2x128xf32>,
    return
  }
  func.func @transform_0(%arg0: i32) -> (i32, i32) {
    %c0_i32 = arith.constant 0 : i32
    %c0_i32_0 = arith.constant 0 : i32
    return %arg0, %c0_i32 : i32, i32
  }
  func.func @transform_1(%arg0: i32) -> (i32, i32) {
    %c0_i32 = arith.constant 0 : i32
    %c0_i32_0 = arith.constant 0 : i32
    %c0_i32_1 = arith.constant 0 : i32
    return %c0_i32, %c0_i32_0 : i32, i32
  }
  func.func @transform_2(%arg0: i32) -> (i32, i32) {
    %c0_i32 = arith.constant 0 : i32
    %c0_i32_0 = arith.constant 0 : i32
    %c0_i32_1 = arith.constant 0 : i32
    return %c0_i32, %c0_i32_0 : i32, i32
  }
  func.func @transform_3(%arg0: i32) -> (i32, i32) {
    %c0_i32 = arith.constant 0 : i32
    %c0_i32_0 = arith.constant 0 : i32
    %c0_i32_1 = arith.constant 0 : i32
    return %c0_i32, %c0_i32_0 : i32, i32
  }
  func.func @transform_4(%arg0: i32) -> (i32, i32) {
    %c0_i32 = arith.constant 0 : i32
    %c0_i32_0 = arith.constant 0 : i32
    %c0_i32_1 = arith.constant 0 : i32
    return %c0_i32, %c0_i32_0 : i32, i32
  }
  func.func @transform_5(%arg0: i32) -> (i32, i32) {
    %c0_i32 = arith.constant 0 : i32
    %c0_i32_0 = arith.constant 0 : i32
    return %arg0, %c0_i32 : i32, i32
  }
}

</mosaic_0001>

<bundles_post_ra>
// kernel: mynn_forward.4
= control target key start
LH: loop header
LB: loop body
LE: loop exit
PB: predicated region body
PF: predicated region fallthrough
CT: control target
= control target key end

     0   :  { %vm2679_vm0 = vcmask 257024   ;;  %s5094_s1 = inlined_call_operand.vmem [shape: bf16[128,32], index: 1, kind: input, shape index: {}]   ;;  %s5095_s0 = inlined_call_operand.vmem [shape: bf16[2,1024,128], index: 0, kind: input, shape index: {}]   ;;  %s5096_s2 = inlined_call_operand.vmem [shape: f32[1,32], index: 2, kind: input, shape index: {}]   ;;  %s5097_s3 = inlined_call_operand.vmem [shape: bf16[2,256,32], index: 3, kind: output, shape index: {}]  }
   0x1   :  { %v3437_v0 = vld [vmem:[%s5094_s1] sm:$0xff]   ;;  %v3438_v1 = vld [vmem:[%s5094_s1 + $0x8] sm:$0xff]   ;;  %v3439_v2 = vld [vmem:[%s5094_s1 + $0x10] sm:$0xff]  }
   0x2   :  { %3149 = vmatprep.subr.bf16.mxu0 %v3437_v0  ;;  %3421 = vmatprep.subr.bf16.mxu1 %v3437_v0  ;;  %v3440_v3 = vld [vmem:[%s5094_s1 + $0x18] sm:$0xff]   ;;  %v3445_v4 = vld [vmem:[%s5095_s0] sm:$0xff]   ;;  %v3442_v7 = vld [vmem:[%s5094_s1 + $0x28] sm:$0xff]  }
   0x3   :  { %3150 = vmatpush3.bf16.msra.mxu0 %v3437_v0  ;;  %3429 = vmatpush3.bf16.msra.mxu1 %v3437_v0  ;;  %v3446_v5 = vld [vmem:[%s5095_s0 + $0x200] sm:$0xff]   ;;  %v3443_v8 = vld [vmem:[%s5094_s1 + $0x30] sm:$0xff]   ;;  %v3444_v9 = vld [vmem:[%s5094_s1 + $0x38] sm:$0xff]  }
   0x4   :  { %3151 = vmatprep.subr.bf16.mxu0 %v3438_v1  ;;  %3422 = vmatprep.subr.bf16.mxu1 %v3438_v1  ;;  %v3441_v6 = vld [vmem:[%s5094_s1 + $0x20] sm:$0xff]   ;;  %v3447_v10 = vld [vmem:[%s5095_s0 + $0x8] sm:$0xff]   ;;  %v3449_v12 = vld [vmem:[%s5095_s0 + $0x10] sm:$0xff]  }
   0x5   :  { %3165 = vmatprep.mubr.bf16.mxu0 %v3445_v4  ;;  %3293 = vmatprep.mubr.bf16.mxu1 %v3446_v5  ;;  %v3448_v11 = vld [vmem:[%s5095_s0 + $0x208] sm:$0xff]   ;;  %v3450_v13 = vld [vmem:[%s5095_s0 + $0x210] sm:$0xff]   ;;  %v3451_v14 = vld [vmem:[%s5095_s0 + $0x18] sm:$0xff]  }
   0x6   :  { %v3452_v15 = vld [vmem:[%s5095_s0 + $0x218] sm:$0xff]   ;;  %v3453_v16 = vld [vmem:[%s5095_s0 + $0x20] sm:$0xff]   ;;  %v3455_v18 = vld [vmem:[%s5095_s0 + $0x28] sm:$0xff]  }
   0x7   :  { %3152 = vmatpush3.bf16.msra.mxu0 %v3438_v1  ;;  %3430 = vmatpush3.bf16.msra.mxu1 %v3438_v1  ;;  %v3454_v17 = vld [vmem:[%s5095_s0 + $0x220] sm:$0xff]   ;;  %v3456_v19 = vld [vmem:[%s5095_s0 + $0x228] sm:$0xff]   ;;  %v3457_v20 = vld [vmem:[%s5095_s0 + $0x30] sm:$0xff]  }
   0x8   :  { %3153 = vmatprep.subr.bf16.mxu0 %v3439_v2  ;;  %3423 = vmatprep.subr.bf16.mxu1 %v3439_v2  ;;  %v3458_v21 = vld [vmem:[%s5095_s0 + $0x230] sm:$0xff]   ;;  %v3459_v22 = vld [vmem:[%s5095_s0 + $0x38] sm:$0xff]   ;;  %v3461_v24 = vld [vmem:[%s5095_s0 + $0x40] sm:$0xff]  }
   0x9   :  { %v3460_v23 = vld [vmem:[%s5095_s0 + $0x238] sm:$0xff]   ;;  %v3462_v25 = vld [vmem:[%s5095_s0 + $0x240] sm:$0xff]   ;;  %v3463_v26 = vld [vmem:[%s5095_s0 + $0x48] sm:$0xff]  }
   0xa   :  { %v3464_v27 = vld [vmem:[%s5095_s0 + $0x248] sm:$0xff]   ;;  %v3465_v28 = vld [vmem:[%s5095_s0 + $0x50] sm:$0xff]   ;;  %v3467_v30 = vld [vmem:[%s5095_s0 + $0x58] sm:$0xff]  }
   0xb   :  { %3154 = vmatpush3.bf16.msra.mxu0 %v3439_v2  ;;  %3431 = vmatpush3.bf16.msra.mxu1 %v3439_v2  ;;  %v3466_v29 = vld [vmem:[%s5095_s0 + $0x250] sm:$0xff]   ;;  %v3468_v31 = vld [vmem:[%s5095_s0 + $0x258] sm:$0xff]   ;;  %v3469_v32 = vld [vmem:[%s5095_s0 + $0x60] sm:$0xff]  }
   0xc   :  { %3155 = vmatprep.subr.bf16.mxu0 %v3440_v3  ;;  %3424 = vmatprep.subr.bf16.mxu1 %v3440_v3  ;;  %v3470_v33 = vld [vmem:[%s5095_s0 + $0x260] sm:$0xff]   ;;  %v3471_v34 = vld [vmem:[%s5095_s0 + $0x68] sm:$0xff]   ;;  %v3473_v36 = vld [vmem:[%s5095_s0 + $0x70] sm:$0xff]  }
   0xd   :  { %v3472_v35 = vld [vmem:[%s5095_s0 + $0x268] sm:$0xff]   ;;  %v3474_v37 = vld [vmem:[%s5095_s0 + $0x270] sm:$0xff]   ;;  %v3475_v38 = vld [vmem:[%s5095_s0 + $0x78] sm:$0xff]  }
   0xe   :  { %v3476_v39 = vld [vmem:[%s5095_s0 + $0x278] sm:$0xff]   ;;  %v3477_v40 = vld [vmem:[%s5095_s0 + $0x80] sm:$0xff]   ;;  %v3479_v42 = vld [vmem:[%s5095_s0 + $0x88] sm:$0xff]  }
   0xf   :  { %3156 = vmatpush3.bf16.msra.mxu0 %v3440_v3  ;;  %3432 = vmatpush3.bf16.msra.mxu1 %v3440_v3  ;;  %v3478_v41 = vld [vmem:[%s5095_s0 + $0x280] sm:$0xff]   ;;  %v3480_v43 = vld [vmem:[%s5095_s0 + $0x288] sm:$0xff]   ;;  %v3481_v44 = vld [vmem:[%s5095_s0 + $0x90] sm:$0xff]  }
  0x10   :  { %3157 = vmatprep.subr.bf16.mxu0 %v3441_v6  ;;  %3425 = vmatprep.subr.bf16.mxu1 %v3441_v6  ;;  %v3482_v45 = vld [vmem:[%s5095_s0 + $0x290] sm:$0xff]   ;;  %v3483_v46 = vld [vmem:[%s5095_s0 + $0x98] sm:$0xff]   ;;  %v3485_v48 = vld [vmem:[%s5095_s0 + $0xa0] sm:$0xff]  }
  0x11   :  { %v3484_v47 = vld [vmem:[%s5095_s0 + $0x298] sm:$0xff]   ;;  %v3486_v49 = vld [vmem:[%s5095_s0 + $0x2a0] sm:$0xff]   ;;  %v3487_v50 = vld [vmem:[%s5095_s0 + $0xa8] sm:$0xff]  }
  0x12   :  { %v3488_v51 = vld [vmem:[%s5095_s0 + $0x2a8] sm:$0xff]   ;;  %v3489_v52 = vld [vmem:[%s5095_s0 + $0xb0] sm:$0xff]   ;;  %v3491_v54 = vld [vmem:[%s5095_s0 + $0xb8] sm:$0xff]  }
  0x13   :  { %3158 = vmatpush3.bf16.msra.mxu0 %v3441_v6  ;;  %3433 = vmatpush3.bf16.msra.mxu1 %v3441_v6  ;;  %v3490_v53 = vld [vmem:[%s5095_s0 + $0x2b0] sm:$0xff]   ;;  %v3492_v55 = vld [vmem:[%s5095_s0 + $0x2b8] sm:$0xff]   ;;  %v3493_v56 = vld [vmem:[%s5095_s0 + $0xc0] sm:$0xff]  }
  0x14   :  { %3159 = vmatprep.subr.bf16.mxu0 %v3442_v7  ;;  %3426 = vmatprep.subr.bf16.mxu1 %v3442_v7  ;;  %v3494_v57 = vld [vmem:[%s5095_s0 + $0x2c0] sm:$0xff]   ;;  %v3495_v58 = vld [vmem:[%s5095_s0 + $0xc8] sm:$0xff]   ;;  %v3497_v60 = vld [vmem:[%s5095_s0 + $0xd0] sm:$0xff]  }
  0x15   :  { %v3496_v59 = vld [vmem:[%s5095_s0 + $0x2c8] sm:$0xff]   ;;  %v3498_v61 = vld [vmem:[%s5095_s0 + $0x2d0] sm:$0xff]   ;;  %v3499_v62 = vld [vmem:[%s5095_s0 + $0xd8] sm:$0xff]  }
  0x16   :  { %v3500_v63 = vld [vmem:[%s5095_s0 + $0x2d8] sm:$0xff]   ;;  %v3501_v0 = vld [vmem:[%s5095_s0 + $0xe0] sm:$0xff]   ;;  %v3503_v2 = vld [vmem:[%s5095_s0 + $0xe8] sm:$0xff]  }
  0x17   :  { %3160 = vmatpush3.bf16.msra.mxu0 %v3442_v7  ;;  %3434 = vmatpush3.bf16.msra.mxu1 %v3442_v7  ;;  %v3502_v1 = vld [vmem:[%s5095_s0 + $0x2e0] sm:$0xff]   ;;  %v3504_v3 = vld [vmem:[%s5095_s0 + $0x2e8] sm:$0xff]   ;;  %v3505_v4 = vld [vmem:[%s5095_s0 + $0xf0] sm:$0xff]  }
  0x18   :  { %3161 = vmatprep.subr.bf16.mxu0 %v3443_v8  ;;  %3427 = vmatprep.subr.bf16.mxu1 %v3443_v8  ;;  %v3506_v5 = vld [vmem:[%s5095_s0 + $0x2f0] sm:$0xff]   ;;  %v3507_v6 = vld [vmem:[%s5095_s0 + $0xf8] sm:$0xff]  }
  0x19   :  { %v3508_v7 = vld [vmem:[%s5095_s0 + $0x2f8] sm:$0xff]  }
  0x1b   :  { %3162 = vmatpush3.bf16.msra.mxu0 %v3443_v8  ;;  %3435 = vmatpush3.bf16.msra.mxu1 %v3443_v8  ;;  %v3509_v8 = vld [vmem:[%s5095_s0 + $0x100] sm:$0xff]  }
  0x1c   :  { %3163 = vmatprep.subr.bf16.mxu0 %v3444_v9  ;;  %3428 = vmatprep.subr.bf16.mxu1 %v3444_v9 }
  0x1f   :  { %3164 = vmatpush3.bf16.msra.mxu0 %v3444_v9  ;;  %3436 = vmatpush3.bf16.msra.mxu1 %v3444_v9  ;;  %v3510_v9 = vld [vmem:[%s5095_s0 + $0x300] sm:$0xff]  }
  0x22   :  { %3166 = vmatmul.mubr.bf16.vlgmr.msra.gmra.mrb[0].mxu0 %v3447_v10  ;;  %3294 = vmatmul.mubr.bf16.vlgmr.msra.gmra.mrb[0].mxu1 %v3448_v11  ;;  %v3511_v10 = vld [vmem:[%s5095_s0 + $0x108] sm:$0xff]  }
  0x23   :  { %3169 = vmatprep.mubr.bf16.mxu0 %v3449_v12  ;;  %3297 = vmatprep.mubr.bf16.mxu1 %v3450_v13  ;;  %v3512_v11 = vld [vmem:[%s5095_s0 + $0x308] sm:$0xff]   ;;  %v3513_v12 = vld [vmem:[%s5095_s0 + $0x110] sm:$0xff]  }
  0x24   :  { %v3514_v13 = vld [vmem:[%s5095_s0 + $0x310] sm:$0xff]  }
  0x2a   :  { %3170 = vmatmul.mubr.bf16.gmra.mrb[4].mxu0 %v3451_v14  ;;  %3298 = vmatmul.mubr.bf16.gmra.mrb[4].mxu1 %v3452_v15  ;;  %v3515_v14 = vld [vmem:[%s5095_s0 + $0x118] sm:$0xff]  }
  0x2b   :  { %3173 = vmatprep.mubr.bf16.mxu0 %v3453_v16  ;;  %3301 = vmatprep.mubr.bf16.mxu1 %v3454_v17  ;;  %v3516_v15 = vld [vmem:[%s5095_s0 + $0x318] sm:$0xff]   ;;  %v3517_v16 = vld [vmem:[%s5095_s0 + $0x120] sm:$0xff]  }
  0x2c   :  { %v3518_v17 = vld [vmem:[%s5095_s0 + $0x320] sm:$0xff]  }
  0x32   :  { %3174 = vmatmul.mubr.bf16.gmra.mrb[8].mxu0 %v3455_v18  ;;  %3302 = vmatmul.mubr.bf16.gmra.mrb[8].mxu1 %v3456_v19  ;;  %v3519_v18 = vld [vmem:[%s5095_s0 + $0x128] sm:$0xff]  }
  0x33   :  { %3177 = vmatprep.mubr.bf16.mxu0 %v3457_v20  ;;  %3305 = vmatprep.mubr.bf16.mxu1 %v3458_v21  ;;  %v3520_v19 = vld [vmem:[%s5095_s0 + $0x328] sm:$0xff]   ;;  %v3521_v20 = vld [vmem:[%s5095_s0 + $0x130] sm:$0xff]  }
  0x34   :  { %v3522_v21 = vld [vmem:[%s5095_s0 + $0x330] sm:$0xff]  }
  0x3a   :  { %3178 = vmatmul.mubr.bf16.gmra.mrb[12].mxu0 %v3459_v22  ;;  %3306 = vmatmul.mubr.bf16.gmra.mrb[12].mxu1 %v3460_v23  ;;  %v3523_v22 = vld [vmem:[%s5095_s0 + $0x138] sm:$0xff]  }
  0x3b   :  { %3181 = vmatprep.mubr.bf16.mxu0 %v3461_v24  ;;  %3309 = vmatprep.mubr.bf16.mxu1 %v3462_v25  ;;  %v3524_v23 = vld [vmem:[%s5095_s0 + $0x338] sm:$0xff]   ;;  %v3525_v24 = vld [vmem:[%s5095_s0 + $0x140] sm:$0xff]  }
  0x3c   :  { %v3526_v25 = vld [vmem:[%s5095_s0 + $0x340] sm:$0xff]  }
  0x42   :  { %3182 = vmatmul.mubr.bf16.gmra.mrb[16].mxu0 %v3463_v26  ;;  %3310 = vmatmul.mubr.bf16.gmra.mrb[16].mxu1 %v3464_v27  ;;  %v3527_v26 = vld [vmem:[%s5095_s0 + $0x148] sm:$0xff]  }
  0x43   :  { %3185 = vmatprep.mubr.bf16.mxu0 %v3465_v28  ;;  %3313 = vmatprep.mubr.bf16.mxu1 %v3466_v29  ;;  %v3528_v27 = vld [vmem:[%s5095_s0 + $0x348] sm:$0xff]   ;;  %v3529_v28 = vld [vmem:[%s5095_s0 + $0x150] sm:$0xff]  }
  0x44   :  { %v3530_v29 = vld [vmem:[%s5095_s0 + $0x350] sm:$0xff]  }
  0x4a   :  { %3186 = vmatmul.mubr.bf16.gmra.mrb[20].mxu0 %v3467_v30  ;;  %3314 = vmatmul.mubr.bf16.gmra.mrb[20].mxu1 %v3468_v31  ;;  %v3531_v30 = vld [vmem:[%s5095_s0 + $0x158] sm:$0xff]  }
  0x4b   :  { %3189 = vmatprep.mubr.bf16.mxu0 %v3469_v32  ;;  %3317 = vmatprep.mubr.bf16.mxu1 %v3470_v33  ;;  %v3532_v31 = vld [vmem:[%s5095_s0 + $0x358] sm:$0xff]   ;;  %v3533_v32 = vld [vmem:[%s5095_s0 + $0x160] sm:$0xff]  }
  0x4c   :  { %v3534_v33 = vld [vmem:[%s5095_s0 + $0x360] sm:$0xff]  }
  0x52   :  { %3190 = vmatmul.mubr.bf16.gmra.mrb[24].mxu0 %v3471_v34  ;;  %3318 = vmatmul.mubr.bf16.gmra.mrb[24].mxu1 %v3472_v35  ;;  %v3535_v34 = vld [vmem:[%s5095_s0 + $0x168] sm:$0xff]  }
  0x53   :  { %3193 = vmatprep.mubr.bf16.mxu0 %v3473_v36  ;;  %3321 = vmatprep.mubr.bf16.mxu1 %v3474_v37  ;;  %v3536_v35 = vld [vmem:[%s5095_s0 + $0x368] sm:$0xff]   ;;  %v3537_v36 = vld [vmem:[%s5095_s0 + $0x170] sm:$0xff]  }
  0x54   :  { %v3538_v37 = vld [vmem:[%s5095_s0 + $0x370] sm:$0xff]  }
  0x5a   :  { %3194 = vmatmul.mubr.bf16.gmra.mrb[28].mxu0 %v3475_v38  ;;  %3322 = vmatmul.mubr.bf16.gmra.mrb[28].mxu1 %v3476_v39  ;;  %v3539_v38 = vld [vmem:[%s5095_s0 + $0x178] sm:$0xff]  }
  0x5b   :  { %3197 = vmatprep.mubr.bf16.mxu0 %v3477_v40  ;;  %3325 = vmatprep.mubr.bf16.mxu1 %v3478_v41  ;;  %v3540_v39 = vld [vmem:[%s5095_s0 + $0x378] sm:$0xff]   ;;  %v3541_v40 = vld [vmem:[%s5095_s0 + $0x180] sm:$0xff]  }
  0x5c   :  { %v3542_v41 = vld [vmem:[%s5095_s0 + $0x380] sm:$0xff]  }
  0x62   :  { %3198 = vmatmul.mubr.bf16.gmra.mrb[32].mxu0 %v3479_v42  ;;  %3326 = vmatmul.mubr.bf16.gmra.mrb[32].mxu1 %v3480_v43  ;;  %v3543_v42 = vld [vmem:[%s5095_s0 + $0x188] sm:$0xff]  }
  0x63   :  { %3201 = vmatprep.mubr.bf16.mxu0 %v3481_v44  ;;  %3329 = vmatprep.mubr.bf16.mxu1 %v3482_v45  ;;  %v3544_v43 = vld [vmem:[%s5095_s0 + $0x388] sm:$0xff]   ;;  %v3545_v44 = vld [vmem:[%s5095_s0 + $0x190] sm:$0xff]  }
  0x64   :  { %v3546_v45 = vld [vmem:[%s5095_s0 + $0x390] sm:$0xff]  }
  0x6a   :  { %3202 = vmatmul.mubr.bf16.gmra.mrb[36].mxu0 %v3483_v46  ;;  %3330 = vmatmul.mubr.bf16.gmra.mrb[36].mxu1 %v3484_v47  ;;  %v3547_v46 = vld [vmem:[%s5095_s0 + $0x198] sm:$0xff]  }
  0x6b   :  { %3205 = vmatprep.mubr.bf16.mxu0 %v3485_v48  ;;  %3333 = vmatprep.mubr.bf16.mxu1 %v3486_v49  ;;  %v3548_v47 = vld [vmem:[%s5095_s0 + $0x398] sm:$0xff]   ;;  %v3549_v48 = vld [vmem:[%s5095_s0 + $0x1a0] sm:$0xff]  }
  0x6c   :  { %v3550_v49 = vld [vmem:[%s5095_s0 + $0x3a0] sm:$0xff]  }
  0x72   :  { %3206 = vmatmul.mubr.bf16.gmra.mrb[40].mxu0 %v3487_v50  ;;  %3334 = vmatmul.mubr.bf16.gmra.mrb[40].mxu1 %v3488_v51  ;;  %v3551_v50 = vld [vmem:[%s5095_s0 + $0x1a8] sm:$0xff]  }
  0x73   :  { %3209 = vmatprep.mubr.bf16.mxu0 %v3489_v52  ;;  %3337 = vmatprep.mubr.bf16.mxu1 %v3490_v53  ;;  %v3552_v51 = vld [vmem:[%s5095_s0 + $0x3a8] sm:$0xff]   ;;  %v3553_v52 = vld [vmem:[%s5095_s0 + $0x1b0] sm:$0xff]  }
  0x74   :  { %v3554_v53 = vld [vmem:[%s5095_s0 + $0x3b0] sm:$0xff]  }
  0x7a   :  { %3210 = vmatmul.mubr.bf16.gmra.mrb[44].mxu0 %v3491_v54  ;;  %3338 = vmatmul.mubr.bf16.gmra.mrb[44].mxu1 %v3492_v55 }
  0x7b   :  { %3213 = vmatprep.mubr.bf16.mxu0 %v3493_v56  ;;  %3341 = vmatprep.mubr.bf16.mxu1 %v3494_v57 }
  0x82   :  { %3214 = vmatmul.mubr.bf16.gmra.mrb[48].mxu0 %v3495_v58  ;;  %3342 = vmatmul.mubr.bf16.gmra.mrb[48].mxu1 %v3496_v59  ;;  %v3555_v58 = vld [vmem:[%s5095_s0 + $0x1b8] sm:$0xff]  }
  0x83   :  { %3217 = vmatprep.mubr.bf16.mxu0 %v3497_v60  ;;  %3345 = vmatprep.mubr.bf16.mxu1 %v3498_v61  ;;  %v3556_v59 = vld [vmem:[%s5095_s0 + $0x3b8] sm:$0xff]  }
  0x8a   :  { %3218 = vmatmul.mubr.bf16.gmra.mrb[52].mxu0 %v3499_v62  ;;  %3346 = vmatmul.mubr.bf16.gmra.mrb[52].mxu1 %v3500_v63  ;;  %v3557_v62 = vld [vmem:[%s5095_s0 + $0x1c0] sm:$0xff]  }
  0x8b   :  { %3221 = vmatprep.mubr.bf16.mxu0 %v3501_v0  ;;  %3349 = vmatprep.mubr.bf16.mxu1 %v3502_v1  ;;  %v3558_v63 = vld [vmem:[%s5095_s0 + $0x3c0] sm:$0xff]  }
  0x92   :  { %3222 = vmatmul.mubr.bf16.gmra.mrb[56].mxu0 %v3503_v2  ;;  %3350 = vmatmul.mubr.bf16.gmra.mrb[56].mxu1 %v3504_v3 }
  0x93   :  { %3225 = vmatprep.mubr.bf16.mxu0 %v3505_v4  ;;  %3353 = vmatprep.mubr.bf16.mxu1 %v3506_v5 }
  0x9a   :  { %3226 = vmatmul.mubr.bf16.gmra.mrb[60].mxu0 %v3507_v6  ;;  %3354 = vmatmul.mubr.bf16.gmra.mrb[60].mxu1 %v3508_v7  ;;  %v3559_v6 = vld [vmem:[%s5095_s0 + $0x1c8] sm:$0xff]  }
  0x9b   :  { %3229 = vmatprep.mubr.bf16.mxu0 %v3509_v8  ;;  %3357 = vmatprep.mubr.bf16.mxu1 %v3510_v9  ;;  %v3560_v7 = vld [vmem:[%s5095_s0 + $0x3c8] sm:$0xff]  }
  0xa2   :  { %3230 = vmatmul.mubr.bf16.gmra.mrb[64].mxu0 %v3511_v10  ;;  %3358 = vmatmul.mubr.bf16.gmra.mrb[64].mxu1 %v3512_v11  ;;  %v3561_v10 = vld [vmem:[%s5095_s0 + $0x1d0] sm:$0xff]  }
  0xa3   :  { %3233 = vmatprep.mubr.bf16.mxu0 %v3513_v12  ;;  %3361 = vmatprep.mubr.bf16.mxu1 %v3514_v13  ;;  %v3562_v11 = vld [vmem:[%s5095_s0 + $0x3d0] sm:$0xff]  }
  0xaa   :  { %3234 = vmatmul.mubr.bf16.gmra.mrb[68].mxu0 %v3515_v14  ;;  %3362 = vmatmul.mubr.bf16.gmra.mrb[68].mxu1 %v3516_v15 }
  0xab   :  { %3237 = vmatprep.mubr.bf16.mxu0 %v3517_v16  ;;  %3365 = vmatprep.mubr.bf16.mxu1 %v3518_v17 }
  0xb2   :  { %3238 = vmatmul.mubr.bf16.gmra.mrb[72].mxu0 %v3519_v18  ;;  %3366 = vmatmul.mubr.bf16.gmra.mrb[72].mxu1 %v3520_v19  ;;  %v3563_v18 = vld [vmem:[%s5095_s0 + $0x1d8] sm:$0xff]  }
  0xb3   :  { %3241 = vmatprep.mubr.bf16.mxu0 %v3521_v20  ;;  %3369 = vmatprep.mubr.bf16.mxu1 %v3522_v21  ;;  %v3564_v19 = vld [vmem:[%s5095_s0 + $0x3d8] sm:$0xff]  }
  0xba   :  { %3242 = vmatmul.mubr.bf16.gmra.mrb[76].mxu0 %v3523_v22  ;;  %3370 = vmatmul.mubr.bf16.gmra.mrb[76].mxu1 %v3524_v23  ;;  %v3565_v22 = vld [vmem:[%s5095_s0 + $0x1e0] sm:$0xff]  }
  0xbb   :  { %3245 = vmatprep.mubr.bf16.mxu0 %v3525_v24  ;;  %3373 = vmatprep.mubr.bf16.mxu1 %v3526_v25  ;;  %v3566_v23 = vld [vmem:[%s5095_s0 + $0x3e0] sm:$0xff]  }
  0xc2   :  { %3246 = vmatmul.mubr.bf16.gmra.mrb[80].mxu0 %v3527_v26  ;;  %3374 = vmatmul.mubr.bf16.gmra.mrb[80].mxu1 %v3528_v27 }
  0xc3   :  { %3249 = vmatprep.mubr.bf16.mxu0 %v3529_v28  ;;  %3377 = vmatprep.mubr.bf16.mxu1 %v3530_v29 }
  0xca   :  { %3250 = vmatmul.mubr.bf16.gmra.mrb[84].mxu0 %v3531_v30  ;;  %3378 = vmatmul.mubr.bf16.gmra.mrb[84].mxu1 %v3532_v31  ;;  %v3567_v30 = vld [vmem:[%s5095_s0 + $0x1e8] sm:$0xff]  }
  0xcb   :  { %3253 = vmatprep.mubr.bf16.mxu0 %v3533_v32  ;;  %3381 = vmatprep.mubr.bf16.mxu1 %v3534_v33  ;;  %v3568_v31 = vld [vmem:[%s5095_s0 + $0x3e8] sm:$0xff]  }
  0xd2   :  { %3254 = vmatmul.mubr.bf16.gmra.mrb[88].mxu0 %v3535_v34  ;;  %3382 = vmatmul.mubr.bf16.gmra.mrb[88].mxu1 %v3536_v35  ;;  %v3569_v34 = vld [vmem:[%s5095_s0 + $0x1f0] sm:$0xff]  }
  0xd3   :  { %3257 = vmatprep.mubr.bf16.mxu0 %v3537_v36  ;;  %3385 = vmatprep.mubr.bf16.mxu1 %v3538_v37  ;;  %v3570_v35 = vld [vmem:[%s5095_s0 + $0x3f0] sm:$0xff]  }
  0xda   :  { %3258 = vmatmul.mubr.bf16.gmra.mrb[92].mxu0 %v3539_v38  ;;  %3386 = vmatmul.mubr.bf16.gmra.mrb[92].mxu1 %v3540_v39 }
  0xdb   :  { %3261 = vmatprep.mubr.bf16.mxu0 %v3541_v40  ;;  %3389 = vmatprep.mubr.bf16.mxu1 %v3542_v41 }
  0xe2   :  { %3262 = vmatmul.mubr.bf16.gmra.mrb[96].mxu0 %v3543_v42  ;;  %3390 = vmatmul.mubr.bf16.gmra.mrb[96].mxu1 %v3544_v43  ;;  %v3571_v42 = vld [vmem:[%s5095_s0 + $0x1f8] sm:$0xff]  }
  0xe3   :  { %3265 = vmatprep.mubr.bf16.mxu0 %v3545_v44  ;;  %3393 = vmatprep.mubr.bf16.mxu1 %v3546_v45  ;;  %v3572_v43 = vld [vmem:[%s5095_s0 + $0x3f8] sm:$0xff]  }
  0xea   :  { %3266 = vmatmul.mubr.bf16.gmra.mrb[100].mxu0 %v3547_v46  ;;  %3394 = vmatmul.mubr.bf16.gmra.mrb[100].mxu1 %v3548_v47 }
  0xeb   :  { %3269 = vmatprep.mubr.bf16.mxu0 %v3549_v48  ;;  %3397 = vmatprep.mubr.bf16.mxu1 %v3550_v49 }
  0xf2   :  { %3270 = vmatmul.mubr.bf16.gmra.mrb[104].mxu0 %v3551_v50  ;;  %3398 = vmatmul.mubr.bf16.gmra.mrb[104].mxu1 %v3552_v51 }
  0xf3   :  { %3273 = vmatprep.mubr.bf16.mxu0 %v3553_v52  ;;  %3401 = vmatprep.mubr.bf16.mxu1 %v3554_v53 }
  0xf5   :  { %v3947_v54 = vpop.f32.mrb[0].mxu0  ;;  %v3949_v55 = vpop.f32.mrb[0].mxu1 }
  0xf6   :  { %5205 = vst [vmem:[#allocation2_spill] sm:$0xff] %v3949_v55  ;;  %v3951_v56 = vpop.f32.mrb[1].mxu0  ;;  %v3953_v57 = vpop.f32.mrb[1].mxu1 }
  0xf7   :  { %5206 = vst [vmem:[#allocation3_spill] sm:$0xff] %v3953_v57  ;;  %v3961_v60 = vpop.f32.mrb[2].mxu0  ;;  %v3963_v61 = vpop.f32.mrb[2].mxu1 }
  0xf8   :  { %5207 = vst [vmem:[#allocation4_spill] sm:$0xff] %v3963_v61  ;;  %v3971_v0 = vpop.f32.mrb[3].mxu0  ;;  %v3973_v1 = vpop.f32.mrb[3].mxu1 }
  0xf9   :  { %5208 = vst [vmem:[#allocation5_spill] sm:$0xff] %v3973_v1 }
  0xfa   :  { %3274 = vmatmul.mubr.bf16.gmra.mrb[108].mxu0 %v3555_v58  ;;  %3402 = vmatmul.mubr.bf16.gmra.mrb[108].mxu1 %v3556_v59 }
  0xfb   :  { %3277 = vmatprep.mubr.bf16.mxu0 %v3557_v62  ;;  %3405 = vmatprep.mubr.bf16.mxu1 %v3558_v63 }
  0xfd   :  { %v3975_v2 = vpop.f32.mrb[4].mxu0  ;;  %v3977_v3 = vpop.f32.mrb[4].mxu1 }
  0xfe   :  { %5209 = vst [vmem:[#allocation6_spill] sm:$0xff] %v3977_v3  ;;  %v3979_v4 = vpop.f32.mrb[5].mxu0  ;;  %v3981_v5 = vpop.f32.mrb[5].mxu1 }
  0xff   :  { %5210 = vst [vmem:[#allocation7_spill] sm:$0xff] %v3981_v5  ;;  %v3989_v8 = vpop.f32.mrb[6].mxu0  ;;  %v3991_v9 = vpop.f32.mrb[6].mxu1 }
 0x100   :  { %5211 = vst [vmem:[#allocation8_spill] sm:$0xff] %v3991_v9  ;;  %v3999_v12 = vpop.f32.mrb[7].mxu0  ;;  %v4001_v13 = vpop.f32.mrb[7].mxu1 }
 0x101   :  { %5212 = vst [vmem:[#allocation9_spill] sm:$0xff] %v4001_v13 }
 0x102   :  { %3278 = vmatmul.mubr.bf16.gmra.mrb[112].mxu0 %v3559_v6  ;;  %3406 = vmatmul.mubr.bf16.gmra.mrb[112].mxu1 %v3560_v7 }
 0x103   :  { %3281 = vmatprep.mubr.bf16.mxu0 %v3561_v10  ;;  %3409 = vmatprep.mubr.bf16.mxu1 %v3562_v11 }
 0x105   :  { %v4003_v14 = vpop.f32.mrb[8].mxu0  ;;  %v4005_v15 = vpop.f32.mrb[8].mxu1 }
 0x106   :  { %5213 = vst [vmem:[#allocation10_spill] sm:$0xff] %v4005_v15  ;;  %v4007_v16 = vpop.f32.mrb[9].mxu0  ;;  %v4009_v17 = vpop.f32.mrb[9].mxu1 }
 0x107   :  { %5214 = vst [vmem:[#allocation11_spill] sm:$0xff] %v4009_v17  ;;  %v4017_v20 = vpop.f32.mrb[10].mxu0  ;;  %v4019_v21 = vpop.f32.mrb[10].mxu1 }
 0x108   :  { %5215 = vst [vmem:[#allocation12_spill] sm:$0xff] %v4019_v21  ;;  %v4027_v24 = vpop.f32.mrb[11].mxu0  ;;  %v4029_v25 = vpop.f32.mrb[11].mxu1 }
 0x109   :  { %5216 = vst [vmem:[#allocation13_spill] sm:$0xff] %v4027_v24  ;;  %5217 = vst [vmem:[#allocation14_spill] sm:$0xff] %v4029_v25 }
 0x10a   :  { %3282 = vmatmul.mubr.bf16.gmra.mrb[116].mxu0 %v3563_v18  ;;  %3410 = vmatmul.mubr.bf16.gmra.mrb[116].mxu1 %v3564_v19 }
 0x10b   :  { %3285 = vmatprep.mubr.bf16.mxu0 %v3565_v22  ;;  %3413 = vmatprep.mubr.bf16.mxu1 %v3566_v23 }
 0x10d   :  { %v4031_v26 = vpop.f32.mrb[12].mxu0  ;;  %v4033_v27 = vpop.f32.mrb[12].mxu1 }
 0x10e   :  { %5218 = vst [vmem:[#allocation15_spill] sm:$0xff] %v4031_v26  ;;  %5219 = vst [vmem:[#allocation16_spill] sm:$0xff] %v4033_v27  ;;  %v4035_v28 = vpop.f32.mrb[13].mxu0  ;;  %v4037_v29 = vpop.f32.mrb[13].mxu1 }
 0x10f   :  { %5220 = vst [vmem:[#allocation17_spill] sm:$0xff] %v4035_v28  ;;  %5221 = vst [vmem:[#allocation18_spill] sm:$0xff] %v4037_v29  ;;  %v4045_v32 = vpop.f32.mrb[14].mxu0  ;;  %v4047_v33 = vpop.f32.mrb[14].mxu1 }
 0x110   :  { %5222 = vst [vmem:[#allocation19_spill] sm:$0xff] %v4045_v32  ;;  %5223 = vst [vmem:[#allocation20_spill] sm:$0xff] %v4047_v33  ;;  %v4055_v36 = vpop.f32.mrb[15].mxu0  ;;  %v4057_v37 = vpop.f32.mrb[15].mxu1 }
 0x111   :  { %5224 = vst [vmem:[#allocation21_spill] sm:$0xff] %v4055_v36  ;;  %5225 = vst [vmem:[#allocation22_spill] sm:$0xff] %v4057_v37 }
 0x112   :  { %3286 = vmatmul.mubr.bf16.gmra.mrb[120].mxu0 %v3567_v30  ;;  %3414 = vmatmul.mubr.bf16.gmra.mrb[120].mxu1 %v3568_v31 }
 0x113   :  { %3289 = vmatprep.mubr.bf16.mxu0 %v3569_v34  ;;  %3417 = vmatprep.mubr.bf16.mxu1 %v3570_v35 }
 0x115   :  { %v4059_v38 = vpop.f32.mrb[16].mxu0  ;;  %v4061_v39 = vpop.f32.mrb[16].mxu1 }
 0x116   :  { %5226 = vst [vmem:[#allocation23_spill] sm:$0xff] %v4059_v38  ;;  %5227 = vst [vmem:[#allocation24_spill] sm:$0xff] %v4061_v39  ;;  %v4063_v40 = vpop.f32.mrb[17].mxu0  ;;  %v4065_v41 = vpop.f32.mrb[17].mxu1 }
 0x117   :  { %5228 = vst [vmem:[#allocation25_spill] sm:$0xff] %v4063_v40  ;;  %5229 = vst [vmem:[#allocation26_spill] sm:$0xff] %v4065_v41  ;;  %v4073_v44 = vpop.f32.mrb[18].mxu0  ;;  %v4075_v45 = vpop.f32.mrb[18].mxu1 }
 0x118   :  { %5230 = vst [vmem:[#allocation27_spill] sm:$0xff] %v4073_v44  ;;  %5231 = vst [vmem:[#allocation28_spill] sm:$0xff] %v4075_v45  ;;  %v4077_v46 = vpop.f32.mrb[19].mxu0  ;;  %v4079_v47 = vpop.f32.mrb[19].mxu1 }
 0x119   :  { %5232 = vst [vmem:[#allocation29_spill] sm:$0xff] %v4077_v46  ;;  %5233 = vst [vmem:[#allocation30_spill] sm:$0xff] %v4079_v47 }
 0x11a   :  { %3290 = vmatmul.mubr.bf16.gmra.mrb[124].mxu0 %v3571_v42  ;;  %3418 = vmatmul.mubr.bf16.gmra.mrb[124].mxu1 %v3572_v43 }
 0x11d   :  { %v4081_v48 = vpop.f32.mrb[20].mxu0  ;;  %v4083_v49 = vpop.f32.mrb[20].mxu1 }
 0x11e   :  { %5234 = vst [vmem:[#allocation31_spill] sm:$0xff] %v4081_v48  ;;  %5235 = vst [vmem:[#allocation32_spill] sm:$0xff] %v4083_v49  ;;  %v4085_v50 = vpop.f32.mrb[21].mxu0  ;;  %v4087_v51 = vpop.f32.mrb[21].mxu1 }
 0x11f   :  { %5236 = vst [vmem:[#allocation33_spill] sm:$0xff] %v4085_v50  ;;  %5237 = vst [vmem:[#allocation34_spill] sm:$0xff] %v4087_v51  ;;  %v4089_v52 = vpop.f32.mrb[22].mxu0  ;;  %v4091_v53 = vpop.f32.mrb[22].mxu1 }
 0x120   :  { %5238 = vst [vmem:[#allocation35_spill] sm:$0xff] %v4089_v52  ;;  %5239 = vst [vmem:[#allocation36_spill] sm:$0xff] %v4091_v53  ;;  %v4093_v58 = vpop.f32.mrb[23].mxu0  ;;  %v4095_v59 = vpop.f32.mrb[23].mxu1 }
 0x121   :  { %5240 = vst [vmem:[#allocation37_spill] sm:$0xff] %v4093_v58  ;;  %5241 = vst [vmem:[#allocation38_spill] sm:$0xff] %v4095_v59 }
 0x125   :  { %v4097_v62 = vpop.f32.mrb[24].mxu0  ;;  %v4099_v63 = vpop.f32.mrb[24].mxu1 }
 0x126   :  { %5242 = vst [vmem:[#allocation39_spill] sm:$0xff] %v4097_v62  ;;  %5243 = vst [vmem:[#allocation40_spill] sm:$0xff] %v4099_v63  ;;  %v4101_v6 = vpop.f32.mrb[25].mxu0  ;;  %v4103_v7 = vpop.f32.mrb[25].mxu1 }
 0x127   :  { %5244 = vst [vmem:[#allocation41_spill] sm:$0xff] %v4101_v6  ;;  %5245 = vst [vmem:[#allocation42_spill] sm:$0xff] %v4103_v7  ;;  %v4105_v10 = vpop.f32.mrb[26].mxu0  ;;  %v4107_v11 = vpop.f32.mrb[26].mxu1 }
 0x128   :  { %5246 = vst [vmem:[#allocation43_spill] sm:$0xff] %v4105_v10  ;;  %5247 = vst [vmem:[#allocation44_spill] sm:$0xff] %v4107_v11  ;;  %v4109_v18 = vpop.f32.mrb[27].mxu0  ;;  %v4111_v19 = vpop.f32.mrb[27].mxu1 }
 0x129   :  { %5248 = vst [vmem:[#allocation45_spill] sm:$0xff] %v4109_v18  ;;  %5249 = vst [vmem:[#allocation46_spill] sm:$0xff] %v4111_v19 }
 0x12d   :  { %v4113_v22 = vpop.f32.mrb[28].mxu0  ;;  %v4115_v23 = vpop.f32.mrb[28].mxu1 }
 0x12e   :  { %5250 = vst [vmem:[#allocation47_spill] sm:$0xff] %v4113_v22  ;;  %5251 = vst [vmem:[#allocation48_spill] sm:$0xff] %v4115_v23  ;;  %v4117_v30 = vpop.f32.mrb[29].mxu0  ;;  %v4119_v31 = vpop.f32.mrb[29].mxu1 }
 0x12f   :  { %5252 = vst [vmem:[#allocation49_spill] sm:$0xff] %v4117_v30  ;;  %5253 = vst [vmem:[#allocation50_spill] sm:$0xff] %v4119_v31  ;;  %v4121_v34 = vpop.f32.mrb[30].mxu0  ;;  %v4123_v35 = vpop.f32.mrb[30].mxu1 }
 0x130   :  { %5254 = vst [vmem:[#allocation51_spill] sm:$0xff] %v4121_v34  ;;  %5255 = vst [vmem:[#allocation52_spill] sm:$0xff] %v4123_v35  ;;  %v4125_v42 = vpop.f32.mrb[31].mxu0  ;;  %v4127_v43 = vpop.f32.mrb[31].mxu1 }
 0x131   :  { %5256 = vst [vmem:[#allocation53_spill] sm:$0xff] %v4125_v42  ;;  %5257 = vst [vmem:[#allocation54_spill] sm:$0xff] %v4127_v43 }
 0x135   :  { %v4129_v11 = vpop.f32.mrb[32].mxu0  ;;  %v4131_v18 = vpop.f32.mrb[32].mxu1 }
 0x136   :  { %5258 = vst [vmem:[#allocation55_spill] sm:$0xff] %v4131_v18  ;;  %v4137_v23 = vpop.f32.mrb[33].mxu0  ;;  %v4139_v31 = vpop.f32.mrb[33].mxu1 }
 0x137   :  { %5259 = vst [vmem:[#allocation56_spill] sm:$0xff] %v4139_v31  ;;  %v4145_v42 = vpop.f32.mrb[34].mxu0  ;;  %v4147_v34 = vpop.f32.mrb[34].mxu1 }
 0x138   :  { %5260 = vst [vmem:[#allocation57_spill] sm:$0xff] %v4147_v34  ;;  %v4153_v18 = vpop.f32.mrb[35].mxu0  ;;  %v4155_v55 = vpop.f32.mrb[35].mxu1 }
 0x139   :  { %5261 = vst [vmem:[#allocation58_spill] sm:$0xff] %v4155_v55 }
 0x13d   :  { %v4161_v31 = vpop.f32.mrb[36].mxu0  ;;  %v4163_v57 = vpop.f32.mrb[36].mxu1 }
 0x13e   :  { %5262 = vst [vmem:[#allocation59_spill] sm:$0xff] %v4163_v57  ;;  %v4169_v34 = vpop.f32.mrb[37].mxu0  ;;  %v4171_v61 = vpop.f32.mrb[37].mxu1 }
 0x13f   :  { %5263 = vst [vmem:[#allocation60_spill] sm:$0xff] %v4171_v61  ;;  %v4177_v55 = vpop.f32.mrb[38].mxu0  ;;  %v4179_v1 = vpop.f32.mrb[38].mxu1 }
 0x140   :  { %5264 = vst [vmem:[#allocation61_spill] sm:$0xff] %v4179_v1  ;;  %v4185_v57 = vpop.f32.mrb[39].mxu0  ;;  %v4187_v3 = vpop.f32.mrb[39].mxu1 }
 0x141   :  { %5265 = vst [vmem:[#allocation62_spill] sm:$0xff] %v4187_v3 }
 0x145   :  { %v4193_v61 = vpop.f32.mrb[40].mxu0  ;;  %v4195_v5 = vpop.f32.mrb[40].mxu1 }
 0x146   :  { %5266 = vst [vmem:[#allocation63_spill] sm:$0xff] %v4195_v5  ;;  %v4201_v1 = vpop.f32.mrb[41].mxu0  ;;  %v4203_v9 = vpop.f32.mrb[41].mxu1 }
 0x147   :  { %5267 = vst [vmem:[#allocation64_spill] sm:$0xff] %v4203_v9  ;;  %v4209_v3 = vpop.f32.mrb[42].mxu0  ;;  %v4211_v13 = vpop.f32.mrb[42].mxu1 }
 0x148   :  { %5268 = vst [vmem:[#allocation65_spill] sm:$0xff] %v4209_v3  ;;  %5269 = vst [vmem:[#allocation66_spill] sm:$0xff] %v4211_v13  ;;  %v4217_v5 = vpop.f32.mrb[43].mxu0  ;;  %v4219_v15 = vpop.f32.mrb[43].mxu1 }
 0x149   :  { %5270 = vst [vmem:[#allocation67_spill] sm:$0xff] %v4217_v5  ;;  %5271 = vst [vmem:[#allocation68_spill] sm:$0xff] %v4219_v15 }
 0x14d   :  { %v4225_v9 = vpop.f32.mrb[44].mxu0  ;;  %v4227_v17 = vpop.f32.mrb[44].mxu1 }
 0x14e   :  { %5272 = vst [vmem:[#allocation69_spill] sm:$0xff] %v4225_v9  ;;  %5273 = vst [vmem:[#allocation70_spill] sm:$0xff] %v4227_v17  ;;  %v4233_v13 = vpop.f32.mrb[45].mxu0  ;;  %v4235_v21 = vpop.f32.mrb[45].mxu1 }
 0x14f   :  { %5274 = vst [vmem:[#allocation71_spill] sm:$0xff] %v4233_v13  ;;  %5275 = vst [vmem:[#allocation72_spill] sm:$0xff] %v4235_v21  ;;  %v4241_v15 = vpop.f32.mrb[46].mxu0  ;;  %v4243_v25 = vpop.f32.mrb[46].mxu1 }
 0x150   :  { %5276 = vst [vmem:[#allocation73_spill] sm:$0xff] %v4241_v15  ;;  %5277 = vst [vmem:[#allocation74_spill] sm:$0xff] %v4243_v25  ;;  %v4249_v17 = vpop.f32.mrb[47].mxu0  ;;  %v4251_v27 = vpop.f32.mrb[47].mxu1 }
 0x151   :  { %5278 = vst [vmem:[#allocation75_spill] sm:$0xff] %v4249_v17  ;;  %5279 = vst [vmem:[#allocation76_spill] sm:$0xff] %v4251_v27 }
 0x155   :  { %v4257_v21 = vpop.f32.mrb[48].mxu0  ;;  %v4259_v29 = vpop.f32.mrb[48].mxu1 }
 0x156   :  { %5280 = vst [vmem:[#allocation77_spill] sm:$0xff] %v4257_v21  ;;  %5281 = vst [vmem:[#allocation78_spill] sm:$0xff] %v4259_v29  ;;  %v4265_v25 = vpop.f32.mrb[49].mxu0  ;;  %v4267_v33 = vpop.f32.mrb[49].mxu1 }
 0x157   :  { %5282 = vst [vmem:[#allocation79_spill] sm:$0xff] %v4265_v25  ;;  %5283 = vst [vmem:[#allocation80_spill] sm:$0xff] %v4267_v33  ;;  %v4273_v27 = vpop.f32.mrb[50].mxu0  ;;  %v4275_v37 = vpop.f32.mrb[50].mxu1 }
 0x158   :  { %5284 = vst [vmem:[#allocation81_spill] sm:$0xff] %v4273_v27  ;;  %5285 = vst [vmem:[#allocation82_spill] sm:$0xff] %v4275_v37  ;;  %v4281_v29 = vpop.f32.mrb[51].mxu0  ;;  %v4283_v39 = vpop.f32.mrb[51].mxu1 }
 0x159   :  { %5286 = vst [vmem:[#allocation83_spill] sm:$0xff] %v4281_v29  ;;  %5287 = vst [vmem:[#allocation84_spill] sm:$0xff] %v4283_v39 }
 0x15d   :  { %v4289_v33 = vpop.f32.mrb[52].mxu0  ;;  %v4291_v41 = vpop.f32.mrb[52].mxu1 }
 0x15e   :  { %5288 = vst [vmem:[#allocation85_spill] sm:$0xff] %v4289_v33  ;;  %5289 = vst [vmem:[#allocation86_spill] sm:$0xff] %v4291_v41  ;;  %v4297_v37 = vpop.f32.mrb[53].mxu0  ;;  %v4299_v45 = vpop.f32.mrb[53].mxu1 }
 0x15f   :  { %5290 = vst [vmem:[#allocation87_spill] sm:$0xff] %v4297_v37  ;;  %5291 = vst [vmem:[#allocation88_spill] sm:$0xff] %v4299_v45  ;;  %v4305_v39 = vpop.f32.mrb[54].mxu0  ;;  %v4307_v47 = vpop.f32.mrb[54].mxu1 }
 0x160   :  { %5292 = vst [vmem:[#allocation89_spill] sm:$0xff] %v4305_v39  ;;  %5293 = vst [vmem:[#allocation90_spill] sm:$0xff] %v4307_v47  ;;  %v4313_v41 = vpop.f32.mrb[55].mxu0  ;;  %v4315_v49 = vpop.f32.mrb[55].mxu1 }
 0x161   :  { %5294 = vst [vmem:[#allocation91_spill] sm:$0xff] %v4313_v41  ;;  %5295 = vst [vmem:[#allocation92_spill] sm:$0xff] %v4315_v49 }
 0x165   :  { %v4321_v45 = vpop.f32.mrb[56].mxu0  ;;  %v4323_v51 = vpop.f32.mrb[56].mxu1 }
 0x166   :  { %5296 = vst [vmem:[#allocation93_spill] sm:$0xff] %v4321_v45  ;;  %5297 = vst [vmem:[#allocation94_spill] sm:$0xff] %v4323_v51  ;;  %v4329_v47 = vpop.f32.mrb[57].mxu0  ;;  %v4331_v53 = vpop.f32.mrb[57].mxu1 }
 0x167   :  { %5298 = vst [vmem:[#allocation95_spill] sm:$0xff] %v4329_v47  ;;  %5299 = vst [vmem:[#allocation96_spill] sm:$0xff] %v4331_v53  ;;  %v4337_v49 = vpop.f32.mrb[58].mxu0  ;;  %v4339_v59 = vpop.f32.mrb[58].mxu1 }
 0x168   :  { %5300 = vst [vmem:[#allocation97_spill] sm:$0xff] %v4337_v49  ;;  %5301 = vst [vmem:[#allocation98_spill] sm:$0xff] %v4339_v59  ;;  %v4345_v51 = vpop.f32.mrb[59].mxu0  ;;  %v4347_v63 = vpop.f32.mrb[59].mxu1 }
 0x169   :  { %5303 = vst [vmem:[#allocation99_spill] sm:$0xff] %v4345_v51  ;;  %5304 = vst [vmem:[#allocation100_spill] sm:$0xff] %v4347_v63 }
 0x16d   :  { %v4353_v53 = vpop.f32.mrb[60].mxu0  ;;  %v4355_v7 = vpop.f32.mrb[60].mxu1 }
 0x16e   :  { %5306 = vst [vmem:[#allocation101_spill] sm:$0xff] %v4353_v53  ;;  %5307 = vst [vmem:[#allocation102_spill] sm:$0xff] %v4355_v7  ;;  %v4361_v59 = vpop.f32.mrb[61].mxu0  ;;  %v4363_v45 = vpop.f32.mrb[61].mxu1 }
 0x16f   :  { %5310 = vst [vmem:[#allocation103_spill] sm:$0xff] %v4361_v59  ;;  %5311 = vst [vmem:[#allocation104_spill] sm:$0xff] %v4363_v45  ;;  %v4369_v63 = vpop.f32.mrb[62].mxu0  ;;  %v4371_v19 = vpop.f32.mrb[62].mxu1 }
 0x170   :  { %5314 = vst [vmem:[#allocation105_spill] sm:$0xff] %v4369_v63  ;;  %5315 = vst [vmem:[#allocation106_spill] sm:$0xff] %v4371_v19  ;;  %v4377_v7 = vpop.f32.mrb[63].mxu0  ;;  %v4379_v49 = vpop.f32.mrb[63].mxu1 }
 0x171   :  { %5318 = vst [vmem:[#allocation107_spill] sm:$0xff] %v4377_v7  ;;  %5319 = vst [vmem:[#allocation108_spill] sm:$0xff] %v4379_v49 }
 0x175   :  { %v4385_v45 = vpop.f32.mrb[64].mxu0  ;;  %v4387_v51 = vpop.f32.mrb[64].mxu1 }
 0x176   :  { %v4389_v10 = vpop.f32.mrb[65].mxu0  ;;  %v4391_v22 = vpop.f32.mrb[65].mxu1 }
 0x177   :  { %v4393_v63 = vpop.f32.mrb[66].mxu0  ;;  %v4395_v30 = vpop.f32.mrb[66].mxu1 }
 0x178   :  { %v4397_v19 = vpop.f32.mrb[67].mxu0  ;;  %v4399_v53 = vpop.f32.mrb[67].mxu1 }
 0x17d   :  { %v4401_v35 = vpop.f32.mrb[68].mxu0  ;;  %v4403_v7 = vpop.f32.mrb[68].mxu1 }
 0x17e   :  { %v4405_v43 = vpop.f32.mrb[69].mxu0  ;;  %v4407_v49 = vpop.f32.mrb[69].mxu1 }
 0x17f   :  { %v4409_v59 = vpop.f32.mrb[70].mxu0  ;;  %v4411_v47 = vpop.f32.mrb[70].mxu1 }
 0x180   :  { %v4413_v62 = vpop.f32.mrb[71].mxu0  ;;  %v4415_v6 = vpop.f32.mrb[71].mxu1 }
 0x185   :  { %v4417_v41 = vpop.f32.mrb[72].mxu0  ;;  %v4419_v58 = vpop.f32.mrb[72].mxu1 }
 0x186   :  { %v4421_v39 = vpop.f32.mrb[73].mxu0  ;;  %v4423_v52 = vpop.f32.mrb[73].mxu1 }
 0x187   :  { %v4425_v37 = vpop.f32.mrb[74].mxu0  ;;  %v4427_v50 = vpop.f32.mrb[74].mxu1 }
 0x188   :  { %v4429_v33 = vpop.f32.mrb[75].mxu0  ;;  %v4431_v48 = vpop.f32.mrb[75].mxu1 }
 0x18d   :  { %v4433_v29 = vpop.f32.mrb[76].mxu0  ;;  %v4435_v46 = vpop.f32.mrb[76].mxu1 }
 0x18e   :  { %5322 = vst [vmem:[#allocation109_spill] sm:$0xff] %v4433_v29  ;;  %5323 = vst [vmem:[#allocation110_spill] sm:$0xff] %v4435_v46  ;;  %v4437_v27 = vpop.f32.mrb[77].mxu0  ;;  %v4439_v44 = vpop.f32.mrb[77].mxu1 }
 0x18f   :  { %5324 = vst [vmem:[#allocation111_spill] sm:$0xff] %v4437_v27  ;;  %5325 = vst [vmem:[#allocation112_spill] sm:$0xff] %v4439_v44  ;;  %v4441_v25 = vpop.f32.mrb[78].mxu0  ;;  %v4443_v40 = vpop.f32.mrb[78].mxu1 }
 0x190   :  { %5326 = vst [vmem:[#allocation113_spill] sm:$0xff] %v4441_v25  ;;  %5327 = vst [vmem:[#allocation114_spill] sm:$0xff] %v4443_v40  ;;  %v4445_v21 = vpop.f32.mrb[79].mxu0  ;;  %v4447_v38 = vpop.f32.mrb[79].mxu1 }
 0x191   :  { %5328 = vst [vmem:[#allocation115_spill] sm:$0xff] %v4445_v21  ;;  %5329 = vst [vmem:[#allocation116_spill] sm:$0xff] %v4447_v38 }
 0x195   :  { %v4449_v17 = vpop.f32.mrb[80].mxu0  ;;  %v4451_v36 = vpop.f32.mrb[80].mxu1 }
 0x196   :  { %5330 = vst [vmem:[#allocation117_spill] sm:$0xff] %v4449_v17  ;;  %5331 = vst [vmem:[#allocation118_spill] sm:$0xff] %v4451_v36  ;;  %v4453_v15 = vpop.f32.mrb[81].mxu0  ;;  %v4455_v32 = vpop.f32.mrb[81].mxu1 }
 0x197   :  { %5332 = vst [vmem:[#allocation119_spill] sm:$0xff] %v4453_v15  ;;  %5333 = vst [vmem:[#allocation120_spill] sm:$0xff] %v4455_v32  ;;  %v4457_v13 = vpop.f32.mrb[82].mxu0  ;;  %v4459_v28 = vpop.f32.mrb[82].mxu1 }
 0x198   :  { %5334 = vst [vmem:[#allocation121_spill] sm:$0xff] %v4457_v13  ;;  %5335 = vst [vmem:[#allocation122_spill] sm:$0xff] %v4459_v28  ;;  %v4461_v9 = vpop.f32.mrb[83].mxu0  ;;  %v4463_v25 = vpop.f32.mrb[83].mxu1 }
 0x199   :  { %5336 = vst [vmem:[#allocation123_spill] sm:$0xff] %v4461_v9  ;;  %5337 = vst [vmem:[#allocation124_spill] sm:$0xff] %v4463_v25 }
 0x19d   :  { %v4465_v40 = vpop.f32.mrb[84].mxu0  ;;  %v4467_v21 = vpop.f32.mrb[84].mxu1 }
 0x19e   :  { %5338 = vst [vmem:[#allocation125_spill] sm:$0xff] %v4465_v40  ;;  %5339 = vst [vmem:[#allocation126_spill] sm:$0xff] %v4467_v21  ;;  %v4469_v38 = vpop.f32.mrb[85].mxu0  ;;  %v4471_v17 = vpop.f32.mrb[85].mxu1 }
 0x19f   :  { %5340 = vst [vmem:[#allocation127_spill] sm:$0xff] %v4469_v38  ;;  %5341 = vst [vmem:[#allocation128_spill] sm:$0xff] %v4471_v17  ;;  %v4473_v36 = vpop.f32.mrb[86].mxu0  ;;  %v4475_v15 = vpop.f32.mrb[86].mxu1 }
 0x1a0   :  { %5342 = vst [vmem:[#allocation129_spill] sm:$0xff] %v4473_v36  ;;  %5343 = vst [vmem:[#allocation130_spill] sm:$0xff] %v4475_v15  ;;  %v4477_v32 = vpop.f32.mrb[87].mxu0  ;;  %v4479_v13 = vpop.f32.mrb[87].mxu1 }
 0x1a1   :  { %5344 = vst [vmem:[#allocation131_spill] sm:$0xff] %v4477_v32  ;;  %5345 = vst [vmem:[#allocation132_spill] sm:$0xff] %v4479_v13 }
 0x1a5   :  { %v4481_v28 = vpop.f32.mrb[88].mxu0  ;;  %v4483_v9 = vpop.f32.mrb[88].mxu1 }
 0x1a6   :  { %5346 = vst [vmem:[#allocation133_spill] sm:$0xff] %v4481_v28  ;;  %5347 = vst [vmem:[#allocation134_spill] sm:$0xff] %v4483_v9  ;;  %v4485_v25 = vpop.f32.mrb[89].mxu0  ;;  %v4487_v40 = vpop.f32.mrb[89].mxu1 }
 0x1a7   :  { %5348 = vst [vmem:[#allocation135_spill] sm:$0xff] %v4485_v25  ;;  %5349 = vst [vmem:[#allocation136_spill] sm:$0xff] %v4487_v40  ;;  %v4489_v21 = vpop.f32.mrb[90].mxu0  ;;  %v4491_v38 = vpop.f32.mrb[90].mxu1 }
 0x1a8   :  { %5350 = vst [vmem:[#allocation137_spill] sm:$0xff] %v4489_v21  ;;  %5351 = vst [vmem:[#allocation138_spill] sm:$0xff] %v4491_v38  ;;  %v4493_v17 = vpop.f32.mrb[91].mxu0  ;;  %v4495_v36 = vpop.f32.mrb[91].mxu1 }
 0x1a9   :  { %5352 = vst [vmem:[#allocation139_spill] sm:$0xff] %v4493_v17  ;;  %5353 = vst [vmem:[#allocation140_spill] sm:$0xff] %v4495_v36 }
 0x1ad   :  { %v4497_v15 = vpop.f32.mrb[92].mxu0  ;;  %v4499_v32 = vpop.f32.mrb[92].mxu1 }
 0x1ae   :  { %5354 = vst [vmem:[#allocation141_spill] sm:$0xff] %v4497_v15  ;;  %5355 = vst [vmem:[#allocation142_spill] sm:$0xff] %v4499_v32  ;;  %v4501_v13 = vpop.f32.mrb[93].mxu0  ;;  %v4503_v28 = vpop.f32.mrb[93].mxu1 }
 0x1af   :  { %5356 = vst [vmem:[#allocation143_spill] sm:$0xff] %v4501_v13  ;;  %5357 = vst [vmem:[#allocation144_spill] sm:$0xff] %v4503_v28  ;;  %v4505_v9 = vpop.f32.mrb[94].mxu0  ;;  %v4507_v25 = vpop.f32.mrb[94].mxu1  ;;  %v4518_v28 = vld [vmem:[%s5096_s2] ss:$0 sm:$0xff]  ;;  %v5362_v13 = vmax.f32 %v3947_v54, %v4129_v11 }
 0x1b0   :  { %5358 = vst [vmem:[#allocation145_spill] sm:$0xff] %v4505_v9  ;;  %5359 = vst [vmem:[#allocation146_spill] sm:$0xff] %v4507_v25  ;;  %v4509_v40 = vpop.f32.mrb[95].mxu0  ;;  %v4511_v21 = vpop.f32.mrb[95].mxu1  ;;  %v5372_v11 = vld [vmem:[#allocation57_spill] sm:$0xff] }
 0x1b1   :  { %5360 = vst [vmem:[#allocation147_spill] sm:$0xff] %v4509_v40  ;;  %5361 = vst [vmem:[#allocation148_spill] sm:$0xff] %v4511_v21 }
 0x1b5   :  { %v3263_v38 = vpop.f32.mrb[96].mxu0  ;;  %v3391_v17 = vpop.f32.mrb[96].mxu1 }
 0x1b6   :  { %v2226_v36 = vmax.f32 %v4385_v45, %v3263_v38  ;;  %v2258_v15 = vmax.f32 %v4387_v51, %v3391_v17  ;;  %v1521_v26 = vpop.f32.mrb[97].mxu0  ;;  %v2033_v32 = vpop.f32.mrb[97].mxu1  ;;  %v5363_v45 = vld [vmem:[#allocation2_spill] sm:$0xff]  ;;  %v5364_v17 = vld [vmem:[#allocation55_spill] sm:$0xff] }
 0x1b7   :  { %v2224_v25 = vmax.f32 %v4389_v10, %v1521_v26  ;;  %v2256_v40 = vmax.f32 %v4391_v22, %v2033_v32  ;;  %v3264_v9 = vpop.f32.mrb[98].mxu0  ;;  %v3392_v21 = vpop.f32.mrb[98].mxu1  ;;  %v5365_v51 = vmax.f32 %v5363_v45, %v5364_v17  ;;  %v5366_v26 = vmax.f32 %v3951_v56, %v4137_v23  ;;  %v5367_v10 = vld [vmem:[#allocation3_spill] sm:$0xff]  ;;  %v5368_v22 = vld [vmem:[#allocation56_spill] sm:$0xff] }
 0x1b8   :  { %v2290_v38 = vmax.f32 %v5362_v13, %v2226_v36  ;;  %v2227_v27 = vmax.f32 %v4393_v63, %v3264_v9  ;;  %v2259_v46 = vmax.f32 %v4395_v30, %v3392_v21  ;;  %v1524_v29 = vpop.f32.mrb[99].mxu0  ;;  %v2036_v5 = vpop.f32.mrb[99].mxu1  ;;  %v5369_v24 = vmax.f32 %v5367_v10, %v5368_v22  ;;  %v5371_v63 = vld [vmem:[#allocation4_spill] sm:$0xff] }
 0x1b9   :  { %v2322_v44 = vmax.f32 %v5365_v51, %v2258_v15  ;;  %v2288_v32 = vmax.f32 %v5366_v26, %v2224_v25  ;;  %v2225_v54 = vmax.f32 %v4397_v19, %v1524_v29  ;;  %v2257_v13 = vmax.f32 %v4399_v53, %v2036_v5  ;;  %v5376_v53 = vld [vmem:[#allocation58_spill] sm:$0xff] }
 0x1ba   :  { %v2320_v3 = vmax.f32 %v5369_v24, %v2256_v40  ;;  %v2361_v15 = vadd.f32 %v4518_v28, %v2290_v38  ;;  %v5370_v21 = vmax.f32 %v3961_v60, %v4145_v42  ;;  %v5373_v56 = vmax.f32 %v5371_v63, %v5372_v11  ;;  %v5375_v40 = vld [vmem:[#allocation5_spill] sm:$0xff]  ;;  %v5379_v63 = vld [vmem:[#allocation6_spill] sm:$0xff] }
 0x1bb   :  { %v2393_v9 = vadd.f32 %v4518_v28, %v2322_v44  ;;  %v2359_v23 = vadd.f32 %v4518_v28, %v2288_v32  ;;  %v5374_v29 = vmax.f32 %v3971_v0, %v4153_v18  ;;  %v5377_v19 = vmax.f32 %v5375_v40, %v5376_v53 }
 0x1bc   :  { %v2291_v36 = vmax.f32 %v5370_v21, %v2227_v27  ;;  %v2323_v25 = vmax.f32 %v5373_v56, %v2259_v46  ;;  %v2391_v24 = vadd.f32 %v4518_v28, %v2320_v3  ;;  %v2951_v30 = vpack.c.bf16 %v2361_v15, %v2361_v15 }
 0x1bd   :  { %v2289_v5 = vmax.f32 %v5374_v29, %v2225_v54  ;;  %v2321_v44 = vmax.f32 %v5377_v19, %v2257_v13  ;;  %v2983_v38 = vpack.c.bf16 %v2393_v9, %v2393_v9  ;;  %v2949_v42 = vpack.c.bf16 %v2359_v23, %v2359_v23  ;;  %v3267_v17 = vpop.f32.mrb[100].mxu0  ;;  %v3395_v51 = vpop.f32.mrb[100].mxu1  ;;  %v5383_v29 = vld [vmem:[#allocation7_spill] sm:$0xff] }
 0x1be   :  { %v2362_v60 = vadd.f32 %v4518_v28, %v2291_v36  ;;  %v2394_v27 = vadd.f32 %v4518_v28, %v2323_v25  ;;  %v2981_v46 = vpack.c.bf16 %v2391_v24, %v2391_v24  ;;  %2682 = vst.msk [vmem:[%s5097_s3 + $0x8] sm:$0xf] %vm2679_vm0, %v2951_v30  ;;  %v2230_v26 = vmax.f32 %v4401_v35, %v3267_v17  ;;  %v1537_v10 = vpop.f32.mrb[101].mxu0  ;;  %v2049_v22 = vpop.f32.mrb[101].mxu1 }
 0x1bf   :  { %v2360_v45 = vadd.f32 %v4518_v28, %v2289_v5  ;;  %v2392_v3 = vadd.f32 %v4518_v28, %v2321_v44  ;;  %2714 = vst.msk [vmem:[%s5097_s3 + $0x88] sm:$0xf] %vm2679_vm0, %v2983_v38  ;;  %v2262_v32 = vmax.f32 %v4403_v7, %v3395_v51  ;;  %2680 = vst.msk [vmem:[%s5097_s3] sm:$0xf] %vm2679_vm0, %v2949_v42  ;;  %v3268_v9 = vpop.f32.mrb[102].mxu0  ;;  %v3396_v7 = vpop.f32.mrb[102].mxu1 }
 0x1c0   :  { %v2952_v0 = vpack.c.bf16 %v2362_v60, %v2362_v60  ;;  %v2984_v18 = vpack.c.bf16 %v2394_v27, %v2394_v27  ;;  %2712 = vst.msk [vmem:[%s5097_s3 + $0x80] sm:$0xf] %vm2679_vm0, %v2981_v46  ;;  %v2228_v15 = vmax.f32 %v4405_v43, %v1537_v10  ;;  %v2260_v35 = vmax.f32 %v4407_v49, %v2049_v22  ;;  %v5380_v43 = vld [vmem:[#allocation59_spill] sm:$0xff]  ;;  %v1540_v23 = vpop.f32.mrb[103].mxu0  ;;  %v2052_v24 = vpop.f32.mrb[103].mxu1  ;;  %v5387_v60 = vld [vmem:[#allocation8_spill] sm:$0xff] }
 0x1c1   :  { %v2950_v54 = vpack.c.bf16 %v2360_v45, %v2360_v45  ;;  %v2982_v13 = vpack.c.bf16 %v2392_v3, %v2392_v3  ;;  %v5378_v21 = vmax.f32 %v3975_v2, %v4161_v31  ;;  %v5381_v11 = vmax.f32 %v5379_v63, %v5380_v43  ;;  %v5388_v27 = vld [vmem:[#allocation61_spill] sm:$0xff]  ;;  %v5392_v3 = vld [vmem:[#allocation62_spill] sm:$0xff] }
 0x1c2   :  { %2683 = vst.msk [vmem:[%s5097_s3 + $0xc] sm:$0xf] %vm2679_vm0, %v2952_v0  ;;  %2715 = vst.msk [vmem:[%s5097_s3 + $0x8c] sm:$0xf] %vm2679_vm0, %v2984_v18  ;;  %v2231_v56 = vmax.f32 %v4409_v59, %v3268_v9  ;;  %v2263_v25 = vmax.f32 %v4411_v47, %v3396_v7  ;;  %v5382_v2 = vmax.f32 %v3979_v4, %v4169_v34  ;;  %v5384_v59 = vld [vmem:[#allocation60_spill] sm:$0xff]  ;;  %v5391_v45 = vld [vmem:[#allocation9_spill] sm:$0xff] }
 0x1c3   :  { %v2294_v36 = vmax.f32 %v5378_v21, %v2230_v26  ;;  %v2326_v49 = vmax.f32 %v5381_v11, %v2262_v32  ;;  %2681 = vst.msk [vmem:[%s5097_s3 + $0x4] sm:$0xf] %vm2679_vm0, %v2950_v54  ;;  %2713 = vst.msk [vmem:[%s5097_s3 + $0x84] sm:$0xf] %vm2679_vm0, %v2982_v13  ;;  %v5385_v5 = vmax.f32 %v5383_v29, %v5384_v59  ;;  %v5399_v29 = vld [vmem:[#allocation11_spill] sm:$0xff] }
 0x1c4   :  { %v2292_v31 = vmax.f32 %v5382_v2, %v2228_v15  ;;  %v2229_v40 = vmax.f32 %v4413_v62, %v1540_v23  ;;  %v2261_v53 = vmax.f32 %v4415_v6, %v2052_v24  ;;  %v5386_v30 = vmax.f32 %v3989_v8, %v4177_v55 }
 0x1c5   :  { %v2324_v47 = vmax.f32 %v5385_v5, %v2260_v35  ;;  %v2365_v19 = vadd.f32 %v4518_v28, %v2294_v36  ;;  %v2397_v44 = vadd.f32 %v4518_v28, %v2326_v49  ;;  %v5389_v4 = vmax.f32 %v5387_v60, %v5388_v27  ;;  %v3271_v54 = vpop.f32.mrb[104].mxu0  ;;  %v3399_v13 = vpop.f32.mrb[104].mxu1  ;;  %v5405_v60 = vld [vmem:[#allocation66_spill] sm:$0xff] }
 0x1c6   :  { %v2295_v38 = vmax.f32 %v5386_v30, %v2231_v56  ;;  %v2363_v42 = vadd.f32 %v4518_v28, %v2292_v31  ;;  %v5390_v62 = vmax.f32 %v3999_v12, %v4185_v57  ;;  %v5393_v17 = vmax.f32 %v5391_v45, %v5392_v3  ;;  %v1553_v9 = vpop.f32.mrb[105].mxu0  ;;  %v2065_v7 = vpop.f32.mrb[105].mxu1  ;;  %v5395_v56 = vld [vmem:[#allocation10_spill] sm:$0xff] }
 0x1c7   :  { %v2327_v34 = vmax.f32 %v5389_v4, %v2263_v25  ;;  %v2395_v46 = vadd.f32 %v4518_v28, %v2324_v47  ;;  %v2955_v0 = vpack.c.bf16 %v2365_v19, %v2365_v19  ;;  %v2987_v18 = vpack.c.bf16 %v2397_v44, %v2397_v44  ;;  %v3272_v43 = vpop.f32.mrb[106].mxu0  ;;  %v5402_v19 = vld [vmem:[#allocation65_spill] sm:$0xff] }
 0x1c8   :  { %v2293_v6 = vmax.f32 %v5390_v62, %v2229_v40  ;;  %v2325_v51 = vmax.f32 %v5393_v17, %v2261_v53  ;;  %v2366_v55 = vadd.f32 %v4518_v28, %v2295_v38  ;;  %v2953_v26 = vpack.c.bf16 %v2363_v42, %v2363_v42  ;;  %v1556_v2 = vpop.f32.mrb[107].mxu0  ;;  %v5404_v38 = vld [vmem:[#allocation12_spill] sm:$0xff] }
 0x1c9   :  { %v2398_v8 = vadd.f32 %v4518_v28, %v2327_v34  ;;  %v2985_v32 = vpack.c.bf16 %v2395_v46, %v2395_v46  ;;  %2686 = vst.msk [vmem:[%s5097_s3 + $0x18] sm:$0xf] %vm2679_vm0, %v2955_v0  ;;  %2718 = vst.msk [vmem:[%s5097_s3 + $0x98] sm:$0xf] %vm2679_vm0, %v2987_v18  ;;  %v2234_v15 = vmax.f32 %v4417_v41, %v3271_v54  ;;  %v5407_v34 = vld [vmem:[#allocation13_spill] sm:$0xff]  ;;  %v5410_v46 = vld [vmem:[#allocation14_spill] sm:$0xff] }
 0x1ca   :  { %v2364_v10 = vadd.f32 %v4518_v28, %v2293_v6  ;;  %v2396_v22 = vadd.f32 %v4518_v28, %v2325_v51  ;;  %v2956_v57 = vpack.c.bf16 %v2366_v55, %v2366_v55  ;;  %v2266_v35 = vmax.f32 %v4419_v58, %v3399_v13  ;;  %2684 = vst.msk [vmem:[%s5097_s3 + $0x10] sm:$0xf] %vm2679_vm0, %v2953_v26  ;;  %v3400_v58 = vpop.f32.mrb[106].mxu1  ;;  %v5411_v62 = vld [vmem:[#allocation68_spill] sm:$0xff]  ;;  %v5413_v54 = vld [vmem:[#allocation109_spill] sm:$0xff] }
 0x1cb   :  { %v2988_v12 = vpack.c.bf16 %v2398_v8, %v2398_v8  ;;  %2716 = vst.msk [vmem:[%s5097_s3 + $0x90] sm:$0xf] %vm2679_vm0, %v2985_v32  ;;  %v2232_v63 = vmax.f32 %v4421_v39, %v1553_v9  ;;  %v2264_v41 = vmax.f32 %v4423_v52, %v2065_v7  ;;  %v5394_v11 = vmax.f32 %v4003_v14, %v4193_v61  ;;  %v5396_v39 = vld [vmem:[#allocation63_spill] sm:$0xff]  ;;  %v2068_v31 = vpop.f32.mrb[107].mxu1 }
 0x1cc   :  { %v2954_v21 = vpack.c.bf16 %v2364_v10, %v2364_v10  ;;  %v2986_v36 = vpack.c.bf16 %v2396_v22, %v2396_v22  ;;  %2687 = vst.msk [vmem:[%s5097_s3 + $0x1c] sm:$0xf] %vm2679_vm0, %v2956_v57  ;;  %v5397_v25 = vmax.f32 %v5395_v56, %v5396_v39  ;;  %v2235_v23 = vmax.f32 %v4425_v37, %v3272_v43  ;;  %v5400_v37 = vld [vmem:[#allocation64_spill] sm:$0xff]  ;;  %v5414_v57 = vld [vmem:[#allocation110_spill] sm:$0xff] }
 0x1cd   :  { %2719 = vst.msk [vmem:[%s5097_s3 + $0x9c] sm:$0xf] %vm2679_vm0, %v2988_v12  ;;  %v2298_v49 = vmax.f32 %v5394_v11, %v2234_v15  ;;  %v2267_v24 = vmax.f32 %v4427_v50, %v3400_v58  ;;  %v5398_v61 = vmax.f32 %v4007_v16, %v4201_v1  ;;  %v5401_v59 = vmax.f32 %v5399_v29, %v5400_v37  ;;  %v3275_v26 = vpop.f32.mrb[108].mxu0  ;;  %v3403_v32 = vpop.f32.mrb[108].mxu1  ;;  %v5417_v11 = vld [vmem:[#allocation15_spill] sm:$0xff] }
 0x1ce   :  { %v2330_v52 = vmax.f32 %v5397_v25, %v2266_v35  ;;  %2685 = vst.msk [vmem:[%s5097_s3 + $0x14] sm:$0xf] %vm2679_vm0, %v2954_v21  ;;  %2717 = vst.msk [vmem:[%s5097_s3 + $0x94] sm:$0xf] %vm2679_vm0, %v2986_v36  ;;  %v2233_v5 = vmax.f32 %v4429_v33, %v1556_v2  ;;  %v2265_v47 = vmax.f32 %v4431_v48, %v2068_v31  ;;  %v5408_v33 = vld [vmem:[#allocation67_spill] sm:$0xff]  ;;  %v1569_v15 = vpop.f32.mrb[109].mxu0 }
 0x1cf   :  { %v2296_v14 = vmax.f32 %v5398_v61, %v2232_v63  ;;  %v2328_v50 = vmax.f32 %v5401_v59, %v2264_v41  ;;  %v2369_v40 = vadd.f32 %v4518_v28, %v2298_v49  ;;  %v5403_v44 = vmax.f32 %v4017_v20, %v5402_v19  ;;  %v2081_v35 = vpop.f32.mrb[109].mxu1  ;;  %v5415_v21 = vld [vmem:[#allocation111_spill] sm:$0xff]  ;;  %v5416_v63 = vld [vmem:[#allocation112_spill] sm:$0xff]  ;;  %v3276_v43 = vpop.f32.mrb[110].mxu0  ;;  %v5418_v49 = vld [vmem:[#allocation69_spill] sm:$0xff] }
 0x1d0   :  { %v2401_v53 = vadd.f32 %v4518_v28, %v2330_v52  ;;  %v5406_v1 = vmax.f32 %v5404_v38, %v5405_v60  ;;  %v5409_v42 = vmax.f32 %v5407_v34, %v5408_v33  ;;  %v5412_v6 = vmax.f32 %v5410_v46, %v5411_v62  ;;  %v3404_v58 = vpop.f32.mrb[110].mxu1  ;;  %v5420_v25 = vld [vmem:[#allocation16_spill] sm:$0xff]  ;;  %v5421_v52 = vld [vmem:[#allocation70_spill] sm:$0xff]  ;;  %v5423_v2 = vld [vmem:[#allocation113_spill] sm:$0xff]  ;;  %v1572_v29 = vpop.f32.mrb[111].mxu0 }
 0x1d1   :  { %v2299_v30 = vmax.f32 %v5403_v44, %v2235_v23  ;;  %v2367_v27 = vadd.f32 %v4518_v28, %v2296_v14  ;;  %v2399_v4 = vadd.f32 %v4518_v28, %v2328_v50  ;;  %v2959_v3 = vpack.c.bf16 %v2369_v40, %v2369_v40  ;;  %v5424_v61 = vld [vmem:[#allocation114_spill] sm:$0xff]  ;;  %v2084_v37 = vpop.f32.mrb[111].mxu1  ;;  %v5425_v59 = vld [vmem:[#allocation17_spill] sm:$0xff]  ;;  %v5426_v50 = vld [vmem:[#allocation71_spill] sm:$0xff] }
 0x1d2   :  { %v2331_v16 = vmax.f32 %v5406_v1, %v2267_v24  ;;  %v2297_v48 = vmax.f32 %v5409_v42, %v2233_v5  ;;  %v2329_v45 = vmax.f32 %v5412_v6, %v2265_v47  ;;  %v2991_v17 = vpack.c.bf16 %v2401_v53, %v2401_v53  ;;  %v5428_v40 = vld [vmem:[#allocation18_spill] sm:$0xff]  ;;  %v5429_v53 = vld [vmem:[#allocation72_spill] sm:$0xff]  ;;  %v5434_v34 = vld [vmem:[#allocation73_spill] sm:$0xff] }
 0x1d3   :  { %v2370_v20 = vadd.f32 %v4518_v28, %v2299_v30  ;;  %v2957_v0 = vpack.c.bf16 %v2367_v27, %v2367_v27  ;;  %v2989_v18 = vpack.c.bf16 %v2399_v4, %v2399_v4  ;;  %2690 = vst.msk [vmem:[%s5097_s3 + $0x28] sm:$0xf] %vm2679_vm0, %v2959_v3  ;;  %v2238_v13 = vmax.f32 %v5413_v54, %v3275_v26  ;;  %v5431_v30 = vld [vmem:[#allocation115_spill] sm:$0xff]  ;;  %v5432_v60 = vld [vmem:[#allocation116_spill] sm:$0xff]  ;;  %v5437_v46 = vld [vmem:[#allocation74_spill] sm:$0xff] }
 0x1d4   :  { %v2402_v51 = vadd.f32 %v4518_v28, %v2331_v16  ;;  %v2368_v55 = vadd.f32 %v4518_v28, %v2297_v48  ;;  %v2400_v8 = vadd.f32 %v4518_v28, %v2329_v45  ;;  %2722 = vst.msk [vmem:[%s5097_s3 + $0xa8] sm:$0xf] %vm2679_vm0, %v2991_v17  ;;  %v2270_v12 = vmax.f32 %v5414_v57, %v3403_v32  ;;  %v5433_v4 = vld [vmem:[#allocation19_spill] sm:$0xff]  ;;  %v5436_v48 = vld [vmem:[#allocation20_spill] sm:$0xff]  ;;  %v5439_v17 = vld [vmem:[#allocation21_spill] sm:$0xff] }
 0x1d5   :  { %v2960_v10 = vpack.c.bf16 %v2370_v20, %v2370_v20  ;;  %2688 = vst.msk [vmem:[%s5097_s3 + $0x20] sm:$0xf] %vm2679_vm0, %v2957_v0  ;;  %2720 = vst.msk [vmem:[%s5097_s3 + $0xa0] sm:$0xf] %vm2679_vm0, %v2989_v18  ;;  %v2236_v36 = vmax.f32 %v5415_v21, %v1569_v15  ;;  %v2268_v41 = vmax.f32 %v5416_v63, %v2081_v35  ;;  %v5440_v20 = vld [vmem:[#allocation75_spill] sm:$0xff]  ;;  %v5442_v18 = vld [vmem:[#allocation22_spill] sm:$0xff] }
 0x1d6   :  { %v2992_v22 = vpack.c.bf16 %v2402_v51, %v2402_v51  ;;  %v2958_v9 = vpack.c.bf16 %v2368_v55, %v2368_v55  ;;  %v2990_v7 = vpack.c.bf16 %v2400_v8, %v2400_v8  ;;  %v5419_v56 = vmax.f32 %v5417_v11, %v5418_v49  ;;  %v5443_v55 = vld [vmem:[#allocation76_spill] sm:$0xff]  ;;  %v3279_v35 = vpop.f32.mrb[112].mxu0 }
 0x1d7   :  { %2691 = vst.msk [vmem:[%s5097_s3 + $0x2c] sm:$0xf] %vm2679_vm0, %v2960_v10  ;;  %v5422_v23 = vmax.f32 %v5420_v25, %v5421_v52  ;;  %v2239_v31 = vmax.f32 %v5423_v2, %v3276_v43  ;;  %v2271_v14 = vmax.f32 %v5424_v61, %v3404_v58  ;;  %v5427_v5 = vmax.f32 %v5425_v59, %v5426_v50  ;;  %v1585_v58 = vpop.f32.mrb[113].mxu0  ;;  %v5448_v52 = vld [vmem:[#allocation120_spill] sm:$0xff]  ;;  %v5450_v61 = vld [vmem:[#allocation77_spill] sm:$0xff]  ;;  %v5453_v59 = vld [vmem:[#allocation78_spill] sm:$0xff] }
 0x1d8   :  { %2723 = vst.msk [vmem:[%s5097_s3 + $0xac] sm:$0xf] %vm2679_vm0, %v2992_v22  ;;  %v2302_v39 = vmax.f32 %v5419_v56, %v2238_v13  ;;  %2689 = vst.msk [vmem:[%s5097_s3 + $0x24] sm:$0xf] %vm2679_vm0, %v2958_v9  ;;  %v5430_v19 = vmax.f32 %v5428_v40, %v5429_v53  ;;  %v2237_v38 = vmax.f32 %v5431_v30, %v1572_v29  ;;  %v3407_v9 = vpop.f32.mrb[112].mxu1  ;;  %v5456_v53 = vld [vmem:[#allocation122_spill] sm:$0xff] }
 0x1d9   :  { %v2334_v24 = vmax.f32 %v5422_v23, %v2270_v12  ;;  %2721 = vst.msk [vmem:[%s5097_s3 + $0xa4] sm:$0xf] %vm2679_vm0, %v2990_v7  ;;  %v2300_v47 = vmax.f32 %v5427_v5, %v2236_v36  ;;  %v2269_v1 = vmax.f32 %v5432_v60, %v2084_v37  ;;  %v5435_v33 = vmax.f32 %v5433_v4, %v5434_v34  ;;  %v5445_v36 = vld [vmem:[#allocation117_spill] sm:$0xff]  ;;  %v2097_v11 = vpop.f32.mrb[113].mxu1  ;;  %v5452_v37 = vld [vmem:[#allocation24_spill] sm:$0xff]  ;;  %v5458_v60 = vld [vmem:[#allocation79_spill] sm:$0xff] }
 0x1da   :  { %v2332_v44 = vmax.f32 %v5430_v19, %v2268_v41  ;;  %v2373_v16 = vadd.f32 %v4518_v28, %v2302_v39  ;;  %v5438_v62 = vmax.f32 %v5436_v48, %v5437_v46  ;;  %v5441_v51 = vmax.f32 %v5439_v17, %v5440_v20  ;;  %v5446_v41 = vld [vmem:[#allocation118_spill] sm:$0xff]  ;;  %v5447_v39 = vld [vmem:[#allocation119_spill] sm:$0xff]  ;;  %v3408_v2 = vpop.f32.mrb[114].mxu1  ;;  %v5461_v4 = vld [vmem:[#allocation80_spill] sm:$0xff] }
 0x1db   :  { %v2405_v27 = vadd.f32 %v4518_v28, %v2334_v24  ;;  %v2303_v42 = vmax.f32 %v5435_v33, %v2239_v31  ;;  %v2371_v45 = vadd.f32 %v4518_v28, %v2300_v47  ;;  %v5444_v8 = vmax.f32 %v5442_v18, %v5443_v55  ;;  %v3280_v24 = vpop.f32.mrb[114].mxu0  ;;  %v5449_v31 = vld [vmem:[#allocation23_spill] sm:$0xff]  ;;  %v5455_v47 = vld [vmem:[#allocation121_spill] sm:$0xff]  ;;  %v2100_v30 = vpop.f32.mrb[115].mxu1  ;;  %v5464_v46 = vld [vmem:[#allocation124_spill] sm:$0xff] }
 0x1dc   :  { %v2335_v6 = vmax.f32 %v5438_v62, %v2271_v14  ;;  %v2403_v3 = vadd.f32 %v4518_v28, %v2332_v44  ;;  %v2301_v0 = vmax.f32 %v5441_v51, %v2237_v38  ;;  %v2963_v32 = vpack.c.bf16 %v2373_v16, %v2373_v16  ;;  %v1588_v44 = vpop.f32.mrb[115].mxu0  ;;  %v5457_v38 = vld [vmem:[#allocation25_spill] sm:$0xff]  ;;  %v5469_v18 = vld [vmem:[#allocation82_spill] sm:$0xff] }
 0x1dd   :  { %v2333_v26 = vmax.f32 %v5444_v8, %v2269_v1  ;;  %v2995_v10 = vpack.c.bf16 %v2405_v27, %v2405_v27  ;;  %v2374_v22 = vadd.f32 %v4518_v28, %v2303_v42  ;;  %v2961_v13 = vpack.c.bf16 %v2371_v45, %v2371_v45  ;;  %v5460_v27 = vld [vmem:[#allocation26_spill] sm:$0xff]  ;;  %v5463_v42 = vld [vmem:[#allocation123_spill] sm:$0xff]  ;;  %v5466_v17 = vld [vmem:[#allocation81_spill] sm:$0xff] }
 0x1de   :  { %v2406_v54 = vadd.f32 %v4518_v28, %v2335_v6  ;;  %v2993_v57 = vpack.c.bf16 %v2403_v3, %v2403_v3  ;;  %v2372_v12 = vadd.f32 %v4518_v28, %v2301_v0  ;;  %2694 = vst.msk [vmem:[%s5097_s3 + $0x38] sm:$0xf] %vm2679_vm0, %v2963_v32  ;;  %v2242_v63 = vmax.f32 %v5445_v36, %v3279_v35  ;;  %v5465_v3 = vld [vmem:[#allocation27_spill] sm:$0xff]  ;;  %v5468_v0 = vld [vmem:[#allocation28_spill] sm:$0xff] }
 0x1df   :  { %v2404_v15 = vadd.f32 %v4518_v28, %v2333_v26  ;;  %2726 = vst.msk [vmem:[%s5097_s3 + $0xb8] sm:$0xf] %vm2679_vm0, %v2995_v10  ;;  %v2964_v7 = vpack.c.bf16 %v2374_v22, %v2374_v22  ;;  %v2274_v43 = vmax.f32 %v5446_v41, %v3407_v9  ;;  %2692 = vst.msk [vmem:[%s5097_s3 + $0x30] sm:$0xf] %vm2679_vm0, %v2961_v13  ;;  %v5471_v10 = vld [vmem:[#allocation29_spill] sm:$0xff]  ;;  %v5472_v22 = vld [vmem:[#allocation83_spill] sm:$0xff] }
 0x1e0   :  { %v2996_v21 = vpack.c.bf16 %v2406_v54, %v2406_v54  ;;  %2724 = vst.msk [vmem:[%s5097_s3 + $0xb0] sm:$0xf] %vm2679_vm0, %v2993_v57  ;;  %v2962_v49 = vpack.c.bf16 %v2372_v12, %v2372_v12  ;;  %v2240_v25 = vmax.f32 %v5447_v39, %v1585_v58  ;;  %v2272_v23 = vmax.f32 %v5448_v52, %v2097_v11  ;;  %v5474_v57 = vld [vmem:[#allocation30_spill] sm:$0xff]  ;;  %v5475_v12 = vld [vmem:[#allocation84_spill] sm:$0xff]  ;;  %v3283_v11 = vpop.f32.mrb[116].mxu0 }
 0x1e1   :  { %v2994_v56 = vpack.c.bf16 %v2404_v15, %v2404_v15  ;;  %2695 = vst.msk [vmem:[%s5097_s3 + $0x3c] sm:$0xf] %vm2679_vm0, %v2964_v7  ;;  %v5451_v14 = vmax.f32 %v5449_v31, %v5450_v61  ;;  %v5454_v50 = vmax.f32 %v5452_v37, %v5453_v59  ;;  %v2243_v40 = vmax.f32 %v5455_v47, %v3280_v24  ;;  %v5480_v59 = vld [vmem:[#allocation128_spill] sm:$0xff] }
 0x1e2   :  { %2727 = vst.msk [vmem:[%s5097_s3 + $0xbc] sm:$0xf] %vm2679_vm0, %v2996_v21  ;;  %v2275_v19 = vmax.f32 %v5456_v53, %v3408_v2  ;;  %2693 = vst.msk [vmem:[%s5097_s3 + $0x34] sm:$0xf] %vm2679_vm0, %v2962_v49  ;;  %v5459_v1 = vmax.f32 %v5457_v38, %v5458_v60  ;;  %v5462_v34 = vmax.f32 %v5460_v27, %v5461_v4  ;;  %v3411_v49 = vpop.f32.mrb[116].mxu1  ;;  %v1601_v2 = vpop.f32.mrb[117].mxu0 }
 0x1e3   :  { %v2306_v29 = vmax.f32 %v5451_v14, %v2242_v63  ;;  %v2338_v5 = vmax.f32 %v5454_v50, %v2274_v43  ;;  %2725 = vst.msk [vmem:[%s5097_s3 + $0xb4] sm:$0xf] %vm2679_vm0, %v2994_v56  ;;  %v2241_v48 = vmax.f32 %v5463_v42, %v1588_v44  ;;  %v2273_v62 = vmax.f32 %v5464_v46, %v2100_v30  ;;  %v2113_v31 = vpop.f32.mrb[117].mxu1  ;;  %v5482_v53 = vld [vmem:[#allocation85_spill] sm:$0xff]  ;;  %v5484_v30 = vld [vmem:[#allocation32_spill] sm:$0xff]  ;;  %v5485_v38 = vld [vmem:[#allocation86_spill] sm:$0xff] }
 0x1e4   :  { %v2304_v16 = vmax.f32 %v5459_v1, %v2240_v25  ;;  %v2336_v33 = vmax.f32 %v5462_v34, %v2272_v23  ;;  %v5467_v20 = vmax.f32 %v5465_v3, %v5466_v17  ;;  %v5470_v55 = vmax.f32 %v5468_v0, %v5469_v18  ;;  %v5477_v25 = vld [vmem:[#allocation125_spill] sm:$0xff]  ;;  %v5478_v23 = vld [vmem:[#allocation126_spill] sm:$0xff]  ;;  %v3412_v47 = vpop.f32.mrb[118].mxu1  ;;  %v5490_v46 = vld [vmem:[#allocation87_spill] sm:$0xff] }
 0x1e5   :  { %v2377_v6 = vadd.f32 %v4518_v28, %v2306_v29  ;;  %v2409_v45 = vadd.f32 %v4518_v28, %v2338_v5  ;;  %v5473_v54 = vmax.f32 %v5471_v10, %v5472_v22  ;;  %v5476_v15 = vmax.f32 %v5474_v57, %v5475_v12  ;;  %v5479_v29 = vld [vmem:[#allocation127_spill] sm:$0xff]  ;;  %v3284_v5 = vpop.f32.mrb[118].mxu0  ;;  %v5488_v4 = vld [vmem:[#allocation130_spill] sm:$0xff]  ;;  %v2116_v42 = vpop.f32.mrb[119].mxu1  ;;  %v5493_v3 = vld [vmem:[#allocation88_spill] sm:$0xff] }
 0x1e6   :  { %v2307_v51 = vmax.f32 %v5467_v20, %v2243_v40  ;;  %v2339_v8 = vmax.f32 %v5470_v55, %v2275_v19  ;;  %v2375_v26 = vadd.f32 %v4518_v28, %v2304_v16  ;;  %v2407_v32 = vadd.f32 %v4518_v28, %v2336_v33  ;;  %v5481_v40 = vld [vmem:[#allocation31_spill] sm:$0xff]  ;;  %v5487_v16 = vld [vmem:[#allocation129_spill] sm:$0xff]  ;;  %v1604_v33 = vpop.f32.mrb[119].mxu0  ;;  %v5496_v18 = vld [vmem:[#allocation132_spill] sm:$0xff] }
 0x1e7   :  { %v2305_v13 = vmax.f32 %v5473_v54, %v2241_v48  ;;  %v2337_v35 = vmax.f32 %v5476_v15, %v2273_v62  ;;  %v2967_v9 = vpack.c.bf16 %v2377_v6, %v2377_v6  ;;  %v2999_v7 = vpack.c.bf16 %v2409_v45, %v2409_v45  ;;  %v5489_v48 = vld [vmem:[#allocation33_spill] sm:$0xff]  ;;  %v5492_v45 = vld [vmem:[#allocation34_spill] sm:$0xff] }
 0x1e8   :  { %v2378_v21 = vadd.f32 %v4518_v28, %v2307_v51  ;;  %v2410_v36 = vadd.f32 %v4518_v28, %v2339_v8  ;;  %v2965_v63 = vpack.c.bf16 %v2375_v26, %v2375_v26  ;;  %v2997_v41 = vpack.c.bf16 %v2407_v32, %v2407_v32  ;;  %v5495_v51 = vld [vmem:[#allocation131_spill] sm:$0xff]  ;;  %v5498_v10 = vld [vmem:[#allocation89_spill] sm:$0xff]  ;;  %v5501_v57 = vld [vmem:[#allocation90_spill] sm:$0xff] }
 0x1e9   :  { %v2376_v43 = vadd.f32 %v4518_v28, %v2305_v13  ;;  %v2408_v58 = vadd.f32 %v4518_v28, %v2337_v35  ;;  %2698 = vst.msk [vmem:[%s5097_s3 + $0x48] sm:$0xf] %vm2679_vm0, %v2967_v9  ;;  %2730 = vst.msk [vmem:[%s5097_s3 + $0xc8] sm:$0xf] %vm2679_vm0, %v2999_v7  ;;  %v2246_v52 = vmax.f32 %v5477_v25, %v3283_v11  ;;  %v5497_v32 = vld [vmem:[#allocation35_spill] sm:$0xff]  ;;  %v5500_v13 = vld [vmem:[#allocation36_spill] sm:$0xff] }
 0x1ea   :  { %v2968_v56 = vpack.c.bf16 %v2378_v21, %v2378_v21  ;;  %v3000_v39 = vpack.c.bf16 %v2410_v36, %v2410_v36  ;;  %v2278_v24 = vmax.f32 %v5478_v23, %v3411_v49  ;;  %2696 = vst.msk [vmem:[%s5097_s3 + $0x40] sm:$0xf] %vm2679_vm0, %v2965_v63  ;;  %2728 = vst.msk [vmem:[%s5097_s3 + $0xc0] sm:$0xf] %vm2679_vm0, %v2997_v41  ;;  %v5503_v7 = vld [vmem:[#allocation37_spill] sm:$0xff]  ;;  %v5504_v21 = vld [vmem:[#allocation91_spill] sm:$0xff] }
 0x1eb   :  { %v2966_v61 = vpack.c.bf16 %v2376_v43, %v2376_v43  ;;  %v2998_v14 = vpack.c.bf16 %v2408_v58, %v2408_v58  ;;  %v2244_v37 = vmax.f32 %v5479_v29, %v1601_v2  ;;  %v2276_v50 = vmax.f32 %v5480_v59, %v2113_v31  ;;  %v5506_v41 = vld [vmem:[#allocation38_spill] sm:$0xff]  ;;  %v5507_v43 = vld [vmem:[#allocation92_spill] sm:$0xff]  ;;  %v3287_v31 = vpop.f32.mrb[120].mxu0 }
 0x1ec   :  { %2699 = vst.msk [vmem:[%s5097_s3 + $0x4c] sm:$0xf] %vm2679_vm0, %v2968_v56  ;;  %2731 = vst.msk [vmem:[%s5097_s3 + $0xcc] sm:$0xf] %vm2679_vm0, %v3000_v39  ;;  %v5483_v19 = vmax.f32 %v5481_v40, %v5482_v53  ;;  %v5486_v60 = vmax.f32 %v5484_v30, %v5485_v38  ;;  %v2247_v27 = vmax.f32 %v5487_v16, %v3284_v5  ;;  %v5512_v38 = vld [vmem:[#allocation136_spill] sm:$0xff] }
 0x1ed   :  { %v2279_v34 = vmax.f32 %v5488_v4, %v3412_v47  ;;  %2697 = vst.msk [vmem:[%s5097_s3 + $0x44] sm:$0xf] %vm2679_vm0, %v2966_v61  ;;  %2729 = vst.msk [vmem:[%s5097_s3 + $0xc4] sm:$0xf] %vm2679_vm0, %v2998_v14  ;;  %v5491_v62 = vmax.f32 %v5489_v48, %v5490_v46  ;;  %v5494_v17 = vmax.f32 %v5492_v45, %v5493_v3  ;;  %v3415_v61 = vpop.f32.mrb[120].mxu1  ;;  %v1617_v47 = vpop.f32.mrb[121].mxu0 }
 0x1ee   :  { %v2310_v44 = vmax.f32 %v5483_v19, %v2246_v52  ;;  %v2342_v1 = vmax.f32 %v5486_v60, %v2278_v24  ;;  %v2245_v0 = vmax.f32 %v5495_v51, %v1604_v33  ;;  %v2277_v55 = vmax.f32 %v5496_v18, %v2116_v42  ;;  %v2129_v40 = vpop.f32.mrb[121].mxu1  ;;  %v5514_v4 = vld [vmem:[#allocation93_spill] sm:$0xff]  ;;  %v5516_v42 = vld [vmem:[#allocation40_spill] sm:$0xff]  ;;  %v5517_v48 = vld [vmem:[#allocation94_spill] sm:$0xff] }
 0x1ef   :  { %v2308_v6 = vmax.f32 %v5491_v62, %v2244_v37  ;;  %v2340_v20 = vmax.f32 %v5494_v17, %v2276_v50  ;;  %v5499_v22 = vmax.f32 %v5497_v32, %v5498_v10  ;;  %v5502_v12 = vmax.f32 %v5500_v13, %v5501_v57  ;;  %v5509_v37 = vld [vmem:[#allocation133_spill] sm:$0xff]  ;;  %v5510_v50 = vld [vmem:[#allocation134_spill] sm:$0xff]  ;;  %v3416_v16 = vpop.f32.mrb[122].mxu1  ;;  %v5522_v18 = vld [vmem:[#allocation95_spill] sm:$0xff] }
 0x1f0   :  { %v2381_v8 = vadd.f32 %v4518_v28, %v2310_v44  ;;  %v2413_v26 = vadd.f32 %v4518_v28, %v2342_v1  ;;  %v5505_v36 = vmax.f32 %v5503_v7, %v5504_v21  ;;  %v5508_v58 = vmax.f32 %v5506_v41, %v5507_v43  ;;  %v5511_v44 = vld [vmem:[#allocation135_spill] sm:$0xff]  ;;  %v3288_v1 = vpop.f32.mrb[122].mxu0  ;;  %v5520_v3 = vld [vmem:[#allocation138_spill] sm:$0xff]  ;;  %v2132_v51 = vpop.f32.mrb[123].mxu1  ;;  %v5525_v32 = vld [vmem:[#allocation96_spill] sm:$0xff] }
 0x1f1   :  { %v2311_v54 = vmax.f32 %v5499_v22, %v2247_v27  ;;  %v2343_v15 = vmax.f32 %v5502_v12, %v2279_v34  ;;  %v2379_v35 = vadd.f32 %v4518_v28, %v2308_v6  ;;  %v2411_v9 = vadd.f32 %v4518_v28, %v2340_v20  ;;  %v5513_v27 = vld [vmem:[#allocation39_spill] sm:$0xff]  ;;  %v5519_v6 = vld [vmem:[#allocation137_spill] sm:$0xff]  ;;  %v1620_v20 = vpop.f32.mrb[123].mxu0  ;;  %v5528_v57 = vld [vmem:[#allocation140_spill] sm:$0xff] }
 0x1f2   :  { %v2309_v63 = vmax.f32 %v5505_v36, %v2245_v0  ;;  %v2341_v11 = vmax.f32 %v5508_v58, %v2277_v55  ;;  %v2971_v49 = vpack.c.bf16 %v2381_v8, %v2381_v8  ;;  %v3003_v56 = vpack.c.bf16 %v2413_v26, %v2413_v26  ;;  %v5521_v0 = vld [vmem:[#allocation41_spill] sm:$0xff]  ;;  %v5524_v26 = vld [vmem:[#allocation42_spill] sm:$0xff] }
 0x1f3   :  { %v2382_v39 = vadd.f32 %v4518_v28, %v2311_v54  ;;  %v2414_v25 = vadd.f32 %v4518_v28, %v2343_v15  ;;  %v2969_v52 = vpack.c.bf16 %v2379_v35, %v2379_v35  ;;  %v3001_v23 = vpack.c.bf16 %v2411_v9, %v2411_v9  ;;  %v5527_v54 = vld [vmem:[#allocation139_spill] sm:$0xff]  ;;  %v5530_v7 = vld [vmem:[#allocation97_spill] sm:$0xff]  ;;  %v5533_v41 = vld [vmem:[#allocation98_spill] sm:$0xff] }
 0x1f4   :  { %v2380_v24 = vadd.f32 %v4518_v28, %v2309_v63  ;;  %v2412_v2 = vadd.f32 %v4518_v28, %v2341_v11  ;;  %2702 = vst.msk [vmem:[%s5097_s3 + $0x58] sm:$0xf] %vm2679_vm0, %v2971_v49  ;;  %2734 = vst.msk [vmem:[%s5097_s3 + $0xd8] sm:$0xf] %vm2679_vm0, %v3003_v56  ;;  %v2250_v59 = vmax.f32 %v5509_v37, %v3287_v31  ;;  %v5529_v9 = vld [vmem:[#allocation43_spill] sm:$0xff]  ;;  %v5532_v63 = vld [vmem:[#allocation44_spill] sm:$0xff] }
 0x1f5   :  { %v2972_v14 = vpack.c.bf16 %v2382_v39, %v2382_v39  ;;  %v3004_v29 = vpack.c.bf16 %v2414_v25, %v2414_v25  ;;  %v2282_v5 = vmax.f32 %v5510_v50, %v3415_v61  ;;  %2700 = vst.msk [vmem:[%s5097_s3 + $0x50] sm:$0xf] %vm2679_vm0, %v2969_v52  ;;  %2732 = vst.msk [vmem:[%s5097_s3 + $0xd0] sm:$0xf] %vm2679_vm0, %v3001_v23  ;;  %v5535_v56 = vld [vmem:[#allocation45_spill] sm:$0xff]  ;;  %v5536_v39 = vld [vmem:[#allocation99_spill] sm:$0xff] }
 0x1f6   :  { %v2970_v53 = vpack.c.bf16 %v2380_v24, %v2380_v24  ;;  %v3002_v19 = vpack.c.bf16 %v2412_v2, %v2412_v2  ;;  %v2248_v30 = vmax.f32 %v5511_v44, %v1617_v47  ;;  %v2280_v60 = vmax.f32 %v5512_v38, %v2129_v40  ;;  %v5538_v23 = vld [vmem:[#allocation46_spill] sm:$0xff]  ;;  %v5539_v24 = vld [vmem:[#allocation100_spill] sm:$0xff]  ;;  %v3291_v40 = vpop.f32.mrb[124].mxu0 }
 0x1f7   :  { %2703 = vst.msk [vmem:[%s5097_s3 + $0x5c] sm:$0xf] %vm2679_vm0, %v2972_v14  ;;  %2735 = vst.msk [vmem:[%s5097_s3 + $0xdc] sm:$0xf] %vm2679_vm0, %v3004_v29  ;;  %v5515_v34 = vmax.f32 %v5513_v27, %v5514_v4  ;;  %v5518_v46 = vmax.f32 %v5516_v42, %v5517_v48  ;;  %v2251_v45 = vmax.f32 %v5519_v6, %v3288_v1  ;;  %v5544_v48 = vld [vmem:[#allocation144_spill] sm:$0xff] }
 0x1f8   :  { %v2283_v17 = vmax.f32 %v5520_v3, %v3416_v16  ;;  %2701 = vst.msk [vmem:[%s5097_s3 + $0x54] sm:$0xf] %vm2679_vm0, %v2970_v53  ;;  %2733 = vst.msk [vmem:[%s5097_s3 + $0xd4] sm:$0xf] %vm2679_vm0, %v3002_v19  ;;  %v5523_v55 = vmax.f32 %v5521_v0, %v5522_v18  ;;  %v5526_v10 = vmax.f32 %v5524_v26, %v5525_v32  ;;  %v3419_v53 = vpop.f32.mrb[124].mxu1  ;;  %v1633_v16 = vpop.f32.mrb[125].mxu0 }
 0x1f9   :  { %v2314_v33 = vmax.f32 %v5515_v34, %v2250_v59  ;;  %v2346_v62 = vmax.f32 %v5518_v46, %v2282_v5  ;;  %v2249_v13 = vmax.f32 %v5527_v54, %v1620_v20  ;;  %v2281_v12 = vmax.f32 %v5528_v57, %v2132_v51  ;;  %v2145_v27 = vpop.f32.mrb[125].mxu1  ;;  %v5546_v3 = vld [vmem:[#allocation101_spill] sm:$0xff]  ;;  %v5548_v51 = vld [vmem:[#allocation48_spill] sm:$0xff]  ;;  %v5549_v0 = vld [vmem:[#allocation102_spill] sm:$0xff] }
 0x1fa   :  { %v2312_v8 = vmax.f32 %v5523_v55, %v2248_v30  ;;  %v2344_v22 = vmax.f32 %v5526_v10, %v2280_v60  ;;  %v5531_v21 = vmax.f32 %v5529_v9, %v5530_v7  ;;  %v5534_v43 = vmax.f32 %v5532_v63, %v5533_v41  ;;  %v5541_v30 = vld [vmem:[#allocation141_spill] sm:$0xff]  ;;  %v5542_v60 = vld [vmem:[#allocation142_spill] sm:$0xff]  ;;  %v3420_v6 = vpop.f32.mrb[126].mxu1  ;;  %v5554_v57 = vld [vmem:[#allocation103_spill] sm:$0xff] }
 0x1fb   :  { %v2385_v15 = vadd.f32 %v4518_v28, %v2314_v33  ;;  %v2417_v35 = vadd.f32 %v4518_v28, %v2346_v62  ;;  %v5537_v25 = vmax.f32 %v5535_v56, %v5536_v39  ;;  %v5540_v2 = vmax.f32 %v5538_v23, %v5539_v24  ;;  %v5543_v33 = vld [vmem:[#allocation143_spill] sm:$0xff]  ;;  %v3292_v62 = vpop.f32.mrb[126].mxu0  ;;  %v5552_v32 = vld [vmem:[#allocation146_spill] sm:$0xff]  ;;  %v2148_v54 = vpop.f32.mrb[127].mxu1  ;;  %v5557_v9 = vld [vmem:[#allocation104_spill] sm:$0xff] }
 0x1fc   :  { %v2315_v36 = vmax.f32 %v5531_v21, %v2251_v45  ;;  %v2347_v58 = vmax.f32 %v5534_v43, %v2283_v17  ;;  %v2383_v11 = vadd.f32 %v4518_v28, %v2312_v8  ;;  %v2415_v49 = vadd.f32 %v4518_v28, %v2344_v22  ;;  %v5545_v45 = vld [vmem:[#allocation47_spill] sm:$0xff]  ;;  %v5551_v8 = vld [vmem:[#allocation145_spill] sm:$0xff]  ;;  %v1636_v22 = vpop.f32.mrb[127].mxu0  ;;  %v5560_v41 = vld [vmem:[#allocation148_spill] sm:$0xff] }
 0x1fd   :  { %v2313_v52 = vmax.f32 %v5537_v25, %v2249_v13  ;;  %v2345_v31 = vmax.f32 %v5540_v2, %v2281_v12  ;;  %v2975_v61 = vpack.c.bf16 %v2385_v15, %v2385_v15  ;;  %v3007_v14 = vpack.c.bf16 %v2417_v35, %v2417_v35  ;;  %v5553_v13 = vld [vmem:[#allocation49_spill] sm:$0xff]  ;;  %v5556_v35 = vld [vmem:[#allocation50_spill] sm:$0xff] }
 0x1fe   :  { %v2386_v29 = vadd.f32 %v4518_v28, %v2315_v36  ;;  %v2418_v37 = vadd.f32 %v4518_v28, %v2347_v58  ;;  %v2973_v59 = vpack.c.bf16 %v2383_v11, %v2383_v11  ;;  %v3005_v50 = vpack.c.bf16 %v2415_v49, %v2415_v49  ;;  %v5559_v36 = vld [vmem:[#allocation147_spill] sm:$0xff]  ;;  %v5562_v56 = vld [vmem:[#allocation105_spill] sm:$0xff]  ;;  %v5565_v23 = vld [vmem:[#allocation106_spill] sm:$0xff] }
 0x1ff   :  { %v2384_v5 = vadd.f32 %v4518_v28, %v2313_v52  ;;  %v2416_v47 = vadd.f32 %v4518_v28, %v2345_v31  ;;  %2706 = vst.msk [vmem:[%s5097_s3 + $0x68] sm:$0xf] %vm2679_vm0, %v2975_v61  ;;  %2738 = vst.msk [vmem:[%s5097_s3 + $0xe8] sm:$0xf] %vm2679_vm0, %v3007_v14  ;;  %v2254_v38 = vmax.f32 %v5541_v30, %v3291_v40  ;;  %v5561_v49 = vld [vmem:[#allocation51_spill] sm:$0xff]  ;;  %v5564_v52 = vld [vmem:[#allocation52_spill] sm:$0xff] }
 0x200   :  { %v2976_v19 = vpack.c.bf16 %v2386_v29, %v2386_v29  ;;  %v3008_v44 = vpack.c.bf16 %v2418_v37, %v2418_v37  ;;  %v2286_v1 = vmax.f32 %v5542_v60, %v3419_v53  ;;  %2704 = vst.msk [vmem:[%s5097_s3 + $0x60] sm:$0xf] %vm2679_vm0, %v2973_v59  ;;  %2736 = vst.msk [vmem:[%s5097_s3 + $0xe0] sm:$0xf] %vm2679_vm0, %v3005_v50  ;;  %v5567_v14 = vld [vmem:[#allocation53_spill] sm:$0xff]  ;;  %v5568_v29 = vld [vmem:[#allocation107_spill] sm:$0xff] }
 0x201   :  { %v2974_v4 = vpack.c.bf16 %v2384_v5, %v2384_v5  ;;  %v3006_v34 = vpack.c.bf16 %v2416_v47, %v2416_v47  ;;  %v2252_v42 = vmax.f32 %v5543_v33, %v1633_v16  ;;  %v2284_v46 = vmax.f32 %v5544_v48, %v2145_v27  ;;  %v5570_v50 = vld [vmem:[#allocation54_spill] sm:$0xff]  ;;  %v5571_v5 = vld [vmem:[#allocation108_spill] sm:$0xff] }
 0x202   :  { %2707 = vst.msk [vmem:[%s5097_s3 + $0x6c] sm:$0xf] %vm2679_vm0, %v2976_v19  ;;  %2739 = vst.msk [vmem:[%s5097_s3 + $0xec] sm:$0xf] %vm2679_vm0, %v3008_v44  ;;  %v5547_v17 = vmax.f32 %v5545_v45, %v5546_v3  ;;  %v5550_v18 = vmax.f32 %v5548_v51, %v5549_v0  ;;  %v2255_v26 = vmax.f32 %v5551_v8, %v3292_v62 }
 0x203   :  { %v2287_v10 = vmax.f32 %v5552_v32, %v3420_v6  ;;  %2705 = vst.msk [vmem:[%s5097_s3 + $0x64] sm:$0xf] %vm2679_vm0, %v2974_v4  ;;  %2737 = vst.msk [vmem:[%s5097_s3 + $0xe4] sm:$0xf] %vm2679_vm0, %v3006_v34  ;;  %v5555_v12 = vmax.f32 %v5553_v13, %v5554_v57  ;;  %v5558_v7 = vmax.f32 %v5556_v35, %v5557_v9 }
 0x204   :  { %v2318_v20 = vmax.f32 %v5547_v17, %v2254_v38  ;;  %v2350_v55 = vmax.f32 %v5550_v18, %v2286_v1  ;;  %v2253_v63 = vmax.f32 %v5559_v36, %v1636_v22  ;;  %v2285_v43 = vmax.f32 %v5560_v41, %v2148_v54 }
 0x205   :  { %v2316_v15 = vmax.f32 %v5555_v12, %v2252_v42  ;;  %v2348_v21 = vmax.f32 %v5558_v7, %v2284_v46  ;;  %v5563_v39 = vmax.f32 %v5561_v49, %v5562_v56  ;;  %v5566_v24 = vmax.f32 %v5564_v52, %v5565_v23 }
 0x206   :  { %v2389_v58 = vadd.f32 %v4518_v28, %v2318_v20  ;;  %v2421_v11 = vadd.f32 %v4518_v28, %v2350_v55  ;;  %v5569_v37 = vmax.f32 %v5567_v14, %v5568_v29  ;;  %v5572_v47 = vmax.f32 %v5570_v50, %v5571_v5 }
 0x207   :  { %v2319_v25 = vmax.f32 %v5563_v39, %v2255_v26  ;;  %v2351_v2 = vmax.f32 %v5566_v24, %v2287_v10  ;;  %v2387_v31 = vadd.f32 %v4518_v28, %v2316_v15  ;;  %v2419_v61 = vadd.f32 %v4518_v28, %v2348_v21 }
 0x208   :  { %v2317_v59 = vmax.f32 %v5569_v37, %v2253_v63  ;;  %v2349_v40 = vmax.f32 %v5572_v47, %v2285_v43  ;;  %v2979_v53 = vpack.c.bf16 %v2389_v58, %v2389_v58  ;;  %v3011_v19 = vpack.c.bf16 %v2421_v11, %v2421_v11 }
 0x209   :  { %v2390_v44 = vadd.f32 %v4518_v28, %v2319_v25  ;;  %v2422_v30 = vadd.f32 %v4518_v28, %v2351_v2  ;;  %v2977_v38 = vpack.c.bf16 %v2387_v31, %v2387_v31  ;;  %v3009_v60 = vpack.c.bf16 %v2419_v61, %v2419_v61 }
 0x20a   :  { %v2388_v1 = vadd.f32 %v4518_v28, %v2317_v59  ;;  %v2420_v16 = vadd.f32 %v4518_v28, %v2349_v40  ;;  %2710 = vst.msk [vmem:[%s5097_s3 + $0x78] sm:$0xf] %vm2679_vm0, %v2979_v53  ;;  %2742 = vst.msk [vmem:[%s5097_s3 + $0xf8] sm:$0xf] %vm2679_vm0, %v3011_v19 }
 0x20b   :  { %v2980_v27 = vpack.c.bf16 %v2390_v44, %v2390_v44  ;;  %v3012_v4 = vpack.c.bf16 %v2422_v30, %v2422_v30  ;;  %2708 = vst.msk [vmem:[%s5097_s3 + $0x70] sm:$0xf] %vm2679_vm0, %v2977_v38  ;;  %2740 = vst.msk [vmem:[%s5097_s3 + $0xf0] sm:$0xf] %vm2679_vm0, %v3009_v60 }
 0x20c   :  { %v2978_v28 = vpack.c.bf16 %v2388_v1, %v2388_v1  ;;  %v3010_v34 = vpack.c.bf16 %v2420_v16, %v2420_v16 }
 0x20d   :  { %2711 = vst.msk [vmem:[%s5097_s3 + $0x7c] sm:$0xf] %vm2679_vm0, %v2980_v27  ;;  %2743 = vst.msk [vmem:[%s5097_s3 + $0xfc] sm:$0xf] %vm2679_vm0, %v3012_v4 }
 0x20e   :  { %2709 = vst.msk [vmem:[%s5097_s3 + $0x74] sm:$0xf] %vm2679_vm0, %v2978_v28  ;;  %2741 = vst.msk [vmem:[%s5097_s3 + $0xf4] sm:$0xf] %vm2679_vm0, %v3010_v34 }

// kernel: mynn_forward.5
= control target key start
LH: loop header
LB: loop body
LE: loop exit
PB: predicated region body
PF: predicated region fallthrough
CT: control target
= control target key end

     0   :  { %vm2233_vm0 = vcmask 1042432   ;;  %vm2234_vm1 = vcmask 1046532   ;;  %v12156_v21 = vmov 0  ;;  %vm3228_vm3 = vsmask.f32 2304  ;;  %s11874_s2 = inlined_call_operand.vmem [shape: bf16[5,128,64], index: 2, kind: input, shape index: {}]   ;;  %s11875_s0 = inlined_call_operand.vmem [shape: bf16[2,224,128], index: 0, kind: input, shape index: {}]   ;;  %s11876_s1 = inlined_call_operand.vmem [shape: bf16[5,128,64], index: 1, kind: input, shape index: {}]   ;;  %s11877_s3 = inlined_call_operand.vmem [shape: f32[1,32], index: 3, kind: input, shape index: {}]   ;;  %s11878_s4 = inlined_call_operand.vmem [shape: bf16[2,8,24,32], index: 4, kind: output, shape index: {}]  }
   0x1   :  { %v7828_v0 = vld [vmem:[%s11874_s2] sm:$0xff]   ;;  %v7830_v2 = vld [vmem:[%s11874_s2 + $0x8] sm:$0xff]   ;;  %v7832_v4 = vld [vmem:[%s11874_s2 + $0x10] sm:$0xff]   ;;  %vm3229_vm4 = vsmask.f32 6416  ;;  %vm4337_vm9 = vcmask 1041408  }
   0x2   :  { %v7829_v1 = vld [vmem:[%s11874_s2 + $0x80] sm:$0xff]   ;;  %6755 = vmatprep.subr.bf16.mxu1 %v7828_v0  ;;  %v7831_v3 = vld [vmem:[%s11874_s2 + $0x88] sm:$0xff]   ;;  %v7833_v5 = vld [vmem:[%s11874_s2 + $0x90] sm:$0xff]   ;;  %vm856_vm6 = vsmask.f32 3328  ;;  %vm4338_vm10 = vcmask 1045508  }
   0x3   :  { %7075 = vmatprep.subr.bf16.mxu0 %v7829_v1  ;;  %6756 = vmatpush3.bf16.msra.mxu1 %v7828_v0  ;;  %v7834_v6 = vld [vmem:[%s11874_s2 + $0x18] sm:$0xff]   ;;  %v7836_v8 = vld [vmem:[%s11874_s2 + $0x20] sm:$0xff]   ;;  %v7838_v10 = vld [vmem:[%s11874_s2 + $0x28] sm:$0xff]   ;;  %vm857_vm7 = vsmask.f32 7440  ;;  %vm5833_vm12 = vcmask 257024  }
   0x4   :  { %7076 = vmatpush3.bf16.msra.mxu0 %v7829_v1  ;;  %6757 = vmatprep.subr.bf16.mxu1 %v7830_v2  ;;  %v7835_v7 = vld [vmem:[%s11874_s2 + $0x98] sm:$0xff]   ;;  %v7837_v9 = vld [vmem:[%s11874_s2 + $0xa0] sm:$0xff]   ;;  %v8119_v11 = vld [vmem:[%s11875_s0 + $0xc] sm:$0xf] }
   0x5   :  { %7077 = vmatprep.subr.bf16.mxu0 %v7831_v3  ;;  %v8124_v12 = vld [vmem:[%s11875_s0 + $0x10] sm:$0xf]  ;;  %v7839_v13 = vld [vmem:[%s11874_s2 + $0xa8] sm:$0xff]   ;;  %v8139_v16 = vld [vmem:[%s11875_s0 + $0x14] sm:$0xf]  ;;  %v2244_v19 = vrot.slane %v8119_v11, 5 }
   0x6   :  { %v5886_v14 = vcombine.low %v8119_v11, %v8124_v12  ;;  %v8134_v15 = vld [vmem:[%s11875_s0 + $0x8] sm:$0xf]  ;;  %12154 = vst [vmem:[#allocation3_spill] sm:$0xff] %v8139_v16  ;;  %v8144_v17 = vld [vmem:[%s11875_s0 + $0x18] sm:$0xf]  ;;  %v2247_v20 = vrot.slane %v8124_v12, 5  ;;  %vm8150_vm2 = vmor %vm2233_vm0, %vm2234_vm1 }
   0x7   :  { %6758 = vmatpush3.bf16.msra.mxu1 %v7830_v2  ;;  %12153 = vst [vmem:[#allocation2_spill] sm:$0xff] %v8134_v15  ;;  %12155 = vst [vmem:[#allocation4_spill] sm:$0xff] %v8144_v17  ;;  %v11879_v18 = vrot.slane %v8134_v15, 5  ;;  %v12157_v21 = vsel %vm8150_vm2, 4294967295, %v12156_v21  ;;  %v2250_v22 = vrot.slane %v8139_v16, 5  ;;  %v7840_v23 = vld [vmem:[%s11874_s2 + $0x30] sm:$0xff]   ;;  %v5887_v56 = vcombine.low %v8139_v16, %v8144_v17 }
   0x8   :  { %7078 = vmatpush3.bf16.msra.mxu0 %v7831_v3  ;;  %6759 = vmatprep.subr.bf16.mxu1 %v7832_v4  ;;  %12158 = vst [vmem:[#allocation5_spill] sm:$0xff] %v12157_v21  ;;  %v2246_v25 = vrot.slane %v2244_v19, 4  ;;  %v2249_v26 = vrot.slane %v2247_v20, 4  ;;  %v2253_v27 = vrot.slane %v8144_v17, 5  ;;  %v7841_v28 = vld [vmem:[%s11874_s2 + $0xb0] sm:$0xff]   ;;  %v7842_v35 = vld [vmem:[%s11874_s2 + $0x38] sm:$0xff]   ;;  %vm8668_vm5 = vmor %vm3228_vm3, %vm3229_vm4 }
   0x9   :  { %7079 = vmatprep.subr.bf16.mxu0 %v7833_v5  ;;  %6771 = vmatprep.mubr.bf16.mxu1 %v5886_v14  ;;  %v2243_v24 = vrot.slane %v11879_v18, 4  ;;  %v2252_v29 = vrot.slane %v2250_v22, 4  ;;  %v8167_v30 = vld [vmem:[%s11875_s0 + $0x1c] sm:$0xf]  ;;  %v8184_v34 = vld [vmem:[%s11875_s0 + $0x20] sm:$0xf]  ;;  %vm9598_vm8 = vmor %vm856_vm6, %vm857_vm7 }
   0xa   :  { %12159 = vst [vmem:[#allocation6_spill] sm:$0xff] %v8167_v30  ;;  %v8175_v32 = vsel %vm8150_vm2, %v2246_v25, %v2247_v20  ;;  %v8179_v33 = vsel %vm8150_vm2, %v2249_v26, %v2250_v22  ;;  %v8200_v39 = vld [vmem:[%s11875_s0 + $0x24] sm:$0xf]  ;;  %v2255_v41 = vrot.slane %v2253_v27, 4  ;;  %v2256_v42 = vrot.slane %v8167_v30, 5  ;;  %v7843_v43 = vld [vmem:[%s11874_s2 + $0xb8] sm:$0xff]   ;;  %vm10293_vm11 = vmor %vm4337_vm9, %vm4338_vm10 }
   0xb   :  { %6760 = vmatpush3.bf16.msra.mxu1 %v7832_v4  ;;  %v8171_v31 = vsel %vm8150_vm2, %v2243_v24, %v2244_v19  ;;  %12161 = vst [vmem:[#allocation8_spill] sm:$0xff] %v8175_v32  ;;  %12162 = vst [vmem:[#allocation9_spill] sm:$0xff] %v8179_v33  ;;  %v8191_v36 = vsel %vm8150_vm2, %v2252_v29, %v2253_v27  ;;  %v6112_v38 = vcombine.low %v8175_v32, %v8179_v33  ;;  %v8212_v45 = vld [vmem:[%s11875_s0 + $0x28] sm:$0xf]  ;;  %v8218_v48 = vld [vmem:[%s11875_s0 + $0x30] sm:$0xf] }
   0xc   :  { %7080 = vmatpush3.bf16.msra.mxu0 %v7833_v5  ;;  %6761 = vmatprep.subr.bf16.mxu1 %v7834_v6  ;;  %12160 = vst [vmem:[#allocation7_spill] sm:$0xff] %v8171_v31  ;;  %12163 = vst [vmem:[#allocation10_spill] sm:$0xff] %v8191_v36  ;;  %v2259_v44 = vrot.slane %v8184_v34, 5  ;;  %v2258_v46 = vrot.slane %v2256_v42, 4  ;;  %v2262_v47 = vrot.slane %v8200_v39, 5  ;;  %v7846_v50 = vld [vmem:[%s11876_s1] sm:$0xff]   ;;  %v8225_v51 = vsel %vm8150_vm2, %v2255_v41, %v2256_v42 }
   0xd   :  { %7081 = vmatprep.subr.bf16.mxu0 %v7835_v7  ;;  %7091 = vmatprep.mubr.bf16.mxu0 %v6112_v38  ;;  %12164 = vst [vmem:[#allocation11_spill] sm:$0xff] %v8225_v51  ;;  %v8230_v52 = vld [vmem:[%s11875_s0 + $0x2c] sm:$0xf]  ;;  %v2265_v53 = vrot.slane %v8212_v45, 5  ;;  %v7847_v54 = vld [vmem:[%s11876_s1 + $0xc0] sm:$0xff]   ;;  %v2271_v55 = vrot.slane %v8218_v48, 5  ;;  %v6113_v60 = vcombine.low %v8191_v36, %v8225_v51  ;;  %v5888_v62 = vcombine.low %v8167_v30, %v8184_v34 }
   0xe   :  { %v2261_v49 = vrot.slane %v2259_v44, 4  ;;  %v8241_v57 = vsel %vm8150_vm2, %v2258_v46, %v2259_v44  ;;  %v8250_v59 = vld [vmem:[%s11875_s0 + $0x34] sm:$0xf]  ;;  %v2268_v61 = vrot.slane %v8230_v52, 5  ;;  %v2264_v63 = vrot.slane %v2262_v47, 4  ;;  %v7850_v2 = vld [vmem:[%s11876_s1 + $0x8] sm:$0xff]  }
   0xf   :  { %6762 = vmatpush3.bf16.msra.mxu1 %v7834_v6  ;;  %12165 = vst [vmem:[#allocation12_spill] sm:$0xff] %v8241_v57  ;;  %v2267_v0 = vrot.slane %v2265_v53, 4  ;;  %v2273_v4 = vrot.slane %v2271_v55, 4  ;;  %v2274_v5 = vrot.slane %v8250_v59, 5  ;;  %v8266_v6 = vld [vmem:[%s11875_s0 + $0x38] sm:$0xf]  ;;  %v5889_v25 = vcombine.low %v8200_v39, %v8212_v45 }
  0x10   :  { %7082 = vmatpush3.bf16.msra.mxu0 %v7835_v7  ;;  %6763 = vmatprep.subr.bf16.mxu1 %v7836_v8  ;;  %v8245_v58 = vsel %vm8150_vm2, %v2261_v49, %v2262_v47  ;;  %v2270_v3 = vrot.slane %v2268_v61, 4  ;;  %v7851_v7 = vld [vmem:[%s11876_s1 + $0xc8] sm:$0xff]   ;;  %v2277_v14 = vrot.slane %v8266_v6, 5  ;;  %v7856_v19 = vld [vmem:[%s11876_s1 + $0x10] sm:$0xff]   ;;  %v8310_v26 = vld [vmem:[%s11875_s0 + $0x44] sm:$0xf] }
  0x11   :  { %7083 = vmatprep.subr.bf16.mxu0 %v7837_v9  ;;  %12166 = vst [vmem:[#allocation13_spill] sm:$0xff] %v8245_v58  ;;  %v6114_v1 = vcombine.low %v8241_v57, %v8245_v58  ;;  %v8299_v22 = vsel %vm8150_vm2, %v2273_v4, %v2274_v5  ;;  %v7857_v24 = vld [vmem:[%s11876_s1 + $0xd0] sm:$0xff]   ;;  %12172 = vst [vmem:[#allocation19_spill] sm:$0xff] %v8310_v26  ;;  %v2276_v38 = vrot.slane %v2274_v5, 4  ;;  %v7860_v42 = vld [vmem:[%s11876_s1 + $0x18] sm:$0xff]   ;;  %v2286_v46 = vrot.slane %v8310_v26, 5 }
  0x12   :  { %v8295_v20 = vsel %vm8150_vm2, %v2270_v3, %v2271_v55  ;;  %12171 = vst [vmem:[#allocation18_spill] sm:$0xff] %v8299_v22  ;;  %v2279_v41 = vrot.slane %v2277_v14, 4  ;;  %v8326_v47 = vld [vmem:[%s11875_s0 + $0x48] sm:$0xf]  ;;  %v7861_v49 = vld [vmem:[%s11876_s1 + $0xd8] sm:$0xff]   ;;  %v12216_v32 = vshrl.u32 %v8134_v15, 16 }
  0x13   :  { %6764 = vmatpush3.bf16.msra.mxu1 %v7836_v8  ;;  %v8274_v8 = vld [vmem:[%s11875_s0 + $0x40] sm:$0xf]  ;;  %12170 = vst [vmem:[#allocation17_spill] sm:$0xff] %v8295_v20  ;;  %12173 = vst [vmem:[#allocation20_spill] sm:$0xff] %v8326_v47  ;;  %v8347_v55 = vld [vmem:[%s11875_s0 + $0x4c] sm:$0xf] }
  0x14   :  { %7084 = vmatpush3.bf16.msra.mxu0 %v7837_v9  ;;  %6765 = vmatprep.subr.bf16.mxu1 %v7838_v10  ;;  %12167 = vst [vmem:[#allocation14_spill] sm:$0xff] %v8274_v8  ;;  %v8279_v9 = vld [vmem:[%s11875_s0 + $0x3c] sm:$0xf]  ;;  %12177 = vst [vmem:[#allocation24_spill] sm:$0xff] %v8347_v55  ;;  %v2292_v5 = vrot.slane %v8347_v55, 5 }
  0x15   :  { %7085 = vmatprep.subr.bf16.mxu0 %v7839_v13  ;;  %v2280_v29 = vrot.slane %v8279_v9, 5  ;;  %v5892_v4 = vcombine.low %v8279_v9, %v8274_v8  ;;  %v8443_v40 = vld [vmem:[%s11875_s0 + $0x68] sm:$0xf]  ;;  %v7880_v37 = vld [vmem:[%s11876_s1 + $0x38] sm:$0xff]  }
  0x17   :  { %6766 = vmatpush3.bf16.msra.mxu1 %v7838_v10  ;;  %v8283_v10 = vsel %vm8150_vm2, %v2264_v63, %v2265_v53  ;;  %v8338_v53 = vsel %vm8150_vm2, %v2276_v38, %v2277_v14  ;;  %v7866_v63 = vld [vmem:[%s11876_s1 + $0x20] sm:$0xff]  }
  0x18   :  { %7086 = vmatpush3.bf16.msra.mxu0 %v7839_v13  ;;  %6767 = vmatprep.subr.bf16.mxu1 %v7840_v23  ;;  %12168 = vst [vmem:[#allocation15_spill] sm:$0xff] %v8283_v10  ;;  %v8287_v13 = vsel %vm8150_vm2, %v2267_v0, %v2268_v61  ;;  %12175 = vst [vmem:[#allocation22_spill] sm:$0xff] %v8338_v53  ;;  %v5891_v0 = vcombine.low %v8250_v59, %v8266_v6 }
  0x19   :  { %7087 = vmatprep.subr.bf16.mxu0 %v7841_v28  ;;  %12169 = vst [vmem:[#allocation16_spill] sm:$0xff] %v8287_v13  ;;  %v6115_v27 = vcombine.low %v8283_v10, %v8287_v13 }
  0x1b   :  { %6768 = vmatpush3.bf16.msra.mxu1 %v7840_v23  ;;  %v2283_v23 = vrot.slane %v8274_v8, 5 }
  0x1c   :  { %7088 = vmatpush3.bf16.msra.mxu0 %v7841_v28  ;;  %6769 = vmatprep.subr.bf16.mxu1 %v7842_v35  ;;  %v5890_v28 = vcombine.low %v8230_v52, %v8218_v48 }
  0x1d   :  { %7089 = vmatprep.subr.bf16.mxu0 %v7843_v43  ;;  %v2285_v44 = vrot.slane %v2283_v23, 4 }
  0x1f   :  { %6770 = vmatpush3.bf16.msra.mxu1 %v7842_v35  ;;  %v6116_v35 = vcombine.low %v8295_v20, %v8299_v22  ;;  %v8356_v61 = vsel %vm8150_vm2, %v2285_v44, %v2286_v46  ;;  %v11901_v22 = vshll.u32 %v8167_v30, 16 }
  0x20   :  { %7090 = vmatpush3.bf16.msra.mxu0 %v7843_v43  ;;  %6819 = vmatprep.subr.bf16.mxu1 %v7846_v50  ;;  %v2282_v43 = vrot.slane %v2280_v29, 4  ;;  %12179 = vst [vmem:[#allocation26_spill] sm:$0xff] %v8356_v61 }
  0x21   :  { %7139 = vmatprep.subr.bf16.mxu0 %v7847_v54 }
  0x22   :  { %6772 = vmatmul.mubr.bf16.vlgmr.msra.gmra.mrb[0].mxu1 %v5887_v56  ;;  %v2289_v56 = vrot.slane %v8326_v47, 5 }
  0x23   :  { %7092 = vmatmul.mubr.bf16.vlgmr.msra.gmra.mrb[0].mxu0 %v6113_v60  ;;  %6820 = vmatpush3.bf16.msra.mxu1 %v7846_v50  ;;  %v8334_v50 = vld [vmem:[%s11875_s0 + $0x50] sm:$0xf]  ;;  %v8352_v60 = vsel %vm8150_vm2, %v2282_v43, %v2283_v23 }
  0x24   :  { %7140 = vmatpush3.bf16.msra.mxu0 %v7847_v54  ;;  %6775 = vmatprep.mubr.bf16.mxu1 %v5888_v62  ;;  %12174 = vst [vmem:[#allocation21_spill] sm:$0xff] %v8334_v50  ;;  %v8342_v54 = vsel %vm8150_vm2, %v2279_v41, %v2280_v29  ;;  %12178 = vst [vmem:[#allocation25_spill] sm:$0xff] %v8352_v60  ;;  %v2295_v62 = vrot.slane %v8334_v50, 5  ;;  %v6118_v14 = vcombine.low %v8352_v60, %v8356_v61  ;;  %v8391_v29 = vld [vmem:[%s11875_s0 + $0x60] sm:$0xf] }
  0x25   :  { %7095 = vmatprep.mubr.bf16.mxu0 %v6114_v1  ;;  %6821 = vmatprep.subr.bf16.mxu1 %v7850_v2  ;;  %12176 = vst [vmem:[#allocation23_spill] sm:$0xff] %v8342_v54  ;;  %v8367_v1 = vld [vmem:[%s11875_s0 + $0x54] sm:$0xf]  ;;  %v6117_v3 = vcombine.low %v8338_v53, %v8342_v54  ;;  %v2291_v23 = vrot.slane %v2289_v56, 4 }
  0x26   :  { %7141 = vmatprep.subr.bf16.mxu0 %v7851_v7  ;;  %12180 = vst [vmem:[#allocation27_spill] sm:$0xff] %v8367_v1 }
  0x27   :  { %6822 = vmatpush3.bf16.msra.mxu1 %v7850_v2  ;;  %v7867_v2 = vld [vmem:[%s11876_s1 + $0xe0] sm:$0xff]   ;;  %v8402_v41 = vsel %vm8150_vm2, %v2291_v23, %v2292_v5 }
  0x28   :  { %7142 = vmatpush3.bf16.msra.mxu0 %v7851_v7  ;;  %6823 = vmatprep.subr.bf16.mxu1 %v7856_v19  ;;  %v8380_v7 = vld [vmem:[%s11875_s0 + $0x58] sm:$0xf]  ;;  %12182 = vst [vmem:[#allocation29_spill] sm:$0xff] %v8402_v41 }
  0x29   :  { %7143 = vmatprep.subr.bf16.mxu0 %v7857_v24  ;;  %v2301_v43 = vrot.slane %v8380_v7, 5 }
  0x2a   :  { %6776 = vmatmul.mubr.bf16.gmra.mrb[4].mxu1 %v5889_v25  ;;  %v2297_v25 = vrot.slane %v2295_v62, 4 }
  0x2b   :  { %7096 = vmatmul.mubr.bf16.gmra.mrb[4].mxu0 %v6115_v27  ;;  %6779 = vmatprep.mubr.bf16.mxu1 %v5890_v28  ;;  %v2298_v27 = vrot.slane %v8367_v1, 5  ;;  %v7870_v28 = vld [vmem:[%s11876_s1 + $0x28] sm:$0xff]  }
  0x2c   :  { %7099 = vmatprep.mubr.bf16.mxu0 %v6116_v35  ;;  %6824 = vmatpush3.bf16.msra.mxu1 %v7856_v19  ;;  %v2288_v19 = vrot.slane %v2286_v46, 4  ;;  %v7871_v35 = vld [vmem:[%s11876_s1 + $0xe8] sm:$0xff]  }
  0x2d   :  { %7144 = vmatpush3.bf16.msra.mxu0 %v7857_v24  ;;  %6825 = vmatprep.subr.bf16.mxu1 %v7860_v42  ;;  %v2294_v24 = vrot.slane %v2292_v5, 4  ;;  %v8416_v46 = vsel %vm8150_vm2, %v2297_v25, %v2298_v27 }
  0x2e   :  { %7145 = vmatprep.subr.bf16.mxu0 %v7861_v49  ;;  %v8398_v38 = vsel %vm8150_vm2, %v2288_v19, %v2289_v56  ;;  %12185 = vst [vmem:[#allocation32_spill] sm:$0xff] %v8416_v46  ;;  %v7876_v56 = vld [vmem:[%s11876_s1 + $0x30] sm:$0xff]   ;;  %v2303_v19 = vrot.slane %v2301_v43, 4 }
  0x2f   :  { %12181 = vst [vmem:[#allocation28_spill] sm:$0xff] %v8398_v38  ;;  %v8412_v44 = vsel %vm8150_vm2, %v2294_v24, %v2295_v62  ;;  %v8427_v62 = vld [vmem:[%s11875_s0 + $0x64] sm:$0xf] }
  0x30   :  { %6826 = vmatpush3.bf16.msra.mxu1 %v7860_v42  ;;  %v8407_v42 = vld [vmem:[%s11875_s0 + $0x5c] sm:$0xf]  ;;  %12184 = vst [vmem:[#allocation31_spill] sm:$0xff] %v8412_v44  ;;  %v6120_v5 = vcombine.low %v8412_v44, %v8416_v46  ;;  %v2385_v25 = vrot.slane %v8427_v62, 5 }
  0x31   :  { %7146 = vmatpush3.bf16.msra.mxu0 %v7861_v49  ;;  %6827 = vmatprep.subr.bf16.mxu1 %v7866_v63  ;;  %12183 = vst [vmem:[#allocation30_spill] sm:$0xff] %v8407_v42  ;;  %v2307_v49 = vrot.slane %v8391_v29, 5 }
  0x32   :  { %6780 = vmatmul.mubr.bf16.gmra.mrb[8].mxu1 %v5891_v0  ;;  %7147 = vmatprep.subr.bf16.mxu0 %v7867_v2  ;;  %v5893_v0 = vcombine.low %v8310_v26, %v8326_v47 }
  0x33   :  { %7100 = vmatmul.mubr.bf16.gmra.mrb[8].mxu0 %v6117_v3  ;;  %6783 = vmatprep.mubr.bf16.mxu1 %v5892_v4  ;;  %v5894_v3 = vcombine.low %v8347_v55, %v8334_v50  ;;  %v2304_v4 = vrot.slane %v8407_v42, 5  ;;  %v2384_v24 = vrot.slane %v2307_v49, 4 }
  0x34   :  { %7103 = vmatprep.mubr.bf16.mxu0 %v6118_v14  ;;  %6828 = vmatpush3.bf16.msra.mxu1 %v7866_v63  ;;  %v7877_v63 = vld [vmem:[%s11876_s1 + $0xf0] sm:$0xff]   ;;  %v2300_v14 = vrot.slane %v2298_v27, 4  ;;  %v8451_v27 = vld [vmem:[%s11875_s0 + $0x7c] sm:$0xf] }
  0x35   :  { %7148 = vmatpush3.bf16.msra.mxu0 %v7867_v2  ;;  %6829 = vmatprep.subr.bf16.mxu1 %v7870_v28  ;;  %v6119_v2 = vcombine.low %v8398_v38, %v8402_v41  ;;  %v2306_v23 = vrot.slane %v2304_v4, 4  ;;  %12186 = vst [vmem:[#allocation33_spill] sm:$0xff] %v8451_v27  ;;  %v8470_v46 = vsel %vm8150_vm2, %v2303_v19, %v2304_v4  ;;  %v2388_v41 = vrot.slane %v8443_v40, 5 }
  0x36   :  { %7149 = vmatprep.subr.bf16.mxu0 %v7871_v35  ;;  %v8466_v18 = vsel %vm8150_vm2, %v2300_v14, %v2301_v43  ;;  %12188 = vst [vmem:[#allocation35_spill] sm:$0xff] %v8470_v46  ;;  %v2386_v43 = vsel %vm8150_vm2, %v2384_v24, %v2385_v25  ;;  %v8489_v14 = vld [vmem:[%s11876_s1 + $0x40] sm:$0xff]   ;;  %v12190_v38 = vrot.slane %v8451_v27, 5 }
  0x37   :  { %12187 = vst [vmem:[#allocation34_spill] sm:$0xff] %v8466_v18  ;;  %v6121_v19 = vcombine.low %v8466_v18, %v8470_v46  ;;  %v2390_v44 = vrot.slane %v2388_v41, 4 }
  0x38   :  { %6830 = vmatpush3.bf16.msra.mxu1 %v7870_v28  ;;  %v8456_v28 = vld [vmem:[%s11875_s0 + $0x80] sm:$0xf]  ;;  %v2319_v54 = vrot.slane %v12190_v38, 4 }
  0x39   :  { %7150 = vmatpush3.bf16.msra.mxu0 %v7871_v35  ;;  %6831 = vmatprep.subr.bf16.mxu1 %v7876_v56  ;;  %v7881_v35 = vld [vmem:[%s11876_s1 + $0xf8] sm:$0xff]   ;;  %v2320_v4 = vrot.slane %v8456_v28, 5 }
  0x3a   :  { %6784 = vmatmul.mubr.bf16.gmra.mrb[12].mxu1 %v5893_v0  ;;  %7151 = vmatprep.subr.bf16.mxu0 %v7877_v63  ;;  %v45_v0 = vld [vmem:[%s11875_s0 + $0x6c] sm:$0xf] }
  0x3b   :  { %7104 = vmatmul.mubr.bf16.gmra.mrb[12].mxu0 %v6119_v2  ;;  %6787 = vmatprep.mubr.bf16.mxu1 %v5894_v3  ;;  %v8476_v2 = vld [vmem:[%s11875_s0 + $0x84] sm:$0xf]  ;;  %v8480_v3 = vsel %vm8150_vm2, %v2306_v23, %v2307_v49  ;;  %v2391_v23 = vrot.slane %v45_v0, 5  ;;  %v2322_v46 = vrot.slane %v2320_v4, 4  ;;  %v8530_v0 = vsel %vm8150_vm2, %v2319_v54, %v2320_v4 }
  0x3c   :  { %7107 = vmatprep.mubr.bf16.mxu0 %v6120_v5  ;;  %6832 = vmatpush3.bf16.msra.mxu1 %v7876_v56  ;;  %12189 = vst [vmem:[#allocation36_spill] sm:$0xff] %v8480_v3  ;;  %v5895_v56 = vcombine.low %v8367_v1, %v8380_v7  ;;  %v8496_v49 = vld [vmem:[%s11874_s2 + $0xc0] sm:$0xff]   ;;  %v6122_v24 = vcombine.low %v8480_v3, %v2386_v43  ;;  %v2387_v5 = vrot.slane %v2385_v25, 4  ;;  %v2323_v61 = vrot.slane %v8476_v2, 5  ;;  %v8507_v7 = vld [vmem:[%s11875_s0 + $0x88] sm:$0xf] }
  0x3d   :  { %7152 = vmatpush3.bf16.msra.mxu0 %v7877_v63  ;;  %6833 = vmatprep.subr.bf16.mxu1 %v7880_v37  ;;  %v5896_v63 = vcombine.low %v8407_v42, %v8391_v29  ;;  %v8515_v29 = vld [vmem:[%s11875_s0 + $0x90] sm:$0xf]  ;;  %v2392_v25 = vsel %vm8150_vm2, %v2390_v44, %v2391_v23  ;;  %12191 = vst [vmem:[#allocation37_spill] sm:$0xff] %v8530_v0  ;;  %v8543_v44 = vld [vmem:[%s11875_s0 + $0x94] sm:$0xf] }
  0x3e   :  { %7153 = vmatprep.subr.bf16.mxu0 %v7881_v35  ;;  %v2389_v38 = vsel %vm8150_vm2, %v2387_v5, %v2388_v41  ;;  %v8534_v43 = vsel %vm8150_vm2, %v2322_v46, %v2323_v61  ;;  %v5898_v54 = vcombine.low %v8451_v27, %v8456_v28  ;;  %v2325_v4 = vrot.slane %v2323_v61, 4  ;;  %v8563_v61 = vld [vmem:[%s11875_s0 + $0xa0] sm:$0xf] }
  0x3f   :  { %12192 = vst [vmem:[#allocation38_spill] sm:$0xff] %v8534_v43  ;;  %v6123_v5 = vcombine.low %v2389_v38, %v2392_v25  ;;  %v6124_v46 = vcombine.low %v8530_v0, %v8534_v43  ;;  %v8558_v38 = vld [vmem:[%s11875_s0 + $0x9c] sm:$0xf]  ;;  %v5899_v43 = vcombine.low %v8476_v2, %v8507_v7  ;;  %v11895_v27 = vshll.u32 %v8144_v17, 16 }
  0x40   :  { %6834 = vmatpush3.bf16.msra.mxu1 %v7880_v37  ;;  %v8521_v37 = vld [vmem:[%s11875_s0 + $0x8c] sm:$0xf]  ;;  %v11894_v25 = vshrl.u32 %v8144_v17, 16  ;;  %v12219_v17 = vshll.u32 %v8119_v11, 16 }
  0x41   :  { %7154 = vmatpush3.bf16.msra.mxu0 %v7881_v35  ;;  %6883 = vmatprep.subr.bf16.mxu1 %v8489_v14  ;;  %v2326_v35 = vrot.slane %v8507_v7, 5  ;;  %v2329_v41 = vrot.slane %v8521_v37, 5 }
  0x42   :  { %6788 = vmatmul.mubr.bf16.gmra.mrb[16].mxu1 %v5895_v56  ;;  %7203 = vmatprep.subr.bf16.mxu0 %v8496_v49  ;;  %v2332_v56 = vrot.slane %v8515_v29, 5 }
  0x43   :  { %7108 = vmatmul.mubr.bf16.gmra.mrb[16].mxu0 %v6121_v19  ;;  %6791 = vmatprep.mubr.bf16.mxu1 %v5896_v63  ;;  %v5897_v19 = vcombine.low %v8427_v62, %v8443_v40  ;;  %v2328_v63 = vrot.slane %v2326_v35, 4  ;;  %v2331_v23 = vrot.slane %v2329_v41, 4  ;;  %v8552_v40 = vld [vmem:[%s11875_s0 + $0x98] sm:$0xf]  ;;  %v8571_v0 = vsel %vm8150_vm2, %v2325_v4, %v2326_v35  ;;  %v8593_v35 = vld [vmem:[%s11875_s0 + $0xa4] sm:$0xf] }
  0x44   :  { %7111 = vmatprep.mubr.bf16.mxu0 %v6122_v24  ;;  %v2334_v62 = vrot.slane %v2332_v56, 4  ;;  %v2335_v24 = vrot.slane %v8543_v44, 5  ;;  %12193 = vst [vmem:[#allocation39_spill] sm:$0xff] %v8571_v0  ;;  %v2338_v28 = vrot.slane %v8552_v40, 5  ;;  %v8599_v4 = vld [vmem:[%s11875_s0 + $0xa8] sm:$0xf] }
  0x45   :  { %v8584_v2 = vsel %vm8150_vm2, %v2331_v23, %v2332_v56  ;;  %v2341_v23 = vrot.slane %v8558_v38, 5 }
  0x46   :  { %12196 = vst [vmem:[#allocation41_spill] sm:$0xff] %v8584_v2  ;;  %v8588_v7 = vsel %vm8150_vm2, %v2334_v62, %v2335_v24  ;;  %v3260_v62 = vrot.slane %v11894_v25, 5  ;;  %v2337_v18 = vrot.slane %v2335_v24, 4  ;;  %v2347_v24 = vrot.slane %v8593_v35, 5 }
  0x47   :  { %12197 = vst [vmem:[#allocation42_spill] sm:$0xff] %v8588_v7  ;;  %v2343_v53 = vrot.slane %v2341_v23, 4 }
  0x4a   :  { %6792 = vmatmul.mubr.bf16.gmra.mrb[20].mxu1 %v5897_v19  ;;  %v8576_v19 = vsel %vm8150_vm2, %v2328_v63, %v2329_v41  ;;  %v2344_v41 = vrot.slane %v8563_v61, 5  ;;  %v5900_v63 = vcombine.low %v8521_v37, %v8515_v29  ;;  %v2340_v29 = vrot.slane %v2338_v28, 4  ;;  %v8620_v37 = vld [vmem:[%s11875_s0 + $0xb0] sm:$0xf] }
  0x4b   :  { %7112 = vmatmul.mubr.bf16.gmra.mrb[20].mxu0 %v6123_v5  ;;  %6795 = vmatprep.mubr.bf16.mxu1 %v5898_v54  ;;  %12194 = vst [vmem:[#allocation40_spill] sm:$0xff] %v8576_v19  ;;  %v12195_v5 = vshrl.u32 %v8139_v16, 16  ;;  %v6125_v3 = vcombine.low %v8571_v0, %v8576_v19 }
  0x4c   :  { %7115 = vmatprep.mubr.bf16.mxu0 %v6124_v46  ;;  %v12198_v46 = vshll.u32 %v8139_v16, 16  ;;  %v2346_v13 = vrot.slane %v2344_v41, 4  ;;  %v3246_v16 = vrot.slane %v12219_v17, 6 }
  0x4d   :  { %v3255_v54 = vrot.slane %v12195_v5, 5  ;;  %v3261_v5 = vrot.slane %v11895_v27, 6  ;;  %v11902_v27 = vshrl.u32 %v8167_v30, 16  ;;  %v73_v30 = vld [vmem:[%s11875_s0 + $0xdc] sm:$0xf] }
  0x4e   :  { %v3256_v56 = vrot.slane %v12198_v46, 6  ;;  %v6126_v46 = vcombine.low %v8584_v2, %v8588_v7 }
  0x4f   :  { %v3262_v25 = vor.u32 %v3261_v5, %v3260_v62  ;;  %v3265_v2 = vrot.slane %v11902_v27, 5  ;;  %v8633_v62 = vld [vmem:[%s11875_s0 + $0xac] sm:$0xf]  ;;  %v5901_v5 = vcombine.low %v8543_v44, %v8552_v40  ;;  %v8658_v44 = vsel %vm8150_vm2, %v2346_v13, %v2347_v24  ;;  %v8676_v13 = vld [vmem:[%s11875_s0 + $0xbc] sm:$0xf] }
  0x50   :  { %v8612_v60 = vor.u32 %v3256_v56, %v3255_v54  ;;  %v3266_v54 = vrot.slane %v11901_v22, 6  ;;  %v2350_v56 = vrot.slane %v8599_v4, 5  ;;  %v8643_v22 = vsel %vm8150_vm2, %v2340_v29, %v2341_v23  ;;  %12202 = vst [vmem:[#allocation46_spill] sm:$0xff] %v8658_v44  ;;  %v8694_v27 = vld [vmem:[%s11875_s0 + $0xc0] sm:$0xf] }
  0x51   :  { %v3264_v19 = vrot.slane %v3262_v25, 4  ;;  %12200 = vst [vmem:[#allocation44_spill] sm:$0xff] %v8643_v22  ;;  %v2356_v40 = vrot.slane %v8620_v37, 5 }
  0x52   :  { %6796 = vmatmul.mubr.bf16.gmra.mrb[24].mxu1 %v5899_v43  ;;  %v3259_v7 = vrot.slane %v8612_v60, 4  ;;  %v8639_v43 = vsel %vm8150_vm2, %v2337_v18, %v2338_v28  ;;  %v2349_v18 = vrot.slane %v2347_v24, 4  ;;  %v8664_v28 = vld [vmem:[%s11875_s0 + $0xb8] sm:$0xf] }
  0x53   :  { %7116 = vmatmul.mubr.bf16.gmra.mrb[24].mxu0 %v6125_v3  ;;  %6799 = vmatprep.mubr.bf16.mxu1 %v5900_v63  ;;  %12199 = vst [vmem:[#allocation43_spill] sm:$0xff] %v8639_v43  ;;  %v8648_v3 = vld [vmem:[%s11875_s0 + $0xb4] sm:$0xf]  ;;  %v8650_v63 = vor.u32 %v3266_v54, %v3265_v2  ;;  %v6127_v24 = vcombine.low %v8639_v43, %v8643_v22  ;;  %v2358_v20 = vrot.slane %v2356_v40, 4  ;;  %v2362_v22 = vrot.slane %v8664_v28, 5 }
  0x54   :  { %7119 = vmatprep.mubr.bf16.mxu0 %v6126_v46  ;;  %v8654_v46 = vsel %vm8150_vm2, %v2343_v53, %v2344_v41  ;;  %v2352_v53 = vrot.slane %v2350_v56, 4  ;;  %v2353_v41 = vrot.slane %v8633_v62, 5  ;;  %v8680_v23 = vsel %vm8668_vm5, %v3259_v7, %v3262_v25 }
  0x55   :  { %12201 = vst [vmem:[#allocation45_spill] sm:$0xff] %v8654_v46  ;;  %12205 = vst [vmem:[#allocation47_spill] sm:$0xff] %v8680_v23  ;;  %v8685_v29 = vsel %vm8668_vm5, %v3264_v19, %v8650_v63  ;;  %v5902_v54 = vcombine.low %v8558_v38, %v8563_v61  ;;  %v6128_v7 = vcombine.low %v8654_v46, %v8658_v44  ;;  %v2359_v19 = vrot.slane %v8648_v3, 5  ;;  %v8709_v44 = vld [vmem:[%s11875_s0 + $0xc4] sm:$0xf] }
  0x56   :  { %12206 = vst [vmem:[#allocation48_spill] sm:$0xff] %v8685_v29  ;;  %v2355_v0 = vrot.slane %v2353_v41, 4  ;;  %v2365_v25 = vrot.slane %v8676_v13, 5  ;;  %v8713_v46 = vsel %vm8150_vm2, %v2349_v18, %v2350_v56  ;;  %v8717_v43 = vsel %vm8150_vm2, %v2352_v53, %v2353_v41  ;;  %v8731_v56 = vld [vmem:[%s11875_s0 + $0xc8] sm:$0xf] }
  0x57   :  { %12207 = vst [vmem:[#allocation49_spill] sm:$0xff] %v8713_v46  ;;  %12208 = vst [vmem:[#allocation50_spill] sm:$0xff] %v8717_v43  ;;  %v2361_v61 = vrot.slane %v2359_v19, 4  ;;  %v5903_v18 = vcombine.low %v8593_v35, %v8599_v4  ;;  %v6129_v53 = vcombine.low %v8713_v46, %v8717_v43  ;;  %v5904_v35 = vcombine.low %v8633_v62, %v8620_v37  ;;  %v8757_v4 = vld [vmem:[%s11875_s0 + $0xd0] sm:$0xf] }
  0x58   :  { %v2367_v38 = vrot.slane %v2365_v25, 4  ;;  %v2371_v58 = vrot.slane %v8709_v44, 5  ;;  %v5905_v62 = vcombine.low %v8648_v3, %v8664_v28  ;;  %v2374_v57 = vrot.slane %v8731_v56, 5  ;;  %v8788_v28 = vld [vmem:[%s11875_s0 + $0xd8] sm:$0xf] }
  0x59   :  { %v8777_v43 = vsel %vm8150_vm2, %v2361_v61, %v2362_v22  ;;  %v2380_v3 = vrot.slane %v8757_v4, 5 }
  0x5a   :  { %6800 = vmatmul.mubr.bf16.gmra.mrb[28].mxu1 %v5901_v5  ;;  %v8721_v5 = vsel %vm8150_vm2, %v2355_v0, %v2356_v40  ;;  %v8738_v0 = vld [vmem:[%s11875_s0 + $0xcc] sm:$0xf]  ;;  %v8748_v40 = vld [vmem:[%s11875_s0 + $0x4] sm:$0xf]  ;;  %12211 = vst [vmem:[#allocation53_spill] sm:$0xff] %v8777_v43  ;;  %v2376_v36 = vrot.slane %v2374_v57, 4 }
  0x5b   :  { %7120 = vmatmul.mubr.bf16.gmra.mrb[28].mxu0 %v6127_v24  ;;  %6803 = vmatprep.mubr.bf16.mxu1 %v5902_v54  ;;  %12209 = vst [vmem:[#allocation51_spill] sm:$0xff] %v8721_v5  ;;  %v2368_v24 = vrot.slane %v8694_v27, 5  ;;  %v8726_v54 = vsel %vm8150_vm2, %v2358_v20, %v2359_v19  ;;  %v8743_v20 = vld [vmem:[%s11875_s0] sm:$0xf]  ;;  %v11921_v46 = vshrl.u32 %v8748_v40, 16  ;;  %v2393_v61 = vrot.slane %v2380_v3, 4 }
  0x5c   :  { %7123 = vmatprep.mubr.bf16.mxu0 %v6128_v7  ;;  %12210 = vst [vmem:[#allocation52_spill] sm:$0xff] %v8726_v54  ;;  %v2364_v7 = vrot.slane %v2362_v22, 4  ;;  %v6130_v41 = vcombine.low %v8721_v5, %v8726_v54  ;;  %v11919_v10 = vshrl.u32 %v8743_v20, 16  ;;  %v11920_v51 = vshll.u32 %v8743_v20, 16  ;;  %v8773_v54 = vld [vmem:[%s11875_s0 + $0xd4] sm:$0xf] }
  0x5d   :  { %v2370_v19 = vrot.slane %v2368_v24, 4  ;;  %v2373_v5 = vrot.slane %v2371_v58, 4  ;;  %v2394_v33 = vrot.slane %v8773_v54, 5 }
  0x5e   :  { %v8781_v37 = vsel %vm8150_vm2, %v2364_v7, %v2365_v25  ;;  %v3231_v7 = vrot.slane %v11919_v10, 5  ;;  %v5906_v10 = vcombine.low %v8676_v13, %v8694_v27  ;;  %v12218_v27 = vshrl.u32 %v8119_v11, 16 }
  0x5f   :  { %12212 = vst [vmem:[#allocation54_spill] sm:$0xff] %v8781_v37  ;;  %v8796_v22 = vsel %vm8150_vm2, %v2370_v19, %v2371_v58  ;;  %v6131_v25 = vcombine.low %v8777_v43, %v8781_v37  ;;  %v12217_v58 = vshll.u32 %v8134_v15, 16  ;;  %v2396_v17 = vrot.slane %v2394_v33, 4 }
  0x60   :  { %12214 = vst [vmem:[#allocation56_spill] sm:$0xff] %v8796_v22  ;;  %v3245_v13 = vrot.slane %v12218_v27, 5  ;;  %v11937_v27 = vshrl.u32 %v8200_v39, 16 }
  0x61   :  { %v3241_v31 = vrot.slane %v12217_v58, 6  ;;  %v8833_v58 = vsel %vm8150_vm2, %v2373_v5, %v2374_v57 }
  0x62   :  { %6804 = vmatmul.mubr.bf16.gmra.mrb[32].mxu1 %v5903_v18  ;;  %v2377_v18 = vrot.slane %v8738_v0, 5  ;;  %12220 = vst [vmem:[#allocation57_spill] sm:$0xff] %v8833_v58 }
  0x63   :  { %7124 = vmatmul.mubr.bf16.gmra.mrb[32].mxu0 %v6129_v53  ;;  %6807 = vmatprep.mubr.bf16.mxu1 %v5904_v35  ;;  %v8792_v53 = vsel %vm8150_vm2, %v2367_v38, %v2368_v24  ;;  %v3232_v35 = vrot.slane %v11920_v51, 6  ;;  %v12215_v38 = vshll.u32 %v8748_v40, 16  ;;  %v2397_v51 = vrot.slane %v8788_v28, 5 }
  0x64   :  { %7127 = vmatprep.mubr.bf16.mxu0 %v6130_v41  ;;  %12213 = vst [vmem:[#allocation55_spill] sm:$0xff] %v8792_v53  ;;  %v3235_v41 = vrot.slane %v11921_v46, 5  ;;  %v2379_v19 = vrot.slane %v2377_v18, 4  ;;  %v6132_v46 = vcombine.low %v8792_v53, %v8796_v22  ;;  %v5908_v22 = vcombine.low %v8738_v0, %v8757_v4 }
  0x65   :  { %v3236_v24 = vrot.slane %v12215_v38, 6  ;;  %v3240_v38 = vrot.slane %v12216_v32, 5  ;;  %v3233_v37 = vor.u32 %v3232_v35, %v3231_v7  ;;  %v5907_v32 = vcombine.low %v8709_v44, %v8731_v56 }
  0x66   :  { %v8841_v35 = vsel %vm8150_vm2, %v2376_v36, %v2377_v18  ;;  %v12223_v56 = vshll.u32 %v8124_v12, 16  ;;  %v8849_v5 = vsel %vm8150_vm2, %v2379_v19, %v2380_v3  ;;  %v2395_v0 = vsel %vm8150_vm2, %v2393_v61, %v2394_v33 }
  0x67   :  { %v8823_v43 = vor.u32 %v3236_v24, %v3235_v41  ;;  %12221 = vst [vmem:[#allocation58_spill] sm:$0xff] %v8841_v35  ;;  %12224 = vst [vmem:[#allocation59_spill] sm:$0xff] %v8849_v5  ;;  %v2400_v4 = vrot.slane %v73_v30, 5  ;;  %v3242_v18 = vor.u32 %v3241_v31, %v3240_v38  ;;  %v3247_v41 = vor.u32 %v3246_v16, %v3245_v13 }
  0x68   :  { %v3251_v57 = vrot.slane %v12223_v56, 6  ;;  %v11938_v24 = vshll.u32 %v8200_v39, 16  ;;  %v6133_v3 = vcombine.low %v8833_v58, %v8841_v35  ;;  %v11935_v33 = vshll.u32 %v8230_v52, 16 }
  0x69   :  { %v3239_v36 = vrot.slane %v8823_v43, 4  ;;  %v11934_v30 = vshrl.u32 %v8230_v52, 16  ;;  %v2398_v16 = vsel %vm8150_vm2, %v2396_v17, %v2397_v51  ;;  %v11940_v31 = vshll.u32 %v8184_v34, 16 }
  0x6a   :  { %6808 = vmatmul.mubr.bf16.gmra.mrb[36].mxu1 %v5905_v62  ;;  %v12222_v62 = vshrl.u32 %v8124_v12, 16  ;;  %v11939_v61 = vshrl.u32 %v8184_v34, 16  ;;  %v3244_v13 = vrot.slane %v3242_v18, 4  ;;  %v3249_v56 = vrot.slane %v3247_v41, 4 }
  0x6b   :  { %7128 = vmatmul.mubr.bf16.gmra.mrb[36].mxu0 %v6131_v25  ;;  %6811 = vmatprep.mubr.bf16.mxu1 %v5906_v10  ;;  %v2399_v10 = vrot.slane %v2397_v51, 4  ;;  %v3234_v25 = vrot.slane %v3233_v37, 4  ;;  %v6134_v37 = vcombine.low %v8849_v5, %v2395_v0 }
  0x6c   :  { %v3250_v44 = vrot.slane %v12222_v62, 5  ;;  %7131 = vmatprep.mubr.bf16.mxu0 %v6132_v46  ;;  %v11936_v46 = vshll.u32 %v8212_v45, 16  ;;  %v11933_v62 = vshrl.u32 %v8212_v45, 16 }
  0x6d   :  { %v2401_v38 = vsel %vm8150_vm2, %v2399_v10, %v2400_v4  ;;  %v3238_v0 = vsel %vm8668_vm5, %v3234_v25, %v8823_v43  ;;  %v3285_v10 = vrot.slane %v11934_v30, 5  ;;  %v3286_v4 = vrot.slane %v11935_v33, 6  ;;  %v8901_v25 = vld [vmem:[%s11875_s0 + $0x18] sm:$0xf] }
  0x6e   :  { %v3252_v19 = vor.u32 %v3251_v57, %v3250_v44  ;;  %v3275_v44 = vrot.slane %v11937_v27, 5  ;;  %v3276_v57 = vrot.slane %v11938_v24, 6  ;;  %v3280_v51 = vrot.slane %v11933_v62, 5  ;;  %v8889_v62 = vld [vmem:[%s11875_s0 + $0x10] sm:$0xf] }
  0x6f   :  { %v3281_v17 = vrot.slane %v11936_v46, 6  ;;  %v5909_v30 = vcombine.low %v8773_v54, %v8788_v28  ;;  %v5918_v33 = vcombine.low %v8743_v20, %v8748_v40  ;;  %v6135_v24 = vcombine.low %v2398_v16, %v2401_v38 }
  0x70   :  { %v3254_v7 = vrot.slane %v3252_v19, 4  ;;  %v3277_v35 = vor.u32 %v3276_v57, %v3275_v44  ;;  %v3287_v28 = vor.u32 %v3286_v4, %v3285_v10  ;;  %v11944_v16 = vshll.u32 %v8250_v59, 16 }
  0x71   :  { %v3282_v54 = vor.u32 %v3281_v17, %v3280_v51  ;;  %v11942_v38 = vshrl.u32 %v8250_v59, 16  ;;  %v11946_v44 = vshrl.u32 %v8266_v6, 16  ;;  %v8955_v51 = vld [vmem:[%s11875_s0 + $0x28] sm:$0xf] }
  0x72   :  { %6812 = vmatmul.mubr.bf16.gmra.mrb[40].mxu1 %v5907_v32  ;;  %v3243_v32 = vsel %vm8668_vm5, %v3239_v36, %v3242_v18  ;;  %v8906_v36 = vld [vmem:[%s11875_s0 + $0x1c] sm:$0xf]  ;;  %v3248_v18 = vsel %vm8668_vm5, %v3244_v13, %v3247_v41  ;;  %v8930_v46 = vsel %vm8668_vm5, %v3254_v7, %v8612_v60  ;;  %v12226_v41 = vshrl.u32 %v8218_v48, 16  ;;  %v8943_v60 = vld [vmem:[%s11875_s0 + $0x20] sm:$0xf] }
  0x73   :  { %7132 = vmatmul.mubr.bf16.gmra.mrb[40].mxu0 %v6133_v3  ;;  %6815 = vmatprep.mubr.bf16.mxu1 %v5908_v22  ;;  %v8894_v22 = vld [vmem:[%s11875_s0 + $0x14] sm:$0xf]  ;;  %v3270_v3 = vrot.slane %v11939_v61, 5  ;;  %v6160_v43 = vcombine.low %v3238_v0, %v3243_v32  ;;  %v8924_v61 = vsel %vm8668_vm5, %v3249_v56, %v3252_v19  ;;  %v12227_v19 = vshll.u32 %v8218_v48, 16  ;;  %v8948_v7 = vld [vmem:[%s11875_s0 + $0x24] sm:$0xf] }
  0x74   :  { %7135 = vmatprep.mubr.bf16.mxu0 %v6134_v37  ;;  %v3271_v37 = vrot.slane %v11940_v31, 6  ;;  %12225 = vst [vmem:[#allocation60_spill] sm:$0xff] %v8924_v61  ;;  %v3269_v31 = vrot.slane %v8650_v63, 4  ;;  %v3290_v13 = vrot.slane %v12226_v41, 5  ;;  %v11947_v63 = vshll.u32 %v8266_v6, 16 }
  0x75   :  { %v3291_v56 = vrot.slane %v12227_v19, 6  ;;  %v3279_v4 = vrot.slane %v3277_v35, 4  ;;  %v6161_v41 = vcombine.low %v3248_v18, %v8924_v61  ;;  %v6162_v19 = vcombine.low %v8930_v46, %v8680_v23 }
  0x76   :  { %v3272_v27 = vor.u32 %v3271_v37, %v3270_v3  ;;  %v3284_v3 = vrot.slane %v3282_v54, 4  ;;  %v3289_v37 = vrot.slane %v3287_v28, 4  ;;  %v3295_v57 = vrot.slane %v11942_v38, 5 }
  0x77   :  { %v3296_v17 = vrot.slane %v11944_v16, 6  ;;  %v3301_v18 = vrot.slane %v11947_v63, 6  ;;  %v11948_v0 = vshll.u32 %v8274_v8, 16  ;;  %v11949_v32 = vshrl.u32 %v8274_v8, 16  ;;  %v7890_v63 = vld [vmem:[%s11876_s1 + $0x48] sm:$0xff]  }
  0x78   :  { %v3274_v10 = vrot.slane %v3272_v27, 4  ;;  %v12229_v38 = vshrl.u32 %v8279_v9, 16  ;;  %v12230_v16 = vshll.u32 %v8279_v9, 16 }
  0x7a   :  { %6816 = vmatmul.mubr.bf16.gmra.mrb[44].mxu1 %v5909_v30  ;;  %v8960_v30 = vld [vmem:[%s11875_s0 + $0x2c] sm:$0xf]  ;;  %v3305_v5 = vrot.slane %v12229_v38, 5  ;;  %v3306_v58 = vrot.slane %v12230_v16, 6  ;;  %v9000_v38 = vsel %vm8668_vm5, %v3274_v10, %v3277_v35  ;;  %v9020_v10 = vor.u32 %v3296_v17, %v3295_v57  ;;  %v7896_v57 = vld [vmem:[%s11876_s1 + $0x50] sm:$0xff]  }
  0x7b   :  { %7136 = vmatmul.mubr.bf16.gmra.mrb[44].mxu0 %v6135_v24  ;;  %6835 = vmatprep.mubr.bf16.mxu1 %v5918_v33  ;;  %v8975_v24 = vsel %vm8668_vm5, %v3269_v31, %v3272_v27  ;;  %v8977_v33 = vor.u32 %v3291_v56, %v3290_v13  ;;  %12231 = vst [vmem:[#allocation62_spill] sm:$0xff] %v9000_v38  ;;  %v7891_v13 = vld [vmem:[%s11874_s2 + $0xc8] sm:$0xff]   ;;  %v9040_v17 = vld [vmem:[%s11874_s2 + $0xd0] sm:$0xff]  }
  0x7c   :  { %7155 = vmatprep.mubr.bf16.mxu0 %v6160_v43  ;;  %12228 = vst [vmem:[#allocation61_spill] sm:$0xff] %v8975_v24  ;;  %v3300_v43 = vrot.slane %v11946_v44, 5  ;;  %v9009_v56 = vsel %vm8668_vm5, %v3279_v4, %v3282_v54  ;;  %v9013_v44 = vsel %vm8668_vm5, %v3284_v3, %v3287_v28  ;;  %v12235_v16 = vcombine.low %v8134_v15, %v8119_v11 }
  0x7d   :  { %12232 = vst [vmem:[#allocation63_spill] sm:$0xff] %v9009_v56  ;;  %12233 = vst [vmem:[#allocation64_spill] sm:$0xff] %v9013_v44  ;;  %v9018_v35 = vsel %vm8668_vm5, %v3289_v37, %v8977_v33  ;;  %v9027_v31 = vor.u32 %v3306_v58, %v3305_v5  ;;  %v3310_v54 = vrot.slane %v11949_v32, 5  ;;  %v3311_v28 = vrot.slane %v11948_v0, 6 }
  0x7e   :  { %12234 = vst [vmem:[#allocation65_spill] sm:$0xff] %v9018_v35  ;;  %v9025_v27 = vor.u32 %v3301_v18, %v3300_v43  ;;  %v12236_v58 = vshrl.u32 %v8310_v26, 16  ;;  %v12237_v4 = vshll.u32 %v8310_v26, 16  ;;  %v12238_v37 = vshrl.u32 %v8326_v47, 16 }
  0x7f   :  { %v12240_v18 = vcombine.low %v8889_v62, %v8894_v22  ;;  %v9070_v62 = vld [vmem:[%s11875_s0 + $0x34] sm:$0xf]  ;;  %v9088_v22 = vld [vmem:[%s11875_s0 + $0x3c] sm:$0xf]  ;;  %v12244_v26 = vshll.u32 %v8334_v50, 16 }
  0x80   :  { %v3315_v5 = vrot.slane %v12236_v58, 5  ;;  %v3316_v3 = vrot.slane %v12237_v4, 6  ;;  %v12241_v58 = vshrl.u32 %v8347_v55, 16  ;;  %v12242_v4 = vshll.u32 %v8347_v55, 16 }
  0x81   :  { %v12243_v55 = vshrl.u32 %v8334_v50, 16  ;;  %v3331_v8 = vrot.slane %v12244_v26, 6  ;;  %v12247_v26 = vshll.u32 %v8367_v1, 16 }
  0x82   :  { %6836 = vmatmul.mubr.bf16.vlgmr.msra.gmra.mrb[0].mxu1 %v12235_v16  ;;  %v3325_v32 = vrot.slane %v12241_v58, 5  ;;  %v3326_v53 = vrot.slane %v12242_v4, 6  ;;  %v3294_v58 = vrot.slane %v8977_v33, 4  ;;  %v3299_v4 = vrot.slane %v9020_v10, 4  ;;  %v9083_v16 = vld [vmem:[%s11875_s0 + $0x38] sm:$0xf] }
  0x83   :  { %7156 = vmatmul.mubr.bf16.vlgmr.msra.gmra.mrb[0].mxu0 %v6161_v41  ;;  %6884 = vmatpush3.bf16.msra.mxu1 %v8489_v14  ;;  %v3320_v41 = vrot.slane %v12238_v37, 5  ;;  %v12239_v14 = vshll.u32 %v8326_v47, 16  ;;  %v6164_v37 = vcombine.low %v9000_v38, %v9009_v56  ;;  %v3309_v33 = vrot.slane %v9027_v31, 4 }
  0x84   :  { %7204 = vmatpush3.bf16.msra.mxu0 %v8496_v49  ;;  %6839 = vmatprep.mubr.bf16.mxu1 %v12240_v18  ;;  %v9065_v49 = vld [vmem:[%s11875_s0 + $0x30] sm:$0xf]  ;;  %v3304_v18 = vrot.slane %v9025_v27, 4  ;;  %v3317_v0 = vor.u32 %v3316_v3, %v3315_v5  ;;  %v3327_v23 = vor.u32 %v3326_v53, %v3325_v32  ;;  %v3330_v47 = vrot.slane %v12243_v55, 5 }
  0x85   :  { %v3321_v43 = vrot.slane %v12239_v14, 6  ;;  %7159 = vmatprep.mubr.bf16.mxu0 %v6162_v19  ;;  %6885 = vmatprep.subr.bf16.mxu1 %v7890_v63  ;;  %v3312_v19 = vor.u32 %v3311_v28, %v3310_v54  ;;  %v9105_v54 = vld [vmem:[%s11875_s0 + $0x58] sm:$0xf]  ;;  %v12246_v55 = vshrl.u32 %v8367_v1, 16  ;;  %v3336_v28 = vrot.slane %v12247_v26, 6 }
  0x86   :  { %7205 = vmatprep.subr.bf16.mxu0 %v7891_v13  ;;  %12245 = vst [vmem:[#allocation66_spill] sm:$0xff] %v9105_v54  ;;  %v11962_v53 = vshrl.u32 %v9105_v54, 16  ;;  %v12248_v5 = vcombine.low %v8901_v25, %v8906_v36  ;;  %v9119_v3 = vsel %vm8668_vm5, %v3294_v58, %v9020_v10  ;;  %v7901_v25 = vld [vmem:[%s11874_s2 + $0xd8] sm:$0xff]   ;;  %v11964_v10 = vshrl.u32 %v8407_v42, 16 }
  0x87   :  { %6886 = vmatpush3.bf16.msra.mxu1 %v7890_v63  ;;  %v3322_v21 = vor.u32 %v3321_v43, %v3320_v41  ;;  %v7900_v63 = vld [vmem:[%s11876_s1 + $0x58] sm:$0xff]   ;;  %v3335_v32 = vrot.slane %v12246_v55, 5  ;;  %12249 = vst [vmem:[#allocation67_spill] sm:$0xff] %v9119_v3  ;;  %v9124_v41 = vld [vmem:[%s11875_s0 + $0x40] sm:$0xf]  ;;  %v12250_v58 = vcombine.low %v8685_v29, %v8975_v24  ;;  %v12251_v26 = vcombine.low %v8943_v60, %v8948_v7 }
  0x88   :  { %7206 = vmatpush3.bf16.msra.mxu0 %v7891_v13  ;;  %6887 = vmatprep.subr.bf16.mxu1 %v7896_v57  ;;  %v11963_v13 = vshll.u32 %v9105_v54, 16  ;;  %v9129_v43 = vld [vmem:[%s11875_s0 + $0x44] sm:$0xf]  ;;  %v9152_v55 = vsel %vm8668_vm5, %v3304_v18, %v9027_v31  ;;  %v3314_v14 = vrot.slane %v3312_v19, 4  ;;  %v3319_v36 = vrot.slane %v3317_v0, 4 }
  0x89   :  { %7207 = vmatprep.subr.bf16.mxu0 %v9040_v17  ;;  %12253 = vst [vmem:[#allocation69_spill] sm:$0xff] %v9152_v55  ;;  %v3324_v60 = vrot.slane %v3322_v21, 4  ;;  %v3329_v7 = vrot.slane %v3327_v23, 4  ;;  %v3345_v18 = vrot.slane %v11964_v10, 5  ;;  %v9200_v10 = vld [vmem:[%s11875_s0 + $0x48] sm:$0xf] }
  0x8a   :  { %6840 = vmatmul.mubr.bf16.gmra.mrb[4].mxu1 %v12248_v5  ;;  %v9147_v5 = vsel %vm8668_vm5, %v3299_v4, %v9025_v27  ;;  %v3337_v27 = vor.u32 %v3336_v28, %v3335_v32  ;;  %v3340_v4 = vrot.slane %v11962_v53, 5  ;;  %v3341_v31 = vrot.slane %v11963_v13, 6  ;;  %v7907_v28 = vld [vmem:[%s11874_s2 + $0xe0] sm:$0xff]   ;;  %v9421_v24 = vld [vmem:[%s11875_s0 + $0x98] sm:$0xf] }
  0x8b   :  { %7160 = vmatmul.mubr.bf16.gmra.mrb[4].mxu0 %v12250_v58  ;;  %6843 = vmatprep.mubr.bf16.mxu1 %v12251_v26  ;;  %12252 = vst [vmem:[#allocation68_spill] sm:$0xff] %v9147_v5  ;;  %v9156_v58 = vsel %vm8668_vm5, %v3309_v33, %v3312_v19  ;;  %v3332_v26 = vor.u32 %v3331_v8, %v3330_v47  ;;  %v9172_v8 = vld [vmem:[%s11875_s0 + $0x70] sm:$0xf]  ;;  %v7906_v47 = vld [vmem:[%s11876_s1 + $0x60] sm:$0xff]   ;;  %v12257_v33 = vshll.u32 %v8407_v42, 16  ;;  %12295 = vst [vmem:[#allocation88_spill] sm:$0xff] %v9421_v24 }
  0x8c   :  { %7163 = vmatprep.mubr.bf16.mxu0 %v6164_v37  ;;  %12254 = vst [vmem:[#allocation70_spill] sm:$0xff] %v9156_v58  ;;  %6888 = vmatpush3.bf16.msra.mxu1 %v7896_v57  ;;  %v9166_v37 = vld [vmem:[%s11875_s0 + $0x60] sm:$0xf]  ;;  %12256 = vst [vmem:[#allocation72_spill] sm:$0xff] %v9172_v8  ;;  %v9191_v13 = vsel %vm8668_vm5, %v3314_v14, %v3317_v0  ;;  %v9195_v19 = vsel %vm8668_vm5, %v3319_v36, %v3322_v21  ;;  %v9212_v0 = vld [vmem:[%s11875_s0 + $0x74] sm:$0xf] }
  0x8d   :  { %7208 = vmatpush3.bf16.msra.mxu0 %v9040_v17  ;;  %6889 = vmatprep.subr.bf16.mxu1 %v7900_v63  ;;  %12255 = vst [vmem:[#allocation71_spill] sm:$0xff] %v9166_v37  ;;  %v6166_v17 = vcombine.low %v9119_v3, %v9147_v5  ;;  %v3346_v32 = vrot.slane %v12257_v33, 6  ;;  %12258 = vst [vmem:[#allocation73_spill] sm:$0xff] %v9191_v13  ;;  %v9205_v33 = vld [vmem:[%s11875_s0 + $0x4c] sm:$0xf]  ;;  %v9216_v21 = vsel %vm8668_vm5, %v3324_v60, %v3327_v23 }
  0x8e   :  { %7209 = vmatprep.subr.bf16.mxu0 %v7901_v25  ;;  %12259 = vst [vmem:[#allocation74_spill] sm:$0xff] %v9195_v19  ;;  %12260 = vst [vmem:[#allocation75_spill] sm:$0xff] %v9212_v0  ;;  %v3334_v14 = vrot.slane %v3332_v26, 4  ;;  %v11974_v36 = vshrl.u32 %v9172_v8, 16  ;;  %v9222_v42 = vsel %vm8668_vm5, %v3329_v7, %v3332_v26  ;;  %v3339_v53 = vrot.slane %v3337_v27, 4 }
  0x8f   :  { %12261 = vst [vmem:[#allocation76_spill] sm:$0xff] %v9222_v42  ;;  %v3342_v1 = vor.u32 %v3341_v31, %v3340_v4  ;;  %v12262_v50 = vshrl.u32 %v9166_v37, 16  ;;  %v9229_v23 = vld [vmem:[%s11875_s0 + $0x78] sm:$0xf]  ;;  %v12264_v60 = vcombine.low %v8955_v51, %v8960_v30  ;;  %v12265_v7 = vshll.u32 %v9166_v37, 16  ;;  %v7911_v31 = vld [vmem:[%s11874_s2 + $0xe8] sm:$0xff]  }
  0x90   :  { %6890 = vmatpush3.bf16.msra.mxu1 %v7900_v63  ;;  %12263 = vst [vmem:[#allocation77_spill] sm:$0xff] %v9229_v23  ;;  %v7910_v63 = vld [vmem:[%s11876_s1 + $0x68] sm:$0xff]   ;;  %v12266_v57 = vcombine.low %v9013_v44, %v9018_v35  ;;  %v12267_v51 = vcombine.low %v9065_v49, %v9070_v62  ;;  %v6168_v30 = vcombine.low %v9191_v13, %v9195_v19  ;;  %v9267_v49 = vld [vmem:[%s11875_s0 + $0x5c] sm:$0xf]  ;;  %v12276_v13 = vshrl.u32 %v9229_v23, 16 }
  0x91   :  { %7210 = vmatpush3.bf16.msra.mxu0 %v7901_v25  ;;  %v3350_v29 = vrot.slane %v12262_v50, 5  ;;  %6891 = vmatprep.subr.bf16.mxu1 %v7906_v47  ;;  %v3347_v25 = vor.u32 %v3346_v32, %v3345_v18  ;;  %v3351_v26 = vrot.slane %v12265_v7, 6  ;;  %v9255_v18 = vld [vmem:[%s11875_s0 + $0x50] sm:$0xf]  ;;  %v9260_v32 = vld [vmem:[%s11875_s0 + $0x54] sm:$0xf]  ;;  %v9281_v37 = vsel %vm8668_vm5, %v3334_v14, %v3337_v27 }
  0x92   :  { %6844 = vmatmul.mubr.bf16.gmra.mrb[8].mxu1 %v12264_v60  ;;  %7211 = vmatprep.subr.bf16.mxu0 %v7907_v28  ;;  %v12268_v50 = vshll.u32 %v9172_v8, 16  ;;  %12269 = vst [vmem:[#allocation78_spill] sm:$0xff] %v9281_v37  ;;  %v3344_v62 = vrot.slane %v3342_v1, 4  ;;  %v12273_v27 = vshll.u32 %v9212_v0, 16  ;;  %v3363_v5 = vrot.slane %v12276_v13, 5 }
  0x93   :  { %7164 = vmatmul.mubr.bf16.gmra.mrb[8].mxu0 %v12266_v57  ;;  %6847 = vmatprep.mubr.bf16.mxu1 %v12267_v51  ;;  %v3354_v51 = vrot.slane %v11974_v36, 5  ;;  %v7916_v36 = vld [vmem:[%s11876_s1 + $0x70] sm:$0xff]   ;;  %v12272_v57 = vshrl.u32 %v9212_v0, 16  ;;  %v11998_v38 = vshll.u32 %v9421_v24, 16 }
  0x94   :  { %7167 = vmatprep.mubr.bf16.mxu0 %v6166_v17  ;;  %v3355_v4 = vrot.slane %v12268_v50, 6  ;;  %6892 = vmatpush3.bf16.msra.mxu1 %v7906_v47  ;;  %v9285_v17 = vsel %vm8668_vm5, %v3339_v53, %v3342_v1  ;;  %v3349_v50 = vrot.slane %v3347_v25, 4  ;;  %v9290_v47 = vor.u32 %v3351_v26, %v3350_v29  ;;  %v7917_v1 = vld [vmem:[%s11874_s2 + $0xf0] sm:$0xff]   ;;  %v9302_v53 = vld [vmem:[%s11875_s0 + $0x7c] sm:$0xf] }
  0x95   :  { %12270 = vst [vmem:[#allocation79_spill] sm:$0xff] %v9285_v17  ;;  %7212 = vmatpush3.bf16.msra.mxu0 %v7907_v28  ;;  %6893 = vmatprep.subr.bf16.mxu1 %v7910_v63  ;;  %v3358_v60 = vrot.slane %v12272_v57, 5  ;;  %v3359_v14 = vrot.slane %v12273_v27, 6  ;;  %12274 = vst [vmem:[#allocation81_spill] sm:$0xff] %v9302_v53  ;;  %v9309_v26 = vld [vmem:[%s11875_s0 + $0x84] sm:$0xf]  ;;  %v9323_v3 = vsel %vm8668_vm5, %v3344_v62, %v3347_v25 }
  0x96   :  { %12271 = vst [vmem:[#allocation80_spill] sm:$0xff] %v9290_v47  ;;  %7213 = vmatprep.subr.bf16.mxu0 %v7911_v31  ;;  %12275 = vst [vmem:[#allocation82_spill] sm:$0xff] %v9309_v26  ;;  %v11986_v27 = vshrl.u32 %v9309_v26, 16  ;;  %v3356_v19 = vor.u32 %v3355_v4, %v3354_v51  ;;  %v12277_v28 = vshll.u32 %v9229_v23, 16  ;;  %v9328_v57 = vld [vmem:[%s11875_s0 + $0x80] sm:$0xf]  ;;  %v12280_v51 = vcombine.low %v9083_v16, %v9088_v22 }
  0x97   :  { %12278 = vst [vmem:[#allocation83_spill] sm:$0xff] %v9323_v3  ;;  %12279 = vst [vmem:[#allocation84_spill] sm:$0xff] %v9328_v57  ;;  %v9341_v25 = vsel %vm8668_vm5, %v3349_v50, %v9290_v47  ;;  %v9343_v62 = vor.u32 %v3359_v14, %v3358_v60  ;;  %v7921_v16 = vld [vmem:[%s11874_s2 + $0xf8] sm:$0xff]   ;;  %v12282_v22 = vcombine.low %v9152_v55, %v9156_v58  ;;  %v12284_v50 = vshrl.u32 %v9302_v53, 16 }
  0x98   :  { %v3364_v35 = vrot.slane %v12277_v28, 6  ;;  %6894 = vmatpush3.bf16.msra.mxu1 %v7910_v63  ;;  %v7920_v63 = vld [vmem:[%s11876_s1 + $0x78] sm:$0xff]   ;;  %12281 = vst [vmem:[#allocation85_spill] sm:$0xff] %v9341_v25  ;;  %v12283_v60 = vcombine.low %v9124_v41, %v9129_v43  ;;  %v3378_v28 = vrot.slane %v11986_v27, 5  ;;  %v12286_v7 = vshll.u32 %v9309_v26, 16 }
  0x99   :  { %7214 = vmatpush3.bf16.msra.mxu0 %v7911_v31  ;;  %6895 = vmatprep.subr.bf16.mxu1 %v7916_v36  ;;  %v9348_v31 = vld [vmem:[%s11875_s0 + $0x88] sm:$0xf]  ;;  %v3368_v14 = vrot.slane %v12284_v50, 5  ;;  %v3357_v13 = vrot.slane %v3356_v19, 4  ;;  %v9374_v41 = vld [vmem:[%s11875_s0 + $0x8c] sm:$0xf] }
  0x9a   :  { %6848 = vmatmul.mubr.bf16.gmra.mrb[12].mxu1 %v12280_v51  ;;  %7215 = vmatprep.subr.bf16.mxu0 %v7917_v1  ;;  %v12285_v51 = vshll.u32 %v9302_v53, 16  ;;  %v3379_v4 = vrot.slane %v12286_v7, 6  ;;  %v9369_v47 = vor.u32 %v3364_v35, %v3363_v5  ;;  %v9385_v35 = vld [vmem:[%s11875_s0 + $0x94] sm:$0xf]  ;;  %v9401_v43 = vld [vmem:[%s11875_s0 + $0x90] sm:$0xf] }
  0x9b   :  { %7168 = vmatmul.mubr.bf16.gmra.mrb[12].mxu0 %v12282_v22  ;;  %6851 = vmatprep.mubr.bf16.mxu1 %v12283_v60  ;;  %v12287_v60 = vshrl.u32 %v9328_v57, 16  ;;  %12289 = vst [vmem:[#allocation86_spill] sm:$0xff] %v9385_v35  ;;  %12292 = vst [vmem:[#allocation87_spill] sm:$0xff] %v9401_v43  ;;  %v9408_v19 = vld [vmem:[%s11876_s1 + $0x100] sm:$0xff]   ;;  %v12293_v56 = vshrl.u32 %v9374_v41, 16 }
  0x9c   :  { %v3369_v29 = vrot.slane %v12285_v51, 6  ;;  %7171 = vmatprep.mubr.bf16.mxu0 %v6168_v30  ;;  %6896 = vmatpush3.bf16.msra.mxu1 %v7916_v36  ;;  %v12288_v51 = vshll.u32 %v9328_v57, 16  ;;  %v9392_v36 = vld [vmem:[%s11874_s2 + $0x40] sm:$0xff]   ;;  %v12290_v30 = vshrl.u32 %v9348_v31, 16  ;;  %v3380_v58 = vor.u32 %v3379_v4, %v3378_v28 }
  0x9d   :  { %v3373_v50 = vrot.slane %v12287_v60, 5  ;;  %7216 = vmatpush3.bf16.msra.mxu0 %v7917_v1  ;;  %6897 = vmatprep.subr.bf16.mxu1 %v7920_v63  ;;  %v3367_v55 = vrot.slane %v9369_v47, 4  ;;  %v3388_v5 = vrot.slane %v12293_v56, 5  ;;  %v12294_v1 = vshll.u32 %v9374_v41, 16 }
  0x9e   :  { %v3374_v7 = vrot.slane %v12288_v51, 6  ;;  %v3383_v60 = vrot.slane %v12290_v30, 5  ;;  %v12291_v51 = vshll.u32 %v9348_v31, 16  ;;  %7217 = vmatprep.subr.bf16.mxu0 %v7921_v16  ;;  %v3362_v30 = vrot.slane %v9343_v62, 4 }
  0x9f   :  { %v3370_v22 = vor.u32 %v3369_v29, %v3368_v14  ;;  %v3389_v44 = vrot.slane %v12294_v1, 6  ;;  %v12296_v4 = vshrl.u32 %v9385_v35, 16  ;;  %v12297_v14 = vshll.u32 %v9385_v35, 16 }
  0xa0   :  { %v3384_v27 = vrot.slane %v12291_v51, 6  ;;  %6898 = vmatpush3.bf16.msra.mxu1 %v7920_v63  ;;  %v3375_v61 = vor.u32 %v3374_v7, %v3373_v50  ;;  %v12298_v1 = vcombine.low %v9200_v10, %v9205_v33  ;;  %v3361_v63 = vsel %vm8668_vm5, %v3357_v13, %v9343_v62 }
  0xa1   :  { %v3398_v28 = vrot.slane %v12296_v4, 5  ;;  %v3399_v56 = vrot.slane %v12297_v14, 6  ;;  %7218 = vmatpush3.bf16.msra.mxu0 %v7921_v16  ;;  %6947 = vmatprep.subr.bf16.mxu1 %v9392_v36  ;;  %v12299_v7 = vshrl.u32 %v9401_v43, 16  ;;  %v12300_v4 = vshll.u32 %v9401_v43, 16 }
  0xa2   :  { %6852 = vmatmul.mubr.bf16.gmra.mrb[16].mxu1 %v12298_v1  ;;  %v3385_v50 = vor.u32 %v3384_v27, %v3383_v60  ;;  %7267 = vmatprep.subr.bf16.mxu0 %v9408_v19  ;;  %v12301_v16 = vcombine.low %v9216_v21, %v9222_v42  ;;  %v12302_v10 = vcombine.low %v9255_v18, %v9260_v32  ;;  %v3372_v27 = vrot.slane %v3370_v22, 4 }
  0xa3   :  { %v3393_v51 = vrot.slane %v12299_v7, 5  ;;  %v3394_v29 = vrot.slane %v12300_v4, 6  ;;  %v3366_v33 = vsel %vm8668_vm5, %v3362_v30, %v9369_v47  ;;  %v3377_v13 = vrot.slane %v3375_v61, 4  ;;  %v9464_v4 = vld [vmem:[%s11875_s0 + $0x9c] sm:$0xf] }
  0xa4   :  { %7172 = vmatmul.mubr.bf16.gmra.mrb[16].mxu0 %v12301_v16  ;;  %6855 = vmatprep.mubr.bf16.mxu1 %v12302_v10  ;;  %v3382_v62 = vrot.slane %v3380_v58, 4  ;;  %v12303_v60 = vcombine.low %v9281_v37, %v9285_v17  ;;  %v6171_v14 = vcombine.low %v9323_v3, %v9341_v25  ;;  %v3390_v7 = vor.u32 %v3389_v44, %v3388_v5 }
  0xa5   :  { %v3404_v18 = vrot.slane %v11998_v38, 6  ;;  %v3400_v32 = vor.u32 %v3399_v56, %v3398_v28  ;;  %v12304_v47 = vshrl.u32 %v9421_v24, 16  ;;  %12305 = vst [vmem:[#allocation89_spill] sm:$0xff] %v9464_v4  ;;  %v12000_v16 = vshll.u32 %v9464_v4, 16 }
  0xa6   :  { %7175 = vmatprep.mubr.bf16.mxu0 %v12303_v60  ;;  %v11999_v10 = vshrl.u32 %v9464_v4, 16  ;;  %v6172_v60 = vcombine.low %v3361_v63, %v3366_v33  ;;  %v3387_v5 = vrot.slane %v3385_v50, 4  ;;  %v3395_v1 = vor.u32 %v3394_v29, %v3393_v51  ;;  %v9487_v51 = vld [vmem:[%s11875_s0 + $0xa0] sm:$0xf] }
  0xa7   :  { %v3403_v30 = vrot.slane %v12304_v47, 5  ;;  %v3371_v28 = vsel %vm8668_vm5, %v3367_v55, %v3370_v22  ;;  %v9474_v56 = vsel %vm8668_vm5, %v3372_v27, %v3375_v61  ;;  %v9478_v47 = vsel %vm8668_vm5, %v3377_v13, %v3380_v58  ;;  %12309 = vst [vmem:[#allocation93_spill] sm:$0xff] %v9487_v51 }
  0xa8   :  { %12306 = vst [vmem:[#allocation90_spill] sm:$0xff] %v9474_v56  ;;  %12307 = vst [vmem:[#allocation91_spill] sm:$0xff] %v9478_v47  ;;  %v9482_v38 = vsel %vm8668_vm5, %v3382_v62, %v3385_v50  ;;  %v3392_v63 = vrot.slane %v3390_v7, 4  ;;  %v3397_v33 = vrot.slane %v3395_v1, 4  ;;  %v12003_v61 = vshrl.u32 %v9487_v51, 16 }
  0xa9   :  { %12308 = vst [vmem:[#allocation92_spill] sm:$0xff] %v9482_v38  ;;  %v3402_v22 = vrot.slane %v3400_v32, 4  ;;  %v9491_v29 = vor.u32 %v3404_v18, %v3403_v30  ;;  %v3408_v58 = vrot.slane %v11999_v10, 5  ;;  %v3409_v50 = vrot.slane %v12000_v16, 6  ;;  %v12314_v10 = vld [vmem:[#allocation3_spill] sm:$0xff] }
  0xaa   :  { %v12310_v27 = vcombine.low %v9105_v54, %v9267_v49  ;;  %v6173_v13 = vcombine.low %v3371_v28, %v9474_v56  ;;  %v6174_v62 = vcombine.low %v9478_v47, %v9482_v38  ;;  %v9505_v44 = vsel %vm8668_vm5, %v3387_v5, %v3390_v7  ;;  %v9515_v49 = vld [vmem:[%s11875_s0 + $0xa4] sm:$0xf] }
  0xab   :  { %12311 = vst [vmem:[#allocation94_spill] sm:$0xff] %v9505_v44  ;;  %v12312_v30 = vcombine.low %v9172_v8, %v9212_v0  ;;  %12313 = vst [vmem:[#allocation95_spill] sm:$0xff] %v9515_v49  ;;  %v12315_v7 = vshll.u32 %v12314_v10, 16  ;;  %v12316_v16 = vshrl.u32 %v12314_v10, 16  ;;  %v9531_v18 = vsel %vm8668_vm5, %v3397_v33, %v3400_v32  ;;  %v9549_v33 = vld [vmem:[%s11875_s0 + $0xa8] sm:$0xf] }
  0xac   :  { %6856 = vmatmul.mubr.bf16.gmra.mrb[20].mxu1 %v12310_v27  ;;  %7176 = vmatmul.mubr.bf16.gmra.mrb[20].mxu0 %v6171_v14  ;;  %12318 = vst [vmem:[#allocation96_spill] sm:$0xff] %v9531_v18  ;;  %v3413_v28 = vrot.slane %v12003_v61, 5  ;;  %v12319_v27 = vld [vmem:[#allocation4_spill] sm:$0xff]  ;;  %v9540_v10 = vsel %vm8668_vm5, %v3402_v22, %v9491_v29  ;;  %v3407_v32 = vrot.slane %v9491_v29, 4  ;;  %12323 = vst [vmem:[#allocation97_spill] sm:$0xff] %v9549_v33  ;;  %v12334_v25 = vshrl.u32 %v9549_v33, 16 }
  0xad   :  { %6859 = vmatprep.mubr.bf16.mxu1 %v12312_v30  ;;  %v9521_v5 = vrot.slane %v12315_v7, 5  ;;  %v915_v14 = vrot.slane %v12316_v16, 4  ;;  %7179 = vmatprep.mubr.bf16.mxu0 %v6172_v60  ;;  %v9527_v30 = vsel %vm8668_vm5, %v3392_v63, %v3395_v1  ;;  %v12320_v55 = vshll.u32 %v12319_v27, 16  ;;  %12321 = vst [vmem:[#allocation4_spill] sm:$0xff] %v9540_v10  ;;  %v9562_v29 = vld [vmem:[%s11875_s0 + $0xac] sm:$0xf] }
  0xae   :  { %12317 = vst [vmem:[#allocation3_spill] sm:$0xff] %v9527_v30  ;;  %v3410_v16 = vor.u32 %v3409_v50, %v3408_v58  ;;  %v12322_v60 = vshll.u32 %v9487_v51, 16  ;;  %v12324_v22 = vshrl.u32 %v12319_v27, 16  ;;  %v12325_v58 = vshrl.u32 %v9515_v49, 16  ;;  %12327 = vst [vmem:[#allocation98_spill] sm:$0xff] %v9562_v29 }
  0xaf   :  { %v921_v38 = vrot.slane %v12320_v55, 5  ;;  %v916_v63 = vor.u32 %v915_v14, %v9521_v5  ;;  %v12329_v56 = vcombine.low %v9229_v23, %v9302_v53  ;;  %v12331_v55 = vld [vmem:[#allocation6_spill] sm:$0xff]  ;;  %v3423_v53 = vrot.slane %v12334_v25, 5  ;;  %v9607_v25 = vld [vmem:[%s11875_s0 + $0xb8] sm:$0xf] }
  0xb0   :  { %v3414_v1 = vrot.slane %v12322_v60, 6  ;;  %v925_v61 = vrot.slane %v12324_v22, 4  ;;  %v3418_v50 = vrot.slane %v12325_v58, 5  ;;  %v12326_v60 = vshll.u32 %v9515_v49, 16  ;;  %v9569_v58 = vld [vmem:[%s11875_s0 + $0xb4] sm:$0xf] }
  0xb1   :  { %v917_v7 = vrot.slane %v916_v63, 4  ;;  %v3412_v22 = vrot.slane %v3410_v16, 4  ;;  %12328 = vst [vmem:[#allocation99_spill] sm:$0xff] %v9569_v58  ;;  %v9579_v63 = vld [vmem:[%s11875_s0 + $0xb0] sm:$0xf]  ;;  %v12332_v17 = vshll.u32 %v12331_v55, 16 }
  0xb2   :  { %v3419_v14 = vrot.slane %v12326_v60, 6  ;;  %v926_v27 = vor.u32 %v925_v61, %v921_v38  ;;  %v3415_v47 = vor.u32 %v3414_v1, %v3413_v28  ;;  %12330 = vst [vmem:[#allocation100_spill] sm:$0xff] %v9579_v63  ;;  %v12333_v60 = vcombine.low %v9328_v57, %v9309_v26 }
  0xb3   :  { %v9585_v3 = vrot.slane %v12332_v17, 5  ;;  %v12335_v23 = vshll.u32 %v9549_v33, 16  ;;  %v12336_v61 = vshrl.u32 %v9562_v29, 16 }
  0xb4   :  { %6860 = vmatmul.mubr.bf16.gmra.mrb[24].mxu1 %v12329_v56  ;;  %v927_v1 = vrot.slane %v926_v27, 4  ;;  %7180 = vmatmul.mubr.bf16.gmra.mrb[24].mxu0 %v6173_v13  ;;  %v3420_v56 = vor.u32 %v3419_v14, %v3418_v50  ;;  %v12339_v13 = vshll.u32 %v9562_v29, 16  ;;  %v9612_v50 = vsel %vm9598_vm8, %v917_v7, %v921_v38 }
  0xb5   :  { %6863 = vmatprep.mubr.bf16.mxu1 %v12333_v60  ;;  %v3424_v0 = vrot.slane %v12335_v23, 6  ;;  %v3428_v28 = vrot.slane %v12336_v61, 5  ;;  %7183 = vmatprep.mubr.bf16.mxu0 %v6174_v62  ;;  %12340 = vst [vmem:[#allocation6_spill] sm:$0xff] %v9612_v50  ;;  %v12342_v60 = vshrl.u32 %v9569_v58, 16  ;;  %v6175_v38 = vcombine.low %v9505_v44, %v9527_v30 }
  0xb6   :  { %v3429_v27 = vrot.slane %v12339_v13, 6  ;;  %v9617_v14 = vsel %vm9598_vm8, %v927_v1, %v9585_v3  ;;  %v12343_v13 = vshll.u32 %v9569_v58, 16  ;;  %v5935_v7 = vcombine.low %v9421_v24, %v9464_v4 }
  0xb7   :  { %12341 = vst [vmem:[#allocation101_spill] sm:$0xff] %v9617_v14  ;;  %v3438_v61 = vrot.slane %v12342_v60, 5  ;;  %v12344_v1 = vshrl.u32 %v9579_v63, 16  ;;  %v12345_v62 = vshll.u32 %v9579_v63, 16  ;;  %v6176_v60 = vcombine.low %v9531_v18, %v9540_v10 }
  0xb8   :  { %v3439_v26 = vrot.slane %v12343_v13, 6  ;;  %v9638_v13 = vsel %vm8668_vm5, %v3407_v32, %v3410_v16  ;;  %v9642_v23 = vsel %vm8668_vm5, %v3412_v22, %v3415_v47  ;;  %v3417_v30 = vrot.slane %v3415_v47, 4  ;;  %v9651_v16 = vld [vmem:[%s11875_s0 + $0xbc] sm:$0xf]  ;;  %v9663_v47 = vld [vmem:[%s11875_s0 + $0xc4] sm:$0xf] }
  0xb9   :  { %v3433_v57 = vrot.slane %v12344_v1, 5  ;;  %v3434_v8 = vrot.slane %v12345_v62, 6  ;;  %12346 = vst [vmem:[#allocation102_spill] sm:$0xff] %v9638_v13  ;;  %12347 = vst [vmem:[#allocation103_spill] sm:$0xff] %v9642_v23  ;;  %v3422_v44 = vrot.slane %v3420_v56, 4  ;;  %v3425_v4 = vor.u32 %v3424_v0, %v3423_v53 }
  0xba   :  { %v3430_v24 = vor.u32 %v3429_v27, %v3428_v28  ;;  %v12348_v1 = vshll.u32 %v9607_v25, 16  ;;  %v3440_v37 = vor.u32 %v3439_v26, %v3438_v61  ;;  %v12349_v62 = vshrl.u32 %v9607_v25, 16 }
  0xbb   :  { %v12044_v22 = vshrl.u32 %v9651_v16, 16  ;;  %v12350_v0 = vcombine.low %v9348_v31, %v9374_v41  ;;  %v5936_v53 = vcombine.low %v9487_v51, %v9515_v49  ;;  %v3435_v26 = vor.u32 %v3434_v8, %v3433_v57  ;;  %v9679_v57 = vld [vmem:[%s11875_s0 + $0xc0] sm:$0xf]  ;;  %v9709_v51 = vld [vmem:[%s11875_s0 + $0xcc] sm:$0xf] }
  0xbc   :  { %v3444_v42 = vrot.slane %v12348_v1, 6  ;;  %v3443_v54 = vrot.slane %v12349_v62, 5  ;;  %7184 = vmatmul.mubr.bf16.gmra.mrb[28].mxu0 %v6175_v38  ;;  %v12351_v61 = vcombine.low %v9401_v43, %v9385_v35  ;;  %v6177_v1 = vcombine.low %v9638_v13, %v9642_v23  ;;  %v9694_v62 = vld [vmem:[%s11875_s0 + $0xc8] sm:$0xf]  ;;  %12360 = vst [vmem:[#allocation107_spill] sm:$0xff] %v9709_v51 }
  0xbd   :  { %6864 = vmatmul.mubr.bf16.gmra.mrb[28].mxu1 %v12350_v0  ;;  %v9674_v8 = vsel %vm8668_vm5, %v3417_v30, %v3420_v56  ;;  %7187 = vmatprep.mubr.bf16.mxu0 %v6176_v60  ;;  %v9685_v0 = vsel %vm8668_vm5, %v3422_v44, %v3425_v4  ;;  %v3432_v28 = vrot.slane %v3430_v24, 4  ;;  %v3437_v27 = vrot.slane %v3435_v26, 4  ;;  %12355 = vst [vmem:[#allocation106_spill] sm:$0xff] %v9694_v62 }
  0xbe   :  { %6867 = vmatprep.mubr.bf16.mxu1 %v12351_v61  ;;  %12352 = vst [vmem:[#allocation104_spill] sm:$0xff] %v9674_v8  ;;  %12353 = vst [vmem:[#allocation105_spill] sm:$0xff] %v9685_v0  ;;  %v3427_v61 = vrot.slane %v3425_v4, 4  ;;  %v3442_v32 = vrot.slane %v3440_v37, 4  ;;  %v3445_v30 = vor.u32 %v3444_v42, %v3443_v54  ;;  %v3448_v56 = vrot.slane %v12044_v22, 5 }
  0xbf   :  { %v12354_v23 = vshll.u32 %v9651_v16, 16  ;;  %v12356_v4 = vshrl.u32 %v9663_v47, 16  ;;  %v12357_v42 = vshll.u32 %v9663_v47, 16  ;;  %v12358_v22 = vshrl.u32 %v9679_v57, 16 }
  0xc0   :  { %v9725_v18 = vsel %vm8668_vm5, %v3432_v28, %v3435_v26  ;;  %v9729_v60 = vsel %vm8668_vm5, %v3437_v27, %v3440_v37  ;;  %v9733_v44 = vsel %vm8668_vm5, %v3442_v32, %v3445_v30  ;;  %v9742_v26 = vld [vmem:[%s11875_s0 + $0xd0] sm:$0xf]  ;;  %v12369_v27 = vshll.u32 %v9709_v51, 16 }
  0xc1   :  { %v3449_v10 = vrot.slane %v12354_v23, 6  ;;  %v3458_v38 = vrot.slane %v12356_v4, 5  ;;  %v3459_v54 = vrot.slane %v12357_v42, 6  ;;  %v3453_v13 = vrot.slane %v12358_v22, 5  ;;  %12362 = vst [vmem:[#allocation109_spill] sm:$0xff] %v9725_v18  ;;  %12363 = vst [vmem:[#allocation110_spill] sm:$0xff] %v9729_v60 }
  0xc2   :  { %v12359_v23 = vshll.u32 %v9679_v57, 16  ;;  %v6178_v4 = vcombine.low %v9674_v8, %v9685_v0  ;;  %v5937_v42 = vcombine.low %v9549_v33, %v9562_v29  ;;  %v9719_v22 = vsel %vm8668_vm5, %v3427_v61, %v3430_v24  ;;  %12364 = vst [vmem:[#allocation111_spill] sm:$0xff] %v9733_v44  ;;  %12367 = vst [vmem:[#allocation112_spill] sm:$0xff] %v9742_v26 }
  0xc3   :  { %12361 = vst [vmem:[#allocation108_spill] sm:$0xff] %v9719_v22  ;;  %v3450_v0 = vor.u32 %v3449_v10, %v3448_v56  ;;  %v3460_v8 = vor.u32 %v3459_v54, %v3458_v38  ;;  %v12365_v24 = vshrl.u32 %v9694_v62, 16  ;;  %v3469_v38 = vrot.slane %v12369_v27, 6 }
  0xc4   :  { %v3454_v49 = vrot.slane %v12359_v23, 6  ;;  %v5938_v23 = vcombine.low %v9579_v63, %v9569_v58  ;;  %v12366_v58 = vshll.u32 %v9694_v62, 16  ;;  %7188 = vmatmul.mubr.bf16.gmra.mrb[32].mxu0 %v6177_v1  ;;  %v12371_v54 = vshll.u32 %v8743_v20, 16 }
  0xc5   :  { %6868 = vmatmul.mubr.bf16.gmra.mrb[32].mxu1 %v5935_v7  ;;  %v3463_v61 = vrot.slane %v12365_v24, 5  ;;  %v12368_v7 = vshrl.u32 %v9709_v51, 16  ;;  %7191 = vmatprep.mubr.bf16.mxu0 %v6178_v4  ;;  %v12372_v37 = vshll.u32 %v8748_v40, 16  ;;  %v3447_v4 = vrot.slane %v3445_v30, 4 }
  0xc6   :  { %v3464_v63 = vrot.slane %v12366_v58, 6  ;;  %6871 = vmatprep.mubr.bf16.mxu1 %v5936_v53  ;;  %v3455_v32 = vor.u32 %v3454_v49, %v3453_v13  ;;  %v12370_v58 = vshrl.u32 %v8743_v20, 16  ;;  %v865_v24 = vrot.slane %v12371_v54, 5 }
  0xc7   :  { %v3468_v28 = vrot.slane %v12368_v7, 5  ;;  %v9756_v1 = vrot.slane %v12372_v37, 5  ;;  %v12373_v49 = vshrl.u32 %v8748_v40, 16  ;;  %v6179_v53 = vcombine.low %v9719_v22, %v9725_v18 }
  0xc8   :  { %v862_v56 = vrot.slane %v12370_v58, 4  ;;  %v6180_v7 = vcombine.low %v9729_v60, %v9733_v44  ;;  %v3452_v27 = vrot.slane %v3450_v0, 4  ;;  %v3457_v10 = vrot.slane %v3455_v32, 4 }
  0xc9   :  { %v875_v13 = vrot.slane %v12373_v49, 4  ;;  %v3462_v58 = vrot.slane %v3460_v8, 4  ;;  %v3465_v29 = vor.u32 %v3464_v63, %v3463_v61  ;;  %v12374_v20 = vshrl.u32 %v9742_v26, 16 }
  0xca   :  { %v3470_v33 = vor.u32 %v3469_v38, %v3468_v28  ;;  %v12375_v37 = vshll.u32 %v9742_v26, 16  ;;  %v12376_v40 = vshll.u32 %v8134_v15, 16  ;;  %v12377_v18 = vshrl.u32 %v8134_v15, 16 }
  0xcb   :  { %v3473_v54 = vrot.slane %v12374_v20, 5  ;;  %v866_v43 = vor.u32 %v865_v24, %v862_v56  ;;  %v876_v30 = vor.u32 %v875_v13, %v9756_v1  ;;  %v12378_v44 = vshll.u32 %v8119_v11, 16 }
  0xcc   :  { %v3474_v35 = vrot.slane %v12375_v37, 6  ;;  %v881_v49 = vrot.slane %v12376_v40, 5  ;;  %v885_v22 = vrot.slane %v12377_v18, 4  ;;  %v12379_v63 = vshrl.u32 %v8119_v11, 16  ;;  %7192 = vmatmul.mubr.bf16.gmra.mrb[36].mxu0 %v6179_v53 }
  0xcd   :  { %v9775_v60 = vrot.slane %v12378_v44, 5  ;;  %6872 = vmatmul.mubr.bf16.gmra.mrb[36].mxu1 %v5937_v42  ;;  %v9781_v28 = vsel %vm8668_vm5, %v3447_v4, %v3450_v0  ;;  %v9785_v38 = vsel %vm8668_vm5, %v3452_v27, %v3455_v32  ;;  %v9789_v18 = vsel %vm8668_vm5, %v3457_v10, %v3460_v8  ;;  %7195 = vmatprep.mubr.bf16.mxu0 %v6180_v7 }
  0xce   :  { %v895_v61 = vrot.slane %v12379_v63, 4  ;;  %v9793_v44 = vsel %vm8668_vm5, %v3462_v58, %v3465_v29  ;;  %6875 = vmatprep.mubr.bf16.mxu1 %v5938_v23  ;;  %v3467_v11 = vrot.slane %v3465_v29, 4  ;;  %v3472_v42 = vrot.slane %v3470_v33, 4 }
  0xcf   :  { %12380 = vst [vmem:[#allocation113_spill] sm:$0xff] %v9793_v44  ;;  %v9795_v56 = vor.u32 %v3474_v35, %v3473_v54  ;;  %v886_v0 = vor.u32 %v885_v22, %v881_v49  ;;  %v867_v24 = vrot.slane %v866_v43, 4  ;;  %v877_v13 = vrot.slane %v876_v30, 4 }
  0xd0   :  { %v896_v32 = vor.u32 %v895_v61, %v9775_v60  ;;  %v12382_v4 = vshrl.u32 %v8124_v12, 16  ;;  %v12383_v10 = vshrl.u32 %v12331_v55, 16  ;;  %v5939_v53 = vcombine.low %v9607_v25, %v9651_v16 }
  0xd1   :  { %12381 = vst [vmem:[#allocation114_spill] sm:$0xff] %v9795_v56  ;;  %v6181_v29 = vcombine.low %v9781_v28, %v9785_v38  ;;  %v5940_v35 = vcombine.low %v9679_v57, %v9663_v47  ;;  %v12384_v43 = vshll.u32 %v8124_v12, 16  ;;  %v6182_v23 = vcombine.low %v9789_v18, %v9793_v44  ;;  %v12455_v44 = vld [vmem:[#allocation78_spill] sm:$0xff] }
  0xd2   :  { %v905_v8 = vrot.slane %v12382_v4, 4  ;;  %v935_v27 = vrot.slane %v12383_v10, 4  ;;  %v9814_v7 = vsel %vm8668_vm5, %v3467_v11, %v3470_v33  ;;  %v9819_v55 = vsel %vm8668_vm5, %v3472_v42, %v9795_v56 }
  0xd3   :  { %v901_v22 = vrot.slane %v12384_v43, 5  ;;  %12385 = vst [vmem:[#allocation115_spill] sm:$0xff] %v9814_v7  ;;  %12386 = vst [vmem:[#allocation116_spill] sm:$0xff] %v9819_v55  ;;  %v887_v58 = vrot.slane %v886_v0, 4  ;;  %v872_v20 = vsel %vm9598_vm8, %v867_v24, %v9756_v1  ;;  %v882_v12 = vsel %vm9598_vm8, %v877_v13, %v881_v49 }
  0xd4   :  { %v897_v54 = vrot.slane %v896_v32, 4  ;;  %v936_v40 = vor.u32 %v935_v27, %v9585_v3  ;;  %v12387_v33 = vshrl.u32 %v8184_v34, 16  ;;  %v12388_v63 = vshll.u32 %v8200_v39, 16  ;;  %7196 = vmatmul.mubr.bf16.gmra.mrb[40].mxu0 %v6181_v29 }
  0xd5   :  { %v906_v37 = vor.u32 %v905_v8, %v901_v22  ;;  %v12389_v11 = vshrl.u32 %v8200_v39, 16  ;;  %6876 = vmatmul.mubr.bf16.gmra.mrb[40].mxu1 %v5939_v53  ;;  %v12390_v0 = vshll.u32 %v8212_v45, 16  ;;  %v12391_v24 = vshrl.u32 %v8212_v45, 16  ;;  %7199 = vmatprep.mubr.bf16.mxu0 %v6182_v23 }
  0xd6   :  { %v945_v30 = vrot.slane %v12387_v33, 4  ;;  %v951_v61 = vrot.slane %v12388_v63, 5  ;;  %v12392_v13 = vshll.u32 %v8230_v52, 16  ;;  %v12393_v3 = vshrl.u32 %v8230_v52, 16  ;;  %6879 = vmatprep.mubr.bf16.mxu1 %v5940_v35 }
  0xd7   :  { %v955_v42 = vrot.slane %v12389_v11, 4  ;;  %v961_v1 = vrot.slane %v12390_v0, 5  ;;  %v965_v49 = vrot.slane %v12391_v24, 4  ;;  %v5941_v8 = vcombine.low %v9694_v62, %v9709_v51 }
  0xd8   :  { %v971_v32 = vrot.slane %v12392_v13, 5  ;;  %v975_v4 = vrot.slane %v12393_v3, 4  ;;  %v6183_v39 = vcombine.low %v9814_v7, %v9819_v55  ;;  %v892_v10 = vsel %vm9598_vm8, %v887_v58, %v9775_v60 }
  0xd9   :  { %v12394_v45 = vshll.u32 %v8184_v34, 16  ;;  %v5966_v53 = vcombine.low %v872_v20, %v882_v12  ;;  %v12395_v52 = vshrl.u32 %v8218_v48, 16  ;;  %v12396_v29 = vshll.u32 %v8250_v59, 16 }
  0xda   :  { %v12397_v33 = vshrl.u32 %v8250_v59, 16  ;;  %v9858_v11 = vsel %vm9598_vm8, %v897_v54, %v901_v22  ;;  %v907_v0 = vrot.slane %v906_v37, 4  ;;  %v937_v60 = vrot.slane %v936_v40, 4  ;;  %v12404_v37 = vld [vmem:[#allocation60_spill] sm:$0xff] }
  0xdb   :  { %v941_v27 = vrot.slane %v12394_v45, 5  ;;  %v985_v43 = vrot.slane %v12395_v52, 4  ;;  %v991_v35 = vrot.slane %v12396_v29, 5  ;;  %12398 = vst [vmem:[#allocation117_spill] sm:$0xff] %v9858_v11  ;;  %v956_v34 = vor.u32 %v955_v42, %v951_v61 }
  0xdc   :  { %v995_v63 = vrot.slane %v12397_v33, 4  ;;  %v966_v24 = vor.u32 %v965_v49, %v961_v1  ;;  %v976_v23 = vor.u32 %v975_v4, %v971_v32  ;;  %v12399_v20 = vshll.u32 %v8218_v48, 16  ;;  %v12407_v4 = vld [vmem:[#allocation61_spill] sm:$0xff]  ;;  %7200 = vmatmul.mubr.bf16.gmra.mrb[44].mxu0 %v6183_v39  ;;  %v12413_v39 = vld [vmem:[#allocation14_spill] sm:$0xff] }
  0xdd   :  { %v946_v58 = vor.u32 %v945_v30, %v941_v27  ;;  %v12400_v13 = vshll.u32 %v8266_v6, 16  ;;  %v12401_v45 = vshrl.u32 %v8266_v6, 16  ;;  %v12402_v52 = vshll.u32 %v8279_v9, 16  ;;  %v12406_v6 = vld [vmem:[#allocation62_spill] sm:$0xff]  ;;  %6880 = vmatmul.mubr.bf16.gmra.mrb[44].mxu1 %v5941_v8  ;;  %v12411_v8 = vld [vmem:[#allocation67_spill] sm:$0xff] }
  0xde   :  { %v981_v12 = vrot.slane %v12399_v20, 5  ;;  %v12403_v22 = vshrl.u32 %v8279_v9, 16  ;;  %v6208_v40 = vcombine.low %v12404_v37, %v8930_v46  ;;  %v996_v42 = vor.u32 %v995_v63, %v991_v35  ;;  %6899 = vmatprep.mubr.bf16.mxu1 %v5966_v53  ;;  %v12433_v63 = vld [vmem:[#allocation24_spill] sm:$0xff] }
  0xdf   :  { %v1001_v3 = vrot.slane %v12400_v13, 5  ;;  %v1005_v59 = vrot.slane %v12401_v45, 4  ;;  %v1011_v29 = vrot.slane %v12402_v52, 5  ;;  %v5967_v48 = vcombine.low %v892_v10, %v9858_v11  ;;  %v12410_v10 = vld [vmem:[#allocation63_spill] sm:$0xff] }
  0xe0   :  { %v1015_v54 = vrot.slane %v12403_v22, 4  ;;  %v986_v30 = vor.u32 %v985_v43, %v981_v12  ;;  %v9876_v49 = vsel %vm9598_vm8, %v907_v0, %v9521_v5  ;;  %v6210_v33 = vcombine.low %v12407_v4, %v12406_v6  ;;  %v12409_v43 = vld [vmem:[#allocation64_spill] sm:$0xff]  ;;  %7219 = vmatprep.mubr.bf16.mxu0 %v6208_v40  ;;  %v12412_v22 = vld [vmem:[#allocation65_spill] sm:$0xff] }
  0xe1   :  { %12405 = vst [vmem:[#allocation60_spill] sm:$0xff] %v9876_v49  ;;  %v9882_v9 = vsel %vm9598_vm8, %v937_v60, %v941_v27  ;;  %v947_v20 = vrot.slane %v946_v58, 4  ;;  %v957_v13 = vrot.slane %v956_v34, 4  ;;  %v967_v46 = vrot.slane %v966_v24, 4  ;;  %v12415_v24 = vld [vmem:[#allocation19_spill] sm:$0xff]  ;;  %v12421_v4 = vld [vmem:[#allocation69_spill] sm:$0xff] }
  0xe2   :  { %12408 = vst [vmem:[#allocation62_spill] sm:$0xff] %v9882_v9  ;;  %v977_v45 = vrot.slane %v976_v23, 4  ;;  %v1006_v52 = vor.u32 %v1005_v59, %v1001_v3  ;;  %v1016_v5 = vor.u32 %v1015_v54, %v1011_v29  ;;  %v5968_v0 = vcombine.low %v9876_v49, %v9612_v50  ;;  %v12437_v50 = vld [vmem:[#allocation48_spill] sm:$0xff] }
  0xe3   :  { %v987_v27 = vrot.slane %v986_v30, 4  ;;  %v997_v60 = vrot.slane %v996_v42, 4  ;;  %v12414_v53 = vshrl.u32 %v12413_v39, 16  ;;  %v12416_v6 = vshll.u32 %v12415_v24, 16 }
  0xe4   :  { %v12417_v59 = vshrl.u32 %v12415_v24, 16  ;;  %v9902_v40 = vsel %vm9598_vm8, %v947_v20, %v951_v61  ;;  %v9906_v30 = vsel %vm9598_vm8, %v957_v13, %v961_v1  ;;  %v9910_v42 = vsel %vm9598_vm8, %v967_v46, %v971_v32  ;;  %v12427_v13 = vld [vmem:[#allocation20_spill] sm:$0xff] }
  0xe5   :  { %v1025_v34 = vrot.slane %v12414_v53, 4  ;;  %v9896_v23 = vrot.slane %v12416_v6, 5  ;;  %12418 = vst [vmem:[#allocation61_spill] sm:$0xff] %v9902_v40  ;;  %12419 = vst [vmem:[#allocation64_spill] sm:$0xff] %v9906_v30  ;;  %v12422_v53 = vld [vmem:[#allocation68_spill] sm:$0xff]  ;;  %v9916_v6 = vsel %vm9598_vm8, %v977_v45, %v981_v12  ;;  %v1007_v24 = vrot.slane %v1006_v52, 4  ;;  %6900 = vmatmul.mubr.bf16.vlgmr.msra.gmra.mrb[0].mxu1 %v5967_v48 }
  0xe6   :  { %v1035_v54 = vrot.slane %v12417_v59, 4  ;;  %12420 = vst [vmem:[#allocation63_spill] sm:$0xff] %v9910_v42  ;;  %12423 = vst [vmem:[#allocation67_spill] sm:$0xff] %v9916_v6  ;;  %v1017_v59 = vrot.slane %v1016_v5, 4  ;;  %v12424_v61 = vshll.u32 %v12413_v39, 16  ;;  %v9922_v1 = vsel %vm9598_vm8, %v987_v27, %v991_v35  ;;  %v7926_v52 = vld [vmem:[%s11874_s2 + $0x48] sm:$0xff]   ;;  %6948 = vmatpush3.bf16.msra.mxu1 %v9392_v36  ;;  %6903 = vmatprep.mubr.bf16.mxu1 %v5968_v0 }
  0xe7   :  { %12425 = vst [vmem:[#allocation65_spill] sm:$0xff] %v9922_v1  ;;  %v9926_v32 = vsel %vm9598_vm8, %v997_v60, %v1001_v3  ;;  %v12428_v46 = vshll.u32 %v12427_v13, 16  ;;  %v12429_v12 = vshrl.u32 %v12427_v13, 16  ;;  %v5970_v5 = vcombine.low %v9902_v40, %v9906_v30  ;;  %v12430_v35 = vld [vmem:[#allocation73_spill] sm:$0xff]  ;;  %v12431_v27 = vld [vmem:[#allocation70_spill] sm:$0xff]  ;;  %v7927_v60 = vld [vmem:[%s11876_s1 + $0x108] sm:$0xff]   ;;  %6949 = vmatprep.subr.bf16.mxu1 %v7926_v52 }
  0xe8   :  { %v1021_v20 = vrot.slane %v12424_v61, 5  ;;  %12426 = vst [vmem:[#allocation14_spill] sm:$0xff] %v9926_v32  ;;  %v1036_v3 = vor.u32 %v1035_v54, %v9896_v23  ;;  %v12434_v58 = vshll.u32 %v12433_v63, 16  ;;  %v12435_v30 = vshrl.u32 %v12433_v63, 16  ;;  %v12441_v63 = vld [vmem:[#allocation21_spill] sm:$0xff]  ;;  %v12449_v40 = vld [vmem:[#allocation66_spill] sm:$0xff] }
  0xe9   :  { %v9930_v37 = vrot.slane %v12428_v46, 5  ;;  %v1045_v45 = vrot.slane %v12429_v12, 4  ;;  %v12432_v46 = vld [vmem:[#allocation74_spill] sm:$0xff]  ;;  %v9961_v13 = vsel %vm9598_vm8, %v1007_v24, %v1011_v29  ;;  %v9995_v48 = vld [vmem:[%s11875_s0 + $0x68] sm:$0xf]  ;;  %v12450_v11 = vshll.u32 %v12449_v40, 16 }
  0xea   :  { %v1026_v61 = vor.u32 %v1025_v34, %v1021_v20  ;;  %v1051_v15 = vrot.slane %v12434_v58, 5  ;;  %v1055_v39 = vrot.slane %v12435_v30, 4  ;;  %v12436_v34 = vld [vmem:[#allocation47_spill] sm:$0xff]  ;;  %12439 = vst [vmem:[#allocation19_spill] sm:$0xff] %v9961_v13  ;;  %v9965_v12 = vsel %vm9598_vm8, %v1017_v59, %v1021_v20  ;;  %12448 = vst [vmem:[#allocation20_spill] sm:$0xff] %v9995_v48  ;;  %6950 = vmatpush3.bf16.msra.mxu1 %v7926_v52 }
  0xeb   :  { %v12438_v54 = vcombine.low %v12436_v34, %v12437_v50  ;;  %12440 = vst [vmem:[#allocation69_spill] sm:$0xff] %v9965_v12  ;;  %v7928_v50 = vld [vmem:[%s11874_s2 + $0x50] sm:$0xff]   ;;  %v1046_v36 = vor.u32 %v1045_v45, %v9930_v37  ;;  %v12442_v58 = vshrl.u32 %v12441_v63, 16  ;;  %v12443_v34 = vld [vmem:[#allocation27_spill] sm:$0xff]  ;;  %v1037_v20 = vrot.slane %v1036_v3, 4 }
  0xec   :  { %v12445_v24 = vshrl.u32 %v12443_v34, 16  ;;  %v1027_v0 = vrot.slane %v1026_v61, 4  ;;  %v9986_v45 = vld [vmem:[%s11875_s0 + $0x64] sm:$0xf]  ;;  %6951 = vmatprep.subr.bf16.mxu1 %v7928_v50  ;;  %v12456_v61 = vld [vmem:[#allocation76_spill] sm:$0xff] }
  0xed   :  { %7220 = vmatmul.mubr.bf16.vlgmr.msra.gmra.mrb[0].mxu0 %v12438_v54  ;;  %v1065_v30 = vrot.slane %v12442_v58, 4  ;;  %v12444_v54 = vshll.u32 %v12443_v34, 16  ;;  %12446 = vst [vmem:[#allocation68_spill] sm:$0xff] %v9986_v45  ;;  %v1056_v34 = vor.u32 %v1055_v39, %v1051_v15  ;;  %v1081_v58 = vrot.slane %v12450_v11, 5  ;;  %v12452_v39 = vld [vmem:[#allocation30_spill] sm:$0xff] }
  0xee   :  { %7268 = vmatpush3.bf16.msra.mxu0 %v9408_v19  ;;  %v1075_v59 = vrot.slane %v12445_v24, 4  ;;  %7223 = vmatprep.mubr.bf16.mxu0 %v6210_v33  ;;  %v7929_v19 = vld [vmem:[%s11876_s1 + $0x110] sm:$0xff]   ;;  %v12447_v33 = vshll.u32 %v12441_v63, 16  ;;  %v12453_v55 = vshll.u32 %v12452_v39, 16  ;;  %v1047_v3 = vrot.slane %v1046_v36, 4 }
  0xef   :  { %v9976_v29 = vrot.slane %v12444_v54, 5  ;;  %7269 = vmatprep.subr.bf16.mxu0 %v7927_v60  ;;  %v12451_v54 = vshrl.u32 %v12449_v40, 16  ;;  %v12457_v40 = vshrl.u32 %v9986_v45, 16  ;;  %v10024_v36 = vld [vmem:[%s11875_s0 + $0x6c] sm:$0xf]  ;;  %v12463_v11 = vshll.u32 %v9995_v48, 16  ;;  %6952 = vmatpush3.bf16.msra.mxu1 %v7928_v50 }
  0xf0   :  { %v1061_v24 = vrot.slane %v12447_v33, 5  ;;  %v10005_v63 = vrot.slane %v12453_v55, 5  ;;  %v12454_v33 = vshrl.u32 %v12452_v39, 16  ;;  %v7930_v55 = vld [vmem:[%s11874_s2 + $0x58] sm:$0xff]   ;;  %12459 = vst [vmem:[#allocation73_spill] sm:$0xff] %v10024_v36 }
  0xf1   :  { %v1085_v49 = vrot.slane %v12451_v54, 4  ;;  %v1076_v56 = vor.u32 %v1075_v59, %v9976_v29  ;;  %v3478_v54 = vrot.slane %v12457_v40, 5  ;;  %v12460_v59 = vcombine.low %v9617_v14, %v9882_v9  ;;  %v7931_v40 = vld [vmem:[%s11876_s1 + $0x118] sm:$0xff]   ;;  %6953 = vmatprep.subr.bf16.mxu1 %v7930_v55 }
  0xf2   :  { %v1095_v26 = vrot.slane %v12454_v33, 4  ;;  %7270 = vmatpush3.bf16.msra.mxu0 %v7927_v60  ;;  %v1066_v52 = vor.u32 %v1065_v30, %v1061_v24  ;;  %v12458_v60 = vshll.u32 %v9986_v45, 16  ;;  %v10033_v33 = vsel %vm9598_vm8, %v1027_v0, %v9896_v23 }
  0xf3   :  { %7271 = vmatprep.subr.bf16.mxu0 %v7929_v19  ;;  %6904 = vmatmul.mubr.bf16.gmra.mrb[4].mxu1 %v12460_v59  ;;  %12461 = vst [vmem:[#allocation70_spill] sm:$0xff] %v10033_v33  ;;  %v3484_v45 = vrot.slane %v12463_v11, 6  ;;  %v3488_v30 = vshrl.u32 %v10024_v36, 16  ;;  %v12464_v59 = vcombine.low %v12410_v10, %v12409_v43  ;;  %v10049_v23 = vsel %vm9598_vm8, %v1037_v20, %v9930_v37 }
  0xf4   :  { %v3479_v39 = vrot.slane %v12458_v60, 6  ;;  %v12462_v60 = vshrl.u32 %v9995_v48, 16  ;;  %6907 = vmatprep.mubr.bf16.mxu1 %v5970_v5  ;;  %12465 = vst [vmem:[#allocation74_spill] sm:$0xff] %v10049_v23  ;;  %v1057_v0 = vrot.slane %v1056_v34, 4  ;;  %v1086_v14 = vor.u32 %v1085_v49, %v1081_v58  ;;  %v12468_v5 = vld [vmem:[#allocation80_spill] sm:$0xff]  ;;  %6954 = vmatpush3.bf16.msra.mxu1 %v7930_v55 }
  0xf5   :  { %7224 = vmatmul.mubr.bf16.gmra.mrb[4].mxu0 %v12464_v59  ;;  %v1096_v9 = vor.u32 %v1095_v26, %v10005_v63  ;;  %v10057_v11 = vsel %vm9598_vm8, %v1047_v3, %v1051_v15  ;;  %v1067_v43 = vrot.slane %v1066_v52, 4  ;;  %v1077_v10 = vrot.slane %v1076_v56, 4  ;;  %v12470_v26 = vld [vmem:[#allocation72_spill] sm:$0xff]  ;;  %v7932_v15 = vld [vmem:[%s11874_s2 + $0x60] sm:$0xff]   ;;  %v12473_v3 = vld [vmem:[#allocation75_spill] sm:$0xff] }
  0xf6   :  { %v3483_v7 = vrot.slane %v12462_v60, 5  ;;  %v12466_v60 = vcombine.low %v12412_v22, %v12411_v8  ;;  %12467 = vst [vmem:[#allocation24_spill] sm:$0xff] %v10057_v11  ;;  %v3477_v59 = vrot.slane %v12468_v5, 4  ;;  %7272 = vmatpush3.bf16.msra.mxu0 %v7929_v19  ;;  %v3480_v37 = vor.u32 %v3479_v39, %v3478_v54  ;;  %6955 = vmatprep.subr.bf16.mxu1 %v7932_v15 }
  0xf7   :  { %v12469_v49 = vshll.u32 %v10024_v36, 16  ;;  %v12471_v34 = vshrl.u32 %v12470_v26, 16  ;;  %v12472_v8 = vshll.u32 %v12470_v26, 16  ;;  %7273 = vmatprep.subr.bf16.mxu0 %v7931_v40  ;;  %v3490_v50 = vrot.slane %v3488_v30, 5  ;;  %v12479_v30 = vld [vmem:[#allocation77_spill] sm:$0xff] }
  0xf8   :  { %7227 = vmatprep.mubr.bf16.mxu0 %v12466_v60  ;;  %v3485_v56 = vor.u32 %v3484_v45, %v3483_v7  ;;  %v12474_v19 = vshll.u32 %v12473_v3, 16  ;;  %v12475_v54 = vshrl.u32 %v12473_v3, 16  ;;  %v7933_v60 = vld [vmem:[%s11876_s1 + $0x120] sm:$0xff]   ;;  %v10080_v5 = vsel %vm9598_vm8, %v1057_v0, %v1061_v24  ;;  %v12482_v36 = vld [vmem:[#allocation81_spill] sm:$0xff]  ;;  %6956 = vmatpush3.bf16.msra.mxu1 %v7932_v15 }
  0xf9   :  { %v3491_v20 = vrot.slane %v12469_v49, 6  ;;  %v1106_v48 = vrot.slane %v12471_v34, 4  ;;  %v1109_v22 = vrot.slane %v12472_v8, 5  ;;  %v1087_v49 = vrot.slane %v1086_v14, 4  ;;  %v12476_v34 = vld [vmem:[#allocation71_spill] sm:$0xff] }
  0xfa   :  { %v10071_v52 = vrot.slane %v12474_v19, 5  ;;  %v1119_v39 = vrot.slane %v12475_v54, 4  ;;  %v1097_v26 = vrot.slane %v1096_v9, 4  ;;  %v12477_v7 = vshll.u32 %v12476_v34, 16  ;;  %7274 = vmatpush3.bf16.msra.mxu0 %v7931_v40  ;;  %v12521_v34 = vld [vmem:[#allocation89_spill] sm:$0xff] }
  0xfb   :  { %v12480_v8 = vshll.u32 %v12479_v30, 16  ;;  %v12481_v3 = vshrl.u32 %v12479_v30, 16  ;;  %v12483_v51 = vshll.u32 %v12482_v36, 16  ;;  %v12484_v24 = vshrl.u32 %v12482_v36, 16  ;;  %7275 = vmatprep.subr.bf16.mxu0 %v7933_v60 }
  0xfc   :  { %v10084_v45 = vrot.slane %v12477_v7, 5  ;;  %v10101_v9 = vsel %vm9598_vm8, %v1067_v43, %v9976_v29  ;;  %v10105_v55 = vsel %vm9598_vm8, %v1077_v10, %v1081_v58  ;;  %v1110_v0 = vor.u32 %v1109_v22, %v1106_v48  ;;  %v7935_v58 = vld [vmem:[%s11876_s1 + $0x128] sm:$0xff]  }
  0xfd   :  { %v10088_v19 = vrot.slane %v12480_v8, 5  ;;  %v1129_v54 = vrot.slane %v12481_v3, 4  ;;  %v10094_v62 = vrot.slane %v12483_v51, 5  ;;  %v1139_v14 = vrot.slane %v12484_v24, 4  ;;  %12485 = vst [vmem:[#allocation48_spill] sm:$0xff] %v10105_v55  ;;  %v7934_v51 = vld [vmem:[%s11874_s2 + $0x68] sm:$0xff]  }
  0xfe   :  { %12478 = vst [vmem:[#allocation47_spill] sm:$0xff] %v10084_v45  ;;  %v12486_v36 = vcombine.low %v9910_v42, %v9916_v6  ;;  %v3482_v40 = vrot.slane %v3480_v37, 4  ;;  %v3487_v7 = vrot.slane %v3485_v56, 4  ;;  %v3492_v30 = vor.u32 %v3491_v20, %v3490_v50  ;;  %v12489_v10 = vld [vmem:[#allocation83_spill] sm:$0xff]  ;;  %7276 = vmatpush3.bf16.msra.mxu0 %v7933_v60  ;;  %6957 = vmatprep.subr.bf16.mxu1 %v7934_v51  ;;  %v7937_v60 = vld [vmem:[%s11876_s1 + $0x130] sm:$0xff]  }
  0xff   :  { %v1120_v29 = vor.u32 %v1119_v39, %v10071_v52  ;;  %v12487_v48 = vcombine.low %v12422_v53, %v12421_v4  ;;  %v12488_v43 = vcombine.low %v9922_v1, %v9926_v32  ;;  %v12490_v22 = vld [vmem:[#allocation79_spill] sm:$0xff]  ;;  %v10127_v20 = vsel %vm8668_vm5, %v3477_v59, %v3480_v37  ;;  %v7936_v37 = vld [vmem:[%s11874_s2 + $0x70] sm:$0xff]   ;;  %7277 = vmatprep.subr.bf16.mxu0 %v7935_v58  ;;  %v12533_v1 = vld [vmem:[#allocation93_spill] sm:$0xff] }
 0x100   :  { %6908 = vmatmul.mubr.bf16.gmra.mrb[8].mxu1 %v12486_v36  ;;  %v10132_v50 = vsel %vm9598_vm8, %v1087_v49, %v10005_v63  ;;  %v12492_v4 = vcombine.low %v12431_v27, %v12430_v35  ;;  %v10140_v53 = vsel %vm9598_vm8, %v1097_v26, %v10084_v45  ;;  %v1130_v39 = vor.u32 %v1129_v54, %v10088_v19  ;;  %v12493_v54 = vld [vmem:[#allocation84_spill] sm:$0xff]  ;;  %v12525_v6 = vld [vmem:[#allocation3_spill] sm:$0xff] }
 0x101   :  { %7228 = vmatmul.mubr.bf16.gmra.mrb[8].mxu0 %v12487_v48  ;;  %6911 = vmatprep.mubr.bf16.mxu1 %v12488_v43  ;;  %12491 = vst [vmem:[#allocation21_spill] sm:$0xff] %v10132_v50  ;;  %v1140_v3 = vor.u32 %v1139_v14, %v10094_v62  ;;  %v5974_v59 = vcombine.low %v10033_v33, %v10049_v23  ;;  %v10150_v27 = vrot.slane %v1110_v0, 4  ;;  %v10163_v26 = vrot.slane %v1120_v29, 4  ;;  %v12495_v0 = vld [vmem:[#allocation85_spill] sm:$0xff]  ;;  %v10233_v36 = vld [vmem:[%s11875_s0 + $0x14] sm:$0xf] }
 0x102   :  { %7231 = vmatprep.mubr.bf16.mxu0 %v12492_v4  ;;  %v10157_v15 = vsel %vm8668_vm5, %v3482_v40, %v3485_v56  ;;  %v10161_v49 = vsel %vm8668_vm5, %v3487_v7, %v3492_v30  ;;  %v12494_v24 = vshrl.u32 %v12493_v54, 16  ;;  %v12496_v40 = vld [vmem:[#allocation91_spill] sm:$0xff]  ;;  %v12497_v7 = vld [vmem:[#allocation90_spill] sm:$0xff]  ;;  %v12498_v29 = vshll.u32 %v12493_v54, 16  ;;  %6958 = vmatpush3.bf16.msra.mxu1 %v7934_v51 }
 0x103   :  { %v1131_v43 = vrot.slane %v1130_v39, 4  ;;  %v1141_v4 = vrot.slane %v1140_v3, 4  ;;  %v1116_v54 = vsel %vm9598_vm8, %v10150_v27, %v10071_v52  ;;  %v12503_v39 = vld [vmem:[#allocation92_spill] sm:$0xff]  ;;  %7278 = vmatpush3.bf16.msra.mxu0 %v7935_v58  ;;  %6959 = vmatprep.subr.bf16.mxu1 %v7936_v37  ;;  %v12504_v51 = vcombine.low %v9961_v13, %v9965_v12  ;;  %v12510_v56 = vld [vmem:[#allocation87_spill] sm:$0xff] }
 0x104   :  { %v10167_v14 = vrot.slane %v12494_v24, 4  ;;  %v10180_v48 = vrot.slane %v12498_v29, 5  ;;  %v12499_v24 = vld [vmem:[#allocation82_spill] sm:$0xff]  ;;  %v12505_v27 = vshll.u32 %v9348_v31, 16  ;;  %7279 = vmatprep.subr.bf16.mxu0 %v7937_v60  ;;  %v12507_v30 = vcombine.low %v12432_v46, %v9216_v21 }
 0x105   :  { %v12500_v35 = vshll.u32 %v12499_v24, 16  ;;  %v12501_v63 = vshrl.u32 %v12499_v24, 16  ;;  %v12502_v29 = vld [vmem:[#allocation94_spill] sm:$0xff]  ;;  %v12506_v24 = vshrl.u32 %v9348_v31, 16  ;;  %v12511_v31 = vshrl.u32 %v12510_v56, 16 }
 0x106   :  { %v1150_v52 = vor.u32 %v10167_v14, %v10180_v48  ;;  %v10212_v58 = vrot.slane %v12505_v27, 5  ;;  %v12509_v14 = vshrl.u32 %v9374_v41, 16  ;;  %v12109_v45 = vrot.slane %v10233_v36, 6  ;;  %6960 = vmatpush3.bf16.msra.mxu1 %v7936_v37 }
 0x107   :  { %v10184_v8 = vrot.slane %v12500_v35, 5  ;;  %v10188_v23 = vrot.slane %v12501_v63, 4  ;;  %v7938_v35 = vld [vmem:[%s11874_s2 + $0x78] sm:$0xff]   ;;  %v1126_v63 = vsel %vm9598_vm8, %v10163_v26, %v10088_v19  ;;  %v1169_v3 = vrot.slane %v12506_v24, 4  ;;  %7280 = vmatpush3.bf16.msra.mxu0 %v7937_v60  ;;  %v10269_v60 = vld [vmem:[%s11874_s2 + $0x100] sm:$0xff]  }
 0x108   :  { %6912 = vmatmul.mubr.bf16.gmra.mrb[12].mxu1 %v12504_v51  ;;  %v7939_v51 = vld [vmem:[%s11876_s1 + $0x138] sm:$0xff]   ;;  %v12508_v19 = vshll.u32 %v9374_v41, 16  ;;  %v1179_v27 = vrot.slane %v12509_v14, 4  ;;  %v1189_v24 = vrot.slane %v12511_v31, 4  ;;  %v12512_v21 = vcombine.low %v12456_v61, %v12455_v44  ;;  %v12514_v14 = vld [vmem:[#allocation86_spill] sm:$0xff]  ;;  %6961 = vmatprep.subr.bf16.mxu1 %v7938_v35  ;;  %12517 = vst [vmem:[#allocation27_spill] sm:$0xff] %v10269_v60 }
 0x109   :  { %7232 = vmatmul.mubr.bf16.gmra.mrb[12].mxu0 %v12507_v30  ;;  %6915 = vmatprep.mubr.bf16.mxu1 %v5974_v59  ;;  %v1136_v46 = vsel %vm9598_vm8, %v1131_v43, %v10094_v62  ;;  %v10245_v41 = vsel %vm9598_vm8, %v1141_v4, %v10180_v48  ;;  %v1160_v59 = vor.u32 %v10188_v23, %v10184_v8  ;;  %v12513_v30 = vshll.u32 %v12510_v56, 16  ;;  %v10260_v62 = vld [vmem:[%s11876_s1 + $0x80] sm:$0xff]   ;;  %v8003_v23 = vld [vmem:[%s11875_s0 + $0x18] sm:$0xf] }
 0x10a   :  { %v10224_v26 = vrot.slane %v12508_v19, 5  ;;  %7235 = vmatprep.mubr.bf16.mxu0 %v12512_v21  ;;  %v12515_v31 = vshll.u32 %v12514_v14, 16  ;;  %v12516_v61 = vshrl.u32 %v12514_v14, 16  ;;  %v4357_v37 = vrot.slane %v8003_v23, 6  ;;  %7281 = vmatprep.subr.bf16.mxu0 %v7939_v51 }
 0x10b   :  { %v1185_v19 = vrot.slane %v12513_v30, 5  ;;  %v1170_v56 = vor.u32 %v1169_v3, %v10212_v58  ;;  %v4356_v48 = vrot.slane %v12109_v45, 4  ;;  %v12518_v30 = vld [vmem:[#allocation88_spill] sm:$0xff]  ;;  %v12522_v12 = vshll.u32 %v12521_v34, 16  ;;  %6962 = vmatpush3.bf16.msra.mxu1 %v7938_v35  ;;  %v10285_v45 = vld [vmem:[%s11875_s0 + $0x1c] sm:$0xf]  ;;  %7282 = vmatpush3.bf16.msra.mxu0 %v7939_v51 }
 0x10c   :  { %v10253_v44 = vrot.slane %v12515_v31, 5  ;;  %v1199_v21 = vrot.slane %v12516_v61, 4  ;;  %v1180_v43 = vor.u32 %v1179_v27, %v10224_v26  ;;  %v12519_v14 = vshll.u32 %v12518_v30, 16  ;;  %7011 = vmatprep.subr.bf16.mxu1 %v10260_v62  ;;  %7331 = vmatprep.subr.bf16.mxu0 %v10269_v60 }
 0x10d   :  { %v1190_v4 = vor.u32 %v1189_v24, %v1185_v19  ;;  %v4359_v61 = vrot.slane %v4357_v37, 4  ;;  %v12520_v3 = vshrl.u32 %v12518_v30, 16  ;;  %v1215_v33 = vrot.slane %v12522_v12, 5 }
 0x10e   :  { %v1205_v31 = vrot.slane %v12519_v14, 5  ;;  %v12523_v32 = vshrl.u32 %v12521_v34, 16  ;;  %v12112_v27 = vrot.slane %v10285_v45, 6  ;;  %v5978_v24 = vcombine.low %v1116_v54, %v1126_v63  ;;  %v12524_v14 = vld [vmem:[#allocation96_spill] sm:$0xff] }
 0x10f   :  { %v1209_v23 = vrot.slane %v12520_v3, 4  ;;  %v1200_v30 = vor.u32 %v1199_v21, %v10253_v44  ;;  %v10302_v34 = vcombine.low %v1136_v46, %v10245_v41  ;;  %v1151_v54 = vrot.slane %v1150_v52, 4 }
 0x110   :  { %v1219_v13 = vrot.slane %v12523_v32, 4  ;;  %v12528_v32 = vcombine.low %v10057_v11, %v10080_v5  ;;  %v10307_v35 = vsel %vm10293_vm11, %v4356_v48, %v4357_v37  ;;  %v10313_v63 = vsel %vm10293_vm11, %v4359_v61, %v12112_v27 }
 0x111   :  { %12529 = vst [vmem:[#allocation66_spill] sm:$0xff] %v10313_v63  ;;  %v12530_v51 = vcombine.low %v12490_v22, %v12489_v10  ;;  %v12531_v46 = vcombine.low %v10101_v9, %v10105_v55  ;;  %v1161_v52 = vrot.slane %v1160_v59, 4  ;;  %v1171_v21 = vrot.slane %v1170_v56, 4  ;;  %v12536_v59 = vld [vmem:[#allocation95_spill] sm:$0xff]  ;;  %v12539_v63 = vld [vmem:[#allocation97_spill] sm:$0xff] }
 0x112   :  { %6916 = vmatmul.mubr.bf16.gmra.mrb[16].mxu1 %v12528_v32  ;;  %v1181_v3 = vrot.slane %v1180_v43, 4  ;;  %v12532_v48 = vcombine.low %v12495_v0, %v10127_v20  ;;  %v1191_v61 = vrot.slane %v1190_v4, 4  ;;  %v1210_v32 = vor.u32 %v1209_v23, %v1205_v31 }
 0x113   :  { %7236 = vmatmul.mubr.bf16.gmra.mrb[16].mxu0 %v12530_v51  ;;  %6919 = vmatprep.mubr.bf16.mxu1 %v12531_v46  ;;  %v1220_v27 = vor.u32 %v1219_v13, %v1215_v33  ;;  %v12534_v10 = vshrl.u32 %v12533_v1, 16  ;;  %v1201_v51 = vrot.slane %v1200_v30, 4  ;;  %v12535_v11 = vshll.u32 %v12533_v1, 16  ;;  %v12542_v13 = vld [vmem:[#allocation98_spill] sm:$0xff] }
 0x114   :  { %7239 = vmatprep.mubr.bf16.mxu0 %v12532_v48  ;;  %v12537_v56 = vshll.u32 %v12536_v59, 16  ;;  %v12538_v42 = vshrl.u32 %v12536_v59, 16  ;;  %v12540_v60 = vshll.u32 %v12539_v63, 16  ;;  %v12541_v0 = vshrl.u32 %v12539_v63, 16 }
 0x115   :  { %v1229_v22 = vrot.slane %v12534_v10, 4  ;;  %v1225_v46 = vrot.slane %v12535_v11, 5  ;;  %v12543_v23 = vshll.u32 %v12542_v13, 16  ;;  %v12544_v30 = vshrl.u32 %v12542_v13, 16  ;;  %v12552_v13 = vld [vmem:[#allocation108_spill] sm:$0xff] }
 0x116   :  { %v1235_v43 = vrot.slane %v12537_v56, 5  ;;  %v1239_v37 = vrot.slane %v12538_v42, 4  ;;  %v1245_v20 = vrot.slane %v12540_v60, 5  ;;  %v1249_v4 = vrot.slane %v12541_v0, 4  ;;  %v12551_v56 = vld [vmem:[#allocation103_spill] sm:$0xff] }
 0x117   :  { %v1255_v48 = vrot.slane %v12543_v23, 5  ;;  %v1259_v10 = vrot.slane %v12544_v30, 4  ;;  %v10345_v1 = vsel %vm9598_vm8, %v1151_v54, %v10184_v8  ;;  %v10350_v42 = vsel %vm9598_vm8, %v1161_v52, %v10212_v58  ;;  %v12553_v23 = vld [vmem:[#allocation105_spill] sm:$0xff] }
 0x118   :  { %v10355_v11 = vsel %vm9598_vm8, %v1171_v21, %v10224_v26  ;;  %v10361_v63 = vsel %vm9598_vm8, %v1181_v3, %v1185_v19  ;;  %v1211_v59 = vrot.slane %v1210_v32, 4  ;;  %v1221_v8 = vrot.slane %v1220_v27, 4  ;;  %v12547_v3 = vld [vmem:[#allocation102_spill] sm:$0xff]  ;;  %v12548_v32 = vld [vmem:[#allocation4_spill] sm:$0xff] }
 0x119   :  { %v1230_v54 = vor.u32 %v1229_v22, %v1225_v46  ;;  %v10366_v58 = vsel %vm9598_vm8, %v1191_v61, %v10253_v44  ;;  %v10370_v52 = vsel %vm9598_vm8, %v1201_v51, %v1205_v31  ;;  %v1240_v26 = vor.u32 %v1239_v37, %v1235_v43  ;;  %v12550_v51 = vld [vmem:[#allocation104_spill] sm:$0xff] }
 0x11a   :  { %12545 = vst [vmem:[#allocation30_spill] sm:$0xff] %v10370_v52  ;;  %v12546_v19 = vcombine.low %v10132_v50, %v10140_v53  ;;  %v5980_v27 = vcombine.low %v10345_v1, %v10350_v42  ;;  %v1250_v44 = vor.u32 %v1249_v4, %v1245_v20  ;;  %v1260_v61 = vor.u32 %v1259_v10, %v1255_v48 }
 0x11b   :  { %v12549_v31 = vcombine.low %v10157_v15, %v10161_v49  ;;  %v10397_v15 = vsel %vm9598_vm8, %v1211_v59, %v1215_v33  ;;  %v10401_v49 = vsel %vm9598_vm8, %v1221_v8, %v1225_v46  ;;  %v1241_v10 = vrot.slane %v1240_v26, 4 }
 0x11c   :  { %6920 = vmatmul.mubr.bf16.gmra.mrb[20].mxu1 %v12546_v19  ;;  %v12554_v19 = vcombine.low %v12497_v7, %v12496_v40  ;;  %12555 = vst [vmem:[#allocation78_spill] sm:$0xff] %v10397_v15  ;;  %12556 = vst [vmem:[#allocation76_spill] sm:$0xff] %v10401_v49  ;;  %v12560_v7 = vld [vmem:[#allocation99_spill] sm:$0xff]  ;;  %v1251_v4 = vrot.slane %v1250_v44, 4  ;;  %v1261_v22 = vrot.slane %v1260_v61, 4  ;;  %v12563_v46 = vshll.u32 %v9607_v25, 16 }
 0x11d   :  { %7240 = vmatmul.mubr.bf16.gmra.mrb[20].mxu0 %v12549_v31  ;;  %6923 = vmatprep.mubr.bf16.mxu1 %v5978_v24  ;;  %v1231_v24 = vrot.slane %v1230_v54, 4  ;;  %v12557_v31 = vld [vmem:[#allocation100_spill] sm:$0xff]  ;;  %v12562_v33 = vshrl.u32 %v12560_v7, 16  ;;  %v12564_v54 = vshrl.u32 %v9607_v25, 16  ;;  %v12568_v61 = vld [vmem:[#allocation110_spill] sm:$0xff]  ;;  %v12571_v25 = vshrl.u32 %v9663_v47, 16 }
 0x11e   :  { %7243 = vmatprep.mubr.bf16.mxu0 %v12554_v19  ;;  %v12558_v21 = vshll.u32 %v12557_v31, 16  ;;  %v12559_v30 = vshrl.u32 %v12557_v31, 16  ;;  %v12561_v19 = vshll.u32 %v12560_v7, 16  ;;  %v1285_v8 = vrot.slane %v12563_v46, 5  ;;  %v12569_v7 = vld [vmem:[#allocation109_spill] sm:$0xff] }
 0x11f   :  { %v1279_v59 = vrot.slane %v12562_v33, 4  ;;  %v1289_v26 = vrot.slane %v12564_v54, 4  ;;  %v12570_v46 = vshll.u32 %v9663_v47, 16  ;;  %v1319_v54 = vrot.slane %v12571_v25, 4  ;;  %v12585_v25 = vld [vmem:[#allocation107_spill] sm:$0xff]  ;;  %v12593_v33 = vld [vmem:[#allocation114_spill] sm:$0xff] }
 0x120   :  { %v1265_v60 = vrot.slane %v12558_v21, 5  ;;  %v1269_v40 = vrot.slane %v12559_v30, 4  ;;  %v10409_v0 = vrot.slane %v12561_v19, 5  ;;  %v12565_v21 = vshll.u32 %v9651_v16, 16 }
 0x121   :  { %v12566_v30 = vshrl.u32 %v9651_v16, 16  ;;  %v12567_v19 = vshrl.u32 %v9679_v57, 16  ;;  %v1315_v55 = vrot.slane %v12570_v46, 5  ;;  %v10437_v16 = vsel %vm9598_vm8, %v1241_v10, %v1245_v20 }
 0x122   :  { %v1295_v37 = vrot.slane %v12565_v21, 5  ;;  %v10433_v21 = vsel %vm9598_vm8, %v1231_v24, %v1235_v43  ;;  %12573 = vst [vmem:[#allocation72_spill] sm:$0xff] %v10437_v16  ;;  %v10444_v46 = vsel %vm9598_vm8, %v1251_v4, %v1255_v48  ;;  %v10448_v47 = vsel %vm9598_vm8, %v1261_v22, %v1265_v60  ;;  %v12579_v22 = vld [vmem:[#allocation111_spill] sm:$0xff] }
 0x123   :  { %v1299_v31 = vrot.slane %v12566_v30, 4  ;;  %v1309_v50 = vrot.slane %v12567_v19, 4  ;;  %12572 = vst [vmem:[#allocation80_spill] sm:$0xff] %v10433_v21  ;;  %v1270_v30 = vor.u32 %v1269_v40, %v1265_v60  ;;  %v12574_v19 = vshll.u32 %v9679_v57, 16  ;;  %12575 = vst [vmem:[#allocation75_spill] sm:$0xff] %v10444_v46 }
 0x124   :  { %6924 = vmatmul.mubr.bf16.gmra.mrb[24].mxu1 %v10302_v34  ;;  %12576 = vst [vmem:[#allocation77_spill] sm:$0xff] %v10448_v47  ;;  %v1280_v43 = vor.u32 %v1279_v59, %v10409_v0  ;;  %v12577_v24 = vcombine.low %v12503_v39, %v12502_v29  ;;  %v1290_v57 = vor.u32 %v1289_v26, %v1285_v8  ;;  %v10466_v29 = vld [vmem:[%s11875_s0 + $0xd4] sm:$0xf] }
 0x125   :  { %v1305_v44 = vrot.slane %v12574_v19, 5  ;;  %6927 = vmatprep.mubr.bf16.mxu1 %v5980_v27  ;;  %v1300_v34 = vor.u32 %v1299_v31, %v1295_v37  ;;  %v12578_v48 = vcombine.low %v12525_v6, %v12524_v14  ;;  %v1320_v40 = vor.u32 %v1319_v54, %v1315_v55  ;;  %12580 = vst [vmem:[#allocation81_spill] sm:$0xff] %v10466_v29  ;;  %v10479_v31 = vld [vmem:[%s11875_s0 + $0xd8] sm:$0xf] }
 0x126   :  { %7244 = vmatmul.mubr.bf16.gmra.mrb[24].mxu0 %v12577_v24  ;;  %v12121_v39 = vshll.u32 %v10466_v29, 16  ;;  %v1271_v27 = vrot.slane %v1270_v30, 4  ;;  %v12120_v6 = vshrl.u32 %v10466_v29, 16  ;;  %v1281_v26 = vrot.slane %v1280_v43, 4  ;;  %12581 = vst [vmem:[#allocation83_spill] sm:$0xff] %v10479_v31 }
 0x127   :  { %v1310_v10 = vor.u32 %v1309_v50, %v1305_v44  ;;  %7247 = vmatprep.mubr.bf16.mxu0 %v12578_v48  ;;  %v12122_v54 = vshrl.u32 %v10479_v31, 16  ;;  %v1291_v30 = vrot.slane %v1290_v57, 4  ;;  %v1301_v19 = vrot.slane %v1300_v34, 4  ;;  %v12582_v48 = vld [vmem:[#allocation106_spill] sm:$0xff] }
 0x128   :  { %v12583_v20 = vshll.u32 %v12582_v48, 16  ;;  %v1321_v14 = vrot.slane %v1320_v40, 4  ;;  %v3496_v4 = vrot.slane %v12121_v39, 6  ;;  %v12584_v43 = vshrl.u32 %v12582_v48, 16 }
 0x129   :  { %v1311_v24 = vrot.slane %v1310_v10, 4  ;;  %v3495_v60 = vrot.slane %v12120_v6, 5  ;;  %v12586_v57 = vshll.u32 %v12585_v25, 16  ;;  %v12587_v10 = vshrl.u32 %v12585_v25, 16 }
 0x12a   :  { %v1325_v50 = vrot.slane %v12583_v20, 5  ;;  %v1329_v59 = vrot.slane %v12584_v43, 4  ;;  %v12588_v48 = vcombine.low %v10355_v11, %v10361_v63  ;;  %v10507_v43 = vld [vmem:[%s11875_s0 + $0xdc] sm:$0xf]  ;;  %v12590_v25 = vshll.u32 %v10479_v31, 16 }
 0x12b   :  { %v10495_v34 = vrot.slane %v12586_v57, 5  ;;  %v1339_v20 = vrot.slane %v12587_v10, 4  ;;  %12589 = vst [vmem:[#allocation79_spill] sm:$0xff] %v10507_v43  ;;  %v3500_v57 = vrot.slane %v12122_v54, 5  ;;  %v3505_v6 = vshrl.u32 %v10507_v43, 16 }
 0x12c   :  { %6928 = vmatmul.mubr.bf16.gmra.mrb[28].mxu1 %v12588_v48  ;;  %v3501_v10 = vrot.slane %v12590_v25, 6  ;;  %v12591_v40 = vcombine.low %v12548_v32, %v12547_v3  ;;  %v12592_v48 = vcombine.low %v10366_v58, %v10370_v52  ;;  %v10524_v39 = vsel %vm9598_vm8, %v1271_v27, %v10409_v0 }
 0x12d   :  { %v10528_v54 = vsel %vm9598_vm8, %v1281_v26, %v1285_v8  ;;  %v10532_v25 = vsel %vm9598_vm8, %v1291_v30, %v1295_v37  ;;  %v3494_v3 = vrot.slane %v12593_v33, 4  ;;  %v12594_v32 = vcombine.low %v12551_v56, %v12550_v51  ;;  %v12596_v26 = vld [vmem:[#allocation113_spill] sm:$0xff] }
 0x12e   :  { %7248 = vmatmul.mubr.bf16.gmra.mrb[28].mxu0 %v12591_v40  ;;  %6931 = vmatprep.mubr.bf16.mxu1 %v12592_v48  ;;  %v10540_v40 = vsel %vm9598_vm8, %v1301_v19, %v1305_v44  ;;  %v10544_v0 = vsel %vm9598_vm8, %v1311_v24, %v1315_v55  ;;  %v1330_v8 = vor.u32 %v1329_v59, %v1325_v50  ;;  %v12595_v44 = vld [vmem:[#allocation115_spill] sm:$0xff]  ;;  %v3507_v55 = vrot.slane %v3505_v6, 5  ;;  %v10590_v48 = vld [vmem:[%s11875_s0] sm:$0xf] }
 0x12f   :  { %7251 = vmatprep.mubr.bf16.mxu0 %v12594_v32  ;;  %v10550_v37 = vsel %vm9598_vm8, %v1321_v14, %v1325_v50  ;;  %v3497_v33 = vor.u32 %v3496_v4, %v3495_v60  ;;  %v1340_v51 = vor.u32 %v1339_v20, %v10495_v34  ;;  %v3502_v19 = vor.u32 %v3501_v10, %v3500_v57  ;;  %v10566_v60 = vld [vmem:[%s11875_s0 + $0x4] sm:$0xf]  ;;  %v10572_v6 = vld [vmem:[%s11875_s0 + $0xc] sm:$0xf]  ;;  %v12599_v10 = vld [vmem:[#allocation112_spill] sm:$0xff] }
 0x130   :  { %v12597_v59 = vshll.u32 %v10507_v43, 16  ;;  %12598 = vst [vmem:[#allocation84_spill] sm:$0xff] %v10566_v60  ;;  %v4342_v4 = vrot.slane %v10566_v60, 6  ;;  %v1331_v57 = vrot.slane %v1330_v8, 4  ;;  %v12600_v32 = vshll.u32 %v12599_v10, 16  ;;  %12601 = vst [vmem:[#allocation85_spill] sm:$0xff] %v10590_v48 }
 0x131   :  { %v10585_v27 = vsel %vm8668_vm5, %v3494_v3, %v3497_v33  ;;  %v1341_v30 = vrot.slane %v1340_v51, 4  ;;  %v3499_v50 = vrot.slane %v3497_v33, 4  ;;  %v6240_v8 = vrot.slane %v10590_v48, 10  ;;  %v8011_v3 = vld [vmem:[%s11875_s0 + $0x10] sm:$0xf] }
 0x132   :  { %v3508_v24 = vrot.slane %v12597_v59, 6  ;;  %v10579_v59 = vrot.slane %v12600_v32, 5  ;;  %v12602_v32 = vcombine.low %v10397_v15, %v10401_v49  ;;  %v3504_v20 = vrot.slane %v3502_v19, 4 }
 0x133   :  { %v4351_v56 = vrot.slane %v8011_v3, 6  ;;  %v12603_v51 = vcombine.low %v12553_v23, %v12552_v13  ;;  %v12604_v48 = vcombine.low %v10433_v21, %v10437_v16  ;;  %v4344_v60 = vrot.slane %v4342_v4, 4  ;;  %v12607_v23 = vld [vmem:[#allocation116_spill] sm:$0xff]  ;;  %v8013_v16 = vld [vmem:[%s11875_s0 + $0x24] sm:$0xf] }
 0x134   :  { %6932 = vmatmul.mubr.bf16.gmra.mrb[32].mxu1 %v12602_v32  ;;  %v3509_v14 = vor.u32 %v3508_v24, %v3507_v55  ;;  %v10610_v55 = vld [vmem:[%s11875_s0 + $0x8] sm:$0xf]  ;;  %v12605_v32 = vrot.slane %v10572_v6, 6  ;;  %v12606_v13 = vcombine.low %v12569_v7, %v12568_v61  ;;  %v4366_v21 = vrot.slane %v8013_v16, 6  ;;  %v8015_v16 = vld [vmem:[%s11875_s0 + $0x20] sm:$0xf] }
 0x135   :  { %6935 = vmatprep.mubr.bf16.mxu1 %v12604_v48  ;;  %v10631_v33 = vsel %vm9598_vm8, %v1331_v57, %v10495_v34  ;;  %v10636_v61 = vsel %vm9598_vm8, %v1341_v30, %v10579_v59  ;;  %v10640_v7 = vsel %vm8668_vm5, %v3499_v50, %v3502_v19  ;;  %v12608_v34 = vrot.slane %v10285_v45, 6  ;;  %v8016_v30 = vld [vmem:[%s11875_s0 + $0x2c] sm:$0xf] }
 0x136   :  { %7252 = vmatmul.mubr.bf16.gmra.mrb[32].mxu0 %v12603_v51  ;;  %v4350_v3 = vrot.slane %v12605_v32, 4  ;;  %v4353_v51 = vrot.slane %v4351_v56, 4  ;;  %v8014_v32 = vld [vmem:[%s11875_s0 + $0x28] sm:$0xf]  ;;  %v4372_v48 = vrot.slane %v8016_v30, 6  ;;  %v10658_v50 = vsel %vm8668_vm5, %v3504_v20, %v3509_v14 }
 0x137   :  { %7255 = vmatprep.mubr.bf16.mxu0 %v12606_v13  ;;  %v4369_v24 = vrot.slane %v8014_v32, 6  ;;  %v4363_v13 = vrot.slane %v8015_v16, 6  ;;  %v10647_v32 = vsel %vm10293_vm11, %v6240_v8, %v4342_v4  ;;  %v4362_v57 = vrot.slane %v12608_v34, 4 }
 0x138   :  { %v12609_v16 = vrot.slane %v10610_v55, 6  ;;  %v10668_v45 = vsel %vm10293_vm11, %v4350_v3, %v4351_v56  ;;  %v12610_v34 = vrot.slane %v10233_v36, 6  ;;  %v4368_v2 = vrot.slane %v4366_v21, 4  ;;  %v8018_v56 = vld [vmem:[%s11875_s0 + $0x34] sm:$0xf] }
 0x139   :  { %v4365_v8 = vrot.slane %v4363_v13, 4  ;;  %v4371_v14 = vrot.slane %v4369_v24, 4  ;;  %v12611_v20 = vshrl.u32 %v12599_v10, 16  ;;  %v4378_v3 = vrot.slane %v8018_v56, 6  ;;  %v8019_v36 = vld [vmem:[%s11875_s0 + $0x38] sm:$0xf] }
 0x13a   :  { %v10664_v4 = vsel %vm10293_vm11, %v4344_v60, %v12609_v16  ;;  %v10674_v30 = vsel %vm10293_vm11, %v4353_v51, %v12610_v34  ;;  %v8017_v60 = vld [vmem:[%s11875_s0 + $0x30] sm:$0xf]  ;;  %v4381_v51 = vrot.slane %v8019_v36, 6  ;;  %v12612_v34 = vshll.u32 %v10466_v29, 16  ;;  %v8020_v56 = vld [vmem:[%s11875_s0 + $0x3c] sm:$0xf] }
 0x13b   :  { %v1379_v19 = vrot.slane %v12611_v20, 4  ;;  %v4375_v16 = vrot.slane %v8017_v60, 6  ;;  %v12613_v10 = vcombine.low %v10444_v46, %v10448_v47  ;;  %v10694_v20 = vsel %vm10293_vm11, %v4362_v57, %v4363_v13 }
 0x13c   :  { %v1385_v49 = vrot.slane %v12612_v34, 5  ;;  %12614 = vst [vmem:[#allocation91_spill] sm:$0xff] %v10694_v20  ;;  %v4374_v60 = vrot.slane %v4372_v48, 4  ;;  %v4384_v15 = vrot.slane %v8020_v56, 6  ;;  %v12615_v36 = vcombine.low %v12579_v22, %v9781_v28 }
 0x13d   :  { %6936 = vmatmul.mubr.bf16.gmra.mrb[36].mxu1 %v12613_v10  ;;  %v1380_v52 = vor.u32 %v1379_v19, %v10579_v59  ;;  %v12616_v34 = vcombine.low %v10524_v39, %v10528_v54  ;;  %v10708_v13 = vsel %vm10293_vm11, %v4365_v8, %v4366_v21  ;;  %v4377_v57 = vrot.slane %v4375_v16, 4 }
 0x13e   :  { %7256 = vmatmul.mubr.bf16.gmra.mrb[36].mxu0 %v12615_v36  ;;  %12617 = vst [vmem:[#allocation90_spill] sm:$0xff] %v10708_v13  ;;  %v12618_v10 = vshrl.u32 %v10466_v29, 16  ;;  %v12619_v56 = vshll.u32 %v10479_v31, 16  ;;  %v12620_v59 = vcombine.low %v9785_v38, %v9789_v18  ;;  %v10719_v28 = vsel %vm10293_vm11, %v4368_v2, %v4369_v24 }
 0x13f   :  { %6939 = vmatprep.mubr.bf16.mxu1 %v12616_v34  ;;  %12621 = vst [vmem:[#allocation82_spill] sm:$0xff] %v10719_v28  ;;  %v10723_v22 = vsel %vm10293_vm11, %v4371_v14, %v4372_v48  ;;  %v1381_v21 = vrot.slane %v1380_v52, 4  ;;  %v12623_v19 = vshrl.u32 %v10479_v31, 16  ;;  %v4380_v36 = vrot.slane %v4378_v3, 4 }
 0x140   :  { %v1389_v47 = vrot.slane %v12618_v10, 4  ;;  %v1395_v46 = vrot.slane %v12619_v56, 5  ;;  %7259 = vmatprep.mubr.bf16.mxu0 %v12620_v59  ;;  %12622 = vst [vmem:[#allocation94_spill] sm:$0xff] %v10723_v22  ;;  %v4383_v34 = vrot.slane %v4381_v51, 4  ;;  %v8021_v10 = vld [vmem:[%s11875_s0 + $0x40] sm:$0xf] }
 0x141   :  { %v1399_v8 = vrot.slane %v12623_v19, 4  ;;  %v4387_v38 = vrot.slane %v8021_v10, 6  ;;  %v4386_v56 = vrot.slane %v4384_v15, 4  ;;  %v1386_v24 = vsel %vm9598_vm8, %v1381_v21, %v1385_v49  ;;  %v8022_v59 = vld [vmem:[%s11875_s0 + $0x44] sm:$0xf] }
 0x142   :  { %v1390_v18 = vor.u32 %v1389_v47, %v1385_v49  ;;  %v12624_v48 = vshll.u32 %v10507_v43, 16  ;;  %v4390_v19 = vrot.slane %v8022_v59, 6  ;;  %v10738_v31 = vcombine.low %v10636_v61, %v1386_v24  ;;  %v8023_v49 = vld [vmem:[%s11875_s0 + $0x48] sm:$0xf] }
 0x143   :  { %v1400_v2 = vor.u32 %v1399_v8, %v1395_v46  ;;  %v4389_v52 = vrot.slane %v4387_v38, 4  ;;  %v10742_v47 = vsel %vm10293_vm11, %v4374_v60, %v4375_v16  ;;  %v4393_v21 = vrot.slane %v8023_v49, 6 }
 0x144   :  { %v1405_v14 = vrot.slane %v12624_v48, 5  ;;  %v1391_v29 = vrot.slane %v1390_v18, 4  ;;  %12625 = vst [vmem:[#allocation92_spill] sm:$0xff] %v10742_v47  ;;  %v10751_v48 = vsel %vm10293_vm11, %v4377_v57, %v4378_v3  ;;  %v10755_v18 = vsel %vm10293_vm11, %v4380_v36, %v4381_v51  ;;  %v8024_v51 = vld [vmem:[%s11875_s0 + $0x4c] sm:$0xf] }
 0x145   :  { %v1401_v8 = vrot.slane %v1400_v2, 4  ;;  %12626 = vst [vmem:[#allocation87_spill] sm:$0xff] %v10751_v48  ;;  %12627 = vst [vmem:[#allocation86_spill] sm:$0xff] %v10755_v18  ;;  %v12628_v24 = vcombine.low %v10532_v25, %v10540_v40  ;;  %v10766_v2 = vsel %vm10293_vm11, %v4383_v34, %v4384_v15  ;;  %v10770_v3 = vsel %vm10293_vm11, %v4386_v56, %v4387_v38  ;;  %v12653_v56 = vld [vmem:[#allocation67_spill] sm:$0xff] }
 0x146   :  { %v1396_v16 = vsel %vm9598_vm8, %v1391_v29, %v1395_v46  ;;  %12629 = vst [vmem:[#allocation88_spill] sm:$0xff] %v10766_v2  ;;  %12630 = vst [vmem:[#allocation89_spill] sm:$0xff] %v10770_v3  ;;  %v4396_v46 = vrot.slane %v8024_v51, 6  ;;  %v12631_v57 = vcombine.low %v12596_v26, %v12595_v44  ;;  %v12632_v15 = vcombine.low %v10544_v0, %v10550_v37  ;;  %v8025_v26 = vld [vmem:[%s11875_s0 + $0x50] sm:$0xf]  ;;  %v12636_v51 = vld [vmem:[#allocation117_spill] sm:$0xff] }
 0x147   :  { %6940 = vmatmul.mubr.bf16.gmra.mrb[40].mxu1 %v12628_v24  ;;  %v1406_v29 = vsel %vm9598_vm8, %v1401_v8, %v1405_v14  ;;  %v10785_v36 = vsel %vm10293_vm11, %v4389_v52, %v4390_v19  ;;  %v4392_v34 = vrot.slane %v4390_v19, 4  ;;  %v12634_v14 = vcombine.low %v12607_v23, %v10585_v27  ;;  %v12635_v24 = vld [vmem:[#allocation60_spill] sm:$0xff]  ;;  %v12652_v52 = vld [vmem:[#allocation65_spill] sm:$0xff]  ;;  %v8033_v19 = vld [vmem:[%s11875_s0 + $0x88] sm:$0xf] }
 0x148   :  { %7260 = vmatmul.mubr.bf16.gmra.mrb[40].mxu0 %v12631_v57  ;;  %6943 = vmatprep.mubr.bf16.mxu1 %v12632_v15  ;;  %12633 = vst [vmem:[#allocation96_spill] sm:$0xff] %v10785_v36  ;;  %v10787_v38 = vcombine.low %v1396_v16, %v1406_v29  ;;  %v4395_v44 = vrot.slane %v4393_v21, 4  ;;  %v4399_v59 = vrot.slane %v8025_v26, 6  ;;  %v5989_v8 = vcombine.low %v10631_v33, %v10636_v61 }
 0x149   :  { %7263 = vmatprep.mubr.bf16.mxu0 %v12634_v14  ;;  %v4398_v27 = vrot.slane %v4396_v46, 4  ;;  %v6231_v16 = vcombine.low %v10640_v7, %v10658_v50  ;;  %v6014_v29 = vcombine.low %v12636_v51, %v12635_v24  ;;  %v12637_v57 = vrot.slane %v10610_v55, 6  ;;  %v8026_v7 = vld [vmem:[%s11875_s0 + $0x54] sm:$0xf]  ;;  %v8027_v55 = vld [vmem:[%s11875_s0 + $0x58] sm:$0xf] }
 0x14a   :  { %v4401_v23 = vrot.slane %v4399_v59, 4  ;;  %v6258_v14 = vcombine.low %v10647_v32, %v10664_v4  ;;  %v10815_v26 = vsel %vm10293_vm11, %v4392_v34, %v4393_v21  ;;  %v10819_v61 = vsel %vm10293_vm11, %v4395_v44, %v4396_v46  ;;  %v12647_v46 = vld [vmem:[#allocation27_spill] sm:$0xff]  ;;  %v12650_v32 = vld [vmem:[#allocation64_spill] sm:$0xff] }
 0x14b   :  { %v4347_v15 = vrot.slane %v12637_v57, 4  ;;  %12638 = vst [vmem:[#allocation3_spill] sm:$0xff] %v10815_v26  ;;  %v4402_v50 = vrot.slane %v8026_v7, 6  ;;  %v4405_v24 = vrot.slane %v8027_v55, 6  ;;  %v10831_v4 = vsel %vm10293_vm11, %v4398_v27, %v4399_v59  ;;  %v8028_v59 = vld [vmem:[%s11875_s0 + $0x5c] sm:$0xf] }
 0x14c   :  { %v12639_v34 = vrot.slane %v10572_v6, 6  ;;  %v4408_v27 = vrot.slane %v8028_v59, 6  ;;  %v7942_v7 = vld [vmem:[%s11876_s1 + $0x88] sm:$0xff]   ;;  %v8029_v55 = vld [vmem:[%s11875_s0 + $0x60] sm:$0xf]  ;;  %v6018_v60 = vcombine.low %v12653_v56, %v12652_v52  ;;  %v7946_v56 = vld [vmem:[%s11876_s1 + $0x98] sm:$0xff]  }
 0x14d   :  { %v10835_v21 = vsel %vm10293_vm11, %v4401_v23, %v4402_v50  ;;  %v4407_v51 = vrot.slane %v4405_v24, 4  ;;  %v7943_v59 = vld [vmem:[%s11874_s2 + $0x108] sm:$0xff]   ;;  %v7947_v52 = vld [vmem:[%s11874_s2 + $0x118] sm:$0xff]  }
 0x14e   :  { %v4349_v44 = vsel %vm10293_vm11, %v4347_v15, %v12639_v34  ;;  %v6260_v15 = vcombine.low %v10674_v30, %v10307_v35  ;;  %v4411_v34 = vrot.slane %v8029_v55, 6  ;;  %v12646_v55 = vld [vmem:[#allocation68_spill] sm:$0xff] }
 0x14f   :  { %6944 = vmatmul.mubr.bf16.gmra.mrb[44].mxu1 %v5989_v8  ;;  %v4404_v8 = vrot.slane %v4402_v50, 4  ;;  %v6259_v23 = vcombine.low %v4349_v44, %v10668_v45  ;;  %v10855_v6 = vsel %vm10293_vm11, %v4407_v51, %v4408_v27  ;;  %v4410_v50 = vrot.slane %v4408_v27, 4  ;;  %v12643_v44 = vld [vmem:[#allocation6_spill] sm:$0xff]  ;;  %v10876_v27 = vld [vmem:[%s11875_s0 + $0x7c] sm:$0xf] }
 0x150   :  { %7264 = vmatmul.mubr.bf16.gmra.mrb[44].mxu0 %v6231_v16  ;;  %6963 = vmatprep.mubr.bf16.mxu1 %v6014_v29  ;;  %v12640_v16 = vld [vmem:[#allocation61_spill] sm:$0xff]  ;;  %v12641_v29 = vld [vmem:[#allocation62_spill] sm:$0xff] }
 0x151   :  { %7283 = vmatprep.mubr.bf16.mxu0 %v6258_v14  ;;  %v6016_v57 = vcombine.low %v12641_v29, %v12640_v16  ;;  %v10851_v14 = vsel %vm10293_vm11, %v4404_v8, %v4405_v24  ;;  %v12644_v8 = vld [vmem:[#allocation101_spill] sm:$0xff]  ;;  %v12135_v16 = vrot.slane %v10876_v27, 6  ;;  %v4486_v29 = vrot.slane %v4411_v34, 4 }
 0x152   :  { %12642 = vst [vmem:[#allocation93_spill] sm:$0xff] %v10851_v14  ;;  %v12645_v51 = vcombine.low %v12643_v44, %v12644_v8  ;;  %v12134_v24 = vrot.slane %v12646_v55, 6  ;;  %v7944_v44 = vld [vmem:[%s11876_s1 + $0x90] sm:$0xff]   ;;  %v8031_v8 = vld [vmem:[%s11875_s0 + $0x80] sm:$0xf] }
 0x157   :  { %6964 = vmatmul.mubr.bf16.vlgmr.msra.gmra.mrb[0].mxu1 %v12645_v51  ;;  %v4424_v51 = vrot.slane %v8031_v8, 6 }
 0x158   :  { %7284 = vmatmul.mubr.bf16.vlgmr.msra.gmra.mrb[0].mxu0 %v6259_v23  ;;  %7012 = vmatpush3.bf16.msra.mxu1 %v10260_v62  ;;  %v7945_v62 = vld [vmem:[%s11874_s2 + $0x110] sm:$0xff]   ;;  %v10893_v23 = vsel %vm10293_vm11, %v4410_v50, %v4411_v34  ;;  %v12651_v50 = vld [vmem:[#allocation66_spill] sm:$0xff] }
 0x159   :  { %7332 = vmatpush3.bf16.msra.mxu0 %v12647_v46  ;;  %6967 = vmatprep.mubr.bf16.mxu1 %v6016_v57  ;;  %v10899_v46 = vsel %vm10293_vm11, %v4486_v29, %v12134_v24  ;;  %v12649_v57 = vld [vmem:[#allocation63_spill] sm:$0xff]  ;;  %v4426_v8 = vrot.slane %v4424_v51, 4  ;;  %v6261_v34 = vcombine.low %v12651_v50, %v10694_v20  ;;  %v6262_v29 = vcombine.low %v10708_v13, %v10719_v28 }
 0x15a   :  { %7287 = vmatprep.mubr.bf16.mxu0 %v6260_v15  ;;  %7013 = vmatprep.subr.bf16.mxu1 %v7942_v7  ;;  %12648 = vst [vmem:[#allocation95_spill] sm:$0xff] %v10899_v46  ;;  %v6017_v49 = vcombine.low %v12650_v32, %v12649_v57  ;;  %v4423_v15 = vrot.slane %v12135_v16, 4  ;;  %v8032_v32 = vld [vmem:[%s11875_s0 + $0x84] sm:$0xf]  ;;  %v4430_v24 = vrot.slane %v8033_v19, 6  ;;  %v6264_v46 = vcombine.low %v10751_v48, %v10755_v18  ;;  %v12658_v28 = vld [vmem:[#allocation71_spill] sm:$0xff] }
 0x15b   :  { %7333 = vmatprep.subr.bf16.mxu0 %v7943_v59  ;;  %v4427_v57 = vrot.slane %v8032_v32, 6  ;;  %v8034_v19 = vld [vmem:[%s11875_s0 + $0x8c] sm:$0xf]  ;;  %v12659_v13 = vshrl.u32 %v12658_v28, 16  ;;  %v12661_v18 = vld [vmem:[#allocation24_spill] sm:$0xff]  ;;  %v12662_v48 = vld [vmem:[#allocation74_spill] sm:$0xff] }
 0x15c   :  { %7014 = vmatpush3.bf16.msra.mxu1 %v7942_v7  ;;  %v10927_v7 = vsel %vm10293_vm11, %v4423_v15, %v4424_v51  ;;  %v4433_v32 = vrot.slane %v8034_v19, 6  ;;  %v4432_v16 = vrot.slane %v4430_v24, 4  ;;  %v8035_v51 = vld [vmem:[%s11875_s0 + $0x90] sm:$0xf] }
 0x15d   :  { %7334 = vmatpush3.bf16.msra.mxu0 %v7943_v59  ;;  %7015 = vmatprep.subr.bf16.mxu1 %v7944_v44  ;;  %v10931_v59 = vsel %vm10293_vm11, %v4426_v8, %v4427_v57  ;;  %v4429_v10 = vrot.slane %v4427_v57, 4  ;;  %v4436_v15 = vrot.slane %v8035_v51, 6  ;;  %v7948_v8 = vld [vmem:[%s11876_s1 + $0xa0] sm:$0xff]   ;;  %v1349_v20 = vrot.slane %v12659_v13, 4  ;;  %v7950_v13 = vld [vmem:[%s11876_s1 + $0xa8] sm:$0xff]  }
 0x15e   :  { %7335 = vmatprep.subr.bf16.mxu0 %v7945_v62  ;;  %v12656_v51 = vld [vmem:[#allocation70_spill] sm:$0xff] }
 0x15f   :  { %6968 = vmatmul.mubr.bf16.gmra.mrb[4].mxu1 %v6017_v49  ;;  %v4438_v57 = vrot.slane %v4436_v15, 4  ;;  %v6263_v49 = vcombine.low %v10723_v22, %v10742_v47  ;;  %v8036_v47 = vld [vmem:[%s11875_s0 + $0x94] sm:$0xf]  ;;  %v6021_v22 = vcombine.low %v12662_v48, %v12661_v18 }
 0x160   :  { %7288 = vmatmul.mubr.bf16.gmra.mrb[4].mxu0 %v6261_v34  ;;  %6971 = vmatprep.mubr.bf16.mxu1 %v6018_v60  ;;  %v12654_v34 = vld [vmem:[#allocation19_spill] sm:$0xff]  ;;  %v12655_v60 = vld [vmem:[#allocation14_spill] sm:$0xff]  ;;  %v7953_v48 = vld [vmem:[%s11874_s2 + $0x130] sm:$0xff]  }
 0x161   :  { %7291 = vmatprep.mubr.bf16.mxu0 %v6262_v29  ;;  %7016 = vmatpush3.bf16.msra.mxu1 %v7944_v44  ;;  %v6019_v19 = vcombine.low %v12655_v60, %v12654_v34  ;;  %v7949_v44 = vld [vmem:[%s11874_s2 + $0x120] sm:$0xff]   ;;  %v4435_v29 = vrot.slane %v4433_v32, 4  ;;  %v10959_v34 = vsel %vm10293_vm11, %v4429_v10, %v4430_v24  ;;  %v10963_v60 = vsel %vm10293_vm11, %v4432_v16, %v4433_v32  ;;  %v12660_v32 = vld [vmem:[#allocation47_spill] sm:$0xff] }
 0x162   :  { %7336 = vmatpush3.bf16.msra.mxu0 %v7945_v62  ;;  %7017 = vmatprep.subr.bf16.mxu1 %v7946_v56  ;;  %v12657_v62 = vld [vmem:[#allocation69_spill] sm:$0xff] }
 0x163   :  { %7337 = vmatprep.subr.bf16.mxu0 %v7947_v52  ;;  %v6020_v43 = vcombine.low %v12657_v62, %v12656_v51  ;;  %v4439_v51 = vrot.slane %v8036_v47, 6  ;;  %v8037_v62 = vld [vmem:[%s11875_s0 + $0x98] sm:$0xf]  ;;  %v10978_v24 = vsel %vm10293_vm11, %v4435_v29, %v4436_v15  ;;  %v7951_v47 = vld [vmem:[%s11874_s2 + $0x128] sm:$0xff]  }
 0x164   :  { %v4442_v28 = vrot.slane %v8037_v62, 6 }
 0x165   :  { %7018 = vmatpush3.bf16.msra.mxu1 %v7946_v56  ;;  %v10985_v16 = vsel %vm10293_vm11, %v4438_v57, %v4439_v51  ;;  %v8038_v56 = vld [vmem:[%s11875_s0 + $0x9c] sm:$0xf]  ;;  %v4441_v29 = vrot.slane %v4439_v51, 4  ;;  %v8039_v57 = vld [vmem:[%s11875_s0 + $0xa0] sm:$0xf] }
 0x166   :  { %7338 = vmatpush3.bf16.msra.mxu0 %v7947_v52  ;;  %7019 = vmatprep.subr.bf16.mxu1 %v7948_v8  ;;  %v4445_v52 = vrot.slane %v8038_v56, 6  ;;  %v4444_v62 = vrot.slane %v4442_v28, 4  ;;  %v4448_v10 = vrot.slane %v8039_v57, 6  ;;  %v12665_v57 = vld [vmem:[#allocation20_spill] sm:$0xff] }
 0x167   :  { %6972 = vmatmul.mubr.bf16.gmra.mrb[8].mxu1 %v6019_v19  ;;  %7339 = vmatprep.subr.bf16.mxu0 %v7949_v44  ;;  %v1350_v19 = vor.u32 %v1349_v20, %v12660_v32  ;;  %v7952_v20 = vld [vmem:[%s11876_s1 + $0xb0] sm:$0xff]   ;;  %v12666_v15 = vshll.u32 %v12665_v57, 16 }
 0x168   :  { %7292 = vmatmul.mubr.bf16.gmra.mrb[8].mxu0 %v6263_v49  ;;  %6975 = vmatprep.mubr.bf16.mxu1 %v6020_v43  ;;  %v6265_v43 = vcombine.low %v10766_v2, %v10770_v3  ;;  %v12663_v49 = vshll.u32 %v12646_v55, 16  ;;  %v4447_v51 = vrot.slane %v4445_v52, 4  ;;  %v4450_v56 = vrot.slane %v4448_v10, 4 }
 0x169   :  { %7295 = vmatprep.mubr.bf16.mxu0 %v6264_v46  ;;  %7020 = vmatpush3.bf16.msra.mxu1 %v7948_v8  ;;  %v6266_v46 = vcombine.low %v10785_v36, %v10815_v26  ;;  %v1351_v18 = vrot.slane %v1350_v19, 4  ;;  %v11014_v3 = vrot.slane %v12666_v15, 5  ;;  %v12667_v26 = vshrl.u32 %v12665_v57, 16  ;;  %v8040_v19 = vld [vmem:[%s11875_s0 + $0xa4] sm:$0xf] }
 0x16a   :  { %7340 = vmatpush3.bf16.msra.mxu0 %v7949_v44  ;;  %7021 = vmatprep.subr.bf16.mxu1 %v7950_v13  ;;  %v1355_v8 = vrot.slane %v12663_v49, 5  ;;  %v12664_v44 = vshrl.u32 %v12646_v55, 16  ;;  %v11020_v49 = vsel %vm10293_vm11, %v4441_v29, %v4442_v28  ;;  %v11024_v2 = vsel %vm10293_vm11, %v4444_v62, %v4445_v52  ;;  %v8041_v15 = vld [vmem:[%s11875_s0 + $0xa8] sm:$0xf]  ;;  %v7955_v62 = vld [vmem:[%s11874_s2 + $0x138] sm:$0xff]  }
 0x16b   :  { %7341 = vmatprep.subr.bf16.mxu0 %v7951_v47  ;;  %v1369_v36 = vrot.slane %v12667_v26, 4  ;;  %v4454_v57 = vrot.slane %v8041_v15, 6  ;;  %v7954_v26 = vld [vmem:[%s11876_s1 + $0xb8] sm:$0xff]  }
 0x16c   :  { %v1359_v32 = vrot.slane %v12664_v44, 4  ;;  %v4451_v44 = vrot.slane %v8040_v19, 6  ;;  %v1356_v19 = vsel %vm9598_vm8, %v1351_v18, %v1355_v8 }
 0x16d   :  { %7022 = vmatpush3.bf16.msra.mxu1 %v7950_v13  ;;  %v11039_v13 = vsel %vm10293_vm11, %v4447_v51, %v4448_v10  ;;  %v1370_v51 = vor.u32 %v1369_v36, %v11014_v3  ;;  %v6267_v36 = vcombine.low %v10819_v61, %v10831_v4 }
 0x16e   :  { %7342 = vmatpush3.bf16.msra.mxu0 %v7951_v47  ;;  %7023 = vmatprep.subr.bf16.mxu1 %v7952_v20  ;;  %v11043_v52 = vsel %vm10293_vm11, %v4450_v56, %v4451_v44  ;;  %v8042_v47 = vld [vmem:[%s11875_s0 + $0xac] sm:$0xf]  ;;  %v1360_v10 = vor.u32 %v1359_v32, %v1355_v8  ;;  %v4453_v15 = vrot.slane %v4451_v44, 4 }
 0x16f   :  { %6976 = vmatmul.mubr.bf16.gmra.mrb[12].mxu1 %v6021_v22  ;;  %v4457_v29 = vrot.slane %v8042_v47, 6  ;;  %7343 = vmatprep.subr.bf16.mxu0 %v7953_v48  ;;  %v12668_v22 = vcombine.low %v10080_v5, %v10101_v9  ;;  %v4456_v47 = vrot.slane %v4454_v57, 4  ;;  %v11065_v5 = vld [vmem:[%s11875_s0 + $0x74] sm:$0xf]  ;;  %v1371_v56 = vrot.slane %v1370_v51, 4 }
 0x170   :  { %7296 = vmatmul.mubr.bf16.gmra.mrb[12].mxu0 %v6265_v43  ;;  %v8043_v43 = vld [vmem:[%s11875_s0 + $0xb0] sm:$0xf]  ;;  %v4415_v9 = vrot.slane %v11065_v5, 6  ;;  %v11098_v51 = vld [vmem:[%s11875_s0 + $0x78] sm:$0xf] }
 0x171   :  { %6979 = vmatprep.mubr.bf16.mxu1 %v12668_v22  ;;  %7299 = vmatprep.mubr.bf16.mxu0 %v6266_v46  ;;  %v4460_v28 = vrot.slane %v8043_v43, 6  ;;  %v12669_v46 = vld [vmem:[#allocation73_spill] sm:$0xff]  ;;  %v4459_v32 = vrot.slane %v4457_v29, 4  ;;  %v6268_v22 = vcombine.low %v10835_v21, %v10851_v14  ;;  %v1361_v43 = vrot.slane %v1360_v10, 4  ;;  %12672 = vst [vmem:[#allocation98_spill] sm:$0xff] %v11098_v51 }
 0x172   :  { %7024 = vmatpush3.bf16.msra.mxu1 %v7952_v20  ;;  %7344 = vmatpush3.bf16.msra.mxu0 %v7953_v48  ;;  %v12670_v8 = vshll.u32 %v12669_v46, 16  ;;  %v6024_v20 = vcombine.low %v10140_v53, %v1356_v19  ;;  %v11077_v48 = vsel %vm10293_vm11, %v4453_v15, %v4454_v57  ;;  %v11081_v55 = vsel %vm10293_vm11, %v4456_v47, %v4457_v29  ;;  %v8045_v46 = vld [vmem:[%s11875_s0 + $0xb4] sm:$0xf]  ;;  %v8046_v53 = vld [vmem:[%s11875_s0 + $0xb8] sm:$0xf] }
 0x173   :  { %7025 = vmatprep.subr.bf16.mxu1 %v7954_v26  ;;  %v4462_v44 = vrot.slane %v4460_v28, 4  ;;  %7345 = vmatprep.subr.bf16.mxu0 %v7955_v62  ;;  %v4466_v19 = vrot.slane %v8046_v53, 6  ;;  %v11092_v57 = vld [vmem:[%s11875_s0 + $0x70] sm:$0xf]  ;;  %v4417_v29 = vrot.slane %v4415_v9, 4  ;;  %v4418_v15 = vrot.slane %v11098_v51, 6 }
 0x174   :  { %v1375_v18 = vrot.slane %v12670_v8, 5  ;;  %v4463_v8 = vrot.slane %v8045_v46, 6  ;;  %12671 = vst [vmem:[#allocation97_spill] sm:$0xff] %v11092_v57  ;;  %v6241_v10 = vrot.slane %v11092_v57, 10  ;;  %v6323_v47 = vcombine.low %v11077_v48, %v11081_v55  ;;  %v12674_v46 = vld [vmem:[#allocation21_spill] sm:$0xff] }
 0x175   :  { %v11108_v14 = vsel %vm10293_vm11, %v4459_v32, %v4460_v28  ;;  %v8049_v51 = vld [vmem:[%s11875_s0 + $0xbc] sm:$0xf] }
 0x176   :  { %7026 = vmatpush3.bf16.msra.mxu1 %v7954_v26  ;;  %7346 = vmatpush3.bf16.msra.mxu0 %v7955_v62  ;;  %v12673_v26 = vld [vmem:[#allocation48_spill] sm:$0xff]  ;;  %v11112_v57 = vsel %vm10293_vm11, %v4462_v44, %v4463_v8  ;;  %v4469_v62 = vrot.slane %v8049_v51, 6  ;;  %v4465_v32 = vrot.slane %v4463_v8, 4  ;;  %v4468_v44 = vrot.slane %v4466_v19, 4 }
 0x177   :  { %v12675_v53 = vcombine.low %v12673_v26, %v12674_v46  ;;  %v1366_v26 = vsel %vm9598_vm8, %v1361_v43, %v11014_v3  ;;  %v1376_v46 = vsel %vm9598_vm8, %v1371_v56, %v1375_v18  ;;  %v6324_v28 = vcombine.low %v11108_v14, %v11112_v57 }
 0x178   :  { %7300 = vmatmul.mubr.bf16.gmra.mrb[16].mxu0 %v6267_v36  ;;  %v4416_v36 = vsel %vm10293_vm11, %v6241_v10, %v4415_v9  ;;  %v4419_v3 = vsel %vm10293_vm11, %v4417_v29, %v4418_v15  ;;  %v4471_v17 = vrot.slane %v4469_v62, 4  ;;  %v6269_v18 = vcombine.low %v10855_v6, %v10893_v23  ;;  %v8051_v9 = vld [vmem:[%s11875_s0 + $0xc4] sm:$0xf] }
 0x179   :  { %6980 = vmatmul.mubr.bf16.gmra.mrb[16].mxu1 %v12675_v53  ;;  %7303 = vmatprep.mubr.bf16.mxu0 %v6268_v22  ;;  %v8050_v53 = vld [vmem:[%s11875_s0 + $0xc0] sm:$0xf]  ;;  %v4420_v22 = vrot.slane %v4418_v15, 4  ;;  %v6270_v43 = vcombine.low %v4416_v36, %v4419_v3  ;;  %v11135_v8 = vsel %vm10293_vm11, %v4465_v32, %v4466_v19  ;;  %v4475_v10 = vrot.slane %v8051_v9, 6  ;;  %v12689_v9 = vld [vmem:[#allocation77_spill] sm:$0xff] }
 0x17a   :  { %6983 = vmatprep.mubr.bf16.mxu1 %v6024_v20  ;;  %v4472_v51 = vrot.slane %v8050_v53, 6  ;;  %v6025_v20 = vcombine.low %v1366_v26, %v1376_v46  ;;  %v11139_v53 = vsel %vm10293_vm11, %v4468_v44, %v4469_v62  ;;  %v12676_v62 = vcombine.low %v10245_v41, %v10345_v1  ;;  %v12680_v3 = vld [vmem:[#allocation30_spill] sm:$0xff] }
 0x17b   :  { %v6325_v29 = vcombine.low %v11135_v8, %v11139_v53  ;;  %v12677_v46 = vrot.slane %v10876_v27, 6  ;;  %v12678_v36 = vcombine.low %v10350_v42, %v10355_v11  ;;  %v12679_v41 = vcombine.low %v10361_v63, %v10366_v58  ;;  %v12684_v42 = vld [vmem:[#allocation80_spill] sm:$0xff] }
 0x17c   :  { %v4474_v56 = vrot.slane %v4472_v51, 4  ;;  %v11148_v15 = vsel %vm10293_vm11, %v4471_v17, %v4472_v51  ;;  %v6272_v51 = vcombine.low %v10931_v59, %v10959_v34  ;;  %v6273_v1 = vcombine.low %v10963_v60, %v10978_v24 }
 0x17d   :  { %v4422_v32 = vsel %vm10293_vm11, %v4420_v22, %v12677_v46  ;;  %v6274_v27 = vcombine.low %v10985_v16, %v11020_v49  ;;  %v6275_v63 = vcombine.low %v11024_v2, %v11039_v13  ;;  %v6276_v58 = vcombine.low %v11043_v52, %v11077_v48  ;;  %v12687_v22 = vld [vmem:[#allocation75_spill] sm:$0xff] }
 0x17e   :  { %v11152_v19 = vsel %vm10293_vm11, %v4474_v56, %v4475_v10  ;;  %v6271_v44 = vcombine.low %v4422_v32, %v10927_v7  ;;  %v12683_v56 = vld [vmem:[#allocation76_spill] sm:$0xff]  ;;  %v6277_v46 = vcombine.low %v11081_v55, %v11108_v14  ;;  %v6278_v32 = vcombine.low %v11112_v57, %v11135_v8  ;;  %v12774_v14 = vld [vmem:[#allocation83_spill] sm:$0xff] }
 0x17f   :  { %v6326_v26 = vcombine.low %v11148_v15, %v11152_v19  ;;  %v12685_v11 = vcombine.low %v12683_v56, %v12684_v42  ;;  %v12694_v42 = vld [vmem:[#allocation85_spill] sm:$0xff]  ;;  %v4499_v55 = vrot.slane %v12774_v14, 6  ;;  %v12775_v57 = vld [vmem:[#allocation55_spill] sm:$0xff] }
 0x180   :  { %7304 = vmatmul.mubr.bf16.gmra.mrb[20].mxu0 %v6269_v18  ;;  %v12686_v18 = vld [vmem:[#allocation72_spill] sm:$0xff] }
 0x181   :  { %6984 = vmatmul.mubr.bf16.gmra.mrb[20].mxu1 %v6025_v20  ;;  %7307 = vmatprep.mubr.bf16.mxu0 %v6270_v43  ;;  %v12681_v20 = vld [vmem:[#allocation78_spill] sm:$0xff]  ;;  %v12688_v43 = vcombine.low %v12686_v18, %v12687_v22 }
 0x182   :  { %6987 = vmatprep.mubr.bf16.mxu1 %v12676_v62  ;;  %v12682_v17 = vcombine.low %v12680_v3, %v12681_v20  ;;  %v12690_v62 = vcombine.low %v12689_v9, %v10524_v39  ;;  %v12692_v39 = vcombine.low %v10540_v40, %v10544_v0  ;;  %v12693_v3 = vld [vmem:[#allocation84_spill] sm:$0xff] }
 0x183   :  { %v2238_v20 = vrot.slane %v12693_v3, 5  ;;  %v12707_v3 = vld [vmem:[#allocation91_spill] sm:$0xff] }
 0x188   :  { %7308 = vmatmul.mubr.bf16.gmra.mrb[24].mxu0 %v6271_v44  ;;  %v4477_v44 = vrot.slane %v4475_v10, 4  ;;  %v8053_v10 = vld [vmem:[%s11875_s0 + $0xcc] sm:$0xf] }
 0x189   :  { %6988 = vmatmul.mubr.bf16.gmra.mrb[24].mxu1 %v12678_v36  ;;  %7311 = vmatprep.mubr.bf16.mxu0 %v6272_v51  ;;  %v8052_v51 = vld [vmem:[%s11875_s0 + $0xc8] sm:$0xf] }
 0x18a   :  { %6991 = vmatprep.mubr.bf16.mxu1 %v12679_v41  ;;  %v4478_v36 = vrot.slane %v8052_v51, 6  ;;  %v12691_v41 = vcombine.low %v10528_v54, %v10532_v25  ;;  %v6279_v54 = vcombine.low %v11139_v53, %v11148_v15  ;;  %v12701_v51 = vld [vmem:[#allocation8_spill] sm:$0xff]  ;;  %v12779_v15 = vld [vmem:[#allocation79_spill] sm:$0xff] }
 0x18c   :  { %v4480_v40 = vrot.slane %v4478_v36, 4 }
 0x190   :  { %7312 = vmatmul.mubr.bf16.gmra.mrb[28].mxu0 %v6273_v1  ;;  %v11207_v1 = vsel %vm10293_vm11, %v4477_v44, %v4478_v36  ;;  %v12700_v44 = vld [vmem:[#allocation7_spill] sm:$0xff] }
 0x191   :  { %6992 = vmatmul.mubr.bf16.gmra.mrb[28].mxu1 %v12682_v17  ;;  %7315 = vmatprep.mubr.bf16.mxu0 %v6274_v27  ;;  %v4481_v27 = vrot.slane %v8053_v10, 6  ;;  %v6280_v25 = vcombine.low %v11152_v19, %v11207_v1  ;;  %v11220_v17 = vld [vmem:[%s11875_s0 + $0xd0] sm:$0xf]  ;;  %v12702_v36 = vcombine.low %v12700_v44, %v12701_v51  ;;  %v12705_v10 = vld [vmem:[#allocation10_spill] sm:$0xff]  ;;  %v4502_v19 = vrot.slane %v12779_v15, 6 }
 0x192   :  { %6995 = vmatprep.mubr.bf16.mxu1 %v12685_v11  ;;  %v4484_v56 = vrot.slane %v11220_v17, 6  ;;  %v6046_v11 = vrot.slane %v12694_v42, 9  ;;  %v12714_v42 = vld [vmem:[#allocation82_spill] sm:$0xff]  ;;  %v12725_v44 = vld [vmem:[#allocation88_spill] sm:$0xff] }
 0x193   :  { %v4483_v0 = vrot.slane %v4481_v27, 4  ;;  %v11230_v18 = vsel %vm10293_vm11, %v4480_v40, %v4481_v27  ;;  %v12713_v40 = vld [vmem:[#allocation13_spill] sm:$0xff] }
 0x194   :  { %v2239_v9 = vsel %vm8150_vm2, %v6046_v11, %v2238_v20  ;;  %v12715_v11 = vld [vmem:[#allocation94_spill] sm:$0xff]  ;;  %v6327_v17 = vcombine.low %v11207_v1, %v11230_v18  ;;  %v12780_v1 = vld [vmem:[#allocation59_spill] sm:$0xff] }
 0x195   :  { %v11236_v22 = vsel %vm10293_vm11, %v4483_v0, %v4484_v56 }
 0x198   :  { %7316 = vmatmul.mubr.bf16.gmra.mrb[32].mxu0 %v6275_v63  ;;  %v2240_v63 = vrot.slane %v2238_v20, 4 }
 0x199   :  { %6996 = vmatmul.mubr.bf16.gmra.mrb[32].mxu1 %v12688_v43  ;;  %7319 = vmatprep.mubr.bf16.mxu0 %v6276_v58  ;;  %v12695_v58 = vcombine.low %v10550_v37, %v10631_v33  ;;  %v12759_v43 = vld [vmem:[#allocation41_spill] sm:$0xff] }
 0x19a   :  { %6999 = vmatprep.mubr.bf16.mxu1 %v12690_v62  ;;  %v12697_v62 = vld [vmem:[#allocation2_spill] sm:$0xff] }
 0x19b   :  { %v12698_v37 = vrot.slane %v12697_v62, 5  ;;  %v12721_v62 = vld [vmem:[#allocation16_spill] sm:$0xff] }
 0x19d   :  { %v2242_v33 = vsel %vm8150_vm2, %v2240_v63, %v12698_v37  ;;  %v12716_v63 = vcombine.low %v12714_v42, %v12715_v11  ;;  %v2311_v42 = vrot.slane %v11065_v5, 5  ;;  %v12737_v11 = vld [vmem:[#allocation31_spill] sm:$0xff] }
 0x1a0   :  { %7320 = vmatmul.mubr.bf16.gmra.mrb[36].mxu0 %v6277_v46  ;;  %v6064_v46 = vcombine.low %v2239_v9, %v2242_v33  ;;  %v12720_v9 = vld [vmem:[#allocation17_spill] sm:$0xff]  ;;  %v12722_v33 = vld [vmem:[#allocation22_spill] sm:$0xff] }
 0x1a1   :  { %7000 = vmatmul.mubr.bf16.gmra.mrb[36].mxu1 %v12691_v41  ;;  %7323 = vmatprep.mubr.bf16.mxu0 %v6278_v32  ;;  %v12699_v32 = vcombine.low %v10668_v45, %v10674_v30  ;;  %v12703_v41 = vcombine.low %v10307_v35, %v12651_v50  ;;  %v12712_v30 = vld [vmem:[#allocation15_spill] sm:$0xff]  ;;  %v12717_v35 = vld [vmem:[#allocation92_spill] sm:$0xff]  ;;  %v6069_v37 = vcombine.low %v12721_v62, %v12720_v9 }
 0x1a2   :  { %7003 = vmatprep.mubr.bf16.mxu1 %v12692_v39  ;;  %v12704_v39 = vld [vmem:[#allocation9_spill] sm:$0xff]  ;;  %v6068_v0 = vcombine.low %v12713_v40, %v12712_v30  ;;  %v12718_v50 = vld [vmem:[#allocation87_spill] sm:$0xff] }
 0x1a3   :  { %v12706_v27 = vcombine.low %v12704_v39, %v12705_v10  ;;  %v12730_v10 = vld [vmem:[#allocation25_spill] sm:$0xff]  ;;  %v8055_v30 = vld [vmem:[%s11875_s0 + $0x68] sm:$0xf] }
 0x1a4   :  { %v4490_v40 = vrot.slane %v8055_v30, 6 }
 0x1a8   :  { %7324 = vmatmul.mubr.bf16.gmra.mrb[40].mxu0 %v6279_v54  ;;  %v12710_v54 = vld [vmem:[#allocation12_spill] sm:$0xff] }
 0x1a9   :  { %7004 = vmatmul.mubr.bf16.gmra.mrb[40].mxu1 %v12695_v58  ;;  %7327 = vmatprep.mubr.bf16.mxu0 %v6280_v25  ;;  %v12711_v25 = vld [vmem:[#allocation11_spill] sm:$0xff]  ;;  %v12719_v58 = vcombine.low %v12717_v35, %v12718_v50  ;;  %v12739_v50 = vld [vmem:[#allocation34_spill] sm:$0xff] }
 0x1aa   :  { %7007 = vmatprep.mubr.bf16.mxu1 %v10738_v31  ;;  %v6281_v31 = vcombine.low %v11230_v18, %v11236_v22  ;;  %v6067_v45 = vcombine.low %v12711_v25, %v12710_v54  ;;  %v12734_v25 = vld [vmem:[#allocation3_spill] sm:$0xff]  ;;  %v12781_v18 = vld [vmem:[#allocation58_spill] sm:$0xff] }
 0x1b0   :  { %7328 = vmatmul.mubr.bf16.gmra.mrb[44].mxu0 %v6281_v31  ;;  %v12723_v31 = vld [vmem:[#allocation18_spill] sm:$0xff] }
 0x1b1   :  { %7008 = vmatmul.mubr.bf16.gmra.mrb[44].mxu1 %v10787_v38  ;;  %7347 = vmatprep.mubr.bf16.mxu0 %v12699_v32  ;;  %v12708_v38 = vld [vmem:[#allocation90_spill] sm:$0xff] }
 0x1b2   :  { %7027 = vmatprep.mubr.bf16.mxu1 %v6064_v46  ;;  %v12709_v20 = vcombine.low %v12707_v3, %v12708_v38  ;;  %v6070_v46 = vcombine.low %v12723_v31, %v12722_v33  ;;  %v12724_v32 = vld [vmem:[#allocation86_spill] sm:$0xff]  ;;  %v12732_v38 = vld [vmem:[#allocation28_spill] sm:$0xff]  ;;  %v4492_v33 = vrot.slane %v4490_v40, 4  ;;  %v8056_v31 = vld [vmem:[%s11875_s0 + $0x6c] sm:$0xf]  ;;  %s8057_s0 = smov 96  }
 0x1b3   :  { %v12726_v51 = vcombine.low %v12724_v32, %v12725_v44  ;;  %v12743_v32 = vld [vmem:[#allocation97_spill] sm:$0xff]  ;;  %v12744_v44 = vld [vmem:[#allocation98_spill] sm:$0xff] }
 0x1b4   :  { %v2314_v5 = vrot.slane %v12744_v44, 5 }
 0x1b6   :  { %v2316_v30 = vrot.slane %v2314_v5, 4 }
 0x1b8   :  { %7348 = vmatmul.mubr.bf16.vlgmr.msra.gmra.mrb[0].mxu0 %v12703_v41  ;;  %v12728_v41 = vld [vmem:[#allocation96_spill] sm:$0xff] }
 0x1b9   :  { %7028 = vmatmul.mubr.bf16.vlgmr.msra.gmra.mrb[0].mxu1 %v12702_v36  ;;  %7351 = vmatprep.mubr.bf16.mxu0 %v12709_v20  ;;  %v12727_v36 = vld [vmem:[#allocation89_spill] sm:$0xff]  ;;  %v12733_v20 = vld [vmem:[#allocation26_spill] sm:$0xff] }
 0x1ba   :  { %7031 = vmatprep.mubr.bf16.mxu1 %v12706_v27  ;;  %v12729_v39 = vcombine.low %v12727_v36, %v12728_v41  ;;  %v12731_v27 = vld [vmem:[#allocation23_spill] sm:$0xff]  ;;  %v6072_v54 = vcombine.low %v12733_v20, %v12732_v38  ;;  %v12749_v20 = vld [vmem:[#allocation36_spill] sm:$0xff] }
 0x1bb   :  { %v6071_v3 = vcombine.low %v12731_v27, %v12730_v10  ;;  %v12747_v41 = vld [vmem:[#allocation95_spill] sm:$0xff] }
 0x1c0   :  { %7352 = vmatmul.mubr.bf16.gmra.mrb[4].mxu0 %v12716_v63  ;;  %v12738_v63 = vld [vmem:[#allocation29_spill] sm:$0xff] }
 0x1c1   :  { %7032 = vmatmul.mubr.bf16.gmra.mrb[4].mxu1 %v6067_v45  ;;  %7355 = vmatprep.mubr.bf16.mxu0 %v12719_v58  ;;  %v12735_v45 = vcombine.low %v12734_v25, %v10819_v61  ;;  %v6073_v35 = vcombine.low %v12738_v63, %v12737_v11  ;;  %v12740_v58 = vld [vmem:[#allocation32_spill] sm:$0xff]  ;;  %v12754_v11 = vld [vmem:[#allocation37_spill] sm:$0xff] }
 0x1c2   :  { %7035 = vmatprep.mubr.bf16.mxu1 %v6068_v0  ;;  %v12736_v0 = vcombine.low %v10831_v4, %v10835_v21  ;;  %v6074_v9 = vcombine.low %v12740_v58, %v12739_v50  ;;  %v12741_v61 = vld [vmem:[#allocation68_spill] sm:$0xff]  ;;  %v6047_v4 = vrot.slane %v12743_v32, 9  ;;  %v2313_v21 = vrot.slane %v2311_v42, 4  ;;  %v12756_v50 = vld [vmem:[#allocation38_spill] sm:$0xff] }
 0x1c3   :  { %v12742_v62 = vrot.slane %v12741_v61, 6  ;;  %v12758_v61 = vcombine.low %v10978_v24, %v10985_v16  ;;  %v12767_v16 = vld [vmem:[#allocation49_spill] sm:$0xff]  ;;  %v12768_v32 = vld [vmem:[#allocation46_spill] sm:$0xff] }
 0x1c4   :  { %v2315_v38 = vsel %vm8150_vm2, %v2313_v21, %v2314_v5  ;;  %v12772_v21 = vld [vmem:[#allocation52_spill] sm:$0xff]  ;;  %v4495_v5 = vrot.slane %v4484_v56, 4  ;;  %v12777_v56 = vld [vmem:[#allocation57_spill] sm:$0xff] }
 0x1c8   :  { %7356 = vmatmul.mubr.bf16.gmra.mrb[8].mxu0 %v12726_v51  ;;  %v12745_v51 = vld [vmem:[#allocation93_spill] sm:$0xff] }
 0x1c9   :  { %7036 = vmatmul.mubr.bf16.gmra.mrb[8].mxu1 %v6069_v37  ;;  %7359 = vmatprep.mubr.bf16.mxu0 %v12729_v39  ;;  %v4489_v37 = vrot.slane %v12742_v62, 4  ;;  %v12746_v36 = vcombine.low %v12745_v51, %v10855_v6  ;;  %v12748_v39 = vcombine.low %v10893_v23, %v12747_v41  ;;  %v12750_v6 = vld [vmem:[#allocation35_spill] sm:$0xff]  ;;  %v12751_v23 = vld [vmem:[#allocation33_spill] sm:$0xff]  ;;  %v12760_v62 = vld [vmem:[#allocation40_spill] sm:$0xff] }
 0x1ca   :  { %7039 = vmatprep.mubr.bf16.mxu1 %v6070_v46  ;;  %v4493_v46 = vrot.slane %v8056_v31, 6  ;;  %v12763_v31 = vcombine.low %v11020_v49, %v11024_v2  ;;  %v12769_v2 = vld [vmem:[#allocation51_spill] sm:$0xff]  ;;  %v12770_v49 = vld [vmem:[#allocation50_spill] sm:$0xff]  ;;  %v12773_v51 = vld [vmem:[#allocation81_spill] sm:$0xff] }
 0x1cb   :  { %v4491_v10 = vsel %vm10293_vm11, %v4489_v37, %v4490_v40  ;;  %v12752_v40 = vrot.slane %v12751_v23, 5  ;;  %v6079_v37 = vcombine.low %v12760_v62, %v12759_v43  ;;  %v12778_v41 = vld [vmem:[#allocation56_spill] sm:$0xff] }
 0x1cc   :  { %v4494_v27 = vsel %vm10293_vm11, %v4492_v33, %v4493_v46  ;;  %v12766_v46 = vld [vmem:[#allocation44_spill] sm:$0xff]  ;;  %v6086_v8 = vcombine.low %v12778_v41, %v12777_v56 }
 0x1cd   :  { %v6317_v25 = vcombine.low %v4491_v10, %v4494_v27  ;;  %v6087_v27 = vcombine.low %v12781_v18, %v12780_v1 }
 0x1d0   :  { %7360 = vmatmul.mubr.bf16.gmra.mrb[12].mxu0 %v12735_v45 }
 0x1d1   :  { %7040 = vmatmul.mubr.bf16.gmra.mrb[12].mxu1 %v6071_v3  ;;  %7363 = vmatprep.mubr.bf16.mxu0 %v12736_v0  ;;  %v2312_v3 = vsel %vm8150_vm2, %v6047_v4, %v2311_v42  ;;  %v2318_v0 = vsel %vm8150_vm2, %v2316_v30, %v12752_v40  ;;  %v12753_v42 = vcombine.low %v10927_v7, %v10931_v59  ;;  %v12761_v7 = vld [vmem:[#allocation43_spill] sm:$0xff]  ;;  %v12762_v59 = vld [vmem:[#allocation42_spill] sm:$0xff] }
 0x1d2   :  { %7043 = vmatprep.mubr.bf16.mxu1 %v6072_v54  ;;  %v6075_v54 = vcombine.low %v12750_v6, %v12749_v20  ;;  %v6076_v45 = vcombine.low %v2312_v3, %v2315_v38  ;;  %v6077_v63 = vcombine.low %v2318_v0, %v12754_v11  ;;  %v6080_v33 = vcombine.low %v12762_v59, %v12761_v7 }
 0x1d3   :  { %v6082_v4 = vcombine.low %v12768_v32, %v12767_v16 }
 0x1d8   :  { %7364 = vmatmul.mubr.bf16.gmra.mrb[16].mxu0 %v12746_v36  ;;  %v4496_v36 = vrot.slane %v12773_v51, 6 }
 0x1d9   :  { %7044 = vmatmul.mubr.bf16.gmra.mrb[16].mxu1 %v6073_v35  ;;  %7367 = vmatprep.mubr.bf16.mxu0 %v12748_v39  ;;  %v12755_v35 = vld [vmem:[#allocation39_spill] sm:$0xff]  ;;  %v4501_v39 = vrot.slane %v4499_v55, 4 }
 0x1da   :  { %7047 = vmatprep.mubr.bf16.mxu1 %v6074_v9  ;;  %v6078_v58 = vcombine.low %v12756_v50, %v12755_v35  ;;  %v12757_v9 = vcombine.low %v10959_v34, %v10963_v60  ;;  %v12764_v34 = vcombine.low %v11039_v13, %v11043_v52  ;;  %v12765_v60 = vld [vmem:[#allocation45_spill] sm:$0xff]  ;;  %v6083_v13 = vcombine.low %v12770_v49, %v12769_v2 }
 0x1db   :  { %v6081_v24 = vcombine.low %v12766_v46, %v12765_v60  ;;  %v12771_v52 = vld [vmem:[#allocation53_spill] sm:$0xff]  ;;  %v4497_v48 = vsel %vm10293_vm11, %v4495_v5, %v4496_v36  ;;  %v4503_v10 = vsel %vm10293_vm11, %v4501_v39, %v4502_v19 }
 0x1dc   :  { %v6084_v44 = vcombine.low %v12772_v21, %v12771_v52  ;;  %v6328_v53 = vcombine.low %v11236_v22, %v4497_v48 }
 0x1e0   :  { %7368 = vmatmul.mubr.bf16.gmra.mrb[20].mxu0 %v6317_v25 }
 0x1e1   :  { %7048 = vmatmul.mubr.bf16.gmra.mrb[20].mxu1 %v6075_v54  ;;  %7371 = vmatprep.mubr.bf16.mxu0 %v12753_v42 }
 0x1e2   :  { %7051 = vmatprep.mubr.bf16.mxu1 %v6076_v45 }
 0x1e8   :  { %7372 = vmatmul.mubr.bf16.gmra.mrb[24].mxu0 %v12757_v9 }
 0x1e9   :  { %7052 = vmatmul.mubr.bf16.gmra.mrb[24].mxu1 %v6077_v63  ;;  %7375 = vmatprep.mubr.bf16.mxu0 %v12758_v61 }
 0x1ea   :  { %7055 = vmatprep.mubr.bf16.mxu1 %v6078_v58 }
 0x1f0   :  { %7376 = vmatmul.mubr.bf16.gmra.mrb[28].mxu0 %v12763_v31 }
 0x1f1   :  { %7056 = vmatmul.mubr.bf16.gmra.mrb[28].mxu1 %v6079_v37  ;;  %7379 = vmatprep.mubr.bf16.mxu0 %v12764_v34 }
 0x1f2   :  { %7059 = vmatprep.mubr.bf16.mxu1 %v6080_v33 }
 0x1f8   :  { %7380 = vmatmul.mubr.bf16.gmra.mrb[32].mxu0 %v6323_v47  ;;  %v12776_v47 = vld [vmem:[#allocation54_spill] sm:$0xff] }
 0x1f9   :  { %7060 = vmatmul.mubr.bf16.gmra.mrb[32].mxu1 %v6081_v24  ;;  %7383 = vmatprep.mubr.bf16.mxu0 %v6324_v28  ;;  %v6085_v28 = vcombine.low %v12776_v47, %v12775_v57 }
 0x1fa   :  { %7063 = vmatprep.mubr.bf16.mxu1 %v6082_v4 }
 0x200   :  { %7384 = vmatmul.mubr.bf16.gmra.mrb[36].mxu0 %v6325_v29  ;;  %v4498_v29 = vrot.slane %v4496_v36, 4 }
 0x201   :  { %7064 = vmatmul.mubr.bf16.gmra.mrb[36].mxu1 %v6083_v13  ;;  %7387 = vmatprep.mubr.bf16.mxu0 %v6326_v26 }
 0x202   :  { %7067 = vmatprep.mubr.bf16.mxu1 %v6084_v44  ;;  %v4500_v26 = vsel %vm10293_vm11, %v4498_v29, %v4499_v55 }
 0x203   :  { %v6329_v3 = vcombine.low %v4500_v26, %v4503_v10 }
 0x208   :  { %7388 = vmatmul.mubr.bf16.gmra.mrb[40].mxu0 %v6327_v17 }
 0x209   :  { %7068 = vmatmul.mubr.bf16.gmra.mrb[40].mxu1 %v6085_v28  ;;  %7391 = vmatprep.mubr.bf16.mxu0 %v6328_v53 }
 0x20a   :  { %7071 = vmatprep.mubr.bf16.mxu1 %v6086_v8 }
 0x210   :  { %7392 = vmatmul.mubr.bf16.gmra.mrb[44].mxu0 %v6329_v3 }
 0x211   :  { %7072 = vmatmul.mubr.bf16.gmra.mrb[44].mxu1 %v6087_v27 }
 0x28b   :  { %v7349_v38 = vpop.f32.mrb[0].mxu0 }
 0x28c   :  { %v7029_v22 = vpop.f32.mrb[0].mxu1  ;;  %v5091_v54 = vpop.f32.mrb[1].mxu0 }
 0x28d   :  { %v2597_v20 = vpop.f32.mrb[1].mxu1  ;;  %v11389_v6 = vadd.f32 %v7349_v38, %v7029_v22  ;;  %v7350_v30 = vpop.f32.mrb[2].mxu0 }
 0x28e   :  { %v7030_v25 = vpop.f32.mrb[2].mxu1  ;;  %v11391_v45 = vadd.f32 %v5091_v54, %v2597_v20  ;;  %v5094_v12 = vpop.f32.mrb[3].mxu0 }
 0x28f   :  { %v2600_v23 = vpop.f32.mrb[3].mxu1  ;;  %v11393_v40 = vadd.f32 %v7350_v30, %v7030_v25  ;;  %5382 = vrot.lane.b32.xlu1 %v11389_v6, %s8057_s0 }
 0x290   :  { %v11397_v0 = vadd.f32 %v5094_v12, %v2600_v23  ;;  %5378 = vrot.lane.b32.xlu0 %v11391_v45, %s8057_s0 }
 0x293   :  { %5384 = vrot.lane.b32.xlu1 %v11393_v40, %s8057_s0  ;;  %v7353_v11 = vpop.f32.mrb[4].mxu0 }
 0x294   :  { %v7033_v42 = vpop.f32.mrb[4].mxu1  ;;  %5380 = vrot.lane.b32.xlu0 %v11397_v0, %s8057_s0  ;;  %v5107_v50 = vpop.f32.mrb[5].mxu0 }
 0x295   :  { %v2613_v63 = vpop.f32.mrb[5].mxu1  ;;  %v11405_v35 = vadd.f32 %v7353_v11, %v7033_v42  ;;  %v7354_v61 = vpop.f32.mrb[6].mxu0 }
 0x296   :  { %v7034_v58 = vpop.f32.mrb[6].mxu1  ;;  %v11407_v9 = vadd.f32 %v5107_v50, %v2613_v63  ;;  %v5110_v37 = vpop.f32.mrb[7].mxu0 }
 0x297   :  { %v2616_v43 = vpop.f32.mrb[7].mxu1  ;;  %v11409_v62 = vadd.f32 %v7354_v61, %v7034_v58 }
 0x298   :  { %v11411_v7 = vadd.f32 %v5110_v37, %v2616_v43  ;;  %5390 = vrot.lane.b32.xlu0 %v11405_v35, %s8057_s0 }
 0x299   :  { %5392 = vrot.lane.b32.xlu1 %v11409_v62, %s8057_s0 }
 0x29b   :  { %v7357_v33 = vpop.f32.mrb[8].mxu0 }
 0x29c   :  { %v7037_v59 = vpop.f32.mrb[8].mxu1  ;;  %5386 = vrot.lane.b32.xlu0 %v11407_v9, %s8057_s0  ;;  %v5123_v60 = vpop.f32.mrb[9].mxu0 }
 0x29d   :  { %v2629_v31 = vpop.f32.mrb[9].mxu1  ;;  %v11419_v34 = vadd.f32 %v7357_v33, %v7037_v59  ;;  %5388 = vrot.lane.b32.xlu1 %v11411_v7, %s8057_s0  ;;  %v7358_v16 = vpop.f32.mrb[10].mxu0 }
 0x29e   :  { %v7038_v46 = vpop.f32.mrb[10].mxu1  ;;  %v11423_v24 = vadd.f32 %v5123_v60, %v2629_v31  ;;  %v5126_v2 = vpop.f32.mrb[11].mxu0 }
 0x29f   :  { %v2632_v32 = vpop.f32.mrb[11].mxu1  ;;  %v11425_v4 = vadd.f32 %v7358_v16, %v7038_v46 }
 0x2a0   :  { %v11427_v49 = vadd.f32 %v5126_v2, %v2632_v32  ;;  %5398 = vrot.lane.b32.xlu0 %v11419_v34, %s8057_s0 }
 0x2a1   :  { %5400 = vrot.lane.b32.xlu1 %v11425_v4, %s8057_s0 }
 0x2a3   :  { %v7361_v52 = vpop.f32.mrb[12].mxu0 }
 0x2a4   :  { %v7041_v13 = vpop.f32.mrb[12].mxu1  ;;  %5394 = vrot.lane.b32.xlu0 %v11423_v24, %s8057_s0  ;;  %v5139_v5 = vpop.f32.mrb[13].mxu0 }
 0x2a5   :  { %v2645_v21 = vpop.f32.mrb[13].mxu1  ;;  %v11435_v44 = vadd.f32 %v7361_v52, %v7041_v13  ;;  %5396 = vrot.lane.b32.xlu1 %v11427_v49, %s8057_s0  ;;  %v7362_v14 = vpop.f32.mrb[14].mxu0 }
 0x2a6   :  { %v7042_v51 = vpop.f32.mrb[14].mxu1  ;;  %v11439_v36 = vadd.f32 %v5139_v5, %v2645_v21  ;;  %v5142_v57 = vpop.f32.mrb[15].mxu0 }
 0x2a7   :  { %v2648_v55 = vpop.f32.mrb[15].mxu1  ;;  %v11441_v48 = vadd.f32 %v7362_v14, %v7042_v51 }
 0x2a8   :  { %v11443_v47 = vadd.f32 %v5142_v57, %v2648_v55  ;;  %5406 = vrot.lane.b32.xlu0 %v11435_v44, %s8057_s0 }
 0x2a9   :  { %5408 = vrot.lane.b32.xlu1 %v11441_v48, %s8057_s0 }
 0x2ab   :  { %v7365_v17 = vpop.f32.mrb[16].mxu0 }
 0x2ac   :  { %v7045_v28 = vpop.f32.mrb[16].mxu1  ;;  %5402 = vrot.lane.b32.xlu0 %v11439_v36, %s8057_s0  ;;  %v5155_v8 = vpop.f32.mrb[17].mxu0 }
 0x2ad   :  { %v2661_v56 = vpop.f32.mrb[17].mxu1  ;;  %v11451_v41 = vadd.f32 %v7365_v17, %v7045_v28  ;;  %5404 = vrot.lane.b32.xlu1 %v11443_v47, %s8057_s0  ;;  %v7366_v39 = vpop.f32.mrb[18].mxu0 }
 0x2ae   :  { %v7046_v53 = vpop.f32.mrb[18].mxu1  ;;  %v11455_v29 = vadd.f32 %v5155_v8, %v2661_v56  ;;  %v5158_v26 = vpop.f32.mrb[19].mxu0 }
 0x2af   :  { %v2664_v15 = vpop.f32.mrb[19].mxu1  ;;  %v11457_v19 = vadd.f32 %v7366_v39, %v7046_v53 }
 0x2b0   :  { %v11459_v10 = vadd.f32 %v5158_v26, %v2664_v15  ;;  %5414 = vrot.lane.b32.xlu0 %v11451_v41, %s8057_s0 }
 0x2b1   :  { %5416 = vrot.lane.b32.xlu1 %v11457_v19, %s8057_s0 }
 0x2b3   :  { %v7369_v18 = vpop.f32.mrb[20].mxu0 }
 0x2b4   :  { %v7049_v1 = vpop.f32.mrb[20].mxu1  ;;  %5410 = vrot.lane.b32.xlu0 %v11455_v29, %s8057_s0  ;;  %v5171_v22 = vpop.f32.mrb[21].mxu0 }
 0x2b5   :  { %v2677_v27 = vpop.f32.mrb[21].mxu1  ;;  %v11467_v3 = vadd.f32 %v7369_v18, %v7049_v1  ;;  %5412 = vrot.lane.b32.xlu1 %v11459_v10, %s8057_s0  ;;  %v7370_v54 = vpop.f32.mrb[22].mxu0 }
 0x2b6   :  { %v7050_v38 = vpop.f32.mrb[22].mxu1  ;;  %v11471_v20 = vadd.f32 %v5171_v22, %v2677_v27  ;;  %v5174_v23 = vpop.f32.mrb[23].mxu0 }
 0x2b7   :  { %v2680_v25 = vpop.f32.mrb[23].mxu1  ;;  %v11473_v30 = vadd.f32 %v7370_v54, %v7050_v38 }
 0x2b8   :  { %v11475_v12 = vadd.f32 %v5174_v23, %v2680_v25  ;;  %5422 = vrot.lane.b32.xlu0 %v11467_v3, %s8057_s0 }
 0x2b9   :  { %5424 = vrot.lane.b32.xlu1 %v11473_v30, %s8057_s0 }
 0x2bb   :  { %v7373_v11 = vpop.f32.mrb[24].mxu0 }
 0x2bc   :  { %v7053_v42 = vpop.f32.mrb[24].mxu1  ;;  %5418 = vrot.lane.b32.xlu0 %v11471_v20, %s8057_s0  ;;  %v5187_v58 = vpop.f32.mrb[25].mxu0 }
 0x2bd   :  { %v2693_v63 = vpop.f32.mrb[25].mxu1  ;;  %v11483_v50 = vadd.f32 %v7373_v11, %v7053_v42  ;;  %5420 = vrot.lane.b32.xlu1 %v11475_v12, %s8057_s0  ;;  %v7374_v37 = vpop.f32.mrb[26].mxu0 }
 0x2be   :  { %v7054_v61 = vpop.f32.mrb[26].mxu1  ;;  %v11487_v43 = vadd.f32 %v5187_v58, %v2693_v63  ;;  %v5190_v31 = vpop.f32.mrb[27].mxu0 }
 0x2bf   :  { %v2696_v59 = vpop.f32.mrb[27].mxu1  ;;  %v11489_v33 = vadd.f32 %v7374_v37, %v7054_v61 }
 0x2c0   :  { %v11491_v60 = vadd.f32 %v5190_v31, %v2696_v59  ;;  %5430 = vrot.lane.b32.xlu0 %v11483_v50, %s8057_s0 }
 0x2c1   :  { %5432 = vrot.lane.b32.xlu1 %v11489_v33, %s8057_s0 }
 0x2c3   :  { %v7377_v16 = vpop.f32.mrb[28].mxu0 }
 0x2c4   :  { %v7057_v46 = vpop.f32.mrb[28].mxu1  ;;  %5426 = vrot.lane.b32.xlu0 %v11487_v43, %s8057_s0  ;;  %v5203_v13 = vpop.f32.mrb[29].mxu0 }
 0x2c5   :  { %v2709_v32 = vpop.f32.mrb[29].mxu1  ;;  %v11499_v2 = vadd.f32 %v7377_v16, %v7057_v46  ;;  %5428 = vrot.lane.b32.xlu1 %v11491_v60, %s8057_s0  ;;  %v7378_v5 = vpop.f32.mrb[30].mxu0 }
 0x2c6   :  { %v7058_v52 = vpop.f32.mrb[30].mxu1  ;;  %v11503_v21 = vadd.f32 %v5203_v13, %v2709_v32  ;;  %v5206_v55 = vpop.f32.mrb[31].mxu0 }
 0x2c7   :  { %v2712_v51 = vpop.f32.mrb[31].mxu1  ;;  %v11505_v14 = vadd.f32 %v7378_v5, %v7058_v52 }
 0x2c8   :  { %v11507_v57 = vadd.f32 %v5206_v55, %v2712_v51  ;;  %5438 = vrot.lane.b32.xlu0 %v11499_v2, %s8057_s0 }
 0x2c9   :  { %5440 = vrot.lane.b32.xlu1 %v11505_v14, %s8057_s0 }
 0x2cb   :  { %v7381_v17 = vpop.f32.mrb[32].mxu0 }
 0x2cc   :  { %v7061_v28 = vpop.f32.mrb[32].mxu1  ;;  %5434 = vrot.lane.b32.xlu0 %v11503_v21, %s8057_s0  ;;  %v5219_v53 = vpop.f32.mrb[33].mxu0 }
 0x2cd   :  { %v2725_v56 = vpop.f32.mrb[33].mxu1  ;;  %v11515_v8 = vadd.f32 %v7381_v17, %v7061_v28  ;;  %5436 = vrot.lane.b32.xlu1 %v11507_v57, %s8057_s0  ;;  %v7382_v26 = vpop.f32.mrb[34].mxu0 }
 0x2ce   :  { %v7062_v39 = vpop.f32.mrb[34].mxu1  ;;  %v11519_v15 = vadd.f32 %v5219_v53, %v2725_v56  ;;  %v5222_v27 = vpop.f32.mrb[35].mxu0 }
 0x2cf   :  { %v2728_v1 = vpop.f32.mrb[35].mxu1  ;;  %v11521_v18 = vadd.f32 %v7382_v26, %v7062_v39 }
 0x2d0   :  { %v11523_v22 = vadd.f32 %v5222_v27, %v2728_v1  ;;  %5446 = vrot.lane.b32.xlu0 %v11515_v8, %s8057_s0 }
 0x2d1   :  { %5448 = vrot.lane.b32.xlu1 %v11521_v18, %s8057_s0 }
 0x2d3   :  { %v7385_v54 = vpop.f32.mrb[36].mxu0 }
 0x2d4   :  { %v7065_v38 = vpop.f32.mrb[36].mxu1  ;;  %5442 = vrot.lane.b32.xlu0 %v11519_v15, %s8057_s0  ;;  %v5235_v42 = vpop.f32.mrb[37].mxu0 }
 0x2d5   :  { %v2741_v25 = vpop.f32.mrb[37].mxu1  ;;  %v11531_v23 = vadd.f32 %v7385_v54, %v7065_v38  ;;  %5444 = vrot.lane.b32.xlu1 %v11523_v22, %s8057_s0  ;;  %v7386_v58 = vpop.f32.mrb[38].mxu0 }
 0x2d6   :  { %v7066_v11 = vpop.f32.mrb[38].mxu1  ;;  %v11535_v63 = vadd.f32 %v5235_v42, %v2741_v25  ;;  %v5238_v59 = vpop.f32.mrb[39].mxu0 }
 0x2d7   :  { %v2744_v61 = vpop.f32.mrb[39].mxu1  ;;  %v11537_v37 = vadd.f32 %v7386_v58, %v7066_v11 }
 0x2d8   :  { %v11539_v31 = vadd.f32 %v5238_v59, %v2744_v61  ;;  %5454 = vrot.lane.b32.xlu0 %v11531_v23, %s8057_s0 }
 0x2d9   :  { %5456 = vrot.lane.b32.xlu1 %v11537_v37, %s8057_s0 }
 0x2db   :  { %v7389_v16 = vpop.f32.mrb[40].mxu0 }
 0x2dc   :  { %v7069_v46 = vpop.f32.mrb[40].mxu1  ;;  %5450 = vrot.lane.b32.xlu0 %v11535_v63, %s8057_s0  ;;  %v5251_v52 = vpop.f32.mrb[41].mxu0 }
 0x2dd   :  { %v2757_v32 = vpop.f32.mrb[41].mxu1  ;;  %v11547_v13 = vadd.f32 %v7389_v16, %v7069_v46  ;;  %5452 = vrot.lane.b32.xlu1 %v11539_v31, %s8057_s0  ;;  %v7390_v55 = vpop.f32.mrb[42].mxu0  ;;  %v11584_v46 = vld [vmem:[%s11877_s3] ss:$0 sm:$0xff] }
 0x2de   :  { %v7070_v5 = vpop.f32.mrb[42].mxu1  ;;  %v11551_v51 = vadd.f32 %v5251_v52, %v2757_v32  ;;  %v5254_v56 = vpop.f32.mrb[43].mxu0 }
 0x2df   :  { %v2760_v28 = vpop.f32.mrb[43].mxu1  ;;  %v11553_v17 = vadd.f32 %v7390_v55, %v7070_v5 }
 0x2e0   :  { %v11555_v53 = vadd.f32 %v5254_v56, %v2760_v28  ;;  %5462 = vrot.lane.b32.xlu0 %v11547_v13, %s8057_s0 }
 0x2e1   :  { %5464 = vrot.lane.b32.xlu1 %v11553_v17, %s8057_s0 }
 0x2e3   :  { %v7393_v26 = vpop.f32.mrb[44].mxu0 }
 0x2e4   :  { %v7073_v39 = vpop.f32.mrb[44].mxu1  ;;  %5458 = vrot.lane.b32.xlu0 %v11551_v51, %s8057_s0  ;;  %v5267_v38 = vpop.f32.mrb[45].mxu0 }
 0x2e5   :  { %v2773_v1 = vpop.f32.mrb[45].mxu1  ;;  %v11563_v27 = vadd.f32 %v7393_v26, %v7073_v39  ;;  %5460 = vrot.lane.b32.xlu1 %v11555_v53, %s8057_s0  ;;  %v7394_v42 = vpop.f32.mrb[46].mxu0 }
 0x2e6   :  { %v7074_v54 = vpop.f32.mrb[46].mxu1  ;;  %v11567_v25 = vadd.f32 %v5267_v38, %v2773_v1  ;;  %v5270_v61 = vpop.f32.mrb[47].mxu0 }
 0x2e7   :  { %v2776_v11 = vpop.f32.mrb[47].mxu1  ;;  %v11569_v58 = vadd.f32 %v7394_v42, %v7074_v54 }
 0x2e8   :  { %v11571_v59 = vadd.f32 %v5270_v61, %v2776_v11  ;;  %5466 = vrot.lane.b32.xlu0 %v11567_v25, %s8057_s0 }
 0x2ea   :  { %5468 = vrot.lane.b32.xlu1 %v11571_v59, %s8057_s0 }
 0x2ec   :  { %5470 = vrot.lane.b32.xlu0 %v11563_v27, %s8057_s0 }
 0x2ee   :  { %5472 = vrot.lane.b32.xlu1 %v11569_v58, %s8057_s0 }
 0x301   :  { %v5383_v16 = vpop.permute.xlu1 %5382 }
 0x302   :  { %v5524_v32 = vmax.f32 %v11389_v6, %v5383_v16  ;;  %v5379_v52 = vpop.permute.xlu0 %5378 }
 0x303   :  { %v5522_v5 = vmax.f32 %v11391_v45, %v5379_v52 }
 0x304   :  { %v5579_v55 = vadd.f32 %v11584_v46, %v5524_v32 }
 0x305   :  { %v5577_v28 = vadd.f32 %v11584_v46, %v5522_v5  ;;  %v5385_v56 = vpop.permute.xlu1 %5384 }
 0x306   :  { %v6389_v39 = vpack.c.bf16 %v5579_v55, %v5579_v55  ;;  %v5525_v26 = vmax.f32 %v11393_v40, %v5385_v56  ;;  %v5381_v1 = vpop.permute.xlu0 %5380 }
 0x307   :  { %v6387_v38 = vpack.c.bf16 %v5577_v28, %v5577_v28  ;;  %v5523_v54 = vmax.f32 %v11397_v0, %v5381_v1 }
 0x308   :  { %5836 = vst.msk [vmem:[%s11878_s4 + $0x8] sm:$0xf] %vm5833_vm12, %v6389_v39  ;;  %v5580_v6 = vadd.f32 %v11584_v46, %v5525_v26 }
 0x309   :  { %5834 = vst.msk [vmem:[%s11878_s4] sm:$0xf] %vm5833_vm12, %v6387_v38  ;;  %v5578_v45 = vadd.f32 %v11584_v46, %v5523_v54 }
 0x30a   :  { %v6390_v42 = vpack.c.bf16 %v5580_v6, %v5580_v6  ;;  %v5391_v40 = vpop.permute.xlu0 %5390 }
 0x30b   :  { %v6388_v11 = vpack.c.bf16 %v5578_v45, %v5578_v45  ;;  %v5528_v61 = vmax.f32 %v11405_v35, %v5391_v40  ;;  %v5393_v0 = vpop.permute.xlu1 %5392 }
 0x30c   :  { %5837 = vst.msk [vmem:[%s11878_s4 + $0xc] sm:$0xf] %vm5833_vm12, %v6390_v42  ;;  %v5529_v16 = vmax.f32 %v11409_v62, %v5393_v0 }
 0x30d   :  { %5835 = vst.msk [vmem:[%s11878_s4 + $0x4] sm:$0xf] %vm5833_vm12, %v6388_v11  ;;  %v5583_v32 = vadd.f32 %v11584_v46, %v5528_v61 }
 0x30e   :  { %v5584_v52 = vadd.f32 %v11584_v46, %v5529_v16  ;;  %v5387_v5 = vpop.permute.xlu0 %5386 }
 0x30f   :  { %v6393_v55 = vpack.c.bf16 %v5583_v32, %v5583_v32  ;;  %v5526_v35 = vmax.f32 %v11407_v9, %v5387_v5  ;;  %v5389_v28 = vpop.permute.xlu1 %5388 }
 0x310   :  { %v6394_v56 = vpack.c.bf16 %v5584_v52, %v5584_v52  ;;  %v5527_v39 = vmax.f32 %v11411_v7, %v5389_v28 }
 0x311   :  { %5840 = vst.msk [vmem:[%s11878_s4 + $0x18] sm:$0xf] %vm5833_vm12, %v6393_v55  ;;  %v5581_v62 = vadd.f32 %v11584_v46, %v5526_v35 }
 0x312   :  { %5841 = vst.msk [vmem:[%s11878_s4 + $0x1c] sm:$0xf] %vm5833_vm12, %v6394_v56  ;;  %v5582_v26 = vadd.f32 %v11584_v46, %v5527_v39  ;;  %v5399_v1 = vpop.permute.xlu0 %5398 }
 0x313   :  { %v6391_v9 = vpack.c.bf16 %v5581_v62, %v5581_v62  ;;  %v5532_v38 = vmax.f32 %v11419_v34, %v5399_v1  ;;  %v5401_v54 = vpop.permute.xlu1 %5400 }
 0x314   :  { %v6392_v7 = vpack.c.bf16 %v5582_v26, %v5582_v26  ;;  %v5533_v6 = vmax.f32 %v11425_v4, %v5401_v54 }
 0x315   :  { %5838 = vst.msk [vmem:[%s11878_s4 + $0x10] sm:$0xf] %vm5833_vm12, %v6391_v9  ;;  %v5587_v45 = vadd.f32 %v11584_v46, %v5532_v38 }
 0x316   :  { %5839 = vst.msk [vmem:[%s11878_s4 + $0x14] sm:$0xf] %vm5833_vm12, %v6392_v7  ;;  %v5588_v42 = vadd.f32 %v11584_v46, %v5533_v6  ;;  %v5395_v40 = vpop.permute.xlu0 %5394 }
 0x317   :  { %v6397_v34 = vpack.c.bf16 %v5587_v45, %v5587_v45  ;;  %v5530_v11 = vmax.f32 %v11423_v24, %v5395_v40  ;;  %v5397_v61 = vpop.permute.xlu1 %5396 }
 0x318   :  { %v6398_v4 = vpack.c.bf16 %v5588_v42, %v5588_v42  ;;  %v5531_v0 = vmax.f32 %v11427_v49, %v5397_v61 }
 0x319   :  { %5844 = vst.msk [vmem:[%s11878_s4 + $0x28] sm:$0xf] %vm5833_vm12, %v6397_v34  ;;  %v5585_v16 = vadd.f32 %v11584_v46, %v5530_v11 }
 0x31a   :  { %5845 = vst.msk [vmem:[%s11878_s4 + $0x2c] sm:$0xf] %vm5833_vm12, %v6398_v4  ;;  %v5586_v32 = vadd.f32 %v11584_v46, %v5531_v0  ;;  %v5407_v52 = vpop.permute.xlu0 %5406 }
 0x31b   :  { %v6395_v24 = vpack.c.bf16 %v5585_v16, %v5585_v16  ;;  %v5536_v5 = vmax.f32 %v11435_v44, %v5407_v52  ;;  %v5409_v55 = vpop.permute.xlu1 %5408 }
 0x31c   :  { %v6396_v49 = vpack.c.bf16 %v5586_v32, %v5586_v32  ;;  %v5537_v35 = vmax.f32 %v11441_v48, %v5409_v55 }
 0x31d   :  { %5842 = vst.msk [vmem:[%s11878_s4 + $0x20] sm:$0xf] %vm5833_vm12, %v6395_v24  ;;  %v5591_v28 = vadd.f32 %v11584_v46, %v5536_v5 }
 0x31e   :  { %5843 = vst.msk [vmem:[%s11878_s4 + $0x24] sm:$0xf] %vm5833_vm12, %v6396_v49  ;;  %v5592_v56 = vadd.f32 %v11584_v46, %v5537_v35  ;;  %v5403_v39 = vpop.permute.xlu0 %5402 }
 0x31f   :  { %v6401_v44 = vpack.c.bf16 %v5591_v28, %v5591_v28  ;;  %v5534_v62 = vmax.f32 %v11439_v36, %v5403_v39  ;;  %v5405_v26 = vpop.permute.xlu1 %5404 }
 0x320   :  { %v6402_v48 = vpack.c.bf16 %v5592_v56, %v5592_v56  ;;  %v5535_v1 = vmax.f32 %v11443_v47, %v5405_v26 }
 0x321   :  { %5848 = vst.msk [vmem:[%s11878_s4 + $0x38] sm:$0xf] %vm5833_vm12, %v6401_v44  ;;  %v5589_v9 = vadd.f32 %v11584_v46, %v5534_v62 }
 0x322   :  { %5849 = vst.msk [vmem:[%s11878_s4 + $0x3c] sm:$0xf] %vm5833_vm12, %v6402_v48  ;;  %v5590_v38 = vadd.f32 %v11584_v46, %v5535_v1  ;;  %v5415_v54 = vpop.permute.xlu0 %5414 }
 0x323   :  { %v6399_v36 = vpack.c.bf16 %v5589_v9, %v5589_v9  ;;  %v5540_v7 = vmax.f32 %v11451_v41, %v5415_v54  ;;  %v5417_v6 = vpop.permute.xlu1 %5416 }
 0x324   :  { %v6400_v47 = vpack.c.bf16 %v5590_v38, %v5590_v38  ;;  %v5541_v45 = vmax.f32 %v11457_v19, %v5417_v6 }
 0x325   :  { %5846 = vst.msk [vmem:[%s11878_s4 + $0x30] sm:$0xf] %vm5833_vm12, %v6399_v36  ;;  %v5595_v42 = vadd.f32 %v11584_v46, %v5540_v7 }
 0x326   :  { %5847 = vst.msk [vmem:[%s11878_s4 + $0x34] sm:$0xf] %vm5833_vm12, %v6400_v47  ;;  %v5596_v40 = vadd.f32 %v11584_v46, %v5541_v45  ;;  %v5411_v34 = vpop.permute.xlu0 %5410 }
 0x327   :  { %v6405_v41 = vpack.c.bf16 %v5595_v42, %v5595_v42  ;;  %v5538_v11 = vmax.f32 %v11455_v29, %v5411_v34  ;;  %v5413_v61 = vpop.permute.xlu1 %5412 }
 0x328   :  { %v6406_v19 = vpack.c.bf16 %v5596_v40, %v5596_v40  ;;  %v5539_v4 = vmax.f32 %v11459_v10, %v5413_v61 }
 0x329   :  { %5852 = vst.msk [vmem:[%s11878_s4 + $0x48] sm:$0xf] %vm5833_vm12, %v6405_v41  ;;  %v5593_v0 = vadd.f32 %v11584_v46, %v5538_v11 }
 0x32a   :  { %5853 = vst.msk [vmem:[%s11878_s4 + $0x4c] sm:$0xf] %vm5833_vm12, %v6406_v19  ;;  %v5594_v16 = vadd.f32 %v11584_v46, %v5539_v4  ;;  %v5423_v32 = vpop.permute.xlu0 %5422 }
 0x32b   :  { %v6403_v29 = vpack.c.bf16 %v5593_v0, %v5593_v0  ;;  %v5544_v52 = vmax.f32 %v11467_v3, %v5423_v32  ;;  %v5425_v24 = vpop.permute.xlu1 %5424 }
 0x32c   :  { %v6404_v10 = vpack.c.bf16 %v5594_v16, %v5594_v16  ;;  %v5545_v5 = vmax.f32 %v11473_v30, %v5425_v24 }
 0x32d   :  { %5850 = vst.msk [vmem:[%s11878_s4 + $0x40] sm:$0xf] %vm5833_vm12, %v6403_v29  ;;  %v5599_v55 = vadd.f32 %v11584_v46, %v5544_v52 }
 0x32e   :  { %5851 = vst.msk [vmem:[%s11878_s4 + $0x44] sm:$0xf] %vm5833_vm12, %v6404_v10  ;;  %v5600_v49 = vadd.f32 %v11584_v46, %v5545_v5  ;;  %v5419_v35 = vpop.permute.xlu0 %5418 }
 0x32f   :  { %v6409_v3 = vpack.c.bf16 %v5599_v55, %v5599_v55  ;;  %v5542_v28 = vmax.f32 %v11471_v20, %v5419_v35  ;;  %v5421_v56 = vpop.permute.xlu1 %5420 }
 0x330   :  { %v6410_v30 = vpack.c.bf16 %v5600_v49, %v5600_v49  ;;  %v5543_v39 = vmax.f32 %v11475_v12, %v5421_v56 }
 0x331   :  { %5856 = vst.msk [vmem:[%s11878_s4 + $0x58] sm:$0xf] %vm5833_vm12, %v6409_v3  ;;  %v5597_v44 = vadd.f32 %v11584_v46, %v5542_v28 }
 0x332   :  { %5857 = vst.msk [vmem:[%s11878_s4 + $0x5c] sm:$0xf] %vm5833_vm12, %v6410_v30  ;;  %v5598_v62 = vadd.f32 %v11584_v46, %v5543_v39  ;;  %v5431_v26 = vpop.permute.xlu0 %5430 }
 0x333   :  { %v6407_v20 = vpack.c.bf16 %v5597_v44, %v5597_v44  ;;  %v5548_v48 = vmax.f32 %v11483_v50, %v5431_v26  ;;  %v5433_v1 = vpop.permute.xlu1 %5432 }
 0x334   :  { %v6408_v12 = vpack.c.bf16 %v5598_v62, %v5598_v62  ;;  %v5549_v9 = vmax.f32 %v11489_v33, %v5433_v1 }
 0x335   :  { %5854 = vst.msk [vmem:[%s11878_s4 + $0x50] sm:$0xf] %vm5833_vm12, %v6407_v20  ;;  %v5603_v38 = vadd.f32 %v11584_v46, %v5548_v48 }
 0x336   :  { %5855 = vst.msk [vmem:[%s11878_s4 + $0x54] sm:$0xf] %vm5833_vm12, %v6408_v12  ;;  %v5604_v54 = vadd.f32 %v11584_v46, %v5549_v9  ;;  %v5427_v36 = vpop.permute.xlu0 %5426 }
 0x337   :  { %v6413_v50 = vpack.c.bf16 %v5603_v38, %v5603_v38  ;;  %v5546_v7 = vmax.f32 %v11487_v43, %v5427_v36  ;;  %v5429_v6 = vpop.permute.xlu1 %5428 }
 0x338   :  { %v6414_v33 = vpack.c.bf16 %v5604_v54, %v5604_v54  ;;  %v5547_v47 = vmax.f32 %v11491_v60, %v5429_v6 }
 0x339   :  { %5860 = vst.msk [vmem:[%s11878_s4 + $0x68] sm:$0xf] %vm5833_vm12, %v6413_v50  ;;  %v5601_v45 = vadd.f32 %v11584_v46, %v5546_v7 }
 0x33a   :  { %5861 = vst.msk [vmem:[%s11878_s4 + $0x6c] sm:$0xf] %vm5833_vm12, %v6414_v33  ;;  %v5602_v42 = vadd.f32 %v11584_v46, %v5547_v47  ;;  %v5439_v40 = vpop.permute.xlu0 %5438 }
 0x33b   :  { %v6411_v43 = vpack.c.bf16 %v5601_v45, %v5601_v45  ;;  %v5552_v34 = vmax.f32 %v11499_v2, %v5439_v40  ;;  %v5441_v41 = vpop.permute.xlu1 %5440 }
 0x33c   :  { %v6412_v60 = vpack.c.bf16 %v5602_v42, %v5602_v42  ;;  %v5553_v11 = vmax.f32 %v11505_v14, %v5441_v41 }
 0x33d   :  { %5858 = vst.msk [vmem:[%s11878_s4 + $0x60] sm:$0xf] %vm5833_vm12, %v6411_v43  ;;  %v5607_v61 = vadd.f32 %v11584_v46, %v5552_v34 }
 0x33e   :  { %5859 = vst.msk [vmem:[%s11878_s4 + $0x64] sm:$0xf] %vm5833_vm12, %v6412_v60  ;;  %v5608_v19 = vadd.f32 %v11584_v46, %v5553_v11  ;;  %v5435_v4 = vpop.permute.xlu0 %5434 }
 0x33f   :  { %v6417_v2 = vpack.c.bf16 %v5607_v61, %v5607_v61  ;;  %v5550_v0 = vmax.f32 %v11503_v21, %v5435_v4  ;;  %v5437_v16 = vpop.permute.xlu1 %5436 }
 0x340   :  { %v6418_v14 = vpack.c.bf16 %v5608_v19, %v5608_v19  ;;  %v5551_v32 = vmax.f32 %v11507_v57, %v5437_v16 }
 0x341   :  { %5864 = vst.msk [vmem:[%s11878_s4 + $0x78] sm:$0xf] %vm5833_vm12, %v6417_v2  ;;  %v5605_v29 = vadd.f32 %v11584_v46, %v5550_v0 }
 0x342   :  { %5865 = vst.msk [vmem:[%s11878_s4 + $0x7c] sm:$0xf] %vm5833_vm12, %v6418_v14  ;;  %v5606_v52 = vadd.f32 %v11584_v46, %v5551_v32  ;;  %v5447_v24 = vpop.permute.xlu0 %5446 }
 0x343   :  { %v6415_v21 = vpack.c.bf16 %v5605_v29, %v5605_v29  ;;  %v5556_v10 = vmax.f32 %v11515_v8, %v5447_v24  ;;  %v5449_v5 = vpop.permute.xlu1 %5448 }
 0x344   :  { %v6416_v57 = vpack.c.bf16 %v5606_v52, %v5606_v52  ;;  %v5557_v55 = vmax.f32 %v11521_v18, %v5449_v5 }
 0x345   :  { %5862 = vst.msk [vmem:[%s11878_s4 + $0x70] sm:$0xf] %vm5833_vm12, %v6415_v21  ;;  %v5611_v49 = vadd.f32 %v11584_v46, %v5556_v10 }
 0x346   :  { %5863 = vst.msk [vmem:[%s11878_s4 + $0x74] sm:$0xf] %vm5833_vm12, %v6416_v57  ;;  %v5612_v35 = vadd.f32 %v11584_v46, %v5557_v55  ;;  %v5443_v3 = vpop.permute.xlu0 %5442 }
 0x347   :  { %v6421_v8 = vpack.c.bf16 %v5611_v49, %v5611_v49  ;;  %v5554_v28 = vmax.f32 %v11519_v15, %v5443_v3  ;;  %v5445_v56 = vpop.permute.xlu1 %5444 }
 0x348   :  { %v6422_v18 = vpack.c.bf16 %v5612_v35, %v5612_v35  ;;  %v5555_v30 = vmax.f32 %v11523_v22, %v5445_v56 }
 0x349   :  { %5868 = vst.msk [vmem:[%s11878_s4 + $0x88] sm:$0xf] %vm5833_vm12, %v6421_v8  ;;  %v5609_v39 = vadd.f32 %v11584_v46, %v5554_v28 }
 0x34a   :  { %5869 = vst.msk [vmem:[%s11878_s4 + $0x8c] sm:$0xf] %vm5833_vm12, %v6422_v18  ;;  %v5610_v44 = vadd.f32 %v11584_v46, %v5555_v30  ;;  %v5455_v62 = vpop.permute.xlu0 %5454 }
 0x34b   :  { %v6419_v15 = vpack.c.bf16 %v5609_v39, %v5609_v39  ;;  %v5560_v26 = vmax.f32 %v11531_v23, %v5455_v62  ;;  %v5457_v20 = vpop.permute.xlu1 %5456 }
 0x34c   :  { %v6420_v22 = vpack.c.bf16 %v5610_v44, %v5610_v44  ;;  %v5561_v48 = vmax.f32 %v11537_v37, %v5457_v20 }
 0x34d   :  { %5866 = vst.msk [vmem:[%s11878_s4 + $0x80] sm:$0xf] %vm5833_vm12, %v6419_v15  ;;  %v5615_v1 = vadd.f32 %v11584_v46, %v5560_v26 }
 0x34e   :  { %5867 = vst.msk [vmem:[%s11878_s4 + $0x84] sm:$0xf] %vm5833_vm12, %v6420_v22  ;;  %v5616_v12 = vadd.f32 %v11584_v46, %v5561_v48  ;;  %v5451_v9 = vpop.permute.xlu0 %5450 }
 0x34f   :  { %v6425_v23 = vpack.c.bf16 %v5615_v1, %v5615_v1  ;;  %v5558_v38 = vmax.f32 %v11535_v63, %v5451_v9  ;;  %v5453_v54 = vpop.permute.xlu1 %5452 }
 0x350   :  { %v6426_v37 = vpack.c.bf16 %v5616_v12, %v5616_v12  ;;  %v5559_v36 = vmax.f32 %v11539_v31, %v5453_v54 }
 0x351   :  { %5872 = vst.msk [vmem:[%s11878_s4 + $0x98] sm:$0xf] %vm5833_vm12, %v6425_v23  ;;  %v5613_v50 = vadd.f32 %v11584_v46, %v5558_v38 }
 0x352   :  { %5873 = vst.msk [vmem:[%s11878_s4 + $0x9c] sm:$0xf] %vm5833_vm12, %v6426_v37  ;;  %v5614_v7 = vadd.f32 %v11584_v46, %v5559_v36  ;;  %v5463_v6 = vpop.permute.xlu0 %5462 }
 0x353   :  { %v6423_v63 = vpack.c.bf16 %v5613_v50, %v5613_v50  ;;  %v5564_v33 = vmax.f32 %v11547_v13, %v5463_v6  ;;  %v5465_v47 = vpop.permute.xlu1 %5464 }
 0x354   :  { %v6424_v31 = vpack.c.bf16 %v5614_v7, %v5614_v7  ;;  %v5565_v45 = vmax.f32 %v11553_v17, %v5465_v47 }
 0x355   :  { %5870 = vst.msk [vmem:[%s11878_s4 + $0x90] sm:$0xf] %vm5833_vm12, %v6423_v63  ;;  %v5619_v42 = vadd.f32 %v11584_v46, %v5564_v33 }
 0x356   :  { %5871 = vst.msk [vmem:[%s11878_s4 + $0x94] sm:$0xf] %vm5833_vm12, %v6424_v31  ;;  %v5620_v40 = vadd.f32 %v11584_v46, %v5565_v45  ;;  %v5459_v43 = vpop.permute.xlu0 %5458 }
 0x357   :  { %v6429_v13 = vpack.c.bf16 %v5619_v42, %v5619_v42  ;;  %v5562_v34 = vmax.f32 %v11551_v51, %v5459_v43  ;;  %v5461_v41 = vpop.permute.xlu1 %5460 }
 0x358   :  { %v6430_v17 = vpack.c.bf16 %v5620_v40, %v5620_v40  ;;  %v5563_v60 = vmax.f32 %v11555_v53, %v5461_v41 }
 0x359   :  { %5876 = vst.msk [vmem:[%s11878_s4 + $0xa8] sm:$0xf] %vm5833_vm12, %v6429_v13  ;;  %v5617_v11 = vadd.f32 %v11584_v46, %v5562_v34 }
 0x35a   :  { %5877 = vst.msk [vmem:[%s11878_s4 + $0xac] sm:$0xf] %vm5833_vm12, %v6430_v17  ;;  %v5618_v61 = vadd.f32 %v11584_v46, %v5563_v60  ;;  %v5467_v19 = vpop.permute.xlu0 %5466 }
 0x35b   :  { %v6427_v51 = vpack.c.bf16 %v5617_v11, %v5617_v11  ;;  %v5566_v4 = vmax.f32 %v11567_v25, %v5467_v19 }
 0x35c   :  { %v6428_v2 = vpack.c.bf16 %v5618_v61, %v5618_v61  ;;  %v5469_v53 = vpop.permute.xlu1 %5468 }
 0x35d   :  { %5874 = vst.msk [vmem:[%s11878_s4 + $0xa0] sm:$0xf] %vm5833_vm12, %v6427_v51  ;;  %v5621_v0 = vadd.f32 %v11584_v46, %v5566_v4  ;;  %v5567_v16 = vmax.f32 %v11571_v59, %v5469_v53 }
 0x35e   :  { %5875 = vst.msk [vmem:[%s11878_s4 + $0xa4] sm:$0xf] %vm5833_vm12, %v6428_v2  ;;  %v5471_v14 = vpop.permute.xlu0 %5470 }
 0x35f   :  { %v6431_v32 = vpack.c.bf16 %v5621_v0, %v5621_v0  ;;  %v5622_v25 = vadd.f32 %v11584_v46, %v5567_v16  ;;  %v5568_v29 = vmax.f32 %v11563_v27, %v5471_v14 }
 0x360   :  { %v5473_v52 = vpop.permute.xlu1 %5472 }
 0x361   :  { %5878 = vst.msk [vmem:[%s11878_s4 + $0xb0] sm:$0xf] %vm5833_vm12, %v6431_v32  ;;  %v6432_v24 = vpack.c.bf16 %v5622_v25, %v5622_v25  ;;  %v5623_v59 = vadd.f32 %v11584_v46, %v5568_v29  ;;  %v5569_v21 = vmax.f32 %v11569_v58, %v5473_v52 }
 0x363   :  { %5879 = vst.msk [vmem:[%s11878_s4 + $0xb4] sm:$0xf] %vm5833_vm12, %v6432_v24  ;;  %v6433_v10 = vpack.c.bf16 %v5623_v59, %v5623_v59  ;;  %v5624_v5 = vadd.f32 %v11584_v46, %v5569_v21 }
 0x365   :  { %5880 = vst.msk [vmem:[%s11878_s4 + $0xb8] sm:$0xf] %vm5833_vm12, %v6433_v10  ;;  %v6434_v27 = vpack.c.bf16 %v5624_v5, %v5624_v5 }
 0x367   :  { %5881 = vst.msk [vmem:[%s11878_s4 + $0xbc] sm:$0xf] %vm5833_vm12, %v6434_v27 }

// kernel: mynn_forward.6
= control target key start
LH: loop header
LB: loop body
LE: loop exit
PB: predicated region body
PF: predicated region fallthrough
CT: control target
= control target key end

     0   :  { %vm1029_vm0 = vcmask 1042432   ;;  %vm1030_vm1 = vcmask 1046532   ;;  %vm1492_vm3 = vsmask.f32 2304  ;;  %vm1493_vm4 = vsmask.f32 6416  ;;  %s4961_s2 = inlined_call_operand.vmem [shape: bf16[5,128,128], index: 2, kind: input, shape index: {}]   ;;  %s4962_s0 = inlined_call_operand.vmem [shape: bf16[2,88,128], index: 0, kind: input, shape index: {}]   ;;  %s4963_s1 = inlined_call_operand.vmem [shape: bf16[5,128,128], index: 1, kind: input, shape index: {}]   ;;  %s4964_s3 = inlined_call_operand.vmem [shape: f32[1,64], index: 3, kind: input, shape index: {}]   ;;  %s4965_s4 = inlined_call_operand.vmem [shape: bf16[2,4,16,64], index: 4, kind: output, shape index: {}]  }
   0x1   :  { %v3570_v0 = vld [vmem:[%s4961_s2] sm:$0xff]   ;;  %v3572_v2 = vld [vmem:[%s4961_s2 + $0x8] sm:$0xff]   ;;  %v3574_v4 = vld [vmem:[%s4961_s2 + $0x10] sm:$0xff]   ;;  %vm422_vm6 = vsmask.f32 3328  ;;  %vm2001_vm9 = vcmask 1041408  }
   0x2   :  { %v3571_v1 = vld [vmem:[%s4961_s2 + $0x80] sm:$0xff]   ;;  %3105 = vmatprep.subr.bf16.mxu1 %v3570_v0  ;;  %v3573_v3 = vld [vmem:[%s4961_s2 + $0x88] sm:$0xff]   ;;  %v3575_v5 = vld [vmem:[%s4961_s2 + $0x90] sm:$0xff]   ;;  %vm423_vm7 = vsmask.f32 7440  ;;  %vm2002_vm10 = vcmask 1045508  }
   0x3   :  { %3265 = vmatprep.subr.bf16.mxu0 %v3571_v1  ;;  %3106 = vmatpush3.bf16.msra.mxu1 %v3570_v0  ;;  %v3576_v6 = vld [vmem:[%s4961_s2 + $0x18] sm:$0xff]   ;;  %v3578_v8 = vld [vmem:[%s4961_s2 + $0x20] sm:$0xff]   ;;  %v3580_v10 = vld [vmem:[%s4961_s2 + $0x28] sm:$0xff]   ;;  %vm2629_vm12 = vcmask 519168  }
   0x4   :  { %3266 = vmatpush3.bf16.msra.mxu0 %v3571_v1  ;;  %3107 = vmatprep.subr.bf16.mxu1 %v3572_v2  ;;  %v3577_v7 = vld [vmem:[%s4961_s2 + $0x98] sm:$0xff]   ;;  %v3579_v9 = vld [vmem:[%s4961_s2 + $0xa0] sm:$0xff]   ;;  %v3744_v11 = vld [vmem:[%s4962_s0 + $0x8] sm:$0xf] }
   0x5   :  { %3267 = vmatprep.subr.bf16.mxu0 %v3573_v3  ;;  %v3749_v12 = vld [vmem:[%s4962_s0 + $0xc] sm:$0xf]  ;;  %v3761_v15 = vld [vmem:[%s4962_s0 + $0x10] sm:$0xf]  ;;  %v4967_v16 = vrot.slane %v3744_v11, 5  ;;  %vm3772_vm2 = vmor %vm1029_vm0, %vm1030_vm1 }
   0x6   :  { %v3581_v13 = vld [vmem:[%s4961_s2 + $0xa8] sm:$0xff]   ;;  %v3756_v14 = vcombine.low %v3744_v11, %v3749_v12  ;;  %v1040_v17 = vrot.slane %v3749_v12, 5  ;;  %v3768_v18 = vld [vmem:[%s4962_s0 + $0x14] sm:$0xf]  ;;  %v1043_v23 = vrot.slane %v3761_v15, 5  ;;  %v3584_v27 = vld [vmem:[%s4961_s2 + $0x38] sm:$0xff]  }
   0x7   :  { %3108 = vmatpush3.bf16.msra.mxu1 %v3572_v2  ;;  %v3582_v20 = vld [vmem:[%s4961_s2 + $0x30] sm:$0xff]   ;;  %v1039_v21 = vrot.slane %v4967_v16, 4  ;;  %v3785_v24 = vld [vmem:[%s4962_s0 + $0x18] sm:$0xf]  ;;  %v1046_v26 = vrot.slane %v3768_v18, 5  ;;  %v4984_v35 = vshll.u32 %v3749_v12, 16  ;;  %v3844_v52 = vcombine.low %v3761_v15, %v3768_v18  ;;  %vm4036_vm5 = vmor %vm1492_vm3, %vm1493_vm4 }
   0x8   :  { %3268 = vmatpush3.bf16.msra.mxu0 %v3573_v3  ;;  %3109 = vmatprep.subr.bf16.mxu1 %v3574_v4  ;;  %v1042_v22 = vrot.slane %v1040_v17, 4  ;;  %v3583_v25 = vld [vmem:[%s4961_s2 + $0xb0] sm:$0xff]   ;;  %v1049_v30 = vrot.slane %v3785_v24, 5  ;;  %v1045_v31 = vrot.slane %v1043_v23, 4  ;;  %v3585_v34 = vld [vmem:[%s4961_s2 + $0xb8] sm:$0xff]   ;;  %v4983_v38 = vshrl.u32 %v3749_v12, 16  ;;  %vm4299_vm8 = vmor %vm422_vm6, %vm423_vm7 }
   0x9   :  { %3269 = vmatprep.subr.bf16.mxu0 %v3575_v5  ;;  %3121 = vmatprep.mubr.bf16.mxu1 %v3756_v14  ;;  %v1041_v28 = vsel %vm3772_vm2, %v1039_v21, %v1040_v17  ;;  %v1048_v33 = vrot.slane %v1046_v26, 4  ;;  %v3808_v36 = vld [vmem:[%s4962_s0 + $0x1c] sm:$0xf]  ;;  %v3813_v37 = vld [vmem:[%s4962_s0 + $0x20] sm:$0xf]  ;;  %v4968_v41 = vshll.u32 %v3761_v15, 16  ;;  %vm4529_vm11 = vmor %vm2001_vm9, %vm2002_vm10 }
   0xa   :  { %v1044_v29 = vsel %vm3772_vm2, %v1042_v22, %v1043_v23  ;;  %v1052_v39 = vrot.slane %v3808_v36, 5  ;;  %v3821_v40 = vld [vmem:[%s4962_s0 + $0x24] sm:$0xf]  ;;  %v4969_v42 = vshrl.u32 %v3761_v15, 16  ;;  %v1055_v44 = vrot.slane %v3813_v37, 5  ;;  %v3590_v54 = vld [vmem:[%s4963_s1 + $0x8] sm:$0xff]  }
   0xb   :  { %3110 = vmatpush3.bf16.msra.mxu1 %v3574_v4  ;;  %v3799_v32 = vcombine.low %v1041_v28, %v1044_v29  ;;  %v3588_v43 = vld [vmem:[%s4963_s1] sm:$0xff]   ;;  %v1047_v45 = vsel %vm3772_vm2, %v1045_v31, %v1046_v26  ;;  %v1050_v46 = vsel %vm3772_vm2, %v1048_v33, %v1049_v30  ;;  %v1051_v47 = vrot.slane %v1049_v30, 4  ;;  %v3836_v49 = vld [vmem:[%s4962_s0 + $0x28] sm:$0xf]  ;;  %v3855_v57 = vld [vmem:[%s4962_s0 + $0x34] sm:$0xf] }
   0xc   :  { %3270 = vmatpush3.bf16.msra.mxu0 %v3575_v5  ;;  %3111 = vmatprep.subr.bf16.mxu1 %v3576_v6  ;;  %v1054_v48 = vrot.slane %v1052_v39, 4  ;;  %v3589_v50 = vld [vmem:[%s4963_s1 + $0xc0] sm:$0xff]   ;;  %v1085_v51 = vrot.slane %v3821_v40, 5  ;;  %v3846_v53 = vcombine.low %v1047_v45, %v1050_v46  ;;  %v1084_v55 = vrot.slane %v1055_v44, 4  ;;  %v3860_v58 = vld [vmem:[%s4962_s0 + $0x38] sm:$0xf] }
   0xd   :  { %3271 = vmatprep.subr.bf16.mxu0 %v3577_v7  ;;  %3281 = vmatprep.mubr.bf16.mxu0 %v3799_v32  ;;  %v1088_v56 = vrot.slane %v3836_v49, 5  ;;  %v1053_v59 = vsel %vm3772_vm2, %v1051_v47, %v1052_v39  ;;  %v3869_v61 = vld [vmem:[%s4962_s0 + $0x3c] sm:$0xf]  ;;  %v4966_v62 = vrot.slane %v3855_v57, 5  ;;  %v1065_v63 = vrot.slane %v3860_v58, 5  ;;  %v3591_v5 = vld [vmem:[%s4963_s1 + $0xc8] sm:$0xff]  }
   0xe   :  { %v1056_v60 = vsel %vm3772_vm2, %v1054_v48, %v1055_v44  ;;  %v3876_v0 = vld [vmem:[%s4962_s0 + $0x40] sm:$0xf]  ;;  %v1087_v1 = vrot.slane %v1085_v51, 4  ;;  %v1068_v2 = vrot.slane %v3869_v61, 5  ;;  %v1509_v3 = vrot.slane %v4983_v38, 5  ;;  %v3596_v47 = vld [vmem:[%s4963_s1 + $0x18] sm:$0xff]  }
   0xf   :  { %3112 = vmatpush3.bf16.msra.mxu1 %v3576_v6  ;;  %v1510_v4 = vrot.slane %v4984_v35, 6  ;;  %v3888_v6 = vcombine.low %v3785_v24, %v3808_v36  ;;  %v4971_v17 = vshll.u32 %v3744_v11, 16  ;;  %v1067_v21 = vrot.slane %v1065_v63, 4  ;;  %v3918_v28 = vld [vmem:[%s4962_s0 + $0x48] sm:$0xf]  ;;  %v3611_v38 = vld [vmem:[%s4963_s1 + $0x40] sm:$0xff]  }
  0x10   :  { %3272 = vmatpush3.bf16.msra.mxu0 %v3577_v7  ;;  %3113 = vmatprep.subr.bf16.mxu1 %v3578_v8  ;;  %v3893_v7 = vld [vmem:[%s4962_s0 + $0x44] sm:$0xf]  ;;  %v1070_v22 = vrot.slane %v1068_v2, 4  ;;  %v1086_v23 = vsel %vm3772_vm2, %v1084_v55, %v1085_v51  ;;  %v3923_v29 = vld [vmem:[%s4962_s0 + $0x4c] sm:$0xf]  ;;  %v2653_v31 = vcombine.low %v3813_v37, %v3821_v40  ;;  %v1077_v33 = vrot.slane %v3918_v28, 5 }
  0x11   :  { %3273 = vmatprep.subr.bf16.mxu0 %v3579_v9  ;;  %v3928_v30 = vld [vmem:[%s4962_s0 + $0x50] sm:$0xf]  ;;  %v1069_v44 = vsel %vm3772_vm2, %v1067_v21, %v1068_v2  ;;  %v3942_v45 = vld [vmem:[%s4962_s0 + $0x54] sm:$0xf]  ;;  %v3597_v55 = vld [vmem:[%s4963_s1 + $0xd8] sm:$0xff]  }
  0x12   :  { %v1091_v46 = vrot.slane %v3928_v30, 5  ;;  %v3600_v2 = vld [vmem:[%s4963_s1 + $0x20] sm:$0xff]   ;;  %v3681_v19 = vld [vmem:[%s4962_s0 + $0x54] sm:$0xf] }
  0x13   :  { %3114 = vmatpush3.bf16.msra.mxu1 %v3578_v8  ;;  %v1071_v8 = vrot.slane %v3876_v0, 5  ;;  %v3981_v21 = vld [vmem:[%s4962_s0] sm:$0xf] }
  0x14   :  { %3274 = vmatpush3.bf16.msra.mxu0 %v3579_v9  ;;  %3115 = vmatprep.subr.bf16.mxu1 %v3580_v10  ;;  %v3897_v9 = vcombine.low %v1053_v59, %v1056_v60  ;;  %v3959_v60 = vor.u32 %v1510_v4, %v1509_v3  ;;  %v3976_v3 = vcombine.low %v3893_v7, %v3918_v28  ;;  %v1093_v4 = vrot.slane %v1091_v46, 4 }
  0x15   :  { %3275 = vmatprep.subr.bf16.mxu0 %v3581_v13  ;;  %v1073_v26 = vrot.slane %v1071_v8, 4  ;;  %v1072_v48 = vsel %vm3772_vm2, %v1070_v22, %v1071_v8  ;;  %v4970_v8 = vshrl.u32 %v3744_v11, 16  ;;  %v3986_v22 = vld [vmem:[%s4962_s0 + $0x4] sm:$0xf] }
  0x16   :  { %5010 = vst [vmem:[#allocation2_spill] sm:$0xff] %v3897_v9 }
  0x17   :  { %3116 = vmatpush3.bf16.msra.mxu1 %v3580_v10  ;;  %v3594_v10 = vld [vmem:[%s4963_s1 + $0x10] sm:$0xff]  }
  0x18   :  { %3276 = vmatpush3.bf16.msra.mxu0 %v3581_v13  ;;  %3117 = vmatprep.subr.bf16.mxu1 %v3582_v20  ;;  %v1064_v13 = vrot.slane %v4966_v62, 4  ;;  %v1513_v62 = vrot.slane %v3959_v60, 4 }
  0x19   :  { %3277 = vmatprep.subr.bf16.mxu0 %v3583_v25 }
  0x1b   :  { %3118 = vmatpush3.bf16.msra.mxu1 %v3582_v20  ;;  %v3595_v20 = vld [vmem:[%s4963_s1 + $0xd0] sm:$0xff]  }
  0x1c   :  { %3278 = vmatpush3.bf16.msra.mxu0 %v3583_v25  ;;  %3119 = vmatprep.subr.bf16.mxu1 %v3584_v27  ;;  %v1089_v25 = vsel %vm3772_vm2, %v1087_v1, %v1088_v56  ;;  %v3957_v56 = vcombine.low %v3855_v57, %v3860_v58  ;;  %v3965_v1 = vcombine.low %v3869_v61, %v3876_v0 }
  0x1d   :  { %3279 = vmatprep.subr.bf16.mxu0 %v3585_v34  ;;  %v2784_v39 = vcombine.low %v1086_v23, %v1089_v25 }
  0x1f   :  { %3120 = vmatpush3.bf16.msra.mxu1 %v3584_v27  ;;  %v1074_v27 = vrot.slane %v3893_v7, 5 }
  0x20   :  { %3280 = vmatpush3.bf16.msra.mxu0 %v3585_v34  ;;  %3137 = vmatprep.subr.bf16.mxu1 %v3588_v43  ;;  %v1080_v34 = vrot.slane %v3923_v29, 5 }
  0x21   :  { %3297 = vmatprep.subr.bf16.mxu0 %v3589_v50  ;;  %v1076_v51 = vrot.slane %v1074_v27, 4 }
  0x22   :  { %3122 = vmatmul.mubr.bf16.vlgmr.msra.gmra.mrb[0].mxu1 %v3844_v52  ;;  %v1090_v59 = vrot.slane %v1080_v34, 4 }
  0x23   :  { %3282 = vmatmul.mubr.bf16.vlgmr.msra.gmra.mrb[0].mxu0 %v3846_v53  ;;  %3138 = vmatpush3.bf16.msra.mxu1 %v3588_v43  ;;  %v1066_v43 = vsel %vm3772_vm2, %v1064_v13, %v1065_v63  ;;  %v1078_v23 = vsel %vm3772_vm2, %v1076_v51, %v1077_v33 }
  0x24   :  { %3298 = vmatpush3.bf16.msra.mxu0 %v3589_v50  ;;  %3139 = vmatprep.subr.bf16.mxu1 %v3590_v54  ;;  %v1075_v50 = vsel %vm3772_vm2, %v1073_v26, %v1074_v27  ;;  %v3961_v63 = vcombine.low %v1066_v43, %v1069_v44  ;;  %v4982_v26 = vshrl.u32 %v3981_v21, 16  ;;  %v4978_v27 = vshll.u32 %v3981_v21, 16 }
  0x25   :  { %3299 = vmatprep.subr.bf16.mxu0 %v3591_v5  ;;  %3125 = vmatprep.mubr.bf16.mxu1 %v3888_v6  ;;  %v3972_v13 = vcombine.low %v1072_v48, %v1075_v50  ;;  %v1514_v48 = vrot.slane %v4969_v42, 5  ;;  %v3602_v50 = vld [vmem:[%s4963_s1 + $0x28] sm:$0xff]  }
  0x26   :  { %3285 = vmatprep.mubr.bf16.mxu0 %v3897_v9  ;;  %5011 = vst [vmem:[#allocation3_spill] sm:$0xff] %v3961_v63  ;;  %v1495_v43 = vrot.slane %v4982_v26, 5  ;;  %v1496_v44 = vrot.slane %v4978_v27, 6  ;;  %v3603_v42 = vld [vmem:[%s4963_s1 + $0xe8] sm:$0xff]   ;;  %v5040_v9 = vshll.u32 %v3813_v37, 16 }
  0x27   :  { %3140 = vmatpush3.bf16.msra.mxu1 %v3590_v54  ;;  %v1079_v54 = vrot.slane %v1077_v33, 4  ;;  %5012 = vst [vmem:[#allocation4_spill] sm:$0xff] %v3972_v13  ;;  %v4977_v33 = vshll.u32 %v3986_v22, 16 }
  0x28   :  { %3300 = vmatpush3.bf16.msra.mxu0 %v3591_v5  ;;  %3141 = vmatprep.subr.bf16.mxu1 %v3594_v10  ;;  %v1094_v5 = vrot.slane %v3942_v45, 5 }
  0x29   :  { %3301 = vmatprep.subr.bf16.mxu0 %v3595_v20  ;;  %v1081_v25 = vsel %vm3772_vm2, %v1079_v54, %v1080_v34  ;;  %v1504_v34 = vrot.slane %v4970_v8, 5  ;;  %v1500_v54 = vrot.slane %v4977_v33, 6  ;;  %v4973_v8 = vshll.u32 %v3768_v18, 16 }
  0x2a   :  { %3126 = vmatmul.mubr.bf16.gmra.mrb[4].mxu1 %v2653_v31  ;;  %v3601_v31 = vld [vmem:[%s4963_s1 + $0xe0] sm:$0xff]   ;;  %v4027_v16 = vsel %vm3772_vm2, %v1093_v4, %v1094_v5  ;;  %v4972_v5 = vshrl.u32 %v3768_v18, 16  ;;  %v4043_v4 = vcombine.low %v1078_v23, %v1081_v25  ;;  %v3607_v23 = vld [vmem:[%s4963_s1 + $0xf0] sm:$0xff]  }
  0x2b   :  { %3286 = vmatmul.mubr.bf16.gmra.mrb[4].mxu0 %v2784_v39  ;;  %3142 = vmatpush3.bf16.msra.mxu1 %v3594_v10  ;;  %v1505_v10 = vrot.slane %v4971_v17, 6  ;;  %v4975_v39 = vshrl.u32 %v3986_v22, 16 }
  0x2c   :  { %3302 = vmatpush3.bf16.msra.mxu0 %v3595_v20  ;;  %3143 = vmatprep.subr.bf16.mxu1 %v3596_v47  ;;  %v4002_v20 = vsel %vm3772_vm2, %v1090_v59, %v1091_v46  ;;  %v1515_v46 = vrot.slane %v4968_v41, 6  ;;  %5015 = vst [vmem:[#allocation5_spill] sm:$0xff] %v4043_v4 }
  0x2d   :  { %3303 = vmatprep.subr.bf16.mxu0 %v3597_v55  ;;  %3129 = vmatprep.mubr.bf16.mxu1 %v3957_v56  ;;  %v1499_v51 = vrot.slane %v4975_v39, 5  ;;  %v1506_v59 = vor.u32 %v1505_v10, %v1504_v34  ;;  %v4981_v39 = vshrl.u32 %v3813_v37, 16 }
  0x2e   :  { %3289 = vmatprep.mubr.bf16.mxu0 %v3961_v63  ;;  %v4029_v41 = vor.u32 %v1515_v46, %v1514_v48  ;;  %v4974_v48 = vshrl.u32 %v3785_v24, 16  ;;  %v2657_v46 = vcombine.low %v3923_v29, %v3928_v30 }
  0x2f   :  { %3144 = vmatpush3.bf16.msra.mxu1 %v3596_v47  ;;  %v1497_v47 = vor.u32 %v1496_v44, %v1495_v43  ;;  %v1508_v34 = vrot.slane %v1506_v59, 4  ;;  %v4976_v44 = vshll.u32 %v3785_v24, 16 }
  0x30   :  { %3304 = vmatpush3.bf16.msra.mxu0 %v3597_v55  ;;  %3145 = vmatprep.subr.bf16.mxu1 %v3600_v2  ;;  %v1501_v55 = vor.u32 %v1500_v54, %v1499_v51  ;;  %v3606_v51 = vld [vmem:[%s4963_s1 + $0x30] sm:$0xff]   ;;  %v2785_v54 = vcombine.low %v4002_v20, %v4027_v16  ;;  %v1517_v17 = vsel %vm4036_vm5, %v1513_v62, %v4029_v41  ;;  %v1520_v16 = vrot.slane %v4973_v8, 6 }
  0x31   :  { %3305 = vmatprep.subr.bf16.mxu0 %v3601_v31  ;;  %v1498_v43 = vrot.slane %v1497_v47, 4  ;;  %v1519_v47 = vrot.slane %v4972_v5, 5  ;;  %v1524_v20 = vrot.slane %v4974_v48, 5  ;;  %v1525_v5 = vrot.slane %v4976_v44, 6 }
  0x32   :  { %3130 = vmatmul.mubr.bf16.gmra.mrb[8].mxu1 %v3965_v1  ;;  %v1503_v25 = vrot.slane %v1501_v55, 4  ;;  %v4985_v48 = vshll.u32 %v3813_v37, 16 }
  0x33   :  { %3290 = vmatmul.mubr.bf16.gmra.mrb[8].mxu0 %v3972_v13  ;;  %3146 = vmatpush3.bf16.msra.mxu1 %v3600_v2  ;;  %v1512_v2 = vsel %vm4036_vm5, %v1508_v34, %v3959_v60  ;;  %v4980_v60 = vshll.u32 %v3808_v36, 16  ;;  %v4979_v34 = vshrl.u32 %v3808_v36, 16  ;;  %v1502_v62 = vsel %vm4036_vm5, %v1498_v43, %v1501_v55  ;;  %v4095_v43 = vld [vmem:[%s4962_s0 + $0x2c] sm:$0xf] }
  0x34   :  { %3306 = vmatpush3.bf16.msra.mxu0 %v3601_v31  ;;  %3147 = vmatprep.subr.bf16.mxu1 %v3602_v50  ;;  %v1518_v31 = vrot.slane %v4029_v41, 4  ;;  %v1521_v8 = vor.u32 %v1520_v16, %v1519_v47  ;;  %v3608_v41 = vld [vmem:[%s4963_s1 + $0x38] sm:$0xff]   ;;  %v1507_v44 = vsel %vm4036_vm5, %v1503_v25, %v1506_v59  ;;  %v4086_v33 = vor.u32 %v1525_v5, %v1524_v20  ;;  %v4105_v25 = vld [vmem:[%s4962_s0 + $0x30] sm:$0xf] }
  0x35   :  { %3307 = vmatprep.subr.bf16.mxu0 %v3603_v42  ;;  %3133 = vmatprep.mubr.bf16.mxu1 %v3976_v3  ;;  %v1529_v27 = vrot.slane %v4979_v34, 5  ;;  %v1530_v55 = vrot.slane %v4980_v60, 6  ;;  %v1534_v5 = vrot.slane %v4981_v39, 5  ;;  %v1535_v16 = vrot.slane %v4985_v48, 6 }
  0x36   :  { %3293 = vmatprep.mubr.bf16.mxu0 %v4043_v4  ;;  %v1523_v59 = vrot.slane %v1521_v8, 4  ;;  %v4992_v20 = vshrl.u32 %v4095_v43, 16  ;;  %v2810_v34 = vcombine.low %v1502_v62, %v1507_v44  ;;  %v4113_v60 = vcombine.low %v1512_v2, %v1517_v17 }
  0x37   :  { %3148 = vmatpush3.bf16.msra.mxu1 %v3602_v50  ;;  %v3609_v50 = vld [vmem:[%s4963_s1 + $0xf8] sm:$0xff]   ;;  %v4987_v39 = vshll.u32 %v4095_v43, 16  ;;  %v4986_v26 = vshll.u32 %v4105_v25, 16  ;;  %v1522_v35 = vsel %vm4036_vm5, %v1518_v31, %v1521_v8  ;;  %v1528_v48 = vrot.slane %v4086_v33, 4  ;;  %v3612_v8 = vld [vmem:[%s4961_s2 + $0xc0] sm:$0xff]  }
  0x38   :  { %3308 = vmatpush3.bf16.msra.mxu0 %v3603_v42  ;;  %3149 = vmatprep.subr.bf16.mxu1 %v3606_v51  ;;  %v2666_v42 = vcombine.low %v3981_v21, %v3986_v22  ;;  %v1531_v47 = vor.u32 %v1530_v55, %v1529_v27  ;;  %v4988_v44 = vshrl.u32 %v4105_v25, 16  ;;  %v4989_v17 = vshrl.u32 %v3855_v57, 16 }
  0x39   :  { %3309 = vmatprep.subr.bf16.mxu0 %v3607_v23  ;;  %v1527_v27 = vsel %vm4036_vm5, %v1523_v59, %v4086_v33  ;;  %v5016_v2 = vshll.u32 %v3855_v57, 16  ;;  %v4990_v62 = vshll.u32 %v3860_v58, 16  ;;  %v4142_v55 = vor.u32 %v1535_v16, %v1534_v5  ;;  %v3613_v33 = vld [vmem:[%s4963_s1 + $0x48] sm:$0xff]  }
  0x3a   :  { %3134 = vmatmul.mubr.bf16.gmra.mrb[12].mxu1 %v2657_v46  ;;  %v1538_v46 = vrot.slane %v4992_v20, 5  ;;  %v1533_v5 = vrot.slane %v1531_v47, 4  ;;  %v4997_v20 = vshll.u32 %v3893_v7, 16 }
  0x3b   :  { %3294 = vmatmul.mubr.bf16.gmra.mrb[12].mxu0 %v2785_v54  ;;  %3150 = vmatpush3.bf16.msra.mxu1 %v3606_v51  ;;  %v1539_v51 = vrot.slane %v4987_v39, 6  ;;  %v1543_v54 = vrot.slane %v4986_v26, 6  ;;  %v1548_v31 = vrot.slane %v5016_v2, 6  ;;  %v1547_v26 = vrot.slane %v4989_v17, 5 }
  0x3c   :  { %3310 = vmatpush3.bf16.msra.mxu0 %v3607_v23  ;;  %3151 = vmatprep.subr.bf16.mxu1 %v3608_v41  ;;  %v1542_v23 = vrot.slane %v4988_v44, 5  ;;  %v4991_v39 = vshrl.u32 %v3860_v58, 16  ;;  %v4994_v44 = vshll.u32 %v3869_v61, 16  ;;  %v4998_v2 = vshrl.u32 %v3869_v61, 16 }
  0x3d   :  { %3311 = vmatprep.subr.bf16.mxu0 %v3609_v50  ;;  %3153 = vmatprep.mubr.bf16.mxu1 %v2666_v42  ;;  %v1540_v42 = vor.u32 %v1539_v51, %v1538_v46  ;;  %v3614_v51 = vld [vmem:[%s4961_s2 + $0xc8] sm:$0xff]  }
  0x3e   :  { %3313 = vmatprep.mubr.bf16.mxu0 %v2810_v34  ;;  %v1544_v59 = vor.u32 %v1543_v54, %v1542_v23  ;;  %v1553_v34 = vrot.slane %v4990_v62, 6  ;;  %v1552_v46 = vrot.slane %v4991_v39, 5  ;;  %v1549_v23 = vor.u32 %v1548_v31, %v1547_v26  ;;  %v3615_v26 = vld [vmem:[%s4963_s1 + $0x50] sm:$0xff]  }
  0x3f   :  { %3152 = vmatpush3.bf16.msra.mxu1 %v3608_v41  ;;  %v1541_v16 = vrot.slane %v1540_v42, 4  ;;  %v1557_v17 = vrot.slane %v4998_v2, 5  ;;  %v4164_v42 = vcombine.low %v1522_v35, %v1527_v27  ;;  %v1558_v39 = vrot.slane %v4994_v44, 6 }
  0x40   :  { %3312 = vmatpush3.bf16.msra.mxu0 %v3609_v50  ;;  %3169 = vmatprep.subr.bf16.mxu1 %v3611_v38  ;;  %v1546_v54 = vrot.slane %v1544_v59, 4  ;;  %v4995_v50 = vshrl.u32 %v3876_v0, 16  ;;  %v1554_v62 = vor.u32 %v1553_v34, %v1552_v46  ;;  %v5017_v41 = vshll.u32 %v3749_v12, 16 }
  0x41   :  { %3329 = vmatprep.subr.bf16.mxu0 %v3612_v8  ;;  %v1532_v27 = vsel %vm4036_vm5, %v1528_v48, %v1531_v47  ;;  %v1537_v31 = vsel %vm4036_vm5, %v1533_v5, %v4142_v55  ;;  %v1545_v34 = vsel %vm4036_vm5, %v1541_v16, %v1544_v59  ;;  %v5018_v46 = vshll.u32 %v3876_v0, 16 }
  0x42   :  { %3154 = vmatmul.mubr.bf16.vlgmr.msra.gmra.mrb[0].mxu1 %v3756_v14  ;;  %v4171_v4 = vrot.slane %v5017_v41, 5  ;;  %v4996_v14 = vshrl.u32 %v3893_v7, 16  ;;  %v1562_v35 = vrot.slane %v4995_v50, 5  ;;  %v1568_v47 = vrot.slane %v4997_v20, 6 }
  0x43   :  { %3314 = vmatmul.mubr.bf16.vlgmr.msra.gmra.mrb[0].mxu0 %v4113_v60  ;;  %3170 = vmatpush3.bf16.msra.mxu1 %v3611_v38  ;;  %v3616_v38 = vld [vmem:[%s4961_s2 + $0xd0] sm:$0xff]   ;;  %v1563_v41 = vrot.slane %v5018_v46, 6  ;;  %v5002_v5 = vshll.u32 %v3918_v28, 16  ;;  %v1550_v59 = vsel %vm4036_vm5, %v1546_v54, %v1549_v23  ;;  %v1556_v16 = vrot.slane %v1554_v62, 4 }
  0x44   :  { %3330 = vmatpush3.bf16.msra.mxu0 %v3612_v8  ;;  %3171 = vmatprep.subr.bf16.mxu1 %v3613_v33  ;;  %v1551_v8 = vrot.slane %v1549_v23, 4  ;;  %v1567_v48 = vrot.slane %v4996_v14, 5  ;;  %v1559_v44 = vor.u32 %v1558_v39, %v1557_v17  ;;  %v5000_v46 = vshrl.u32 %v3918_v28, 16  ;;  %v3617_v39 = vld [vmem:[%s4963_s1 + $0x58] sm:$0xff]  }
  0x45   :  { %3331 = vmatprep.subr.bf16.mxu0 %v3614_v51  ;;  %3157 = vmatprep.mubr.bf16.mxu1 %v3844_v52  ;;  %v4202_v52 = vcombine.low %v1532_v27, %v1537_v31  ;;  %v1564_v50 = vor.u32 %v1563_v41, %v1562_v35  ;;  %v5001_v14 = vshll.u32 %v3923_v29, 16  ;;  %v1573_v20 = vrot.slane %v5002_v5, 6  ;;  %v3620_v27 = vld [vmem:[%s4963_s1 + $0x60] sm:$0xff]  }
  0x46   :  { %3317 = vmatprep.mubr.bf16.mxu0 %v4164_v42  ;;  %v5019_v2 = vshrl.u32 %v3749_v12, 16  ;;  %v4214_v17 = vor.u32 %v1568_v47, %v1567_v48  ;;  %v1572_v54 = vrot.slane %v5000_v46, 5  ;;  %v3618_v12 = vld [vmem:[%s4961_s2 + $0xd8] sm:$0xff]   ;;  %v1555_v23 = vsel %vm4036_vm5, %v1551_v8, %v1554_v62 }
  0x47   :  { %3172 = vmatpush3.bf16.msra.mxu1 %v3613_v33  ;;  %v5003_v33 = vshrl.u32 %v3923_v29, 16  ;;  %v1561_v35 = vrot.slane %v1559_v44, 4  ;;  %v1560_v31 = vsel %vm4036_vm5, %v1556_v16, %v1559_v44  ;;  %v5020_v48 = vshrl.u32 %v3981_v21, 16 }
  0x48   :  { %v4209_v13 = vrot.slane %v5019_v2, 4  ;;  %3332 = vmatpush3.bf16.msra.mxu0 %v3614_v51  ;;  %3173 = vmatprep.subr.bf16.mxu1 %v3615_v26  ;;  %v2667_v2 = vcombine.low %v4095_v43, %v4105_v25  ;;  %v2814_v51 = vcombine.low %v1545_v34, %v1550_v59  ;;  %v1574_v41 = vor.u32 %v1573_v20, %v1572_v54 }
  0x49   :  { %3333 = vmatprep.subr.bf16.mxu0 %v3616_v38  ;;  %v428_v47 = vrot.slane %v5020_v48, 4  ;;  %v5021_v46 = vshll.u32 %v3981_v21, 16  ;;  %v1566_v62 = vrot.slane %v1564_v50, 4  ;;  %v1578_v8 = vrot.slane %v5001_v14, 6 }
  0x4a   :  { %3158 = vmatmul.mubr.bf16.gmra.mrb[4].mxu1 %v3888_v6  ;;  %v3621_v6 = vld [vmem:[%s4961_s2 + $0xe0] sm:$0xff]   ;;  %v5022_v44 = vshll.u32 %v3986_v22, 16  ;;  %v5023_v59 = vshrl.u32 %v3986_v22, 16  ;;  %v5024_v14 = vshll.u32 %v3744_v11, 16  ;;  %v5025_v5 = vshrl.u32 %v3744_v11, 16 }
  0x4b   :  { %v431_v34 = vrot.slane %v5021_v46, 5  ;;  %3318 = vmatmul.mubr.bf16.gmra.mrb[4].mxu0 %v4202_v52  ;;  %3174 = vmatpush3.bf16.msra.mxu1 %v3615_v26  ;;  %v1571_v46 = vrot.slane %v4214_v17, 4  ;;  %v1577_v26 = vrot.slane %v5003_v33, 5  ;;  %v3622_v33 = vld [vmem:[%s4963_s1 + $0x68] sm:$0xff]  }
  0x4c   :  { %v4244_v20 = vrot.slane %v5022_v44, 5  ;;  %v441_v16 = vrot.slane %v5023_v59, 4  ;;  %3334 = vmatpush3.bf16.msra.mxu0 %v3616_v38  ;;  %3175 = vmatprep.subr.bf16.mxu1 %v3617_v39  ;;  %v4254_v44 = vrot.slane %v5024_v14, 5  ;;  %v451_v59 = vrot.slane %v5025_v5, 4 }
  0x4d   :  { %v432_v54 = vor.u32 %v431_v34, %v428_v47  ;;  %3335 = vmatprep.subr.bf16.mxu0 %v3618_v12  ;;  %3161 = vmatprep.mubr.bf16.mxu1 %v2667_v2  ;;  %v4258_v38 = vcombine.low %v1555_v23, %v1560_v31  ;;  %v1576_v47 = vrot.slane %v1574_v41, 4  ;;  %v5026_v2 = vshrl.u32 %v3761_v15, 16 }
  0x4e   :  { %v442_v48 = vor.u32 %v441_v16, %v4244_v20  ;;  %3321 = vmatprep.mubr.bf16.mxu0 %v2814_v51  ;;  %v1565_v14 = vsel %vm4036_vm5, %v1561_v35, %v1564_v50  ;;  %v1570_v5 = vsel %vm4036_vm5, %v1566_v62, %v4214_v17  ;;  %v5027_v23 = vshll.u32 %v3761_v15, 16  ;;  %v3623_v17 = vld [vmem:[%s4961_s2 + $0xe8] sm:$0xff]  }
  0x4f   :  { %v471_v34 = vrot.slane %v5026_v2, 4  ;;  %3176 = vmatpush3.bf16.msra.mxu1 %v3617_v39  ;;  %v433_v51 = vrot.slane %v432_v54, 4  ;;  %v4274_v16 = vor.u32 %v1578_v8, %v1577_v26  ;;  %v462_v39 = vor.u32 %v4209_v13, %v4171_v4 }
  0x50   :  { %v4272_v31 = vrot.slane %v5027_v23, 5  ;;  %3336 = vmatpush3.bf16.msra.mxu0 %v3618_v12  ;;  %3177 = vmatprep.subr.bf16.mxu1 %v3620_v27  ;;  %v443_v63 = vrot.slane %v442_v48, 4  ;;  %v5028_v2 = vshll.u32 %v3768_v18, 16  ;;  %v452_v15 = vor.u32 %v451_v59, %v4254_v44  ;;  %v3657_v48 = vld [vmem:[%s4961_s2 + $0x130] sm:$0xff]  }
  0x51   :  { %3337 = vmatprep.subr.bf16.mxu0 %v3621_v6  ;;  %v5029_v12 = vshrl.u32 %v3768_v18, 16  ;;  %v5030_v62 = vshll.u32 %v3785_v24, 16  ;;  %v5031_v13 = vshrl.u32 %v3785_v24, 16  ;;  %v4295_v54 = vcombine.low %v1565_v14, %v1570_v5 }
  0x52   :  { %v4280_v50 = vrot.slane %v5028_v2, 5  ;;  %3162 = vmatmul.mubr.bf16.gmra.mrb[8].mxu1 %v3957_v56  ;;  %v472_v18 = vor.u32 %v471_v34, %v4272_v31  ;;  %v5034_v59 = vshll.u32 %v3808_v36, 16  ;;  %v5035_v2 = vshrl.u32 %v3808_v36, 16  ;;  %v3624_v56 = vld [vmem:[%s4963_s1 + $0x70] sm:$0xff]  }
  0x53   :  { %v481_v35 = vrot.slane %v5029_v12, 4  ;;  %v4290_v8 = vrot.slane %v5030_v62, 5  ;;  %v491_v26 = vrot.slane %v5031_v13, 4  ;;  %3322 = vmatmul.mubr.bf16.gmra.mrb[8].mxu0 %v4258_v38  ;;  %3178 = vmatpush3.bf16.msra.mxu1 %v3620_v27  ;;  %v1575_v14 = vsel %vm4036_vm5, %v1571_v46, %v1574_v41  ;;  %v3625_v27 = vld [vmem:[%s4961_s2 + $0xf0] sm:$0xff]  }
  0x54   :  { %v4306_v23 = vrot.slane %v5034_v59, 5  ;;  %v501_v24 = vrot.slane %v5035_v2, 4  ;;  %3338 = vmatpush3.bf16.msra.mxu0 %v3621_v6  ;;  %3179 = vmatprep.subr.bf16.mxu1 %v3622_v33  ;;  %v1580_v34 = vsel %vm4036_vm5, %v1576_v47, %v4274_v16  ;;  %v463_v5 = vrot.slane %v462_v39, 4 }
  0x55   :  { %v5006_v36 = vshll.u32 %v3821_v40, 16  ;;  %3339 = vmatprep.subr.bf16.mxu0 %v3623_v17  ;;  %3165 = vmatprep.mubr.bf16.mxu1 %v3965_v1  ;;  %v438_v6 = vsel %vm4299_vm8, %v433_v51, %v4244_v20  ;;  %v448_v41 = vsel %vm4299_vm8, %v443_v63, %v4254_v44  ;;  %v453_v46 = vrot.slane %v452_v15, 4  ;;  %v3626_v1 = vld [vmem:[%s4963_s1 + $0x78] sm:$0xff]  }
  0x56   :  { %v5005_v47 = vshrl.u32 %v3821_v40, 16  ;;  %3325 = vmatprep.mubr.bf16.mxu0 %v4295_v54  ;;  %v473_v39 = vrot.slane %v472_v18, 4  ;;  %v482_v12 = vor.u32 %v481_v35, %v4280_v50  ;;  %v492_v62 = vor.u32 %v491_v26, %v4290_v8  ;;  %v3627_v63 = vld [vmem:[%s4961_s2 + $0xf8] sm:$0xff]  }
  0x57   :  { %v502_v20 = vor.u32 %v501_v24, %v4306_v23  ;;  %3180 = vmatpush3.bf16.msra.mxu1 %v3622_v33  ;;  %v4338_v51 = vcombine.low %v1575_v14, %v1580_v34  ;;  %v1587_v15 = vshrl.u32 %v3836_v49, 16  ;;  %v1583_v13 = vrot.slane %v5006_v36, 6 }
  0x58   :  { %3340 = vmatpush3.bf16.msra.mxu0 %v3623_v17  ;;  %3181 = vmatprep.subr.bf16.mxu1 %v3624_v56  ;;  %v1582_v35 = vrot.slane %v5005_v47, 5  ;;  %v5036_v33 = vshrl.u32 %v4095_v43, 16  ;;  %v5037_v18 = vshll.u32 %v4095_v43, 16  ;;  %v2692_v2 = vcombine.low %v438_v6, %v448_v41 }
  0x59   :  { %3341 = vmatprep.subr.bf16.mxu0 %v3625_v27  ;;  %v5038_v24 = vshll.u32 %v4105_v25, 16  ;;  %v5039_v17 = vshrl.u32 %v4105_v25, 16  ;;  %v483_v47 = vrot.slane %v482_v12, 4  ;;  %v493_v44 = vrot.slane %v492_v62, 4 }
  0x5a   :  { %v512_v26 = vrot.slane %v5036_v33, 4  ;;  %v515_v59 = vrot.slane %v5037_v18, 5  ;;  %3166 = vmatmul.mubr.bf16.gmra.mrb[12].mxu1 %v3976_v3  ;;  %v503_v36 = vrot.slane %v502_v20, 4  ;;  %v4362_v33 = vrot.slane %v5040_v9, 5  ;;  %v3628_v9 = vld [vmem:[%s4961_s2 + $0x40] sm:$0xff]  }
  0x5b   :  { %v4355_v14 = vrot.slane %v5038_v24, 5  ;;  %v525_v34 = vrot.slane %v5039_v17, 4  ;;  %3326 = vmatmul.mubr.bf16.gmra.mrb[12].mxu0 %v4338_v51  ;;  %3182 = vmatpush3.bf16.msra.mxu1 %v3624_v56  ;;  %v458_v6 = vsel %vm4299_vm8, %v453_v46, %v4171_v4  ;;  %v468_v41 = vsel %vm4299_vm8, %v463_v5, %v4272_v31  ;;  %v3629_v31 = vld [vmem:[%s4963_s1 + $0x100] sm:$0xff]  }
  0x5c   :  { %v1589_v18 = vrot.slane %v1587_v15, 5  ;;  %v5041_v3 = vshll.u32 %v3836_v49, 16  ;;  %3342 = vmatpush3.bf16.msra.mxu0 %v3625_v27  ;;  %3183 = vmatprep.subr.bf16.mxu1 %v3626_v1  ;;  %v1584_v62 = vor.u32 %v1583_v13, %v1582_v35  ;;  %v516_v56 = vor.u32 %v515_v59, %v512_v26 }
  0x5d   :  { %v5042_v20 = vshll.u32 %v3855_v57, 16  ;;  %v5043_v4 = vshrl.u32 %v3855_v57, 16  ;;  %3343 = vmatprep.subr.bf16.mxu0 %v3627_v63  ;;  %3185 = vmatprep.mubr.bf16.mxu1 %v2692_v2  ;;  %v526_v5 = vor.u32 %v525_v34, %v4355_v14  ;;  %v5044_v27 = vshll.u32 %v3860_v58, 16 }
  0x5e   :  { %v1590_v12 = vrot.slane %v5041_v3, 6  ;;  %v5045_v35 = vshrl.u32 %v3860_v58, 16  ;;  %3345 = vmatprep.mubr.bf16.mxu0 %v4113_v60  ;;  %v4393_v26 = vcombine.low %v458_v6, %v468_v41  ;;  %v478_v59 = vsel %vm4299_vm8, %v473_v39, %v4280_v50  ;;  %v3630_v50 = vld [vmem:[%s4961_s2 + $0x48] sm:$0xff]  }
  0x5f   :  { %v4378_v24 = vrot.slane %v5042_v20, 5  ;;  %v535_v46 = vrot.slane %v5043_v4, 4  ;;  %v4388_v15 = vrot.slane %v5044_v27, 5  ;;  %v488_v2 = vsel %vm4299_vm8, %v483_v47, %v4290_v8  ;;  %3184 = vmatpush3.bf16.msra.mxu1 %v3626_v1 }
  0x60   :  { %v545_v13 = vrot.slane %v5045_v35, 4  ;;  %v498_v17 = vsel %vm4299_vm8, %v493_v44, %v4306_v23  ;;  %v508_v58 = vsel %vm4299_vm8, %v503_v36, %v4362_v33  ;;  %v1581_v60 = vrot.slane %v4142_v55, 4  ;;  %3344 = vmatpush3.bf16.msra.mxu0 %v3627_v63  ;;  %3201 = vmatprep.subr.bf16.mxu1 %v3628_v9  ;;  %v3631_v23 = vld [vmem:[%s4963_s1 + $0x108] sm:$0xff]  }
  0x61   :  { %v1586_v39 = vrot.slane %v1584_v62, 4  ;;  %v1591_v34 = vor.u32 %v1590_v12, %v1589_v18  ;;  %v517_v8 = vrot.slane %v516_v56, 4  ;;  %v536_v47 = vor.u32 %v535_v46, %v4378_v24  ;;  %3361 = vmatprep.subr.bf16.mxu0 %v3629_v31 }
  0x62   :  { %v4415_v1 = vcombine.low %v478_v59, %v488_v2  ;;  %v527_v36 = vrot.slane %v526_v5, 4  ;;  %v546_v55 = vor.u32 %v545_v13, %v4388_v15  ;;  %v5046_v63 = vshrl.u32 %v3869_v61, 16  ;;  %3186 = vmatmul.mubr.bf16.vlgmr.msra.gmra.mrb[0].mxu1 %v4393_v26 }
  0x63   :  { %v5047_v6 = vshll.u32 %v3876_v0, 16  ;;  %v5048_v18 = vshrl.u32 %v3876_v0, 16  ;;  %3346 = vmatmul.mubr.bf16.vlgmr.msra.gmra.mrb[0].mxu0 %v4164_v42  ;;  %3202 = vmatpush3.bf16.msra.mxu1 %v3628_v9  ;;  %v4428_v12 = vcombine.low %v498_v17, %v508_v58  ;;  %v1585_v56 = vsel %vm4036_vm5, %v1581_v60, %v1584_v62  ;;  %v3632_v0 = vld [vmem:[%s4961_s2 + $0x50] sm:$0xff]  }
  0x64   :  { %v555_v44 = vrot.slane %v5046_v63, 4  ;;  %v5049_v20 = vshll.u32 %v3869_v61, 16  ;;  %v619_v46 = vshll.u32 %v3928_v30, 16  ;;  %3362 = vmatpush3.bf16.msra.mxu0 %v3629_v31  ;;  %3203 = vmatprep.subr.bf16.mxu1 %v3630_v50  ;;  %v1592_v42 = vsel %vm4036_vm5, %v1586_v39, %v1591_v34  ;;  %v3633_v61 = vld [vmem:[%s4963_s1 + $0x110] sm:$0xff]  }
  0x65   :  { %v4423_v41 = vrot.slane %v5047_v6, 5  ;;  %v565_v3 = vrot.slane %v5048_v18, 4  ;;  %v522_v9 = vsel %vm4299_vm8, %v517_v8, %v4355_v14  ;;  %v537_v5 = vrot.slane %v536_v47, 4  ;;  %3363 = vmatprep.subr.bf16.mxu0 %v3631_v23  ;;  %3189 = vmatprep.mubr.bf16.mxu1 %v4415_v1  ;;  %v3634_v8 = vld [vmem:[%s4961_s2 + $0x58] sm:$0xff]  }
  0x66   :  { %v551_v4 = vrot.slane %v5049_v20, 5  ;;  %v623_v62 = vshrl.u32 %v3928_v30, 16  ;;  %v532_v31 = vsel %vm4299_vm8, %v527_v36, %v4378_v24  ;;  %v547_v27 = vrot.slane %v546_v55, 4  ;;  %3349 = vmatprep.mubr.bf16.mxu0 %v4202_v52 }
  0x67   :  { %v5050_v35 = vshll.u32 %v3893_v7, 16  ;;  %v5051_v14 = vshrl.u32 %v3893_v7, 16  ;;  %v566_v17 = vor.u32 %v565_v3, %v4423_v41  ;;  %v5052_v58 = vshll.u32 %v3918_v28, 16  ;;  %3204 = vmatpush3.bf16.msra.mxu1 %v3630_v50  ;;  %v3636_v3 = vld [vmem:[%s4961_s2 + $0x60] sm:$0xff]  }
  0x68   :  { %v556_v2 = vor.u32 %v555_v44, %v551_v4  ;;  %v5053_v39 = vshrl.u32 %v3918_v28, 16  ;;  %v2842_v24 = vcombine.low %v1585_v56, %v1592_v42  ;;  %v629_v7 = vshll.u32 %v3942_v45, 16  ;;  %3364 = vmatpush3.bf16.msra.mxu0 %v3631_v23  ;;  %3205 = vmatprep.subr.bf16.mxu1 %v3632_v0  ;;  %v3635_v28 = vld [vmem:[%s4963_s1 + $0x118] sm:$0xff]  }
  0x69   :  { %v571_v13 = vrot.slane %v5050_v35, 5  ;;  %v575_v59 = vrot.slane %v5051_v14, 4  ;;  %v4459_v60 = vrot.slane %v5052_v58, 5  ;;  %v1595_v52 = vrot.slane %v619_v46, 6  ;;  %3365 = vmatprep.subr.bf16.mxu0 %v3633_v61  ;;  %v3638_v14 = vld [vmem:[%s4961_s2 + $0x68] sm:$0xff]  }
  0x6a   :  { %v585_v34 = vrot.slane %v5053_v39, 4  ;;  %v1594_v47 = vrot.slane %v623_v62, 5  ;;  %v1599_v36 = vshrl.u32 %v3942_v45, 16  ;;  %v2696_v50 = vcombine.low %v522_v9, %v532_v31  ;;  %3190 = vmatmul.mubr.bf16.gmra.mrb[4].mxu1 %v4428_v12  ;;  %v3655_v45 = vld [vmem:[%s4961_s2 + $0x128] sm:$0xff]  }
  0x6b   :  { %v542_v55 = vsel %vm4299_vm8, %v537_v5, %v4388_v15  ;;  %v576_v63 = vor.u32 %v575_v59, %v571_v13  ;;  %v552_v23 = vsel %vm4299_vm8, %v547_v27, %v551_v4  ;;  %v557_v44 = vrot.slane %v556_v2, 4  ;;  %3350 = vmatmul.mubr.bf16.gmra.mrb[4].mxu0 %v2842_v24  ;;  %3206 = vmatpush3.bf16.msra.mxu1 %v3632_v0  ;;  %v3637_v15 = vld [vmem:[%s4963_s1 + $0x120] sm:$0xff]   ;;  %v3661_v24 = vld [vmem:[%s4962_s0 + $0x8] sm:$0xf] }
  0x6c   :  { %v567_v6 = vrot.slane %v566_v17, 4  ;;  %v586_v18 = vor.u32 %v585_v34, %v4459_v60  ;;  %3366 = vmatpush3.bf16.msra.mxu0 %v3633_v61  ;;  %3207 = vmatprep.subr.bf16.mxu1 %v3634_v8  ;;  %v1596_v56 = vor.u32 %v1595_v52, %v1594_v47  ;;  %v1601_v20 = vrot.slane %v1599_v36, 5 }
  0x6d   :  { %v1602_v4 = vrot.slane %v629_v7, 6  ;;  %3367 = vmatprep.subr.bf16.mxu0 %v3635_v28  ;;  %3193 = vmatprep.mubr.bf16.mxu1 %v2696_v50  ;;  %v4490_v42 = vcombine.low %v542_v55, %v552_v23  ;;  %v577_v0 = vrot.slane %v576_v63, 4  ;;  %v5054_v9 = vshll.u32 %v3923_v29, 16  ;;  %v3662_v50 = vld [vmem:[%s4962_s0 + $0x10] sm:$0xf] }
  0x6e   :  { %3353 = vmatprep.mubr.bf16.mxu0 %v4258_v38  ;;  %v562_v61 = vsel %vm4299_vm8, %v557_v44, %v4423_v41  ;;  %v572_v31 = vsel %vm4299_vm8, %v567_v6, %v571_v13  ;;  %v587_v27 = vrot.slane %v586_v18, 4  ;;  %v2006_v35 = vrot.slane %v3986_v22, 6  ;;  %v3660_v41 = vld [vmem:[%s4962_s0 + $0xc] sm:$0xf]  ;;  %v3663_v44 = vld [vmem:[%s4962_s0 + $0x14] sm:$0xf] }
  0x6f   :  { %v4494_v5 = vrot.slane %v5054_v9, 5  ;;  %3208 = vmatpush3.bf16.msra.mxu1 %v3634_v8  ;;  %v1593_v38 = vrot.slane %v4274_v16, 4  ;;  %v1598_v59 = vrot.slane %v1596_v56, 4  ;;  %v1603_v2 = vor.u32 %v1602_v4, %v1601_v20  ;;  %v3639_v22 = vld [vmem:[%s4963_s1 + $0x128] sm:$0xff]   ;;  %v3643_v9 = vld [vmem:[%s4963_s1 + $0x138] sm:$0xff]  }
  0x70   :  { %3368 = vmatpush3.bf16.msra.mxu0 %v3635_v28  ;;  %3209 = vmatprep.subr.bf16.mxu1 %v3636_v3  ;;  %v2012_v13 = vrot.slane %v3660_v41, 6  ;;  %v4513_v17 = vcombine.low %v562_v61, %v572_v31  ;;  %v582_v58 = vsel %vm4299_vm8, %v577_v0, %v4459_v60  ;;  %v2852_v39 = vrot.slane %v3981_v21, 10  ;;  %v3640_v21 = vld [vmem:[%s4961_s2 + $0x70] sm:$0xff]   ;;  %v3642_v0 = vld [vmem:[%s4961_s2 + $0x78] sm:$0xff]  }
  0x71   :  { %3369 = vmatprep.subr.bf16.mxu0 %v3637_v15  ;;  %v592_v16 = vsel %vm4299_vm8, %v587_v27, %v4494_v5  ;;  %v2008_v34 = vrot.slane %v2006_v35, 4  ;;  %v2009_v8 = vrot.slane %v3661_v24, 6  ;;  %v1597_v52 = vsel %vm4036_vm5, %v1593_v38, %v1596_v56  ;;  %v3641_v28 = vld [vmem:[%s4963_s1 + $0x130] sm:$0xff]  }
  0x72   :  { %3194 = vmatmul.mubr.bf16.gmra.mrb[8].mxu1 %v4490_v42  ;;  %v1604_v47 = vsel %vm4036_vm5, %v1598_v59, %v1603_v2  ;;  %v4541_v36 = vcombine.low %v582_v58, %v592_v16  ;;  %v2015_v55 = vrot.slane %v3662_v50, 6  ;;  %v2007_v10 = vsel %vm4529_vm11, %v2852_v39, %v2006_v35  ;;  %v3664_v35 = vld [vmem:[%s4962_s0 + $0x18] sm:$0xf]  ;;  %v3665_v2 = vld [vmem:[%s4962_s0 + $0x1c] sm:$0xf] }
  0x73   :  { %3354 = vmatmul.mubr.bf16.gmra.mrb[8].mxu0 %v4295_v54  ;;  %3210 = vmatpush3.bf16.msra.mxu1 %v3636_v3  ;;  %v2014_v54 = vrot.slane %v2012_v13, 4  ;;  %v2010_v63 = vsel %vm4529_vm11, %v2008_v34, %v2009_v8  ;;  %v2011_v23 = vrot.slane %v2009_v8, 4  ;;  %v2018_v6 = vrot.slane %v3663_v44, 6  ;;  %v3667_v50 = vld [vmem:[%s4962_s0 + $0x34] sm:$0xf] }
  0x74   :  { %3370 = vmatpush3.bf16.msra.mxu0 %v3637_v15  ;;  %3211 = vmatprep.subr.bf16.mxu1 %v3638_v14  ;;  %v2843_v18 = vcombine.low %v1597_v52, %v1604_v47  ;;  %v5057_v3 = vshrl.u32 %v3813_v37, 16  ;;  %v5058_v56 = vshll.u32 %v3821_v40, 16  ;;  %v5059_v20 = vshrl.u32 %v3821_v40, 16  ;;  %v4603_v47 = vld [vmem:[%s4962_s0 + $0x20] sm:$0xf] }
  0x75   :  { %3371 = vmatprep.subr.bf16.mxu0 %v3639_v22  ;;  %3197 = vmatprep.mubr.bf16.mxu1 %v4513_v17  ;;  %v2016_v37 = vsel %vm4529_vm11, %v2014_v54, %v2015_v55  ;;  %v2017_v61 = vrot.slane %v2015_v55, 4  ;;  %v2870_v31 = vcombine.low %v2007_v10, %v2010_v63  ;;  %v2013_v40 = vsel %vm4529_vm11, %v2011_v23, %v2012_v13  ;;  %v3644_v13 = vld [vmem:[%s4963_s1 + $0x80] sm:$0xff]   ;;  %v3668_v10 = vld [vmem:[%s4962_s0 + $0x38] sm:$0xf] }
  0x76   :  { %3357 = vmatprep.mubr.bf16.mxu0 %v4338_v51  ;;  %v595_v15 = vrot.slane %v5057_v3, 4  ;;  %v4561_v51 = vrot.slane %v5058_v56, 5  ;;  %v605_v4 = vrot.slane %v5059_v20, 4  ;;  %v2020_v27 = vrot.slane %v2018_v6, 4  ;;  %v3648_v3 = vld [vmem:[%s4963_s1 + $0x90] sm:$0xff]  }
  0x77   :  { %3212 = vmatpush3.bf16.msra.mxu1 %v3638_v14  ;;  %v2021_v14 = vrot.slane %v3664_v35, 6  ;;  %v2024_v41 = vrot.slane %v3665_v2, 6  ;;  %v2019_v58 = vsel %vm4529_vm11, %v2017_v61, %v2018_v6  ;;  %v5060_v39 = vshll.u32 %v3836_v49, 16  ;;  %v3646_v49 = vld [vmem:[%s4963_s1 + $0x88] sm:$0xff]   ;;  %v3670_v61 = vld [vmem:[%s4962_s0 + $0x40] sm:$0xf] }
  0x78   :  { %3372 = vmatpush3.bf16.msra.mxu0 %v3639_v22  ;;  %3213 = vmatprep.subr.bf16.mxu1 %v3640_v21  ;;  %v596_v38 = vor.u32 %v595_v15, %v4362_v33  ;;  %v606_v59 = vor.u32 %v605_v4, %v4561_v51  ;;  %v4588_v22 = vcombine.low %v2013_v40, %v2016_v37  ;;  %v3645_v33 = vld [vmem:[%s4961_s2 + $0x100] sm:$0xff]   ;;  %v2031_v8 = vrot.slane %v4105_v25, 6  ;;  %v3647_v25 = vld [vmem:[%s4961_s2 + $0x108] sm:$0xff]   ;;  %v3649_v15 = vld [vmem:[%s4961_s2 + $0x110] sm:$0xff]  }
  0x79   :  { %3373 = vmatprep.subr.bf16.mxu0 %v3641_v28  ;;  %v2022_v16 = vsel %vm4529_vm11, %v2020_v27, %v2021_v14  ;;  %v611_v34 = vrot.slane %v5060_v39, 5  ;;  %v2023_v24 = vrot.slane %v2021_v14, 4  ;;  %v2026_v52 = vrot.slane %v2024_v41, 4  ;;  %v3672_v39 = vld [vmem:[%s4962_s0 + $0x48] sm:$0xf] }
  0x7a   :  { %3198 = vmatmul.mubr.bf16.gmra.mrb[12].mxu1 %v4541_v36  ;;  %v2027_v54 = vrot.slane %v4603_v47, 6  ;;  %v2034_v55 = vrot.slane %v3667_v50, 6  ;;  %v2037_v63 = vrot.slane %v3668_v10, 6  ;;  %v4620_v23 = vcombine.low %v2019_v58, %v2022_v16  ;;  %v3652_v16 = vld [vmem:[%s4963_s1 + $0xa0] sm:$0xff]   ;;  %v4705_v10 = vld [vmem:[%s4962_s0 + $0x4c] sm:$0xf] }
  0x7b   :  { %3358 = vmatmul.mubr.bf16.gmra.mrb[12].mxu0 %v2843_v18  ;;  %3214 = vmatpush3.bf16.msra.mxu1 %v3640_v21  ;;  %v607_v21 = vrot.slane %v606_v59, 4  ;;  %v2025_v44 = vsel %vm4529_vm11, %v2023_v24, %v2024_v41  ;;  %v2033_v6 = vrot.slane %v2031_v8, 4  ;;  %v5061_v40 = vshrl.u32 %v3923_v29, 16  ;;  %v3651_v59 = vld [vmem:[%s4961_s2 + $0x118] sm:$0xff]   ;;  %v3671_v41 = vld [vmem:[%s4962_s0 + $0x44] sm:$0xf] }
  0x7c   :  { %3374 = vmatpush3.bf16.msra.mxu0 %v3641_v28  ;;  %3215 = vmatprep.subr.bf16.mxu1 %v3642_v0  ;;  %v2853_v28 = vrot.slane %v4095_v43, 10  ;;  %v2039_v20 = vrot.slane %v2037_v63, 4  ;;  %v4658_v35 = vrot.slane %v619_v46, 5  ;;  %v625_v14 = vrot.slane %v623_v62, 4 }
  0x7d   :  { %3375 = vmatprep.subr.bf16.mxu0 %v3643_v9  ;;  %3217 = vmatprep.mubr.bf16.mxu1 %v4393_v26  ;;  %v597_v26 = vrot.slane %v596_v38, 4  ;;  %v612_v18 = vsel %vm4299_vm8, %v607_v21, %v611_v34  ;;  %v615_v27 = vrot.slane %v5061_v40, 4  ;;  %v3650_v38 = vld [vmem:[%s4963_s1 + $0x98] sm:$0xff]   ;;  %v2049_v34 = vrot.slane %v3672_v39, 6 }
  0x7e   :  { %3377 = vmatprep.mubr.bf16.mxu0 %v2870_v31  ;;  %v2032_v56 = vsel %vm4529_vm11, %v2853_v28, %v2031_v8  ;;  %v2043_v31 = vrot.slane %v3670_v61, 6  ;;  %v626_v58 = vor.u32 %v625_v14, %v4658_v35  ;;  %v3654_v28 = vld [vmem:[%s4963_s1 + $0xa8] sm:$0xff]  }
  0x7f   :  { %3216 = vmatpush3.bf16.msra.mxu1 %v3642_v0  ;;  %v602_v43 = vsel %vm4299_vm8, %v597_v26, %v4561_v51  ;;  %v2036_v51 = vrot.slane %v2034_v55, 4  ;;  %v3673_v26 = vld [vmem:[%s4962_s0 + $0x4] sm:$0xf]  ;;  %v3678_v14 = vld [vmem:[%s4962_s0 + $0x28] sm:$0xf] }
  0x80   :  { %3376 = vmatpush3.bf16.msra.mxu0 %v3643_v9  ;;  %3233 = vmatprep.subr.bf16.mxu1 %v3644_v13  ;;  %v2724_v4 = vcombine.low %v602_v43, %v612_v18  ;;  %v2035_v9 = vsel %vm4529_vm11, %v2033_v6, %v2034_v55  ;;  %v2045_v2 = vrot.slane %v2043_v31, 4  ;;  %v1034_v21 = vrot.slane %v3673_v26, 5 }
  0x81   :  { %3393 = vmatprep.subr.bf16.mxu0 %v3645_v33  ;;  %v2874_v29 = vcombine.low %v2032_v56, %v2035_v9  ;;  %v2038_v46 = vsel %vm4529_vm11, %v2036_v51, %v2037_v63  ;;  %v2051_v55 = vrot.slane %v2049_v34, 4  ;;  %v2052_v63 = vrot.slane %v4705_v10, 6 }
  0x82   :  { %3218 = vmatmul.mubr.bf16.vlgmr.msra.gmra.mrb[0].mxu1 %v4415_v1  ;;  %v2028_v1 = vsel %vm4529_vm11, %v2026_v52, %v2027_v54  ;;  %v1036_v43 = vrot.slane %v1034_v21, 4 }
  0x83   :  { %3378 = vmatmul.mubr.bf16.vlgmr.msra.gmra.mrb[0].mxu0 %v4588_v22  ;;  %3234 = vmatpush3.bf16.msra.mxu1 %v3644_v13  ;;  %v4644_v0 = vcombine.low %v2025_v44, %v2028_v1  ;;  %v2046_v13 = vrot.slane %v3671_v41, 6  ;;  %v3675_v44 = vld [vmem:[%s4962_s0] sm:$0xf]  ;;  %v2060_v41 = vrot.slane %v2052_v63, 4 }
  0x84   :  { %3394 = vmatpush3.bf16.msra.mxu0 %v3645_v33  ;;  %3235 = vmatprep.subr.bf16.mxu1 %v3646_v49  ;;  %v616_v33 = vor.u32 %v615_v27, %v4494_v5  ;;  %v3653_v5 = vld [vmem:[%s4961_s2 + $0x120] sm:$0xff]   ;;  %v2734_v6 = vrot.slane %v3675_v44, 9  ;;  %v2054_v27 = vrot.slane %v2027_v54, 4 }
  0x85   :  { %3395 = vmatprep.subr.bf16.mxu0 %v3647_v25  ;;  %3221 = vmatprep.mubr.bf16.mxu1 %v4428_v12  ;;  %v3669_v12 = vld [vmem:[%s4962_s0 + $0x3c] sm:$0xf]  ;;  %v2047_v52 = vsel %vm4529_vm11, %v2045_v2, %v2046_v13  ;;  %v2048_v50 = vrot.slane %v2046_v13, 4  ;;  %v5064_v2 = vld [vmem:[#allocation2_spill] sm:$0xff]  ;;  %v2064_v13 = vrot.slane %v3681_v19, 6 }
  0x86   :  { %3381 = vmatprep.mubr.bf16.mxu0 %v4620_v23  ;;  %v2040_v37 = vrot.slane %v3669_v12, 6  ;;  %v1035_v51 = vsel %vm3772_vm2, %v2734_v6, %v1034_v21  ;;  %v3659_v12 = vld [vmem:[%s4961_s2 + $0x138] sm:$0xff]  }
  0x87   :  { %3236 = vmatpush3.bf16.msra.mxu1 %v3646_v49  ;;  %v627_v49 = vrot.slane %v626_v58, 4  ;;  %v5066_v58 = vld [vmem:[#allocation4_spill] sm:$0xff] }
  0x88   :  { %3396 = vmatpush3.bf16.msra.mxu0 %v3647_v25  ;;  %3237 = vmatprep.subr.bf16.mxu1 %v3648_v3  ;;  %v2041_v30 = vsel %vm4529_vm11, %v2039_v20, %v2040_v37  ;;  %v2042_v62 = vrot.slane %v2040_v37, 4  ;;  %v631_v25 = vrot.slane %v629_v7, 5  ;;  %v5062_v20 = vrot.slane %v3744_v11, 5  ;;  %v3676_v11 = vld [vmem:[%s4962_s0 + $0x24] sm:$0xf] }
  0x89   :  { %3397 = vmatprep.subr.bf16.mxu0 %v3649_v15  ;;  %v4688_v24 = vcombine.low %v2038_v46, %v2041_v30  ;;  %v2055_v61 = vrot.slane %v3676_v11, 6  ;;  %v5063_v30 = vrot.slane %v3855_v57, 5 }
  0x8a   :  { %3222 = vmatmul.mubr.bf16.gmra.mrb[4].mxu1 %v2724_v4  ;;  %v2044_v8 = vsel %vm4529_vm11, %v2042_v62, %v2043_v31  ;;  %v632_v1 = vsel %vm4299_vm8, %v627_v49, %v631_v25  ;;  %v1038_v4 = vsel %vm3772_vm2, %v1036_v43, %v5062_v20  ;;  %v3677_v31 = vld [vmem:[%s4962_s0 + $0x30] sm:$0xf] }
  0x8b   :  { %3382 = vmatmul.mubr.bf16.gmra.mrb[4].mxu0 %v4644_v0  ;;  %3238 = vmatpush3.bf16.msra.mxu1 %v3648_v3  ;;  %v4712_v7 = vcombine.low %v2044_v8, %v2047_v52  ;;  %v2050_v3 = vsel %vm4529_vm11, %v2048_v50, %v2049_v34  ;;  %v2752_v37 = vcombine.low %v1035_v51, %v1038_v4  ;;  %v1059_v40 = vrot.slane %v3677_v31, 5 }
  0x8c   :  { %3398 = vmatpush3.bf16.msra.mxu0 %v3649_v15  ;;  %3239 = vmatprep.subr.bf16.mxu1 %v3650_v38  ;;  %v2053_v15 = vsel %vm4529_vm11, %v2051_v55, %v2052_v63 }
  0x8d   :  { %3399 = vmatprep.subr.bf16.mxu0 %v3651_v59  ;;  %3225 = vmatprep.mubr.bf16.mxu1 %v4490_v42  ;;  %v617_v42 = vrot.slane %v616_v33, 4  ;;  %v2877_v9 = vcombine.low %v2050_v3, %v2053_v15  ;;  %v1061_v46 = vrot.slane %v1059_v40, 4  ;;  %v5065_v33 = vld [vmem:[#allocation3_spill] sm:$0xff] }
  0x8e   :  { %3385 = vmatprep.mubr.bf16.mxu0 %v2874_v29 }
  0x8f   :  { %3240 = vmatpush3.bf16.msra.mxu1 %v3650_v38  ;;  %v622_v18 = vsel %vm4299_vm8, %v617_v42, %v4658_v35  ;;  %v2057_v35 = vrot.slane %v2055_v61, 4  ;;  %v2058_v38 = vrot.slane %v3678_v14, 6 }
  0x90   :  { %3400 = vmatpush3.bf16.msra.mxu0 %v3651_v59  ;;  %3241 = vmatprep.subr.bf16.mxu1 %v3652_v16  ;;  %v2725_v56 = vcombine.low %v622_v18, %v632_v1  ;;  %v3679_v59 = vld [vmem:[%s4962_s0 + $0x2c] sm:$0xf] }
  0x91   :  { %3401 = vmatprep.subr.bf16.mxu0 %v3653_v5  ;;  %v2735_v29 = vrot.slane %v3679_v59, 9  ;;  %v2059_v47 = vsel %vm4529_vm11, %v2057_v35, %v2058_v38 }
  0x92   :  { %3226 = vmatmul.mubr.bf16.gmra.mrb[8].mxu1 %v4513_v17  ;;  %v3656_v17 = vld [vmem:[%s4963_s1 + $0xb0] sm:$0xff]  }
  0x93   :  { %3386 = vmatmul.mubr.bf16.gmra.mrb[8].mxu0 %v4688_v24  ;;  %3242 = vmatpush3.bf16.msra.mxu1 %v3652_v16  ;;  %v1060_v54 = vsel %vm3772_vm2, %v2735_v29, %v1059_v40 }
  0x94   :  { %3402 = vmatpush3.bf16.msra.mxu0 %v3653_v5  ;;  %3243 = vmatprep.subr.bf16.mxu1 %v3654_v28  ;;  %v5067_v5 = vld [vmem:[#allocation5_spill] sm:$0xff] }
  0x95   :  { %3403 = vmatprep.subr.bf16.mxu0 %v3655_v45  ;;  %3229 = vmatprep.mubr.bf16.mxu1 %v4541_v36  ;;  %v3658_v36 = vld [vmem:[%s4963_s1 + $0xb8] sm:$0xff]  }
  0x96   :  { %3389 = vmatprep.mubr.bf16.mxu0 %v4712_v7 }
  0x97   :  { %3244 = vmatpush3.bf16.msra.mxu1 %v3654_v28 }
  0x98   :  { %3404 = vmatpush3.bf16.msra.mxu0 %v3655_v45  ;;  %3245 = vmatprep.subr.bf16.mxu1 %v3656_v17 }
  0x99   :  { %3405 = vmatprep.subr.bf16.mxu0 %v3657_v48 }
  0x9a   :  { %3230 = vmatmul.mubr.bf16.gmra.mrb[12].mxu1 %v2725_v56 }
  0x9b   :  { %3390 = vmatmul.mubr.bf16.gmra.mrb[12].mxu0 %v2877_v9  ;;  %3246 = vmatpush3.bf16.msra.mxu1 %v3656_v17 }
  0x9c   :  { %3406 = vmatpush3.bf16.msra.mxu0 %v3657_v48  ;;  %3247 = vmatprep.subr.bf16.mxu1 %v3658_v36 }
  0x9d   :  { %3407 = vmatprep.subr.bf16.mxu0 %v3659_v12  ;;  %3249 = vmatprep.mubr.bf16.mxu1 %v2752_v37 }
  0x9e   :  { %3409 = vmatprep.mubr.bf16.mxu0 %v4588_v22  ;;  %v2056_v22 = vsel %vm4529_vm11, %v2054_v27, %v2055_v61 }
  0x9f   :  { %3248 = vmatpush3.bf16.msra.mxu1 %v3658_v36  ;;  %v2902_v62 = vcombine.low %v2056_v22, %v2059_v47 }
  0xa0   :  { %3408 = vmatpush3.bf16.msra.mxu0 %v3659_v12 }
  0xa2   :  { %3250 = vmatmul.mubr.bf16.vlgmr.msra.gmra.mrb[0].mxu1 %v3799_v32  ;;  %v1063_v32 = vsel %vm3772_vm2, %v1061_v46, %v5063_v30 }
  0xa3   :  { %3410 = vmatmul.mubr.bf16.vlgmr.msra.gmra.mrb[0].mxu0 %v4620_v23  ;;  %3253 = vmatprep.mubr.bf16.mxu1 %v3846_v53  ;;  %v2756_v23 = vcombine.low %v1060_v54, %v1063_v32  ;;  %v3680_v53 = vld [vmem:[%s4962_s0 + $0x50] sm:$0xf]  ;;  %s3682_s0 = smov 64   ;;  %v4863_v32 = vld [vmem:[%s4964_s3] ss:$0 sm:$0xff] }
  0xa4   :  { %3413 = vmatprep.mubr.bf16.mxu0 %v4644_v0  ;;  %v2061_v0 = vrot.slane %v3680_v53, 6 }
  0xa6   :  { %v2063_v57 = vrot.slane %v2061_v0, 4  ;;  %v2062_v16 = vsel %vm4529_vm11, %v2060_v41, %v2061_v0 }
  0xa8   :  { %v2065_v39 = vsel %vm4529_vm11, %v2063_v57, %v2064_v13 }
  0xa9   :  { %v2903_v34 = vcombine.low %v2062_v16, %v2065_v39 }
  0xaa   :  { %3254 = vmatmul.mubr.bf16.gmra.mrb[4].mxu1 %v5064_v2 }
  0xab   :  { %3414 = vmatmul.mubr.bf16.gmra.mrb[4].mxu0 %v2902_v62  ;;  %3257 = vmatprep.mubr.bf16.mxu1 %v2756_v23 }
  0xac   :  { %3417 = vmatprep.mubr.bf16.mxu0 %v4688_v24 }
  0xb2   :  { %3258 = vmatmul.mubr.bf16.gmra.mrb[8].mxu1 %v5065_v33 }
  0xb3   :  { %3418 = vmatmul.mubr.bf16.gmra.mrb[8].mxu0 %v4712_v7  ;;  %3261 = vmatprep.mubr.bf16.mxu1 %v5066_v58 }
  0xb4   :  { %3421 = vmatprep.mubr.bf16.mxu0 %v2877_v9 }
  0xba   :  { %3262 = vmatmul.mubr.bf16.gmra.mrb[12].mxu1 %v5067_v5 }
  0xbb   :  { %3422 = vmatmul.mubr.bf16.gmra.mrb[12].mxu0 %v2903_v34 }
 0x175   :  { %v3251_v24 = vpop.f32.mrb[0].mxu1 }
 0x176   :  { %v3411_v8 = vpop.f32.mrb[0].mxu0  ;;  %v1227_v26 = vpop.f32.mrb[1].mxu1 }
 0x177   :  { %v4796_v21 = vadd.f32 %v3411_v8, %v3251_v24  ;;  %v2383_v52 = vpop.f32.mrb[1].mxu0  ;;  %v3252_v42 = vpop.f32.mrb[2].mxu1 }
 0x178   :  { %v4798_v49 = vadd.f32 %v2383_v52, %v1227_v26  ;;  %v3412_v25 = vpop.f32.mrb[2].mxu0  ;;  %v1230_v28 = vpop.f32.mrb[3].mxu1 }
 0x179   :  { %v4800_v50 = vadd.f32 %v3412_v25, %v3252_v42  ;;  %v2386_v55 = vpop.f32.mrb[3].mxu0  ;;  %2482 = vrot.lane.b32.xlu1 %v4796_v21, %s3682_s0 }
 0x17a   :  { %v4804_v60 = vadd.f32 %v2386_v55, %v1230_v28  ;;  %2478 = vrot.lane.b32.xlu0 %v4798_v49, %s3682_s0 }
 0x17d   :  { %2484 = vrot.lane.b32.xlu1 %v4800_v50, %s3682_s0  ;;  %v3255_v10 = vpop.f32.mrb[4].mxu1 }
 0x17e   :  { %v3415_v63 = vpop.f32.mrb[4].mxu0  ;;  %2480 = vrot.lane.b32.xlu0 %v4804_v60, %s3682_s0  ;;  %v1243_v45 = vpop.f32.mrb[5].mxu1 }
 0x17f   :  { %v4812_v7 = vadd.f32 %v3415_v63, %v3255_v10  ;;  %v2399_v44 = vpop.f32.mrb[5].mxu0  ;;  %v3256_v6 = vpop.f32.mrb[6].mxu1 }
 0x180   :  { %v4814_v43 = vadd.f32 %v2399_v44, %v1243_v45  ;;  %v3416_v18 = vpop.f32.mrb[6].mxu0  ;;  %v1246_v1 = vpop.f32.mrb[7].mxu1 }
 0x181   :  { %v4816_v17 = vadd.f32 %v3416_v18, %v3256_v6  ;;  %v2402_v3 = vpop.f32.mrb[7].mxu0 }
 0x182   :  { %v4818_v15 = vadd.f32 %v2402_v3, %v1246_v1  ;;  %2490 = vrot.lane.b32.xlu0 %v4812_v7, %s3682_s0 }
 0x183   :  { %2492 = vrot.lane.b32.xlu1 %v4816_v17, %s3682_s0 }
 0x185   :  { %v3259_v48 = vpop.f32.mrb[8].mxu1 }
 0x186   :  { %v3419_v56 = vpop.f32.mrb[8].mxu0  ;;  %2486 = vrot.lane.b32.xlu0 %v4814_v43, %s3682_s0  ;;  %v1259_v51 = vpop.f32.mrb[9].mxu1 }
 0x187   :  { %v4826_v20 = vadd.f32 %v3419_v56, %v3259_v48  ;;  %v2415_v4 = vpop.f32.mrb[9].mxu0  ;;  %2488 = vrot.lane.b32.xlu1 %v4818_v15, %s3682_s0  ;;  %v3260_v9 = vpop.f32.mrb[10].mxu1 }
 0x188   :  { %v4830_v36 = vadd.f32 %v2415_v4, %v1259_v51  ;;  %v3420_v12 = vpop.f32.mrb[10].mxu0  ;;  %v1262_v37 = vpop.f32.mrb[11].mxu1 }
 0x189   :  { %v4832_v11 = vadd.f32 %v3420_v12, %v3260_v9  ;;  %v2418_v61 = vpop.f32.mrb[11].mxu0 }
 0x18a   :  { %v4834_v31 = vadd.f32 %v2418_v61, %v1262_v37  ;;  %2498 = vrot.lane.b32.xlu0 %v4826_v20, %s3682_s0 }
 0x18b   :  { %2500 = vrot.lane.b32.xlu1 %v4832_v11, %s3682_s0 }
 0x18d   :  { %v3263_v40 = vpop.f32.mrb[12].mxu1 }
 0x18e   :  { %v3423_v27 = vpop.f32.mrb[12].mxu0  ;;  %2494 = vrot.lane.b32.xlu0 %v4830_v36, %s3682_s0  ;;  %v1275_v35 = vpop.f32.mrb[13].mxu1 }
 0x18f   :  { %v4842_v14 = vadd.f32 %v3423_v27, %v3263_v40  ;;  %v2431_v38 = vpop.f32.mrb[13].mxu0  ;;  %2496 = vrot.lane.b32.xlu1 %v4834_v31, %s3682_s0  ;;  %v3264_v59 = vpop.f32.mrb[14].mxu1 }
 0x190   :  { %v4846_v29 = vadd.f32 %v2431_v38, %v1275_v35  ;;  %v3424_v46 = vpop.f32.mrb[14].mxu0  ;;  %v1278_v22 = vpop.f32.mrb[15].mxu1 }
 0x191   :  { %v4848_v47 = vadd.f32 %v3424_v46, %v3264_v59  ;;  %v2434_v54 = vpop.f32.mrb[15].mxu0 }
 0x192   :  { %v4850_v30 = vadd.f32 %v2434_v54, %v1278_v22  ;;  %2502 = vrot.lane.b32.xlu0 %v4846_v29, %s3682_s0 }
 0x194   :  { %2504 = vrot.lane.b32.xlu1 %v4850_v30, %s3682_s0 }
 0x196   :  { %2506 = vrot.lane.b32.xlu0 %v4842_v14, %s3682_s0 }
 0x198   :  { %2508 = vrot.lane.b32.xlu1 %v4848_v47, %s3682_s0 }
 0x1eb   :  { %v2483_v62 = vpop.permute.xlu1 %2482 }
 0x1ec   :  { %v2528_v23 = vmax.f32 %v4796_v21, %v2483_v62  ;;  %v2479_v2 = vpop.permute.xlu0 %2478 }
 0x1ed   :  { %v2526_v53 = vmax.f32 %v4798_v49, %v2479_v2 }
 0x1ee   :  { %v2551_v0 = vadd.f32 %v4863_v32, %v2528_v23 }
 0x1ef   :  { %v2549_v41 = vadd.f32 %v4863_v32, %v2526_v53  ;;  %v2485_v57 = vpop.permute.xlu1 %2484 }
 0x1f0   :  { %v2931_v19 = vpack.c.bf16 %v2551_v0, %v2551_v0  ;;  %v2529_v13 = vmax.f32 %v4800_v50, %v2485_v57  ;;  %v2481_v33 = vpop.permute.xlu0 %2480 }
 0x1f1   :  { %v2929_v58 = vpack.c.bf16 %v2549_v41, %v2549_v41  ;;  %v2527_v16 = vmax.f32 %v4804_v60, %v2481_v33 }
 0x1f2   :  { %2632 = vst.msk [vmem:[%s4965_s4 + $0x8] sm:$0xf] %vm2629_vm12, %v2931_v19  ;;  %v2552_v39 = vadd.f32 %v4863_v32, %v2529_v13 }
 0x1f3   :  { %2630 = vst.msk [vmem:[%s4965_s4] sm:$0xf] %vm2629_vm12, %v2929_v58  ;;  %v2550_v34 = vadd.f32 %v4863_v32, %v2527_v16 }
 0x1f4   :  { %v2932_v5 = vpack.c.bf16 %v2552_v39, %v2552_v39  ;;  %v2491_v24 = vpop.permute.xlu0 %2490 }
 0x1f5   :  { %v2930_v8 = vpack.c.bf16 %v2550_v34, %v2550_v34  ;;  %v2532_v26 = vmax.f32 %v4812_v7, %v2491_v24  ;;  %v2493_v21 = vpop.permute.xlu1 %2492 }
 0x1f6   :  { %2633 = vst.msk [vmem:[%s4965_s4 + $0xc] sm:$0xf] %vm2629_vm12, %v2932_v5  ;;  %v2533_v52 = vmax.f32 %v4816_v17, %v2493_v21 }
 0x1f7   :  { %2631 = vst.msk [vmem:[%s4965_s4 + $0x4] sm:$0xf] %vm2629_vm12, %v2930_v8  ;;  %v2555_v42 = vadd.f32 %v4863_v32, %v2532_v26 }
 0x1f8   :  { %v2556_v49 = vadd.f32 %v4863_v32, %v2533_v52  ;;  %v2487_v25 = vpop.permute.xlu0 %2486 }
 0x1f9   :  { %v2935_v28 = vpack.c.bf16 %v2555_v42, %v2555_v42  ;;  %v2530_v50 = vmax.f32 %v4814_v43, %v2487_v25  ;;  %v2489_v55 = vpop.permute.xlu1 %2488 }
 0x1fa   :  { %v2936_v60 = vpack.c.bf16 %v2556_v49, %v2556_v49  ;;  %v2531_v10 = vmax.f32 %v4818_v15, %v2489_v55 }
 0x1fb   :  { %2636 = vst.msk [vmem:[%s4965_s4 + $0x18] sm:$0xf] %vm2629_vm12, %v2935_v28  ;;  %v2553_v63 = vadd.f32 %v4863_v32, %v2530_v50 }
 0x1fc   :  { %2637 = vst.msk [vmem:[%s4965_s4 + $0x1c] sm:$0xf] %vm2629_vm12, %v2936_v60  ;;  %v2554_v45 = vadd.f32 %v4863_v32, %v2531_v10  ;;  %v2499_v7 = vpop.permute.xlu0 %2498 }
 0x1fd   :  { %v2933_v44 = vpack.c.bf16 %v2553_v63, %v2553_v63  ;;  %v2536_v6 = vmax.f32 %v4826_v20, %v2499_v7  ;;  %v2501_v43 = vpop.permute.xlu1 %2500 }
 0x1fe   :  { %v2934_v18 = vpack.c.bf16 %v2554_v45, %v2554_v45  ;;  %v2537_v1 = vmax.f32 %v4832_v11, %v2501_v43 }
 0x1ff   :  { %2634 = vst.msk [vmem:[%s4965_s4 + $0x10] sm:$0xf] %vm2629_vm12, %v2933_v44  ;;  %v2559_v17 = vadd.f32 %v4863_v32, %v2536_v6 }
 0x200   :  { %2635 = vst.msk [vmem:[%s4965_s4 + $0x14] sm:$0xf] %vm2629_vm12, %v2934_v18  ;;  %v2560_v3 = vadd.f32 %v4863_v32, %v2537_v1  ;;  %v2495_v15 = vpop.permute.xlu0 %2494 }
 0x201   :  { %v2939_v48 = vpack.c.bf16 %v2559_v17, %v2559_v17  ;;  %v2534_v56 = vmax.f32 %v4830_v36, %v2495_v15  ;;  %v2497_v51 = vpop.permute.xlu1 %2496 }
 0x202   :  { %v2940_v20 = vpack.c.bf16 %v2560_v3, %v2560_v3  ;;  %v2535_v4 = vmax.f32 %v4834_v31, %v2497_v51 }
 0x203   :  { %2640 = vst.msk [vmem:[%s4965_s4 + $0x28] sm:$0xf] %vm2629_vm12, %v2939_v48  ;;  %v2557_v9 = vadd.f32 %v4863_v32, %v2534_v56 }
 0x204   :  { %2641 = vst.msk [vmem:[%s4965_s4 + $0x2c] sm:$0xf] %vm2629_vm12, %v2940_v20  ;;  %v2558_v12 = vadd.f32 %v4863_v32, %v2535_v4  ;;  %v2503_v37 = vpop.permute.xlu0 %2502 }
 0x205   :  { %v2937_v36 = vpack.c.bf16 %v2557_v9, %v2557_v9  ;;  %v2538_v11 = vmax.f32 %v4846_v29, %v2503_v37 }
 0x206   :  { %v2938_v61 = vpack.c.bf16 %v2558_v12, %v2558_v12  ;;  %v2505_v31 = vpop.permute.xlu1 %2504 }
 0x207   :  { %2638 = vst.msk [vmem:[%s4965_s4 + $0x20] sm:$0xf] %vm2629_vm12, %v2937_v36  ;;  %v2561_v40 = vadd.f32 %v4863_v32, %v2538_v11  ;;  %v2539_v27 = vmax.f32 %v4850_v30, %v2505_v31 }
 0x208   :  { %2639 = vst.msk [vmem:[%s4965_s4 + $0x24] sm:$0xf] %vm2629_vm12, %v2938_v61  ;;  %v2507_v35 = vpop.permute.xlu0 %2506 }
 0x209   :  { %v2941_v38 = vpack.c.bf16 %v2561_v40, %v2561_v40  ;;  %v2562_v59 = vadd.f32 %v4863_v32, %v2539_v27  ;;  %v2540_v29 = vmax.f32 %v4842_v14, %v2507_v35 }
 0x20a   :  { %v2509_v46 = vpop.permute.xlu1 %2508 }
 0x20b   :  { %2642 = vst.msk [vmem:[%s4965_s4 + $0x30] sm:$0xf] %vm2629_vm12, %v2941_v38  ;;  %v2942_v22 = vpack.c.bf16 %v2562_v59, %v2562_v59  ;;  %v2563_v54 = vadd.f32 %v4863_v32, %v2540_v29  ;;  %v2541_v30 = vmax.f32 %v4848_v47, %v2509_v46 }
 0x20d   :  { %2643 = vst.msk [vmem:[%s4965_s4 + $0x34] sm:$0xf] %vm2629_vm12, %v2942_v22  ;;  %v2943_v62 = vpack.c.bf16 %v2563_v54, %v2563_v54  ;;  %v2564_v23 = vadd.f32 %v4863_v32, %v2541_v30 }
 0x20f   :  { %2644 = vst.msk [vmem:[%s4965_s4 + $0x38] sm:$0xf] %vm2629_vm12, %v2943_v62  ;;  %v2944_v14 = vpack.c.bf16 %v2564_v23, %v2564_v23 }
 0x211   :  { %2645 = vst.msk [vmem:[%s4965_s4 + $0x3c] sm:$0xf] %vm2629_vm12, %v2944_v14 }

// kernel: mynn_forward.7
= control target key start
LH: loop header
LB: loop body
LE: loop exit
PB: predicated region body
PF: predicated region fallthrough
CT: control target
= control target key end

     0   :  { %v163_v28 = vlaneseq  ;;  %v1179_v36 = vmov 1966171168   ;;  %s1463_s0 = inlined_call_operand.vmem [shape: bf16[2,1024], index: 0, kind: input, shape index: {}]   ;;  %s1464_s1 = inlined_call_operand.vmem [shape: bf16[1024,128], index: 1, kind: input, shape index: {}]   ;;  %s1465_s2 = inlined_call_operand.vmem [shape: f32[1,128], index: 2, kind: input, shape index: {}]   ;;  %s1466_s3 = inlined_call_operand.vmem [shape: bf16[128,128], index: 3, kind: input, shape index: {}]   ;;  %s1467_s4 = inlined_call_operand.vmem [shape: f32[1,128], index: 4, kind: input, shape index: {}]   ;;  %s1468_s5 = inlined_call_operand.hbm [shape: f32[2,128], index: 5, kind: output, shape index: {}]  }
   0x1   :  { %v1082_v0 = vld [vmem:[%s1464_s1 + $0x40] sm:$0xff]   ;;  %v1086_v4 = vld [vmem:[%s1464_s1 + $0x48] sm:$0xff]   ;;  %v1090_v8 = vld [vmem:[%s1464_s1 + $0x50] sm:$0xff]   ;;  %v161_v37 = vunpack.c.l.s4 %v1179_v36 }
   0x2   :  { %v1083_v1 = vld [vmem:[%s1464_s1 + $0xc0] sm:$0xff]   ;;  %961 = vmatprep.subr.bf16.mxu0 %v1082_v0  ;;  %v1087_v5 = vld [vmem:[%s1464_s1 + $0xc8] sm:$0xff]   ;;  %v1091_v9 = vld [vmem:[%s1464_s1 + $0xd0] sm:$0xff]   ;;  %v164_v33 = vshrl.u32 %v163_v28, 7 }
   0x3   :  { %v1084_v2 = vld [vmem:[%s1464_s1] sm:$0xff]   ;;  %983 = vmatprep.subr.bf16.mxu1 %v1083_v1  ;;  %v1088_v6 = vld [vmem:[%s1464_s1 + $0x8] sm:$0xff]   ;;  %v1092_v10 = vld [vmem:[%s1464_s1 + $0x10] sm:$0xff]   ;;  %v162_v40 = vunpack.c.0.s8 %v161_v37 }
   0x4   :  { %v1085_v3 = vld [vmem:[%s1464_s1 + $0x80] sm:$0xff]   ;;  %962 = vmatpush3.bf16.msra.mxu0 %v1084_v2  ;;  %v1089_v7 = vld [vmem:[%s1464_s1 + $0x88] sm:$0xff]   ;;  %v1093_v11 = vld [vmem:[%s1464_s1 + $0x90] sm:$0xff]  }
   0x5   :  { %984 = vmatpush3.bf16.msra.mxu1 %v1085_v3  ;;  %963 = vmatprep.subr.bf16.mxu0 %v1086_v4  ;;  %v1094_v12 = vld [vmem:[%s1464_s1 + $0x58] sm:$0xff]   ;;  %v1098_v16 = vld [vmem:[%s1464_s1 + $0x60] sm:$0xff]   ;;  %v1102_v20 = vld [vmem:[%s1464_s1 + $0x68] sm:$0xff]   ;;  %v1318_v41 = vsub.s32 %v162_v40, %v164_v33 }
   0x6   :  { %985 = vmatprep.subr.bf16.mxu1 %v1087_v5  ;;  %v1095_v13 = vld [vmem:[%s1464_s1 + $0xd8] sm:$0xff]   ;;  %v1099_v17 = vld [vmem:[%s1464_s1 + $0xe0] sm:$0xff]   ;;  %v1103_v21 = vld [vmem:[%s1464_s1 + $0xe8] sm:$0xff]  }
   0x7   :  { %v1096_v14 = vld [vmem:[%s1464_s1 + $0x18] sm:$0xff]   ;;  %v1100_v18 = vld [vmem:[%s1464_s1 + $0x20] sm:$0xff]   ;;  %v1104_v22 = vld [vmem:[%s1464_s1 + $0x28] sm:$0xff]  }
   0x8   :  { %964 = vmatpush3.bf16.msra.mxu0 %v1088_v6  ;;  %v1097_v15 = vld [vmem:[%s1464_s1 + $0x98] sm:$0xff]   ;;  %v1101_v19 = vld [vmem:[%s1464_s1 + $0xa0] sm:$0xff]   ;;  %v1105_v23 = vld [vmem:[%s1464_s1 + $0xa8] sm:$0xff]  }
   0x9   :  { %986 = vmatpush3.bf16.msra.mxu1 %v1089_v7  ;;  %965 = vmatprep.subr.bf16.mxu0 %v1090_v8  ;;  %v1106_v24 = vld [vmem:[%s1464_s1 + $0x70] sm:$0xff]   ;;  %v1110_v29 = vld [vmem:[%s1464_s1 + $0x78] sm:$0xff]   ;;  %v22_v34 = vld [vmem:[%s1463_s0] sm:$0xff] }
   0xa   :  { %987 = vmatprep.subr.bf16.mxu1 %v1091_v9  ;;  %v1107_v25 = vld [vmem:[%s1464_s1 + $0xf0] sm:$0xff]   ;;  %v1111_v30 = vld [vmem:[%s1464_s1 + $0xf8] sm:$0xff]   ;;  %v1115_v35 = vld [vmem:[%s1464_s1 + $0x140] sm:$0xff]   ;;  %v159_v39 = vcombine.high %v22_v34, %v22_v34  ;;  %v166_v42 = vrot.slane %v22_v34, %v1318_v41 }
   0xb   :  { %v1108_v26 = vld [vmem:[%s1464_s1 + $0x30] sm:$0xff]   ;;  %v1112_v31 = vld [vmem:[%s1464_s1 + $0x38] sm:$0xff]   ;;  %v1116_v38 = vld [vmem:[%s1464_s1 + $0x1c0] sm:$0xff]  }
   0xc   :  { %966 = vmatpush3.bf16.msra.mxu0 %v1092_v10  ;;  %v1109_v27 = vld [vmem:[%s1464_s1 + $0xb0] sm:$0xff]   ;;  %v1113_v32 = vld [vmem:[%s1464_s1 + $0xb8] sm:$0xff]   ;;  %v1322_v43 = vrot.slane %v159_v39, %v1318_v41  ;;  %v174_v44 = vcombine.high %v166_v42, %v166_v42  ;;  %v182_v45 = vrot.slane %v166_v42, %v1318_v41  ;;  %v1117_v47 = vld [vmem:[%s1464_s1 + $0x100] sm:$0xff]  }
   0xd   :  { %988 = vmatpush3.bf16.msra.mxu1 %v1093_v11  ;;  %967 = vmatprep.subr.bf16.mxu0 %v1094_v12  ;;  %v1118_v49 = vld [vmem:[%s1464_s1 + $0x180] sm:$0xff]   ;;  %v1119_v52 = vld [vmem:[%s1464_s1 + $0x148] sm:$0xff]   ;;  %v1123_v58 = vld [vmem:[%s1464_s1 + $0x150] sm:$0xff]  }
   0xe   :  { %989 = vmatprep.subr.bf16.mxu1 %v1095_v13  ;;  %v175_v46 = vcombine.high %v1322_v43, %v1322_v43  ;;  %v196_v48 = vrot.slane %v174_v44, %v1318_v41  ;;  %v204_v51 = vcombine.high %v182_v45, %v182_v45  ;;  %v1120_v54 = vld [vmem:[%s1464_s1 + $0x1c8] sm:$0xff]   ;;  %v1124_v59 = vld [vmem:[%s1464_s1 + $0x1d0] sm:$0xff]   ;;  %v1127_v62 = vld [vmem:[%s1464_s1 + $0x158] sm:$0xff]  }
   0xf   :  { %v1121_v55 = vld [vmem:[%s1464_s1 + $0x108] sm:$0xff]   ;;  %v1125_v60 = vld [vmem:[%s1464_s1 + $0x110] sm:$0xff]   ;;  %v1128_v63 = vld [vmem:[%s1464_s1 + $0x1d8] sm:$0xff]  }
  0x10   :  { %968 = vmatpush3.bf16.msra.mxu0 %v1096_v14  ;;  %v203_v50 = vrot.slane %v175_v46, %v1318_v41  ;;  %632 = vmatprep.mubr.bf16.mxu0 %v196_v48  ;;  %v206_v53 = vcombine.high %v196_v48, %v196_v48  ;;  %v1122_v57 = vld [vmem:[%s1464_s1 + $0x188] sm:$0xff]   ;;  %v1126_v61 = vld [vmem:[%s1464_s1 + $0x190] sm:$0xff]   ;;  %v1129_v0 = vld [vmem:[%s1464_s1 + $0x118] sm:$0xff]  }
  0x11   :  { %990 = vmatpush3.bf16.msra.mxu1 %v1097_v15  ;;  %969 = vmatprep.subr.bf16.mxu0 %v1098_v16  ;;  %v1130_v1 = vld [vmem:[%s1464_s1 + $0x198] sm:$0xff]   ;;  %v1131_v2 = vld [vmem:[%s1464_s1 + $0x160] sm:$0xff]   ;;  %v1135_v6 = vld [vmem:[%s1464_s1 + $0x168] sm:$0xff]  }
  0x12   :  { %991 = vmatprep.subr.bf16.mxu1 %v1099_v17  ;;  %v207_v56 = vcombine.high %v203_v50, %v203_v50  ;;  %672 = vmatprep.mubr.bf16.mxu1 %v206_v53  ;;  %v1132_v3 = vld [vmem:[%s1464_s1 + $0x1e0] sm:$0xff]   ;;  %v1136_v7 = vld [vmem:[%s1464_s1 + $0x1e8] sm:$0xff]   ;;  %v1139_v10 = vld [vmem:[%s1464_s1 + $0x170] sm:$0xff]  }
  0x13   :  { %v1133_v4 = vld [vmem:[%s1464_s1 + $0x120] sm:$0xff]   ;;  %v1137_v8 = vld [vmem:[%s1464_s1 + $0x128] sm:$0xff]   ;;  %v1140_v11 = vld [vmem:[%s1464_s1 + $0x1f0] sm:$0xff]  }
  0x14   :  { %970 = vmatpush3.bf16.msra.mxu0 %v1100_v18  ;;  %v1134_v5 = vld [vmem:[%s1464_s1 + $0x1a0] sm:$0xff]   ;;  %v1138_v9 = vld [vmem:[%s1464_s1 + $0x1a8] sm:$0xff]   ;;  %v1141_v12 = vld [vmem:[%s1464_s1 + $0x130] sm:$0xff]  }
  0x15   :  { %992 = vmatpush3.bf16.msra.mxu1 %v1101_v19  ;;  %971 = vmatprep.subr.bf16.mxu0 %v1102_v20  ;;  %v1143_v13 = vld [vmem:[%s1464_s1 + $0x178] sm:$0xff]   ;;  %v1142_v14 = vld [vmem:[%s1464_s1 + $0x1b0] sm:$0xff]  }
  0x16   :  { %993 = vmatprep.subr.bf16.mxu1 %v1103_v21 }
  0x18   :  { %972 = vmatpush3.bf16.msra.mxu0 %v1104_v22 }
  0x19   :  { %994 = vmatpush3.bf16.msra.mxu1 %v1105_v23  ;;  %973 = vmatprep.subr.bf16.mxu0 %v1106_v24 }
  0x1a   :  { %995 = vmatprep.subr.bf16.mxu1 %v1107_v25 }
  0x1c   :  { %974 = vmatpush3.bf16.msra.mxu0 %v1108_v26 }
  0x1d   :  { %996 = vmatpush3.bf16.msra.mxu1 %v1109_v27  ;;  %975 = vmatprep.subr.bf16.mxu0 %v1110_v29 }
  0x1e   :  { %997 = vmatprep.subr.bf16.mxu1 %v1111_v30 }
  0x20   :  { %976 = vmatpush3.bf16.msra.mxu0 %v1112_v31 }
  0x21   :  { %998 = vmatpush3.bf16.msra.mxu1 %v1113_v32  ;;  %1005 = vmatprep.subr.bf16.mxu0 %v1115_v35 }
  0x22   :  { %1027 = vmatprep.subr.bf16.mxu1 %v1116_v38 }
  0x23   :  { %633 = vmatmul.mubr.bf16.vlgmr.msra.gmra.mrb[0].mxu0 %v182_v45 }
  0x24   :  { %1006 = vmatpush3.bf16.msra.mxu0 %v1117_v47  ;;  %673 = vmatmul.mubr.bf16.vlgmr.msra.gmra.mrb[0].mxu1 %v204_v51 }
  0x25   :  { %1007 = vmatprep.subr.bf16.mxu0 %v1119_v52  ;;  %1028 = vmatpush3.bf16.msra.mxu1 %v1118_v49 }
  0x26   :  { %712 = vmatprep.mubr.bf16.mxu0 %v203_v50  ;;  %1029 = vmatprep.subr.bf16.mxu1 %v1120_v54 }
  0x27   :  { %752 = vmatprep.mubr.bf16.mxu1 %v207_v56 }
  0x28   :  { %1008 = vmatpush3.bf16.msra.mxu0 %v1121_v55 }
  0x29   :  { %1009 = vmatprep.subr.bf16.mxu0 %v1123_v58  ;;  %1030 = vmatpush3.bf16.msra.mxu1 %v1122_v57 }
  0x2a   :  { %1031 = vmatprep.subr.bf16.mxu1 %v1124_v59 }
  0x2c   :  { %1010 = vmatpush3.bf16.msra.mxu0 %v1125_v60 }
  0x2d   :  { %1011 = vmatprep.subr.bf16.mxu0 %v1127_v62  ;;  %1032 = vmatpush3.bf16.msra.mxu1 %v1126_v61 }
  0x2e   :  { %1033 = vmatprep.subr.bf16.mxu1 %v1128_v63 }
  0x30   :  { %1012 = vmatpush3.bf16.msra.mxu0 %v1129_v0 }
  0x31   :  { %1013 = vmatprep.subr.bf16.mxu0 %v1131_v2  ;;  %1034 = vmatpush3.bf16.msra.mxu1 %v1130_v1 }
  0x32   :  { %1035 = vmatprep.subr.bf16.mxu1 %v1132_v3 }
  0x34   :  { %1014 = vmatpush3.bf16.msra.mxu0 %v1133_v4 }
  0x35   :  { %1015 = vmatprep.subr.bf16.mxu0 %v1135_v6  ;;  %1036 = vmatpush3.bf16.msra.mxu1 %v1134_v5 }
  0x36   :  { %1037 = vmatprep.subr.bf16.mxu1 %v1136_v7 }
  0x38   :  { %1016 = vmatpush3.bf16.msra.mxu0 %v1137_v8 }
  0x39   :  { %1017 = vmatprep.subr.bf16.mxu0 %v1139_v10  ;;  %1038 = vmatpush3.bf16.msra.mxu1 %v1138_v9 }
  0x3a   :  { %10 = vsyncpa [#allocation3], 0  ;;  %1039 = vmatprep.subr.bf16.mxu1 %v1140_v11  ;;  %v1144_v15 = vld [vmem:[%s1464_s1 + $0x1f8] sm:$0xff]   ;;  %v189_v17 = vrot.slane %v1322_v43, %v1318_v41  ;;  %v1147_v20 = vld [vmem:[%s1466_s3] sm:$0xff]   ;;  %v1180_v21 = vmov 0.0   ;;  %vm1181_vm0 = vmmov 0  }
  0x3b   :  { %v1145_v16 = vld [vmem:[%s1464_s1 + $0x138] sm:$0xff]   ;;  %v1148_v22 = vld [vmem:[%s1466_s3 + $0x8] sm:$0xff]   ;;  %v1149_v23 = vld [vmem:[%s1466_s3 + $0x10] sm:$0xff]   ;;  %s1182_s12 = smov [#allocation2]  }
  0x3c   :  { %1018 = vmatpush3.bf16.msra.mxu0 %v1141_v12  ;;  %v1146_v18 = vld [vmem:[%s1464_s1 + $0x1b8] sm:$0xff]   ;;  %v205_v19 = vcombine.high %v189_v17, %v189_v17  ;;  %v1151_v25 = vld [vmem:[%s1466_s3 + $0x20] sm:$0xff]   ;;  %v1152_v26 = vld [vmem:[%s1466_s3 + $0x28] sm:$0xff]   ;;  %s879_s0 = sshll.u32 %s1182_s12, 4  ;;  %s880_s0 = int_to_ptr.vmem [resolvable:$true] %s879_s0 }
  0x3d   :  { %1019 = vmatprep.subr.bf16.mxu0 %v1143_v13  ;;  %1040 = vmatpush3.bf16.msra.mxu1 %v1142_v14  ;;  %v1150_v24 = vld [vmem:[%s1466_s3 + $0x18] sm:$0xff]   ;;  %v1153_v27 = vld [vmem:[%s1466_s3 + $0x30] sm:$0xff]   ;;  %v887_v30 = vld [vmem:[%s1465_s2] ss:$0 sm:$0xff]  ;;  %s1155_s13 = scalar_lea.vmem %s880_s0, 32  ;;  %p1160_p1 = scmp.lt.s32.totalorder %s880_s0, %s880_s0 }
  0x3e   :  { %1041 = vmatprep.subr.bf16.mxu1 %v1144_v15  ;;  %v1154_v28 = vld [vmem:[%s1466_s3 + $0x38] sm:$0xff]   ;;  %v952_v55 = vld [vmem:[%s1467_s4] ss:$0 sm:$0xff]  ;;  %p1156_p0 = scmp.ne.s32.totalorder %s880_s0, %s1155_s13  ;;  %p1161_p2 = scmp.lt.s32.totalorder %s1155_s13, %s1155_s13 }
  0x40   :  { %1020 = vmatpush3.bf16.msra.mxu0 %v1145_v16  ;;  %p1162_p3 = por %p1161_p2, %p1160_p1 }
  0x41   :  { %1042 = vmatpush3.bf16.msra.mxu1 %v1146_v18  ;;  %1058 = vmatprep.subr.bf16.mxu0 %v1180_v21 }
  0x42   :  { %p1163_p4 = pnand %p1162_p3, %p1156_p0 }
  0x43   :  { %713 = vmatmul.mubr.bf16.vlgmr.msra.gmra.mrb[4].mxu0 %v189_v17 }
  0x44   :  { %753 = vmatmul.mubr.bf16.vlgmr.msra.gmra.mrb[4].mxu1 %v205_v19  ;;  %1059 = vmatpush3.bf16.msra.mxu0 %v1147_v20 }
  0x45   :  { %1060 = vmatprep.subr.bf16.mxu0 %v1180_v21  ;;  %1074 = vmatprep.mubr.msk.bf16.mxu0 %vm1181_vm0, %v1180_v21 }
  0x48   :  { %1061 = vmatpush3.bf16.msra.mxu0 %v1148_v22 }
  0x49   :  { %1062 = vmatprep.subr.bf16.mxu0 %v1180_v21 }
  0x4c   :  { %1063 = vmatpush3.bf16.msra.mxu0 %v1149_v23 }
  0x4d   :  { %1064 = vmatprep.subr.bf16.mxu0 %v1180_v21 }
  0x50   :  { %1065 = vmatpush3.bf16.msra.mxu0 %v1150_v24 }
  0x51   :  { %1066 = vmatprep.subr.bf16.mxu0 %v1180_v21 }
  0x54   :  { %1067 = vmatpush3.bf16.msra.mxu0 %v1151_v25 }
  0x55   :  { %1068 = vmatprep.subr.bf16.mxu0 %v1180_v21 }
  0x58   :  { %1069 = vmatpush3.bf16.msra.mxu0 %v1152_v26 }
  0x59   :  { %1070 = vmatprep.subr.bf16.mxu0 %v1180_v21 }
  0x5c   :  { %1071 = vmatpush3.bf16.msra.mxu0 %v1153_v27 }
  0x5d   :  { %1072 = vmatprep.subr.bf16.mxu0 %v1180_v21 }
  0x60   :  { %1073 = vmatpush3.bf16.msra.mxu0 %v1154_v28 }
  0xf6   :  { %v977_v29 = vpop.f32.mrb[0].mxu0 }
  0xf7   :  { %v978_v31 = vpop.f32.mrb[1].mxu0  ;;  %v999_v32 = vpop.f32.mrb[0].mxu1 }
  0xf8   :  { %v979_v33 = vadd.f32 %v978_v31, %v977_v29  ;;  %v980_v34 = vpop.f32.mrb[2].mxu0  ;;  %v1000_v35 = vpop.f32.mrb[1].mxu1 }
  0xf9   :  { %v981_v36 = vpop.f32.mrb[3].mxu0  ;;  %v1001_v38 = vadd.f32 %v1000_v35, %v999_v32  ;;  %v1002_v39 = vpop.f32.mrb[2].mxu1 }
  0xfa   :  { %v635_v37 = vadd.f32 %v979_v33, %v887_v30  ;;  %v1003_v40 = vpop.f32.mrb[3].mxu1 }
  0xfc   :  { %v675_v41 = vadd.f32 %v1001_v38, %v635_v37 }
 0x116   :  { %v1021_v42 = vpop.f32.mrb[4].mxu0 }
 0x117   :  { %v1022_v43 = vpop.f32.mrb[5].mxu0  ;;  %v1043_v44 = vpop.f32.mrb[4].mxu1 }
 0x118   :  { %v1023_v45 = vadd.f32 %v1022_v43, %v1021_v42  ;;  %v1024_v46 = vpop.f32.mrb[6].mxu0  ;;  %v1044_v47 = vpop.f32.mrb[5].mxu1 }
 0x119   :  { %v1025_v48 = vpop.f32.mrb[7].mxu0  ;;  %v1045_v50 = vadd.f32 %v1044_v47, %v1043_v44  ;;  %v1046_v51 = vpop.f32.mrb[6].mxu1 }
 0x11a   :  { %v715_v49 = vadd.f32 %v1023_v45, %v675_v41  ;;  %v1047_v52 = vpop.f32.mrb[7].mxu1 }
 0x11c   :  { %v755_v53 = vadd.f32 %v1045_v50, %v715_v49 }
 0x11e   :  { %v760_v54 = vpack.c.bf16 %v755_v53, %v755_v53 }
 0x120   :  { %1075 = vmatmul.mubr.bf16.vlgmr.msra.gmra.mrb[8].mxu0 %v760_v54 }
 0x1f3   :  { %v866_v56 = vpop.f32.mrb[8].mxu0 }
 0x1f4   :  { %v867_v57 = vadd.f32 %v952_v55, %v866_v56  ;;  %v1076_v58 = vpop.f32.mrb[9].mxu0 }
 0x1f5   :  { %v869_v59 = vpop.f32.mrb[10].mxu0 }
 0x1f6   :  { %872 = vst [vmem:[#allocation2] sm:$0x3] %v867_v57  ;;  %v1077_v60 = vpop.f32.mrb[11].mxu0 }
 0x1f7   :  { %1166 = shalt.err (!%p1163_p4)
}
 0x1f8   :  { %s1167_s4 = scalar_lea.hbm %s1468_s5, 32 }
 0x1f9   :  { %p1168_p5 = scmp.ne.s32.totalorder %s1468_s5, %s1167_s4  ;;  %p1171_p6 = scmp.lt.u32.totalorder %s1167_s4, %s1468_s5 }
 0x1fb   :  { %p1173_p7 = pnand %p1171_p6, %p1168_p5 }
 0x1fd   :  { %1176 = shalt.err (!%p1173_p7)
}
 0x1fe   :  { %882 = dma.vmem_to_hbm [thread:$0]  %s880_s0, 32, %s1468_s5, [#allocation3]  }
 0x1ff   :  { %1177 = dma.done.wait [#allocation3], 32  }
 0x200   :  { %1178 = vsyncadd [#allocation3], 4294967264 }
 0x201   :  { %886 = vsyncpa [#allocation3], 1 }

</bundles_post_ra>
